<compile_context>
chip_gen: v6e
topology: v6e:2x2x1
jax: 0.10.0
libtpu: 0.0.40
codegen_flags: <defaults>
</compile_context>

<pallas_src>
import math
import functools

import jax
import jax.numpy as jnp
from jax.experimental import pallas as pl
from jax.experimental.pallas import tpu as pltpu

PADDING_IDX = 2
NEG_INF = float("-inf")
LN_EPS = 1e-5


# ----------------------------- tiling helpers -----------------------------

def _pick_row_tile(m, pref=512):
    """Row (sublane) tile: multiple of 8 dividing m (<= pref), or full m."""
    if m <= pref:
        return m
    for t in (512, 256, 128, 64, 32, 16, 8):
        if t <= pref and m % t == 0:
            return t
    return m


def _pick_lane_tile(n, pref=512):
    """Lane tile: multiple of 128 dividing n (<= pref), or full n."""
    if n <= pref or n % 128 != 0:
        return n
    for t in range(pref - pref % 128, 127, -128):
        if n % t == 0:
            return t
    return n


# --------------------------- attention kernel ----------------------------

def _attn_kernel(xq_ref, xkv_ref, wq_ref, wk_ref, wv_ref, wo_ref,
                 cq_ref, saq_ref, sbq_ref, ck_ref, sak_ref, sbk_ref,
                 qb_ref, kb_ref, prev_ref, gam_ref, bta_ref,
                 o_ref, pnew_ref,
                 *, scale, inv_count, n_heads, dk, causal, omega, eps, tq):
    """Fused per-(batch, q-row-tile):
       QKV proj (full-width) + RoPE (XLU rolls) + masked RealFormer softmax
       + P@V per head + Wo proj + admin residual + LayerNorm."""
    f32 = jnp.float32
    bf16 = jnp.bfloat16
    D = n_heads * dk

    xq = xq_ref[0]                      # (tq, D)  bf16
    xkv = xkv_ref[0]                    # (Skv, D) bf16
    Skv = xkv.shape[0]

    def rope(z, cos, sin_a, sin_b):
        # z*cos + neighbor_up*(-sin@even) + neighbor_down*(sin@odd)
        up = pltpu.roll(z, shift=D - 1, axis=1)   # up[j]   = z[j+1 mod D]
        dn = pltpu.roll(z, shift=1, axis=1)       # dn[j]   = z[j-1 mod D]
        return z * cos + up * sin_a + dn * sin_b

    q = rope(jnp.dot(xq, wq_ref[...], preferred_element_type=f32),
             cq_ref[...], saq_ref[...], sbq_ref[...])
    k = rope(jnp.dot(xkv, wk_ref[...], preferred_element_type=f32),
             ck_ref[...], sak_ref[...], sbk_ref[...])
    v = jnp.dot(xkv, wv_ref[...], preferred_element_type=f32)

    # Additive mask bias built in-kernel from 1-D pad vectors (+ causal iota).
    bias = qb_ref[0] + kb_ref[0]                       # (tq,1)+(1,Skv)
    if causal:
        r = jax.lax.broadcasted_iota(jnp.int32, (tq, Skv), 0) \
            + pl.program_id(1) * tq
        c = jax.lax.broadcasted_iota(jnp.int32, (tq, Skv), 1)
        bias = jnp.where(c > r, NEG_INF, bias)

    q16 = q.astype(bf16)
    k16 = k.astype(bf16)
    v16 = v.astype(bf16)

    ctx = []
    for h in range(n_heads):                           # static, unrolled
        lo = h * dk
        qh = q16[:, lo:lo + dk]
        kh = k16[:, lo:lo + dk]
        vh = v16[:, lo:lo + dk]
        raw = jax.lax.dot_general(qh, kh, (((1,), (1,)), ((), ())),
                                  preferred_element_type=f32) * scale + bias
        # RealFormer residual attention: running sum over layers; mean ==
        # sum * (1 / layer_count)  (== torch.cat(...).mean(0)).
        pnew = prev_ref[0, h] + raw
        pnew_ref[0, h] = pnew
        avg = pnew * inv_count

        # softmax(-1), PyTorch semantics (all-masked row -> 0 after nan-fill)
        m = jnp.max(avg, axis=-1, keepdims=True)
        m = jnp.maximum(m, -3.0e38)                    # guard all -inf rows
        e = jnp.exp(avg - m)
        s = jnp.sum(e, axis=-1, keepdims=True)
        w = e * pl.reciprocal(jnp.where(s > 0.0, s, 1.0), approx=True)
        ctx.append(jnp.dot(w.astype(bf16), vh, preferred_element_type=f32))

    # lane-dense (tq, D) context -> single full-K output projection
    attn = jnp.dot(jnp.concatenate(ctx, axis=-1).astype(bf16), wo_ref[...],
                   preferred_element_type=f32)

    # admin residual + LayerNorm (f32 math)
    z = attn * omega + xq.astype(f32)
    mu = jnp.mean(z, axis=-1, keepdims=True)
    var = jnp.mean((z - mu) ** 2, axis=-1, keepdims=True)
    y = (z - mu) * jax.lax.rsqrt(var + eps)
    o_ref[0] = (y * gam_ref[...] + bta_ref[...]).astype(o_ref.dtype)


def pallas_attention(xq, xkv, wp, rope_q, rope_k, qb, kb, prev, gamma, beta,
                     *, count, causal, omega, n_heads):
    """Returns the LayerNorm'd post-attention stream (B,Sq,D) bf16 and the
    updated raw-score running sum (aliased in place with `prev`)."""
    B, Sq, D = xq.shape
    Skv = xkv.shape[1]
    H = n_heads
    dk = D // H
    tq = _pick_row_tile(Sq, pref=128)
    kern = functools.partial(
        _attn_kernel, scale=1.0 / math.sqrt(dk), inv_count=1.0 / float(count),
        n_heads=H, dk=dk, causal=causal, omega=float(omega), eps=LN_EPS, tq=tq)
    cos_q, sina_q, sinb_q = rope_q
    cos_k, sina_k, sinb_k = rope_k
    return pl.pallas_call(
        kern,
        grid=(B, Sq // tq),
        in_specs=[
            pl.BlockSpec((1, tq, D), lambda b, i: (b, i, 0)),       # xq
            pl.BlockSpec((1, Skv, D), lambda b, i: (b, 0, 0)),      # xkv
            pl.BlockSpec((D, D), lambda b, i: (0, 0)),              # wq
            pl.BlockSpec((D, D), lambda b, i: (0, 0)),              # wk
            pl.BlockSpec((D, D), lambda b, i: (0, 0)),              # wv
            pl.BlockSpec((D, D), lambda b, i: (0, 0)),              # wo
            pl.BlockSpec((tq, D), lambda b, i: (i, 0)),             # cos_q
            pl.BlockSpec((tq, D), lambda b, i: (i, 0)),             # sin_a q
            pl.BlockSpec((tq, D), lambda b, i: (i, 0)),             # sin_b q
            pl.BlockSpec((Skv, D), lambda b, i: (0, 0)),            # cos_k
            pl.BlockSpec((Skv, D), lambda b, i: (0, 0)),            # sin_a k
            pl.BlockSpec((Skv, D), lambda b, i: (0, 0)),            # sin_b k
            pl.BlockSpec((1, tq, 1), lambda b, i: (b, i, 0)),       # q pad bias
            pl.BlockSpec((1, 1, Skv), lambda b, i: (b, 0, 0)),      # k pad bias
            pl.BlockSpec((1, H, tq, Skv), lambda b, i: (b, 0, i, 0)),  # prev
            pl.BlockSpec((1, D), lambda b, i: (0, 0)),              # gamma
            pl.BlockSpec((1, D), lambda b, i: (0, 0)),              # beta
        ],
        out_specs=(
            pl.BlockSpec((1, tq, D), lambda b, i: (b, i, 0)),
            pl.BlockSpec((1, H, tq, Skv), lambda b, i: (b, 0, i, 0)),
        ),
        out_shape=(
            jax.ShapeDtypeStruct((B, Sq, D), jnp.bfloat16),
            jax.ShapeDtypeStruct((B, H, Sq, Skv), jnp.float32),
        ),
        input_output_aliases={14: 1},   # prev -> pnew (update in place)
        compiler_params=pltpu.CompilerParams(
            dimension_semantics=("parallel", "parallel")),
    )(xq, xkv, wp["wq"], wp["wk"], wp["wv"], wp["wo"],
      cos_q, sina_q, sinb_q, cos_k, sina_k, sinb_k,
      qb, kb, prev, gamma, beta)


# ----------------------------- SwiGLU kernel -----------------------------

def _swiglu_kernel(x_ref, w_ref, v_ref, w2_ref, gam_ref, bta_ref, o_ref,
                   acc_ref, *, omega, eps):
    """Fused SwiGLU FFN (d_ff-tiled with f32 accumulator) + admin residual
    + LayerNorm over a row tile."""
    f32 = jnp.float32

    @pl.when(pl.program_id(1) == 0)
    def _():
        acc_ref[...] = jnp.zeros_like(acc_ref)

    xb = x_ref[...]                                    # (tm, D) bf16
    pre = jnp.dot(xb, w_ref[...], preferred_element_type=f32)
    gate = jnp.dot(xb, v_ref[...], preferred_element_type=f32)
    act = (pre * jax.nn.sigmoid(pre)) * gate           # SiLU(W x) * V x, f32
    acc_ref[...] += jnp.dot(act.astype(jnp.bfloat16), w2_ref[...],
                            preferred_element_type=f32)

    @pl.when(pl.program_id(1) == pl.num_programs(1) - 1)
    def _():
        z = acc_ref[...] * omega + x_ref[...].astype(f32)
        mu = jnp.mean(z, axis=-1, keepdims=True)
        var = jnp.mean((z - mu) ** 2, axis=-1, keepdims=True)
        y = (z - mu) * jax.lax.rsqrt(var + eps)
        o_ref[...] = (y * gam_ref[...] + bta_ref[...]).astype(o_ref.dtype)


def pallas_swiglu_res_ln(x, W, V, W2, gamma, beta, omega):
    B, S, D = x.shape
    M = B * S
    d_ff = W.shape[1]
    tm = _pick_row_tile(M, pref=512)
    tf = _pick_lane_tile(d_ff, pref=512)
    x2 = x.reshape(M, D)
    kern = functools.partial(_swiglu_kernel, omega=float(omega), eps=LN_EPS)
    y = pl.pallas_call(
        kern,
        grid=(M // tm, d_ff // tf),
        in_specs=[
            pl.BlockSpec((tm, D), lambda i, j: (i, 0)),
            pl.BlockSpec((D, tf), lambda i, j: (0, j)),
            pl.BlockSpec((D, tf), lambda i, j: (0, j)),
            pl.BlockSpec((tf, D), lambda i, j: (j, 0)),
            pl.BlockSpec((1, D), lambda i, j: (0, 0)),
            pl.BlockSpec((1, D), lambda i, j: (0, 0)),
        ],
        out_specs=pl.BlockSpec((tm, D), lambda i, j: (i, 0)),
        out_shape=jax.ShapeDtypeStruct((M, D), jnp.bfloat16),
        scratch_shapes=[pltpu.VMEM((tm, D), jnp.float32)],
        compiler_params=pltpu.CompilerParams(
            dimension_semantics=("parallel", "arbitrary")),
    )(x2, W, V, W2, gamma, beta)
    return y.reshape(B, S, D)


# -------------------------- unembedding kernel ---------------------------

def _linear_kernel(x_ref, w_ref, o_ref):
    o_ref[...] = jnp.dot(x_ref[...].astype(jnp.bfloat16), w_ref[...],
                         preferred_element_type=jnp.float32)


def pallas_linear_bf16(x, w):
    """Tiled x(bf16) @ w(bf16) -> f32.  Weight-tied unembedding."""
    M, K = x.shape
    K2, N = w.shape
    assert K == K2
    tm = _pick_row_tile(M, pref=1024)   # maximize rows -> weight streamed once
    tn = _pick_lane_tile(N, pref=2048)
    return pl.pallas_call(
        _linear_kernel,
        grid=(M // tm, N // tn),
        in_specs=[pl.BlockSpec((tm, K), lambda i, j: (i, 0)),
                  pl.BlockSpec((K, tn), lambda i, j: (0, j))],
        out_specs=pl.BlockSpec((tm, tn), lambda i, j: (i, j)),
        out_shape=jax.ShapeDtypeStruct((M, N), jnp.float32),
        compiler_params=pltpu.CompilerParams(
            dimension_semantics=("parallel", "parallel")),
    )(x, w)


# ------------------------------ glue (JAX) ------------------------------

def rope_tables(dk, n_heads, length):
    """cos / parity-masked sin tables, tiled across heads -> (length, H*dk).
       sin_a: coefficient of roll(x,-1) (even lanes, negated);
       sin_b: coefficient of roll(x,+1) (odd lanes)."""
    dim = dk // 2
    theta = jnp.exp(-jnp.arange(dim, dtype=jnp.float32)
                    * (math.log(10000.0) / dim))
    theta = jnp.repeat(theta, 2)                       # [t0,t0,t1,t1,...]
    pos = jnp.arange(1, length + 1, dtype=jnp.float32)[:, None]   # pos 1..L
    ang = pos * theta[None, :]
    cos = jnp.cos(ang)
    sin = jnp.sin(ang)
    even = (jnp.arange(dk) % 2) == 0
    sin_a = jnp.where(even, -sin, 0.0)
    sin_b = jnp.where(~even, sin, 0.0)
    tile = lambda t: jnp.tile(t, (1, n_heads))
    return tile(cos), tile(sin_a), tile(sin_b)


def pad_bias(pad_mask):
    """(B,S) bool -> (B,S) f32 additive bias (0 allowed, -inf masked)."""
    return jnp.where(pad_mask, NEG_INF, 0.0).astype(jnp.float32)


def transformer_forward(params, src, tgt, src_padding_mask, tgt_padding_mask,
                        *, d_model, n_heads):
    emb = params["emb"]                        # (vocab, d_model) f32
    scale_e = math.sqrt(d_model)
    enc = (emb[src] * scale_e).astype(jnp.bfloat16)
    dec = (emb[tgt] * scale_e).astype(jnp.bfloat16)
    B, Ss = src.shape
    St = tgt.shape[1]
    H = n_heads
    dk = d_model // H

    rope_s = rope_tables(dk, H, Ss)
    rope_t = rope_tables(dk, H, St)

    qb_src = pad_bias(src_padding_mask)[:, :, None]    # (B, Ss, 1)
    kb_src = pad_bias(src_padding_mask)[:, None, :]    # (B, 1, Ss)
    qb_tgt = pad_bias(tgt_padding_mask)[:, :, None]    # (B, St, 1)
    kb_tgt = pad_bias(tgt_padding_mask)[:, None, :]    # (B, 1, St)

    n_enc = len(params["encoder"])
    n_dec = len(params["decoder"])
    omega_enc = math.sqrt(math.log(2.0 * n_enc + 1.0))
    omega_dec = math.sqrt(math.log(3.0 * n_dec + 1.0))

    # ------- encoder -------
    prev = jnp.zeros((B, H, Ss, Ss), jnp.float32)
    x = enc
    for i, lp in enumerate(params["encoder"]):
        sa_norm, prev = pallas_attention(
            x, x, lp["attn"], rope_s, rope_s, qb_src, kb_src, prev,
            lp["ln1_g"], lp["ln1_b"],
            count=i + 1, causal=False, omega=omega_enc, n_heads=H)
        x = pallas_swiglu_res_ln(sa_norm, lp["ffwd"]["W"], lp["ffwd"]["V"],
                                 lp["ffwd"]["W2"], lp["ln2_g"], lp["ln2_b"],
                                 omega_enc)
    memory = x

    # ------- decoder -------
    prev_sa = jnp.zeros((B, H, St, St), jnp.float32)
    prev_ca = jnp.zeros((B, H, St, Ss), jnp.float32)
    y = dec
    for i, lp in enumerate(params["decoder"]):
        sa_norm, prev_sa = pallas_attention(
            y, y, lp["self_attn"], rope_t, rope_t, qb_tgt, kb_tgt, prev_sa,
            lp["ln1_g"], lp["ln1_b"],
            count=i + 1, causal=True, omega=omega_dec, n_heads=H)
        ca_norm, prev_ca = pallas_attention(
            sa_norm, memory, lp["cross_attn"], rope_t, rope_s,
            qb_tgt, kb_src, prev_ca, lp["ln2_g"], lp["ln2_b"],
            count=i + 1, causal=False, omega=omega_dec, n_heads=H)
        y = pallas_swiglu_res_ln(ca_norm, lp["ffwd"]["W"], lp["ffwd"]["V"],
                                 lp["ffwd"]["W2"], lp["ln3_g"], lp["ln3_b"],
                                 omega_dec)

    # ------- weight-tied unembedding (precomputed bf16 [d_model, vocab]) ----
    logits = pallas_linear_bf16(y.reshape(B * St, d_model), params["unemb"])
    return logits.reshape(B, St, -1)


# ---------------------------- parameter init ----------------------------

def xavier_uniform(key, shape, gain=0.8):
    fan_in, fan_out = shape
    a = gain * math.sqrt(6.0 / (fan_in + fan_out))
    return jax.random.uniform(key, shape, jnp.float32, -a, a)


def init_params(key, vocab, d_model, n_heads, d_ff, n_enc, n_dec):
    keys = iter(jax.random.split(key, 256))
    bf = jnp.bfloat16

    def lin(din, dout):
        return xavier_uniform(next(keys), (din, dout))

    def mha_p():
        return dict(wq=lin(d_model, d_model).astype(bf),
                    wk=lin(d_model, d_model).astype(bf),
                    wv=lin(d_model, d_model).astype(bf),
                    wo=lin(d_model, d_model).astype(bf))

    def ff_p():
        return dict(W=lin(d_model, d_ff).astype(bf),
                    V=lin(d_model, d_ff).astype(bf),
                    W2=lin(d_ff, d_model).astype(bf))

    def ln_p():
        return (jnp.ones((1, d_model), jnp.float32),
                jnp.zeros((1, d_model), jnp.float32))

    enc_layers = []
    for _ in range(n_enc):
        g1, b1 = ln_p(); g2, b2 = ln_p()
        enc_layers.append(dict(attn=mha_p(), ffwd=ff_p(),
                               ln1_g=g1, ln1_b=b1, ln2_g=g2, ln2_b=b2))
    dec_layers = []
    for _ in range(n_dec):
        g1, b1 = ln_p(); g2, b2 = ln_p(); g3, b3 = ln_p()
        dec_layers.append(dict(self_attn=mha_p(), cross_attn=mha_p(),
                               ffwd=ff_p(),
                               ln1_g=g1, ln1_b=b1, ln2_g=g2, ln2_b=b2,
                               ln3_g=g3, ln3_b=b3))

    emb = xavier_uniform(next(keys), (vocab, d_model))
    return dict(emb=emb,
                unemb=emb.T.astype(bf),        # weight-tied, pre-transposed
                encoder=enc_layers, decoder=dec_layers)


# --------------------------------- main ---------------------------------

if __name__ == "__main__":
    vocab, d_model, n_heads, d_ff = 32, 128, 4, 256
    n_enc, n_dec = 2, 2
    B, Ss, St = 2, 16, 8

    key = jax.random.PRNGKey(0)
    kp, ks, kt = jax.random.split(key, 3)
    params = init_params(kp, vocab, d_model, n_heads, d_ff, n_enc, n_dec)

    src = jax.random.randint(ks, (B, Ss), 0, vocab)
    tgt = jax.random.randint(kt, (B, St), 0, vocab)
    # force a few explicit padding positions to exercise the masks
    src = src.at[:, -2:].set(PADDING_IDX)
    tgt = tgt.at[:, -1:].set(PADDING_IDX)
    src_padding_mask = (src == PADDING_IDX)
    tgt_padding_mask = (tgt == PADDING_IDX)

    fwd = jax.jit(functools.partial(transformer_forward,
                                    d_model=d_model, n_heads=n_heads))
    logits = fwd(params, src, tgt, src_padding_mask, tgt_padding_mask)
    logits = jax.block_until_ready(logits)
    assert logits.shape == (B, St, vocab)
    assert bool(jnp.all(jnp.isfinite(logits)))
    print("KERNEL_OK")
</pallas_src>

<mosaic_0001>
module attributes {stable_mosaic.version = 11 : i64} {
  func.func @_swiglu_kernel(%arg0: i32, %arg1: i32, %arg2: memref<32x128xbf16, #tpu.memory_space<vmem>>, %arg3: memref<128x256xbf16, #tpu.memory_space<vmem>>, %arg4: memref<128x256xbf16, #tpu.memory_space<vmem>>, %arg5: memref<256x128xbf16, #tpu.memory_space<vmem>>, %arg6: memref<1x128xf32, #tpu.memory_space<vmem>>, %arg7: memref<1x128xf32, #tpu.memory_space<vmem>>, %arg8: memref<32x128xbf16, #tpu.memory_space<vmem>>, %arg9: memref<32x128xf32, #tpu.memory_space<vmem>>) attributes {dimension_semantics = [#tpu.dimension_semantics<parallel>, #tpu.dimension_semantics<arbitrary>], iteration_bounds = array<i64: 1, 1>, scalar_prefetch = 0 : i64, scratch_operands = 1 : i64, tpu.core_type = #tpu.core_type<tc>, window_params = [{transform_indices = @transform_0, window_bounds = array<i64: 32, 128>}, {transform_indices = @transform_1, window_bounds = array<i64: 128, 256>}, {transform_indices = @transform_2, window_bounds = array<i64: 128, 256>}, {transform_indices = @transform_3, window_bounds = array<i64: 256, 128>}, {pipeline_mode = #tpu.pipeline_mode<synchronous>, transform_indices = @transform_4, window_bounds = array<i64: 1, 128>}, {pipeline_mode = #tpu.pipeline_mode<synchronous>, transform_indices = @transform_5, window_bounds = array<i64: 1, 128>}, {transform_indices = @transform_6, window_bounds = array<i64: 32, 128>}]} {
    %c0_i32 = arith.constant 0 : i32
    %0 = arith.cmpi eq, %arg1, %c0_i32 : i32
    %1 = arith.extui %0 : i1 to i32
    %c0_i32_0 = arith.constant 0 : i32
    %2 = arith.cmpi ne, %1, %c0_i32_0 : i32
    scf.if %2 {
      %cst_17 = arith.constant 0.000000e+00 : f32
      %24 = vector.broadcast %cst_17 : f32 to vector<32x128xf32>
      %c0_18 = arith.constant 0 : index
      %c0_19 = arith.constant 0 : index
      %25 = vector.load %arg9[%c0_18, %c0_19] : memref<32x128xf32, #tpu.memory_space<vmem>>, vector<32x128xf32>
      tpu.vector_store %arg9[%c0_18, %c0_19], %24 {strides = array<i32>} : memref<32x128xf32, #tpu.memory_space<vmem>>, vector<32x128xf32>,
    } else {
    }
    %c0 = arith.constant 0 : index
    %c0_1 = arith.constant 0 : index
    %3 = vector.load %arg2[%c0, %c0_1] : memref<32x128xbf16, #tpu.memory_space<vmem>>, vector<32x128xbf16>
    %c0_2 = arith.constant 0 : index
    %c0_3 = arith.constant 0 : index
    %4 = vector.load %arg3[%c0_2, %c0_3] : memref<128x256xbf16, #tpu.memory_space<vmem>>, vector<128x256xbf16>
    %cst = arith.constant dense<0.000000e+00> : vector<32x256xf32>
    %5 = tpu.matmul %3, %4, %cst {dimension_numbers = #tpu.dot_dimension_numbers<[1], [0], [0], [1], [0, 0, 1, 1], [], []>} : vector<32x128xbf16>, vector<128x256xbf16>, vector<32x256xf32> -> vector<32x256xf32>
    %c0_4 = arith.constant 0 : index
    %c0_5 = arith.constant 0 : index
    %6 = vector.load %arg4[%c0_4, %c0_5] : memref<128x256xbf16, #tpu.memory_space<vmem>>, vector<128x256xbf16>
    %cst_6 = arith.constant dense<0.000000e+00> : vector<32x256xf32>
    %7 = tpu.matmul %3, %6, %cst_6 {dimension_numbers = #tpu.dot_dimension_numbers<[1], [0], [0], [1], [0, 0, 1, 1], [], []>} : vector<32x128xbf16>, vector<128x256xbf16>, vector<32x256xf32> -> vector<32x256xf32>
    %8 = arith.negf %5 : vector<32x256xf32>
    %9 = math.exp %8 : vector<32x256xf32>
    %cst_7 = arith.constant 1.000000e+00 : f32
    %10 = vector.broadcast %cst_7 : f32 to vector<32x256xf32>
    %11 = arith.addf %10, %9 : vector<32x256xf32>
    %12 = arith.divf %10, %11 : vector<32x256xf32>
    %13 = arith.mulf %5, %12 : vector<32x256xf32>
    %14 = arith.mulf %13, %7 : vector<32x256xf32>
    %c0_8 = arith.constant 0 : index
    %c0_9 = arith.constant 0 : index
    %15 = vector.load %arg9[%c0_8, %c0_9] : memref<32x128xf32, #tpu.memory_space<vmem>>, vector<32x128xf32>
    %16 = arith.truncf %14 : vector<32x256xf32> to vector<32x256xbf16>
    %c0_10 = arith.constant 0 : index
    %c0_11 = arith.constant 0 : index
    %17 = vector.load %arg5[%c0_10, %c0_11] : memref<256x128xbf16, #tpu.memory_space<vmem>>, vector<256x128xbf16>
    %cst_12 = arith.constant dense<0.000000e+00> : vector<32x128xf32>
    %18 = tpu.matmul %16, %17, %cst_12 {dimension_numbers = #tpu.dot_dimension_numbers<[1], [0], [0], [1], [0, 0, 1, 1], [], []>} : vector<32x256xbf16>, vector<256x128xbf16>, vector<32x128xf32> -> vector<32x128xf32>
    %19 = arith.addf %15, %18 : vector<32x128xf32>
    %c0_13 = arith.constant 0 : index
    %c0_14 = arith.constant 0 : index
    %20 = vector.load %arg9[%c0_13, %c0_14] : memref<32x128xf32, #tpu.memory_space<vmem>>, vector<32x128xf32>
    tpu.vector_store %arg9[%c0_13, %c0_14], %19 {strides = array<i32>} : memref<32x128xf32, #tpu.memory_space<vmem>>, vector<32x128xf32>,
    %c0_i32_15 = arith.constant 0 : i32
    %21 = arith.cmpi eq, %arg1, %c0_i32_15 : i32
    %22 = arith.extui %21 : i1 to i32
    %c0_i32_16 = arith.constant 0 : i32
    %23 = arith.cmpi ne, %22, %c0_i32_16 : i32
    scf.if %23 {
      %c0_17 = arith.constant 0 : index
      %c0_18 = arith.constant 0 : index
      %24 = vector.load %arg9[%c0_17, %c0_18] : memref<32x128xf32, #tpu.memory_space<vmem>>, vector<32x128xf32>
      %cst_19 = arith.constant 1.26863623 : f32
      %25 = vector.broadcast %cst_19 : f32 to vector<32x128xf32>
      %26 = arith.mulf %24, %25 : vector<32x128xf32>
      %c0_20 = arith.constant 0 : index
      %c0_21 = arith.constant 0 : index
      %27 = vector.load %arg2[%c0_20, %c0_21] : memref<32x128xbf16, #tpu.memory_space<vmem>>, vector<32x128xbf16>
      %28 = arith.extf %27 : vector<32x128xbf16> to vector<32x128xf32>
      %29 = arith.addf %26, %28 : vector<32x128xf32>
      %cst_22 = arith.constant dense<0.000000e+00> : vector<32xf32>
      %30 = vector.multi_reduction <add>, %29, %cst_22 [1] : vector<32x128xf32> to vector<32xf32>
      %31 = vector.shape_cast %30 : vector<32xf32> to vector<32x1xf32>
      %cst_23 = arith.constant 1.280000e+02 : f32
      %32 = vector.broadcast %cst_23 : f32 to vector<32x1xf32>
      %33 = arith.divf %31, %32 : vector<32x1xf32>
      %34 = vector.broadcast %33 : vector<32x1xf32> to vector<32x128xf32>
      %35 = arith.subf %29, %34 : vector<32x128xf32>
      %36 = arith.mulf %35, %35 : vector<32x128xf32>
      %cst_24 = arith.constant dense<0.000000e+00> : vector<32xf32>
      %37 = vector.multi_reduction <add>, %36, %cst_24 [1] : vector<32x128xf32> to vector<32xf32>
      %38 = vector.shape_cast %37 : vector<32xf32> to vector<32x1xf32>
      %cst_25 = arith.constant 1.280000e+02 : f32
      %39 = vector.broadcast %cst_25 : f32 to vector<32x1xf32>
      %40 = arith.divf %38, %39 : vector<32x1xf32>
      %41 = vector.broadcast %33 : vector<32x1xf32> to vector<32x128xf32>
      %42 = arith.subf %29, %41 : vector<32x128xf32>
      %cst_26 = arith.constant 9.99999974E-6 : f32
      %43 = vector.broadcast %cst_26 : f32 to vector<32x1xf32>
      %44 = arith.addf %40, %43 : vector<32x1xf32>
      %45 = math.rsqrt %44 : vector<32x1xf32>
      %46 = vector.broadcast %45 : vector<32x1xf32> to vector<32x128xf32>
      %47 = arith.mulf %42, %46 : vector<32x128xf32>
      %c0_27 = arith.constant 0 : index
      %c0_28 = arith.constant 0 : index
      %48 = vector.load %arg6[%c0_27, %c0_28] : memref<1x128xf32, #tpu.memory_space<vmem>>, vector<1x128xf32>
      %49 = vector.broadcast %48 : vector<1x128xf32> to vector<32x128xf32>
      %50 = arith.mulf %47, %49 : vector<32x128xf32>
      %c0_29 = arith.constant 0 : index
      %c0_30 = arith.constant 0 : index
      %51 = vector.load %arg7[%c0_29, %c0_30] : memref<1x128xf32, #tpu.memory_space<vmem>>, vector<1x128xf32>
      %52 = vector.broadcast %51 : vector<1x128xf32> to vector<32x128xf32>
      %53 = arith.addf %50, %52 : vector<32x128xf32>
      %54 = arith.truncf %53 : vector<32x128xf32> to vector<32x128xbf16>
      %c0_31 = arith.constant 0 : index
      %c0_32 = arith.constant 0 : index
      %55 = vector.load %arg8[%c0_31, %c0_32] : memref<32x128xbf16, #tpu.memory_space<vmem>>, vector<32x128xbf16>
      tpu.vector_store %arg8[%c0_31, %c0_32], %54 {strides = array<i32>} : memref<32x128xbf16, #tpu.memory_space<vmem>>, vector<32x128xbf16>,
    } else {
    }
    return
  }
  func.func @transform_0(%arg0: i32, %arg1: i32) -> (i32, i32) {
    %c0_i32 = arith.constant 0 : i32
    %c0_i32_0 = arith.constant 0 : i32
    return %arg0, %c0_i32 : i32, i32
  }
  func.func @transform_1(%arg0: i32, %arg1: i32) -> (i32, i32) {
    %c0_i32 = arith.constant 0 : i32
    %c0_i32_0 = arith.constant 0 : i32
    return %c0_i32, %arg1 : i32, i32
  }
  func.func @transform_2(%arg0: i32, %arg1: i32) -> (i32, i32) {
    %c0_i32 = arith.constant 0 : i32
    %c0_i32_0 = arith.constant 0 : i32
    return %c0_i32, %arg1 : i32, i32
  }
  func.func @transform_3(%arg0: i32, %arg1: i32) -> (i32, i32) {
    %c0_i32 = arith.constant 0 : i32
    %c0_i32_0 = arith.constant 0 : i32
    return %arg1, %c0_i32 : i32, i32
  }
  func.func @transform_4(%arg0: i32, %arg1: i32) -> (i32, i32) {
    %c0_i32 = arith.constant 0 : i32
    %c0_i32_0 = arith.constant 0 : i32
    %c0_i32_1 = arith.constant 0 : i32
    return %c0_i32, %c0_i32_0 : i32, i32
  }
  func.func @transform_5(%arg0: i32, %arg1: i32) -> (i32, i32) {
    %c0_i32 = arith.constant 0 : i32
    %c0_i32_0 = arith.constant 0 : i32
    %c0_i32_1 = arith.constant 0 : i32
    return %c0_i32, %c0_i32_0 : i32, i32
  }
  func.func @transform_6(%arg0: i32, %arg1: i32) -> (i32, i32) {
    %c0_i32 = arith.constant 0 : i32
    %c0_i32_0 = arith.constant 0 : i32
    return %arg0, %c0_i32 : i32, i32
  }
}

module attributes {stable_mosaic.version = 11 : i64} {
  func.func @_attn_kernel(%arg0: i32, %arg1: i32, %arg2: memref<1x16x128xbf16, #tpu.memory_space<vmem>>, %arg3: memref<1x16x128xbf16, #tpu.memory_space<vmem>>, %arg4: memref<128x128xbf16, #tpu.memory_space<vmem>>, %arg5: memref<128x128xbf16, #tpu.memory_space<vmem>>, %arg6: memref<128x128xbf16, #tpu.memory_space<vmem>>, %arg7: memref<128x128xbf16, #tpu.memory_space<vmem>>, %arg8: memref<16x128xf32, #tpu.memory_space<vmem>>, %arg9: memref<16x128xf32, #tpu.memory_space<vmem>>, %arg10: memref<16x128xf32, #tpu.memory_space<vmem>>, %arg11: memref<16x128xf32, #tpu.memory_space<vmem>>, %arg12: memref<16x128xf32, #tpu.memory_space<vmem>>, %arg13: memref<16x128xf32, #tpu.memory_space<vmem>>, %arg14: memref<1x16x1xf32, #tpu.memory_space<vmem>>, %arg15: memref<1x1x16xf32, #tpu.memory_space<vmem>>, %arg16: memref<1x4x16x16xf32, #tpu.memory_space<vmem>>, %arg17: memref<1x128xf32, #tpu.memory_space<vmem>>, %arg18: memref<1x128xf32, #tpu.memory_space<vmem>>, %arg19: memref<1x16x128xbf16, #tpu.memory_space<vmem>>, %arg20: memref<1x4x16x16xf32, #tpu.memory_space<vmem>>) attributes {dimension_semantics = [#tpu.dimension_semantics<parallel>, #tpu.dimension_semantics<parallel>], iteration_bounds = array<i64: 2, 1>, scalar_prefetch = 0 : i64, scratch_operands = 0 : i64, tpu.core_type = #tpu.core_type<tc>, window_params = [{transform_indices = @transform_0, window_bounds = array<i64: 1, 16, 128>}, {transform_indices = @transform_1, window_bounds = array<i64: 1, 16, 128>}, {pipeline_mode = #tpu.pipeline_mode<synchronous>, transform_indices = @transform_2, window_bounds = array<i64: 128, 128>}, {pipeline_mode = #tpu.pipeline_mode<synchronous>, transform_indices = @transform_3, window_bounds = array<i64: 128, 128>}, {pipeline_mode = #tpu.pipeline_mode<synchronous>, transform_indices = @transform_4, window_bounds = array<i64: 128, 128>}, {pipeline_mode = #tpu.pipeline_mode<synchronous>, transform_indices = @transform_5, window_bounds = array<i64: 128, 128>}, {transform_indices = @transform_6, window_bounds = array<i64: 16, 128>}, {transform_indices = @transform_7, window_bounds = array<i64: 16, 128>}, {transform_indices = @transform_8, window_bounds = array<i64: 16, 128>}, {pipeline_mode = #tpu.pipeline_mode<synchronous>, transform_indices = @transform_9, window_bounds = array<i64: 16, 128>}, {pipeline_mode = #tpu.pipeline_mode<synchronous>, transform_indices = @transform_10, window_bounds = array<i64: 16, 128>}, {pipeline_mode = #tpu.pipeline_mode<synchronous>, transform_indices = @transform_11, window_bounds = array<i64: 16, 128>}, {transform_indices = @transform_12, window_bounds = array<i64: 1, 16, 1>}, {transform_indices = @transform_13, window_bounds = array<i64: 1, 1, 16>}, {transform_indices = @transform_14, window_bounds = array<i64: 1, 4, 16, 16>}, {pipeline_mode = #tpu.pipeline_mode<synchronous>, transform_indices = @transform_15, window_bounds = array<i64: 1, 128>}, {pipeline_mode = #tpu.pipeline_mode<synchronous>, transform_indices = @transform_16, window_bounds = array<i64: 1, 128>}, {transform_indices = @transform_17, window_bounds = array<i64: 1, 16, 128>}, {transform_indices = @transform_18, window_bounds = array<i64: 1, 4, 16, 16>}]} {
    %c0 = arith.constant 0 : index
    %c0_0 = arith.constant 0 : index
    %c0_1 = arith.constant 0 : index
    %0 = vector.load %arg2[%c0, %c0_0, %c0_1] : memref<1x16x128xbf16, #tpu.memory_space<vmem>>, vector<1x16x128xbf16>
    %1 = vector.shape_cast %0 : vector<1x16x128xbf16> to vector<16x128xbf16>
    %c0_2 = arith.constant 0 : index
    %c0_3 = arith.constant 0 : index
    %c0_4 = arith.constant 0 : index
    %2 = vector.load %arg3[%c0_2, %c0_3, %c0_4] : memref<1x16x128xbf16, #tpu.memory_space<vmem>>, vector<1x16x128xbf16>
    %3 = vector.shape_cast %2 : vector<1x16x128xbf16> to vector<16x128xbf16>
    %c0_5 = arith.constant 0 : index
    %c0_6 = arith.constant 0 : index
    %4 = vector.load %arg4[%c0_5, %c0_6] : memref<128x128xbf16, #tpu.memory_space<vmem>>, vector<128x128xbf16>
    %cst = arith.constant dense<0.000000e+00> : vector<16x128xf32>
    %5 = tpu.matmul %1, %4, %cst {dimension_numbers = #tpu.dot_dimension_numbers<[1], [0], [0], [1], [0, 0, 1, 1], [], []>} : vector<16x128xbf16>, vector<128x128xbf16>, vector<16x128xf32> -> vector<16x128xf32>
    %c0_7 = arith.constant 0 : index
    %c0_8 = arith.constant 0 : index
    %6 = vector.load %arg8[%c0_7, %c0_8] : memref<16x128xf32, #tpu.memory_space<vmem>>, vector<16x128xf32>
    %c0_9 = arith.constant 0 : index
    %c0_10 = arith.constant 0 : index
    %7 = vector.load %arg9[%c0_9, %c0_10] : memref<16x128xf32, #tpu.memory_space<vmem>>, vector<16x128xf32>
    %c0_11 = arith.constant 0 : index
    %c0_12 = arith.constant 0 : index
    %8 = vector.load %arg10[%c0_11, %c0_12] : memref<16x128xf32, #tpu.memory_space<vmem>>, vector<16x128xf32>
    %c127_i32 = arith.constant 127 : i32
    %9 = tpu.dynamic_rotate %5 by %c127_i32 dim 1 : vector<16x128xf32>, i32 -> vector<16x128xf32>
    %c1_i32 = arith.constant 1 : i32
    %10 = tpu.dynamic_rotate %5 by %c1_i32 dim 1 : vector<16x128xf32>, i32 -> vector<16x128xf32>
    %11 = arith.mulf %5, %6 : vector<16x128xf32>
    %12 = arith.mulf %9, %7 : vector<16x128xf32>
    %13 = arith.addf %11, %12 : vector<16x128xf32>
    %14 = arith.mulf %10, %8 : vector<16x128xf32>
    %15 = arith.addf %13, %14 : vector<16x128xf32>
    %c0_13 = arith.constant 0 : index
    %c0_14 = arith.constant 0 : index
    %16 = vector.load %arg5[%c0_13, %c0_14] : memref<128x128xbf16, #tpu.memory_space<vmem>>, vector<128x128xbf16>
    %cst_15 = arith.constant dense<0.000000e+00> : vector<16x128xf32>
    %17 = tpu.matmul %3, %16, %cst_15 {dimension_numbers = #tpu.dot_dimension_numbers<[1], [0], [0], [1], [0, 0, 1, 1], [], []>} : vector<16x128xbf16>, vector<128x128xbf16>, vector<16x128xf32> -> vector<16x128xf32>
    %c0_16 = arith.constant 0 : index
    %c0_17 = arith.constant 0 : index
    %18 = vector.load %arg11[%c0_16, %c0_17] : memref<16x128xf32, #tpu.memory_space<vmem>>, vector<16x128xf32>
    %c0_18 = arith.constant 0 : index
    %c0_19 = arith.constant 0 : index
    %19 = vector.load %arg12[%c0_18, %c0_19] : memref<16x128xf32, #tpu.memory_space<vmem>>, vector<16x128xf32>
    %c0_20 = arith.constant 0 : index
    %c0_21 = arith.constant 0 : index
    %20 = vector.load %arg13[%c0_20, %c0_21] : memref<16x128xf32, #tpu.memory_space<vmem>>, vector<16x128xf32>
    %c127_i32_22 = arith.constant 127 : i32
    %21 = tpu.dynamic_rotate %17 by %c127_i32_22 dim 1 : vector<16x128xf32>, i32 -> vector<16x128xf32>
    %c1_i32_23 = arith.constant 1 : i32
    %22 = tpu.dynamic_rotate %17 by %c1_i32_23 dim 1 : vector<16x128xf32>, i32 -> vector<16x128xf32>
    %23 = arith.mulf %17, %18 : vector<16x128xf32>
    %24 = arith.mulf %21, %19 : vector<16x128xf32>
    %25 = arith.addf %23, %24 : vector<16x128xf32>
    %26 = arith.mulf %22, %20 : vector<16x128xf32>
    %27 = arith.addf %25, %26 : vector<16x128xf32>
    %c0_24 = arith.constant 0 : index
    %c0_25 = arith.constant 0 : index
    %28 = vector.load %arg6[%c0_24, %c0_25] : memref<128x128xbf16, #tpu.memory_space<vmem>>, vector<128x128xbf16>
    %cst_26 = arith.constant dense<0.000000e+00> : vector<16x128xf32>
    %29 = tpu.matmul %3, %28, %cst_26 {dimension_numbers = #tpu.dot_dimension_numbers<[1], [0], [0], [1], [0, 0, 1, 1], [], []>} : vector<16x128xbf16>, vector<128x128xbf16>, vector<16x128xf32> -> vector<16x128xf32>
    %c0_27 = arith.constant 0 : index
    %c0_28 = arith.constant 0 : index
    %c0_29 = arith.constant 0 : index
    %30 = vector.load %arg14[%c0_27, %c0_28, %c0_29] : memref<1x16x1xf32, #tpu.memory_space<vmem>>, vector<1x16x1xf32>
    %31 = vector.shape_cast %30 : vector<1x16x1xf32> to vector<16x1xf32>
    %c0_30 = arith.constant 0 : index
    %c0_31 = arith.constant 0 : index
    %c0_32 = arith.constant 0 : index
    %32 = vector.load %arg15[%c0_30, %c0_31, %c0_32] : memref<1x1x16xf32, #tpu.memory_space<vmem>>, vector<1x1x16xf32>
    %33 = vector.shape_cast %32 : vector<1x1x16xf32> to vector<1x16xf32>
    %34 = vector.broadcast %31 : vector<16x1xf32> to vector<16x16xf32>
    %35 = vector.broadcast %33 : vector<1x16xf32> to vector<16x16xf32>
    %36 = arith.addf %34, %35 : vector<16x16xf32>
    %37 = arith.truncf %15 : vector<16x128xf32> to vector<16x128xbf16>
    %38 = arith.truncf %27 : vector<16x128xf32> to vector<16x128xbf16>
    %39 = arith.truncf %29 : vector<16x128xf32> to vector<16x128xbf16>
    %40 = vector.extract_strided_slice %37 {offsets = [0, 0], sizes = [16, 32], strides = [1, 1]} : vector<16x128xbf16> to vector<16x32xbf16>
    %41 = vector.extract_strided_slice %38 {offsets = [0, 0], sizes = [16, 32], strides = [1, 1]} : vector<16x128xbf16> to vector<16x32xbf16>
    %42 = vector.extract_strided_slice %39 {offsets = [0, 0], sizes = [16, 32], strides = [1, 1]} : vector<16x128xbf16> to vector<16x32xbf16>
    %cst_33 = arith.constant dense<0.000000e+00> : vector<16x16xf32>
    %43 = tpu.matmul %40, %41, %cst_33 {dimension_numbers = #tpu.dot_dimension_numbers<[1], [1], [0], [0], [0, 0, 1, 0], [], []>} : vector<16x32xbf16>, vector<16x32xbf16>, vector<16x16xf32> -> vector<16x16xf32>
    %cst_34 = arith.constant 0.176776692 : f32
    %44 = vector.broadcast %cst_34 : f32 to vector<16x16xf32>
    %45 = arith.mulf %43, %44 : vector<16x16xf32>
    %46 = arith.addf %45, %36 : vector<16x16xf32>
    %c0_35 = arith.constant 0 : index
    %c0_36 = arith.constant 0 : index
    %c0_37 = arith.constant 0 : index
    %c0_38 = arith.constant 0 : index
    %47 = vector.load %arg16[%c0_35, %c0_36, %c0_37, %c0_38] : memref<1x4x16x16xf32, #tpu.memory_space<vmem>>, vector<1x1x16x16xf32>
    %48 = vector.shape_cast %47 : vector<1x1x16x16xf32> to vector<16x16xf32>
    %49 = arith.addf %48, %46 : vector<16x16xf32>
    %c0_39 = arith.constant 0 : index
    %c0_40 = arith.constant 0 : index
    %c0_41 = arith.constant 0 : index
    %c0_42 = arith.constant 0 : index
    %50 = vector.load %arg20[%c0_39, %c0_40, %c0_41, %c0_42] : memref<1x4x16x16xf32, #tpu.memory_space<vmem>>, vector<1x1x16x16xf32>
    %51 = vector.shape_cast %50 : vector<1x1x16x16xf32> to vector<16x16xf32>
    %52 = vector.shape_cast %49 : vector<16x16xf32> to vector<1x1x16x16xf32>
    tpu.vector_store %arg20[%c0_39, %c0_40, %c0_41, %c0_42], %52 {strides = array<i32>} : memref<1x4x16x16xf32, #tpu.memory_space<vmem>>, vector<1x1x16x16xf32>,
    %cst_43 = arith.constant 1.000000e+00 : f32
    %53 = vector.broadcast %cst_43 : f32 to vector<16x16xf32>
    %54 = arith.mulf %49, %53 : vector<16x16xf32>
    %cst_44 = arith.constant dense<0xFF800000> : vector<16xf32>
    %55 = vector.multi_reduction <maximumf>, %54, %cst_44 [1] : vector<16x16xf32> to vector<16xf32>
    %56 = vector.shape_cast %55 : vector<16xf32> to vector<16x1xf32>
    %cst_45 = arith.constant -3.000000e+38 : f32
    %57 = vector.broadcast %cst_45 : f32 to vector<16x1xf32>
    %58 = arith.maximumf %56, %57 : vector<16x1xf32>
    %59 = vector.broadcast %58 : vector<16x1xf32> to vector<16x16xf32>
    %60 = arith.subf %54, %59 : vector<16x16xf32>
    %61 = math.exp %60 : vector<16x16xf32>
    %cst_46 = arith.constant dense<0.000000e+00> : vector<16xf32>
    %62 = vector.multi_reduction <add>, %61, %cst_46 [1] : vector<16x16xf32> to vector<16xf32>
    %63 = vector.shape_cast %62 : vector<16xf32> to vector<16x1xf32>
    %cst_47 = arith.constant 0.000000e+00 : f32
    %64 = vector.broadcast %cst_47 : f32 to vector<16x1xf32>
    %65 = arith.cmpf ogt, %63, %64 : vector<16x1xf32>
    %cst_48 = arith.constant 1.000000e+00 : f32
    %66 = vector.broadcast %cst_48 : f32 to vector<16x1xf32>
    %67 = arith.select %65, %63, %66 : vector<16x1xi1>, vector<16x1xf32>
    %68 = tpu.reciprocal %67 {approx = true} : vector<16x1xf32> -> vector<16x1xf32>
    %69 = vector.broadcast %68 : vector<16x1xf32> to vector<16x16xf32>
    %70 = arith.mulf %61, %69 : vector<16x16xf32>
    %71 = arith.truncf %70 : vector<16x16xf32> to vector<16x16xbf16>
    %cst_49 = arith.constant dense<0.000000e+00> : vector<16x32xf32>
    %72 = tpu.matmul %71, %42, %cst_49 {dimension_numbers = #tpu.dot_dimension_numbers<[1], [0], [0], [1], [0, 0, 1, 1], [], []>} : vector<16x16xbf16>, vector<16x32xbf16>, vector<16x32xf32> -> vector<16x32xf32>
    %73 = vector.extract_strided_slice %37 {offsets = [0, 32], sizes = [16, 32], strides = [1, 1]} : vector<16x128xbf16> to vector<16x32xbf16>
    %74 = vector.extract_strided_slice %38 {offsets = [0, 32], sizes = [16, 32], strides = [1, 1]} : vector<16x128xbf16> to vector<16x32xbf16>
    %75 = vector.extract_strided_slice %39 {offsets = [0, 32], sizes = [16, 32], strides = [1, 1]} : vector<16x128xbf16> to vector<16x32xbf16>
    %cst_50 = arith.constant dense<0.000000e+00> : vector<16x16xf32>
    %76 = tpu.matmul %73, %74, %cst_50 {dimension_numbers = #tpu.dot_dimension_numbers<[1], [1], [0], [0], [0, 0, 1, 0], [], []>} : vector<16x32xbf16>, vector<16x32xbf16>, vector<16x16xf32> -> vector<16x16xf32>
    %cst_51 = arith.constant 0.176776692 : f32
    %77 = vector.broadcast %cst_51 : f32 to vector<16x16xf32>
    %78 = arith.mulf %76, %77 : vector<16x16xf32>
    %79 = arith.addf %78, %36 : vector<16x16xf32>
    %c0_52 = arith.constant 0 : index
    %c1 = arith.constant 1 : index
    %c0_53 = arith.constant 0 : index
    %c0_54 = arith.constant 0 : index
    %80 = vector.load %arg16[%c0_52, %c1, %c0_53, %c0_54] : memref<1x4x16x16xf32, #tpu.memory_space<vmem>>, vector<1x1x16x16xf32>
    %81 = vector.shape_cast %80 : vector<1x1x16x16xf32> to vector<16x16xf32>
    %82 = arith.addf %81, %79 : vector<16x16xf32>
    %c0_55 = arith.constant 0 : index
    %c1_56 = arith.constant 1 : index
    %c0_57 = arith.constant 0 : index
    %c0_58 = arith.constant 0 : index
    %83 = vector.load %arg20[%c0_55, %c1_56, %c0_57, %c0_58] : memref<1x4x16x16xf32, #tpu.memory_space<vmem>>, vector<1x1x16x16xf32>
    %84 = vector.shape_cast %83 : vector<1x1x16x16xf32> to vector<16x16xf32>
    %85 = vector.shape_cast %82 : vector<16x16xf32> to vector<1x1x16x16xf32>
    tpu.vector_store %arg20[%c0_55, %c1_56, %c0_57, %c0_58], %85 {strides = array<i32>} : memref<1x4x16x16xf32, #tpu.memory_space<vmem>>, vector<1x1x16x16xf32>,
    %cst_59 = arith.constant 1.000000e+00 : f32
    %86 = vector.broadcast %cst_59 : f32 to vector<16x16xf32>
    %87 = arith.mulf %82, %86 : vector<16x16xf32>
    %cst_60 = arith.constant dense<0xFF800000> : vector<16xf32>
    %88 = vector.multi_reduction <maximumf>, %87, %cst_60 [1] : vector<16x16xf32> to vector<16xf32>
    %89 = vector.shape_cast %88 : vector<16xf32> to vector<16x1xf32>
    %cst_61 = arith.constant -3.000000e+38 : f32
    %90 = vector.broadcast %cst_61 : f32 to vector<16x1xf32>
    %91 = arith.maximumf %89, %90 : vector<16x1xf32>
    %92 = vector.broadcast %91 : vector<16x1xf32> to vector<16x16xf32>
    %93 = arith.subf %87, %92 : vector<16x16xf32>
    %94 = math.exp %93 : vector<16x16xf32>
    %cst_62 = arith.constant dense<0.000000e+00> : vector<16xf32>
    %95 = vector.multi_reduction <add>, %94, %cst_62 [1] : vector<16x16xf32> to vector<16xf32>
    %96 = vector.shape_cast %95 : vector<16xf32> to vector<16x1xf32>
    %cst_63 = arith.constant 0.000000e+00 : f32
    %97 = vector.broadcast %cst_63 : f32 to vector<16x1xf32>
    %98 = arith.cmpf ogt, %96, %97 : vector<16x1xf32>
    %cst_64 = arith.constant 1.000000e+00 : f32
    %99 = vector.broadcast %cst_64 : f32 to vector<16x1xf32>
    %100 = arith.select %98, %96, %99 : vector<16x1xi1>, vector<16x1xf32>
    %101 = tpu.reciprocal %100 {approx = true} : vector<16x1xf32> -> vector<16x1xf32>
    %102 = vector.broadcast %101 : vector<16x1xf32> to vector<16x16xf32>
    %103 = arith.mulf %94, %102 : vector<16x16xf32>
    %104 = arith.truncf %103 : vector<16x16xf32> to vector<16x16xbf16>
    %cst_65 = arith.constant dense<0.000000e+00> : vector<16x32xf32>
    %105 = tpu.matmul %104, %75, %cst_65 {dimension_numbers = #tpu.dot_dimension_numbers<[1], [0], [0], [1], [0, 0, 1, 1], [], []>} : vector<16x16xbf16>, vector<16x32xbf16>, vector<16x32xf32> -> vector<16x32xf32>
    %106 = vector.extract_strided_slice %37 {offsets = [0, 64], sizes = [16, 32], strides = [1, 1]} : vector<16x128xbf16> to vector<16x32xbf16>
    %107 = vector.extract_strided_slice %38 {offsets = [0, 64], sizes = [16, 32], strides = [1, 1]} : vector<16x128xbf16> to vector<16x32xbf16>
    %108 = vector.extract_strided_slice %39 {offsets = [0, 64], sizes = [16, 32], strides = [1, 1]} : vector<16x128xbf16> to vector<16x32xbf16>
    %cst_66 = arith.constant dense<0.000000e+00> : vector<16x16xf32>
    %109 = tpu.matmul %106, %107, %cst_66 {dimension_numbers = #tpu.dot_dimension_numbers<[1], [1], [0], [0], [0, 0, 1, 0], [], []>} : vector<16x32xbf16>, vector<16x32xbf16>, vector<16x16xf32> -> vector<16x16xf32>
    %cst_67 = arith.constant 0.176776692 : f32
    %110 = vector.broadcast %cst_67 : f32 to vector<16x16xf32>
    %111 = arith.mulf %109, %110 : vector<16x16xf32>
    %112 = arith.addf %111, %36 : vector<16x16xf32>
    %c0_68 = arith.constant 0 : index
    %c2 = arith.constant 2 : index
    %c0_69 = arith.constant 0 : index
    %c0_70 = arith.constant 0 : index
    %113 = vector.load %arg16[%c0_68, %c2, %c0_69, %c0_70] : memref<1x4x16x16xf32, #tpu.memory_space<vmem>>, vector<1x1x16x16xf32>
    %114 = vector.shape_cast %113 : vector<1x1x16x16xf32> to vector<16x16xf32>
    %115 = arith.addf %114, %112 : vector<16x16xf32>
    %c0_71 = arith.constant 0 : index
    %c2_72 = arith.constant 2 : index
    %c0_73 = arith.constant 0 : index
    %c0_74 = arith.constant 0 : index
    %116 = vector.load %arg20[%c0_71, %c2_72, %c0_73, %c0_74] : memref<1x4x16x16xf32, #tpu.memory_space<vmem>>, vector<1x1x16x16xf32>
    %117 = vector.shape_cast %116 : vector<1x1x16x16xf32> to vector<16x16xf32>
    %118 = vector.shape_cast %115 : vector<16x16xf32> to vector<1x1x16x16xf32>
    tpu.vector_store %arg20[%c0_71, %c2_72, %c0_73, %c0_74], %118 {strides = array<i32>} : memref<1x4x16x16xf32, #tpu.memory_space<vmem>>, vector<1x1x16x16xf32>,
    %cst_75 = arith.constant 1.000000e+00 : f32
    %119 = vector.broadcast %cst_75 : f32 to vector<16x16xf32>
    %120 = arith.mulf %115, %119 : vector<16x16xf32>
    %cst_76 = arith.constant dense<0xFF800000> : vector<16xf32>
    %121 = vector.multi_reduction <maximumf>, %120, %cst_76 [1] : vector<16x16xf32> to vector<16xf32>
    %122 = vector.shape_cast %121 : vector<16xf32> to vector<16x1xf32>
    %cst_77 = arith.constant -3.000000e+38 : f32
    %123 = vector.broadcast %cst_77 : f32 to vector<16x1xf32>
    %124 = arith.maximumf %122, %123 : vector<16x1xf32>
    %125 = vector.broadcast %124 : vector<16x1xf32> to vector<16x16xf32>
    %126 = arith.subf %120, %125 : vector<16x16xf32>
    %127 = math.exp %126 : vector<16x16xf32>
    %cst_78 = arith.constant dense<0.000000e+00> : vector<16xf32>
    %128 = vector.multi_reduction <add>, %127, %cst_78 [1] : vector<16x16xf32> to vector<16xf32>
    %129 = vector.shape_cast %128 : vector<16xf32> to vector<16x1xf32>
    %cst_79 = arith.constant 0.000000e+00 : f32
    %130 = vector.broadcast %cst_79 : f32 to vector<16x1xf32>
    %131 = arith.cmpf ogt, %129, %130 : vector<16x1xf32>
    %cst_80 = arith.constant 1.000000e+00 : f32
    %132 = vector.broadcast %cst_80 : f32 to vector<16x1xf32>
    %133 = arith.select %131, %129, %132 : vector<16x1xi1>, vector<16x1xf32>
    %134 = tpu.reciprocal %133 {approx = true} : vector<16x1xf32> -> vector<16x1xf32>
    %135 = vector.broadcast %134 : vector<16x1xf32> to vector<16x16xf32>
    %136 = arith.mulf %127, %135 : vector<16x16xf32>
    %137 = arith.truncf %136 : vector<16x16xf32> to vector<16x16xbf16>
    %cst_81 = arith.constant dense<0.000000e+00> : vector<16x32xf32>
    %138 = tpu.matmul %137, %108, %cst_81 {dimension_numbers = #tpu.dot_dimension_numbers<[1], [0], [0], [1], [0, 0, 1, 1], [], []>} : vector<16x16xbf16>, vector<16x32xbf16>, vector<16x32xf32> -> vector<16x32xf32>
    %139 = vector.extract_strided_slice %37 {offsets = [0, 96], sizes = [16, 32], strides = [1, 1]} : vector<16x128xbf16> to vector<16x32xbf16>
    %140 = vector.extract_strided_slice %38 {offsets = [0, 96], sizes = [16, 32], strides = [1, 1]} : vector<16x128xbf16> to vector<16x32xbf16>
    %141 = vector.extract_strided_slice %39 {offsets = [0, 96], sizes = [16, 32], strides = [1, 1]} : vector<16x128xbf16> to vector<16x32xbf16>
    %cst_82 = arith.constant dense<0.000000e+00> : vector<16x16xf32>
    %142 = tpu.matmul %139, %140, %cst_82 {dimension_numbers = #tpu.dot_dimension_numbers<[1], [1], [0], [0], [0, 0, 1, 0], [], []>} : vector<16x32xbf16>, vector<16x32xbf16>, vector<16x16xf32> -> vector<16x16xf32>
    %cst_83 = arith.constant 0.176776692 : f32
    %143 = vector.broadcast %cst_83 : f32 to vector<16x16xf32>
    %144 = arith.mulf %142, %143 : vector<16x16xf32>
    %145 = arith.addf %144, %36 : vector<16x16xf32>
    %c0_84 = arith.constant 0 : index
    %c3 = arith.constant 3 : index
    %c0_85 = arith.constant 0 : index
    %c0_86 = arith.constant 0 : index
    %146 = vector.load %arg16[%c0_84, %c3, %c0_85, %c0_86] : memref<1x4x16x16xf32, #tpu.memory_space<vmem>>, vector<1x1x16x16xf32>
    %147 = vector.shape_cast %146 : vector<1x1x16x16xf32> to vector<16x16xf32>
    %148 = arith.addf %147, %145 : vector<16x16xf32>
    %c0_87 = arith.constant 0 : index
    %c3_88 = arith.constant 3 : index
    %c0_89 = arith.constant 0 : index
    %c0_90 = arith.constant 0 : index
    %149 = vector.load %arg20[%c0_87, %c3_88, %c0_89, %c0_90] : memref<1x4x16x16xf32, #tpu.memory_space<vmem>>, vector<1x1x16x16xf32>
    %150 = vector.shape_cast %149 : vector<1x1x16x16xf32> to vector<16x16xf32>
    %151 = vector.shape_cast %148 : vector<16x16xf32> to vector<1x1x16x16xf32>
    tpu.vector_store %arg20[%c0_87, %c3_88, %c0_89, %c0_90], %151 {strides = array<i32>} : memref<1x4x16x16xf32, #tpu.memory_space<vmem>>, vector<1x1x16x16xf32>,
    %cst_91 = arith.constant 1.000000e+00 : f32
    %152 = vector.broadcast %cst_91 : f32 to vector<16x16xf32>
    %153 = arith.mulf %148, %152 : vector<16x16xf32>
    %cst_92 = arith.constant dense<0xFF800000> : vector<16xf32>
    %154 = vector.multi_reduction <maximumf>, %153, %cst_92 [1] : vector<16x16xf32> to vector<16xf32>
    %155 = vector.shape_cast %154 : vector<16xf32> to vector<16x1xf32>
    %cst_93 = arith.constant -3.000000e+38 : f32
    %156 = vector.broadcast %cst_93 : f32 to vector<16x1xf32>
    %157 = arith.maximumf %155, %156 : vector<16x1xf32>
    %158 = vector.broadcast %157 : vector<16x1xf32> to vector<16x16xf32>
    %159 = arith.subf %153, %158 : vector<16x16xf32>
    %160 = math.exp %159 : vector<16x16xf32>
    %cst_94 = arith.constant dense<0.000000e+00> : vector<16xf32>
    %161 = vector.multi_reduction <add>, %160, %cst_94 [1] : vector<16x16xf32> to vector<16xf32>
    %162 = vector.shape_cast %161 : vector<16xf32> to vector<16x1xf32>
    %cst_95 = arith.constant 0.000000e+00 : f32
    %163 = vector.broadcast %cst_95 : f32 to vector<16x1xf32>
    %164 = arith.cmpf ogt, %162, %163 : vector<16x1xf32>
    %cst_96 = arith.constant 1.000000e+00 : f32
    %165 = vector.broadcast %cst_96 : f32 to vector<16x1xf32>
    %166 = arith.select %164, %162, %165 : vector<16x1xi1>, vector<16x1xf32>
    %167 = tpu.reciprocal %166 {approx = true} : vector<16x1xf32> -> vector<16x1xf32>
    %168 = vector.broadcast %167 : vector<16x1xf32> to vector<16x16xf32>
    %169 = arith.mulf %160, %168 : vector<16x16xf32>
    %170 = arith.truncf %169 : vector<16x16xf32> to vector<16x16xbf16>
    %cst_97 = arith.constant dense<0.000000e+00> : vector<16x32xf32>
    %171 = tpu.matmul %170, %141, %cst_97 {dimension_numbers = #tpu.dot_dimension_numbers<[1], [0], [0], [1], [0, 0, 1, 1], [], []>} : vector<16x16xbf16>, vector<16x32xbf16>, vector<16x32xf32> -> vector<16x32xf32>
    %172 = tpu.concatenate %72, %105, %138, %171 in 1 : vector<16x32xf32>, vector<16x32xf32>, vector<16x32xf32>, vector<16x32xf32> -> vector<16x128xf32>
    %173 = arith.truncf %172 : vector<16x128xf32> to vector<16x128xbf16>
    %c0_98 = arith.constant 0 : index
    %c0_99 = arith.constant 0 : index
    %174 = vector.load %arg7[%c0_98, %c0_99] : memref<128x128xbf16, #tpu.memory_space<vmem>>, vector<128x128xbf16>
    %cst_100 = arith.constant dense<0.000000e+00> : vector<16x128xf32>
    %175 = tpu.matmul %173, %174, %cst_100 {dimension_numbers = #tpu.dot_dimension_numbers<[1], [0], [0], [1], [0, 0, 1, 1], [], []>} : vector<16x128xbf16>, vector<128x128xbf16>, vector<16x128xf32> -> vector<16x128xf32>
    %cst_101 = arith.constant 1.26863623 : f32
    %176 = vector.broadcast %cst_101 : f32 to vector<16x128xf32>
    %177 = arith.mulf %175, %176 : vector<16x128xf32>
    %178 = arith.extf %1 : vector<16x128xbf16> to vector<16x128xf32>
    %179 = arith.addf %177, %178 : vector<16x128xf32>
    %cst_102 = arith.constant dense<0.000000e+00> : vector<16xf32>
    %180 = vector.multi_reduction <add>, %179, %cst_102 [1] : vector<16x128xf32> to vector<16xf32>
    %181 = vector.shape_cast %180 : vector<16xf32> to vector<16x1xf32>
    %cst_103 = arith.constant 1.280000e+02 : f32
    %182 = vector.broadcast %cst_103 : f32 to vector<16x1xf32>
    %183 = arith.divf %181, %182 : vector<16x1xf32>
    %184 = vector.broadcast %183 : vector<16x1xf32> to vector<16x128xf32>
    %185 = arith.subf %179, %184 : vector<16x128xf32>
    %186 = arith.mulf %185, %185 : vector<16x128xf32>
    %cst_104 = arith.constant dense<0.000000e+00> : vector<16xf32>
    %187 = vector.multi_reduction <add>, %186, %cst_104 [1] : vector<16x128xf32> to vector<16xf32>
    %188 = vector.shape_cast %187 : vector<16xf32> to vector<16x1xf32>
    %cst_105 = arith.constant 1.280000e+02 : f32
    %189 = vector.broadcast %cst_105 : f32 to vector<16x1xf32>
    %190 = arith.divf %188, %189 : vector<16x1xf32>
    %191 = vector.broadcast %183 : vector<16x1xf32> to vector<16x128xf32>
    %192 = arith.subf %179, %191 : vector<16x128xf32>
    %cst_106 = arith.constant 9.99999974E-6 : f32
    %193 = vector.broadcast %cst_106 : f32 to vector<16x1xf32>
    %194 = arith.addf %190, %193 : vector<16x1xf32>
    %195 = math.rsqrt %194 : vector<16x1xf32>
    %196 = vector.broadcast %195 : vector<16x1xf32> to vector<16x128xf32>
    %197 = arith.mulf %192, %196 : vector<16x128xf32>
    %c0_107 = arith.constant 0 : index
    %c0_108 = arith.constant 0 : index
    %198 = vector.load %arg17[%c0_107, %c0_108] : memref<1x128xf32, #tpu.memory_space<vmem>>, vector<1x128xf32>
    %199 = vector.broadcast %198 : vector<1x128xf32> to vector<16x128xf32>
    %200 = arith.mulf %197, %199 : vector<16x128xf32>
    %c0_109 = arith.constant 0 : index
    %c0_110 = arith.constant 0 : index
    %201 = vector.load %arg18[%c0_109, %c0_110] : memref<1x128xf32, #tpu.memory_space<vmem>>, vector<1x128xf32>
    %202 = vector.broadcast %201 : vector<1x128xf32> to vector<16x128xf32>
    %203 = arith.addf %200, %202 : vector<16x128xf32>
    %204 = arith.truncf %203 : vector<16x128xf32> to vector<16x128xbf16>
    %c0_111 = arith.constant 0 : index
    %c0_112 = arith.constant 0 : index
    %c0_113 = arith.constant 0 : index
    %205 = vector.load %arg19[%c0_111, %c0_112, %c0_113] : memref<1x16x128xbf16, #tpu.memory_space<vmem>>, vector<1x16x128xbf16>
    %206 = vector.shape_cast %205 : vector<1x16x128xbf16> to vector<16x128xbf16>
    %207 = vector.shape_cast %204 : vector<16x128xbf16> to vector<1x16x128xbf16>
    tpu.vector_store %arg19[%c0_111, %c0_112, %c0_113], %207 {strides = array<i32>} : memref<1x16x128xbf16, #tpu.memory_space<vmem>>, vector<1x16x128xbf16>,
    return
  }
  func.func @transform_0(%arg0: i32, %arg1: i32) -> (i32, i32, i32) {
    %c0_i32 = arith.constant 0 : i32
    %c0_i32_0 = arith.constant 0 : i32
    return %arg0, %arg1, %c0_i32 : i32, i32, i32
  }
  func.func @transform_1(%arg0: i32, %arg1: i32) -> (i32, i32, i32) {
    %c0_i32 = arith.constant 0 : i32
    %c0_i32_0 = arith.constant 0 : i32
    %c0_i32_1 = arith.constant 0 : i32
    return %arg0, %c0_i32, %c0_i32_0 : i32, i32, i32
  }
  func.func @transform_2(%arg0: i32, %arg1: i32) -> (i32, i32) {
    %c0_i32 = arith.constant 0 : i32
    %c0_i32_0 = arith.constant 0 : i32
    %c0_i32_1 = arith.constant 0 : i32
    return %c0_i32, %c0_i32_0 : i32, i32
  }
  func.func @transform_3(%arg0: i32, %arg1: i32) -> (i32, i32) {
    %c0_i32 = arith.constant 0 : i32
    %c0_i32_0 = arith.constant 0 : i32
    %c0_i32_1 = arith.constant 0 : i32
    return %c0_i32, %c0_i32_0 : i32, i32
  }
  func.func @transform_4(%arg0: i32, %arg1: i32) -> (i32, i32) {
    %c0_i32 = arith.constant 0 : i32
    %c0_i32_0 = arith.constant 0 : i32
    %c0_i32_1 = arith.constant 0 : i32
    return %c0_i32, %c0_i32_0 : i32, i32
  }
  func.func @transform_5(%arg0: i32, %arg1: i32) -> (i32, i32) {
    %c0_i32 = arith.constant 0 : i32
    %c0_i32_0 = arith.constant 0 : i32
    %c0_i32_1 = arith.constant 0 : i32
    return %c0_i32, %c0_i32_0 : i32, i32
  }
  func.func @transform_6(%arg0: i32, %arg1: i32) -> (i32, i32) {
    %c0_i32 = arith.constant 0 : i32
    %c0_i32_0 = arith.constant 0 : i32
    return %arg1, %c0_i32 : i32, i32
  }
  func.func @transform_7(%arg0: i32, %arg1: i32) -> (i32, i32) {
    %c0_i32 = arith.constant 0 : i32
    %c0_i32_0 = arith.constant 0 : i32
    return %arg1, %c0_i32 : i32, i32
  }
  func.func @transform_8(%arg0: i32, %arg1: i32) -> (i32, i32) {
    %c0_i32 = arith.constant 0 : i32
    %c0_i32_0 = arith.constant 0 : i32
    return %arg1, %c0_i32 : i32, i32
  }
  func.func @transform_9(%arg0: i32, %arg1: i32) -> (i32, i32) {
    %c0_i32 = arith.constant 0 : i32
    %c0_i32_0 = arith.constant 0 : i32
    %c0_i32_1 = arith.constant 0 : i32
    return %c0_i32, %c0_i32_0 : i32, i32
  }
  func.func @transform_10(%arg0: i32, %arg1: i32) -> (i32, i32) {
    %c0_i32 = arith.constant 0 : i32
    %c0_i32_0 = arith.constant 0 : i32
    %c0_i32_1 = arith.constant 0 : i32
    return %c0_i32, %c0_i32_0 : i32, i32
  }
  func.func @transform_11(%arg0: i32, %arg1: i32) -> (i32, i32) {
    %c0_i32 = arith.constant 0 : i32
    %c0_i32_0 = arith.constant 0 : i32
    %c0_i32_1 = arith.constant 0 : i32
    return %c0_i32, %c0_i32_0 : i32, i32
  }
  func.func @transform_12(%arg0: i32, %arg1: i32) -> (i32, i32, i32) {
    %c0_i32 = arith.constant 0 : i32
    %c0_i32_0 = arith.constant 0 : i32
    return %arg0, %arg1, %c0_i32 : i32, i32, i32
  }
  func.func @transform_13(%arg0: i32, %arg1: i32) -> (i32, i32, i32) {
    %c0_i32 = arith.constant 0 : i32
    %c0_i32_0 = arith.constant 0 : i32
    %c0_i32_1 = arith.constant 0 : i32
    return %arg0, %c0_i32, %c0_i32_0 : i32, i32, i32
  }
  func.func @transform_14(%arg0: i32, %arg1: i32) -> (i32, i32, i32, i32) {
    %c0_i32 = arith.constant 0 : i32
    %c0_i32_0 = arith.constant 0 : i32
    %c0_i32_1 = arith.constant 0 : i32
    return %arg0, %c0_i32, %arg1, %c0_i32_0 : i32, i32, i32, i32
  }
  func.func @transform_15(%arg0: i32, %arg1: i32) -> (i32, i32) {
    %c0_i32 = arith.constant 0 : i32
    %c0_i32_0 = arith.constant 0 : i32
    %c0_i32_1 = arith.constant 0 : i32
    return %c0_i32, %c0_i32_0 : i32, i32
  }
  func.func @transform_16(%arg0: i32, %arg1: i32) -> (i32, i32) {
    %c0_i32 = arith.constant 0 : i32
    %c0_i32_0 = arith.constant 0 : i32
    %c0_i32_1 = arith.constant 0 : i32
    return %c0_i32, %c0_i32_0 : i32, i32
  }
  func.func @transform_17(%arg0: i32, %arg1: i32) -> (i32, i32, i32) {
    %c0_i32 = arith.constant 0 : i32
    %c0_i32_0 = arith.constant 0 : i32
    return %arg0, %arg1, %c0_i32 : i32, i32, i32
  }
  func.func @transform_18(%arg0: i32, %arg1: i32) -> (i32, i32, i32, i32) {
    %c0_i32 = arith.constant 0 : i32
    %c0_i32_0 = arith.constant 0 : i32
    %c0_i32_1 = arith.constant 0 : i32
    return %arg0, %c0_i32, %arg1, %c0_i32_0 : i32, i32, i32, i32
  }
}

module attributes {stable_mosaic.version = 11 : i64} {
  func.func @_attn_kernel(%arg0: i32, %arg1: i32, %arg2: memref<1x16x128xbf16, #tpu.memory_space<vmem>>, %arg3: memref<1x16x128xbf16, #tpu.memory_space<vmem>>, %arg4: memref<128x128xbf16, #tpu.memory_space<vmem>>, %arg5: memref<128x128xbf16, #tpu.memory_space<vmem>>, %arg6: memref<128x128xbf16, #tpu.memory_space<vmem>>, %arg7: memref<128x128xbf16, #tpu.memory_space<vmem>>, %arg8: memref<16x128xf32, #tpu.memory_space<vmem>>, %arg9: memref<16x128xf32, #tpu.memory_space<vmem>>, %arg10: memref<16x128xf32, #tpu.memory_space<vmem>>, %arg11: memref<16x128xf32, #tpu.memory_space<vmem>>, %arg12: memref<16x128xf32, #tpu.memory_space<vmem>>, %arg13: memref<16x128xf32, #tpu.memory_space<vmem>>, %arg14: memref<1x16x1xf32, #tpu.memory_space<vmem>>, %arg15: memref<1x1x16xf32, #tpu.memory_space<vmem>>, %arg16: memref<1x4x16x16xf32, #tpu.memory_space<vmem>>, %arg17: memref<1x128xf32, #tpu.memory_space<vmem>>, %arg18: memref<1x128xf32, #tpu.memory_space<vmem>>, %arg19: memref<1x16x128xbf16, #tpu.memory_space<vmem>>, %arg20: memref<1x4x16x16xf32, #tpu.memory_space<vmem>>) attributes {dimension_semantics = [#tpu.dimension_semantics<parallel>, #tpu.dimension_semantics<parallel>], iteration_bounds = array<i64: 2, 1>, scalar_prefetch = 0 : i64, scratch_operands = 0 : i64, tpu.core_type = #tpu.core_type<tc>, window_params = [{transform_indices = @transform_0, window_bounds = array<i64: 1, 16, 128>}, {transform_indices = @transform_1, window_bounds = array<i64: 1, 16, 128>}, {pipeline_mode = #tpu.pipeline_mode<synchronous>, transform_indices = @transform_2, window_bounds = array<i64: 128, 128>}, {pipeline_mode = #tpu.pipeline_mode<synchronous>, transform_indices = @transform_3, window_bounds = array<i64: 128, 128>}, {pipeline_mode = #tpu.pipeline_mode<synchronous>, transform_indices = @transform_4, window_bounds = array<i64: 128, 128>}, {pipeline_mode = #tpu.pipeline_mode<synchronous>, transform_indices = @transform_5, window_bounds = array<i64: 128, 128>}, {transform_indices = @transform_6, window_bounds = array<i64: 16, 128>}, {transform_indices = @transform_7, window_bounds = array<i64: 16, 128>}, {transform_indices = @transform_8, window_bounds = array<i64: 16, 128>}, {pipeline_mode = #tpu.pipeline_mode<synchronous>, transform_indices = @transform_9, window_bounds = array<i64: 16, 128>}, {pipeline_mode = #tpu.pipeline_mode<synchronous>, transform_indices = @transform_10, window_bounds = array<i64: 16, 128>}, {pipeline_mode = #tpu.pipeline_mode<synchronous>, transform_indices = @transform_11, window_bounds = array<i64: 16, 128>}, {transform_indices = @transform_12, window_bounds = array<i64: 1, 16, 1>}, {transform_indices = @transform_13, window_bounds = array<i64: 1, 1, 16>}, {transform_indices = @transform_14, window_bounds = array<i64: 1, 4, 16, 16>}, {pipeline_mode = #tpu.pipeline_mode<synchronous>, transform_indices = @transform_15, window_bounds = array<i64: 1, 128>}, {pipeline_mode = #tpu.pipeline_mode<synchronous>, transform_indices = @transform_16, window_bounds = array<i64: 1, 128>}, {transform_indices = @transform_17, window_bounds = array<i64: 1, 16, 128>}, {transform_indices = @transform_18, window_bounds = array<i64: 1, 4, 16, 16>}]} {
    %c0 = arith.constant 0 : index
    %c0_0 = arith.constant 0 : index
    %c0_1 = arith.constant 0 : index
    %0 = vector.load %arg2[%c0, %c0_0, %c0_1] : memref<1x16x128xbf16, #tpu.memory_space<vmem>>, vector<1x16x128xbf16>
    %1 = vector.shape_cast %0 : vector<1x16x128xbf16> to vector<16x128xbf16>
    %c0_2 = arith.constant 0 : index
    %c0_3 = arith.constant 0 : index
    %c0_4 = arith.constant 0 : index
    %2 = vector.load %arg3[%c0_2, %c0_3, %c0_4] : memref<1x16x128xbf16, #tpu.memory_space<vmem>>, vector<1x16x128xbf16>
    %3 = vector.shape_cast %2 : vector<1x16x128xbf16> to vector<16x128xbf16>
    %c0_5 = arith.constant 0 : index
    %c0_6 = arith.constant 0 : index
    %4 = vector.load %arg4[%c0_5, %c0_6] : memref<128x128xbf16, #tpu.memory_space<vmem>>, vector<128x128xbf16>
    %cst = arith.constant dense<0.000000e+00> : vector<16x128xf32>
    %5 = tpu.matmul %1, %4, %cst {dimension_numbers = #tpu.dot_dimension_numbers<[1], [0], [0], [1], [0, 0, 1, 1], [], []>} : vector<16x128xbf16>, vector<128x128xbf16>, vector<16x128xf32> -> vector<16x128xf32>
    %c0_7 = arith.constant 0 : index
    %c0_8 = arith.constant 0 : index
    %6 = vector.load %arg8[%c0_7, %c0_8] : memref<16x128xf32, #tpu.memory_space<vmem>>, vector<16x128xf32>
    %c0_9 = arith.constant 0 : index
    %c0_10 = arith.constant 0 : index
    %7 = vector.load %arg9[%c0_9, %c0_10] : memref<16x128xf32, #tpu.memory_space<vmem>>, vector<16x128xf32>
    %c0_11 = arith.constant 0 : index
    %c0_12 = arith.constant 0 : index
    %8 = vector.load %arg10[%c0_11, %c0_12] : memref<16x128xf32, #tpu.memory_space<vmem>>, vector<16x128xf32>
    %c127_i32 = arith.constant 127 : i32
    %9 = tpu.dynamic_rotate %5 by %c127_i32 dim 1 : vector<16x128xf32>, i32 -> vector<16x128xf32>
    %c1_i32 = arith.constant 1 : i32
    %10 = tpu.dynamic_rotate %5 by %c1_i32 dim 1 : vector<16x128xf32>, i32 -> vector<16x128xf32>
    %11 = arith.mulf %5, %6 : vector<16x128xf32>
    %12 = arith.mulf %9, %7 : vector<16x128xf32>
    %13 = arith.addf %11, %12 : vector<16x128xf32>
    %14 = arith.mulf %10, %8 : vector<16x128xf32>
    %15 = arith.addf %13, %14 : vector<16x128xf32>
    %c0_13 = arith.constant 0 : index
    %c0_14 = arith.constant 0 : index
    %16 = vector.load %arg5[%c0_13, %c0_14] : memref<128x128xbf16, #tpu.memory_space<vmem>>, vector<128x128xbf16>
    %cst_15 = arith.constant dense<0.000000e+00> : vector<16x128xf32>
    %17 = tpu.matmul %3, %16, %cst_15 {dimension_numbers = #tpu.dot_dimension_numbers<[1], [0], [0], [1], [0, 0, 1, 1], [], []>} : vector<16x128xbf16>, vector<128x128xbf16>, vector<16x128xf32> -> vector<16x128xf32>
    %c0_16 = arith.constant 0 : index
    %c0_17 = arith.constant 0 : index
    %18 = vector.load %arg11[%c0_16, %c0_17] : memref<16x128xf32, #tpu.memory_space<vmem>>, vector<16x128xf32>
    %c0_18 = arith.constant 0 : index
    %c0_19 = arith.constant 0 : index
    %19 = vector.load %arg12[%c0_18, %c0_19] : memref<16x128xf32, #tpu.memory_space<vmem>>, vector<16x128xf32>
    %c0_20 = arith.constant 0 : index
    %c0_21 = arith.constant 0 : index
    %20 = vector.load %arg13[%c0_20, %c0_21] : memref<16x128xf32, #tpu.memory_space<vmem>>, vector<16x128xf32>
    %c127_i32_22 = arith.constant 127 : i32
    %21 = tpu.dynamic_rotate %17 by %c127_i32_22 dim 1 : vector<16x128xf32>, i32 -> vector<16x128xf32>
    %c1_i32_23 = arith.constant 1 : i32
    %22 = tpu.dynamic_rotate %17 by %c1_i32_23 dim 1 : vector<16x128xf32>, i32 -> vector<16x128xf32>
    %23 = arith.mulf %17, %18 : vector<16x128xf32>
    %24 = arith.mulf %21, %19 : vector<16x128xf32>
    %25 = arith.addf %23, %24 : vector<16x128xf32>
    %26 = arith.mulf %22, %20 : vector<16x128xf32>
    %27 = arith.addf %25, %26 : vector<16x128xf32>
    %c0_24 = arith.constant 0 : index
    %c0_25 = arith.constant 0 : index
    %28 = vector.load %arg6[%c0_24, %c0_25] : memref<128x128xbf16, #tpu.memory_space<vmem>>, vector<128x128xbf16>
    %cst_26 = arith.constant dense<0.000000e+00> : vector<16x128xf32>
    %29 = tpu.matmul %3, %28, %cst_26 {dimension_numbers = #tpu.dot_dimension_numbers<[1], [0], [0], [1], [0, 0, 1, 1], [], []>} : vector<16x128xbf16>, vector<128x128xbf16>, vector<16x128xf32> -> vector<16x128xf32>
    %c0_27 = arith.constant 0 : index
    %c0_28 = arith.constant 0 : index
    %c0_29 = arith.constant 0 : index
    %30 = vector.load %arg14[%c0_27, %c0_28, %c0_29] : memref<1x16x1xf32, #tpu.memory_space<vmem>>, vector<1x16x1xf32>
    %31 = vector.shape_cast %30 : vector<1x16x1xf32> to vector<16x1xf32>
    %c0_30 = arith.constant 0 : index
    %c0_31 = arith.constant 0 : index
    %c0_32 = arith.constant 0 : index
    %32 = vector.load %arg15[%c0_30, %c0_31, %c0_32] : memref<1x1x16xf32, #tpu.memory_space<vmem>>, vector<1x1x16xf32>
    %33 = vector.shape_cast %32 : vector<1x1x16xf32> to vector<1x16xf32>
    %34 = vector.broadcast %31 : vector<16x1xf32> to vector<16x16xf32>
    %35 = vector.broadcast %33 : vector<1x16xf32> to vector<16x16xf32>
    %36 = arith.addf %34, %35 : vector<16x16xf32>
    %37 = arith.truncf %15 : vector<16x128xf32> to vector<16x128xbf16>
    %38 = arith.truncf %27 : vector<16x128xf32> to vector<16x128xbf16>
    %39 = arith.truncf %29 : vector<16x128xf32> to vector<16x128xbf16>
    %40 = vector.extract_strided_slice %37 {offsets = [0, 0], sizes = [16, 32], strides = [1, 1]} : vector<16x128xbf16> to vector<16x32xbf16>
    %41 = vector.extract_strided_slice %38 {offsets = [0, 0], sizes = [16, 32], strides = [1, 1]} : vector<16x128xbf16> to vector<16x32xbf16>
    %42 = vector.extract_strided_slice %39 {offsets = [0, 0], sizes = [16, 32], strides = [1, 1]} : vector<16x128xbf16> to vector<16x32xbf16>
    %cst_33 = arith.constant dense<0.000000e+00> : vector<16x16xf32>
    %43 = tpu.matmul %40, %41, %cst_33 {dimension_numbers = #tpu.dot_dimension_numbers<[1], [1], [0], [0], [0, 0, 1, 0], [], []>} : vector<16x32xbf16>, vector<16x32xbf16>, vector<16x16xf32> -> vector<16x16xf32>
    %cst_34 = arith.constant 0.176776692 : f32
    %44 = vector.broadcast %cst_34 : f32 to vector<16x16xf32>
    %45 = arith.mulf %43, %44 : vector<16x16xf32>
    %46 = arith.addf %45, %36 : vector<16x16xf32>
    %c0_35 = arith.constant 0 : index
    %c0_36 = arith.constant 0 : index
    %c0_37 = arith.constant 0 : index
    %c0_38 = arith.constant 0 : index
    %47 = vector.load %arg16[%c0_35, %c0_36, %c0_37, %c0_38] : memref<1x4x16x16xf32, #tpu.memory_space<vmem>>, vector<1x1x16x16xf32>
    %48 = vector.shape_cast %47 : vector<1x1x16x16xf32> to vector<16x16xf32>
    %49 = arith.addf %48, %46 : vector<16x16xf32>
    %c0_39 = arith.constant 0 : index
    %c0_40 = arith.constant 0 : index
    %c0_41 = arith.constant 0 : index
    %c0_42 = arith.constant 0 : index
    %50 = vector.load %arg20[%c0_39, %c0_40, %c0_41, %c0_42] : memref<1x4x16x16xf32, #tpu.memory_space<vmem>>, vector<1x1x16x16xf32>
    %51 = vector.shape_cast %50 : vector<1x1x16x16xf32> to vector<16x16xf32>
    %52 = vector.shape_cast %49 : vector<16x16xf32> to vector<1x1x16x16xf32>
    tpu.vector_store %arg20[%c0_39, %c0_40, %c0_41, %c0_42], %52 {strides = array<i32>} : memref<1x4x16x16xf32, #tpu.memory_space<vmem>>, vector<1x1x16x16xf32>,
    %cst_43 = arith.constant 5.000000e-01 : f32
    %53 = vector.broadcast %cst_43 : f32 to vector<16x16xf32>
    %54 = arith.mulf %49, %53 : vector<16x16xf32>
    %cst_44 = arith.constant dense<0xFF800000> : vector<16xf32>
    %55 = vector.multi_reduction <maximumf>, %54, %cst_44 [1] : vector<16x16xf32> to vector<16xf32>
    %56 = vector.shape_cast %55 : vector<16xf32> to vector<16x1xf32>
    %cst_45 = arith.constant -3.000000e+38 : f32
    %57 = vector.broadcast %cst_45 : f32 to vector<16x1xf32>
    %58 = arith.maximumf %56, %57 : vector<16x1xf32>
    %59 = vector.broadcast %58 : vector<16x1xf32> to vector<16x16xf32>
    %60 = arith.subf %54, %59 : vector<16x16xf32>
    %61 = math.exp %60 : vector<16x16xf32>
    %cst_46 = arith.constant dense<0.000000e+00> : vector<16xf32>
    %62 = vector.multi_reduction <add>, %61, %cst_46 [1] : vector<16x16xf32> to vector<16xf32>
    %63 = vector.shape_cast %62 : vector<16xf32> to vector<16x1xf32>
    %cst_47 = arith.constant 0.000000e+00 : f32
    %64 = vector.broadcast %cst_47 : f32 to vector<16x1xf32>
    %65 = arith.cmpf ogt, %63, %64 : vector<16x1xf32>
    %cst_48 = arith.constant 1.000000e+00 : f32
    %66 = vector.broadcast %cst_48 : f32 to vector<16x1xf32>
    %67 = arith.select %65, %63, %66 : vector<16x1xi1>, vector<16x1xf32>
    %68 = tpu.reciprocal %67 {approx = true} : vector<16x1xf32> -> vector<16x1xf32>
    %69 = vector.broadcast %68 : vector<16x1xf32> to vector<16x16xf32>
    %70 = arith.mulf %61, %69 : vector<16x16xf32>
    %71 = arith.truncf %70 : vector<16x16xf32> to vector<16x16xbf16>
    %cst_49 = arith.constant dense<0.000000e+00> : vector<16x32xf32>
    %72 = tpu.matmul %71, %42, %cst_49 {dimension_numbers = #tpu.dot_dimension_numbers<[1], [0], [0], [1], [0, 0, 1, 1], [], []>} : vector<16x16xbf16>, vector<16x32xbf16>, vector<16x32xf32> -> vector<16x32xf32>
    %73 = vector.extract_strided_slice %37 {offsets = [0, 32], sizes = [16, 32], strides = [1, 1]} : vector<16x128xbf16> to vector<16x32xbf16>
    %74 = vector.extract_strided_slice %38 {offsets = [0, 32], sizes = [16, 32], strides = [1, 1]} : vector<16x128xbf16> to vector<16x32xbf16>
    %75 = vector.extract_strided_slice %39 {offsets = [0, 32], sizes = [16, 32], strides = [1, 1]} : vector<16x128xbf16> to vector<16x32xbf16>
    %cst_50 = arith.constant dense<0.000000e+00> : vector<16x16xf32>
    %76 = tpu.matmul %73, %74, %cst_50 {dimension_numbers = #tpu.dot_dimension_numbers<[1], [1], [0], [0], [0, 0, 1, 0], [], []>} : vector<16x32xbf16>, vector<16x32xbf16>, vector<16x16xf32> -> vector<16x16xf32>
    %cst_51 = arith.constant 0.176776692 : f32
    %77 = vector.broadcast %cst_51 : f32 to vector<16x16xf32>
    %78 = arith.mulf %76, %77 : vector<16x16xf32>
    %79 = arith.addf %78, %36 : vector<16x16xf32>
    %c0_52 = arith.constant 0 : index
    %c1 = arith.constant 1 : index
    %c0_53 = arith.constant 0 : index
    %c0_54 = arith.constant 0 : index
    %80 = vector.load %arg16[%c0_52, %c1, %c0_53, %c0_54] : memref<1x4x16x16xf32, #tpu.memory_space<vmem>>, vector<1x1x16x16xf32>
    %81 = vector.shape_cast %80 : vector<1x1x16x16xf32> to vector<16x16xf32>
    %82 = arith.addf %81, %79 : vector<16x16xf32>
    %c0_55 = arith.constant 0 : index
    %c1_56 = arith.constant 1 : index
    %c0_57 = arith.constant 0 : index
    %c0_58 = arith.constant 0 : index
    %83 = vector.load %arg20[%c0_55, %c1_56, %c0_57, %c0_58] : memref<1x4x16x16xf32, #tpu.memory_space<vmem>>, vector<1x1x16x16xf32>
    %84 = vector.shape_cast %83 : vector<1x1x16x16xf32> to vector<16x16xf32>
    %85 = vector.shape_cast %82 : vector<16x16xf32> to vector<1x1x16x16xf32>
    tpu.vector_store %arg20[%c0_55, %c1_56, %c0_57, %c0_58], %85 {strides = array<i32>} : memref<1x4x16x16xf32, #tpu.memory_space<vmem>>, vector<1x1x16x16xf32>,
    %cst_59 = arith.constant 5.000000e-01 : f32
    %86 = vector.broadcast %cst_59 : f32 to vector<16x16xf32>
    %87 = arith.mulf %82, %86 : vector<16x16xf32>
    %cst_60 = arith.constant dense<0xFF800000> : vector<16xf32>
    %88 = vector.multi_reduction <maximumf>, %87, %cst_60 [1] : vector<16x16xf32> to vector<16xf32>
    %89 = vector.shape_cast %88 : vector<16xf32> to vector<16x1xf32>
    %cst_61 = arith.constant -3.000000e+38 : f32
    %90 = vector.broadcast %cst_61 : f32 to vector<16x1xf32>
    %91 = arith.maximumf %89, %90 : vector<16x1xf32>
    %92 = vector.broadcast %91 : vector<16x1xf32> to vector<16x16xf32>
    %93 = arith.subf %87, %92 : vector<16x16xf32>
    %94 = math.exp %93 : vector<16x16xf32>
    %cst_62 = arith.constant dense<0.000000e+00> : vector<16xf32>
    %95 = vector.multi_reduction <add>, %94, %cst_62 [1] : vector<16x16xf32> to vector<16xf32>
    %96 = vector.shape_cast %95 : vector<16xf32> to vector<16x1xf32>
    %cst_63 = arith.constant 0.000000e+00 : f32
    %97 = vector.broadcast %cst_63 : f32 to vector<16x1xf32>
    %98 = arith.cmpf ogt, %96, %97 : vector<16x1xf32>
    %cst_64 = arith.constant 1.000000e+00 : f32
    %99 = vector.broadcast %cst_64 : f32 to vector<16x1xf32>
    %100 = arith.select %98, %96, %99 : vector<16x1xi1>, vector<16x1xf32>
    %101 = tpu.reciprocal %100 {approx = true} : vector<16x1xf32> -> vector<16x1xf32>
    %102 = vector.broadcast %101 : vector<16x1xf32> to vector<16x16xf32>
    %103 = arith.mulf %94, %102 : vector<16x16xf32>
    %104 = arith.truncf %103 : vector<16x16xf32> to vector<16x16xbf16>
    %cst_65 = arith.constant dense<0.000000e+00> : vector<16x32xf32>
    %105 = tpu.matmul %104, %75, %cst_65 {dimension_numbers = #tpu.dot_dimension_numbers<[1], [0], [0], [1], [0, 0, 1, 1], [], []>} : vector<16x16xbf16>, vector<16x32xbf16>, vector<16x32xf32> -> vector<16x32xf32>
    %106 = vector.extract_strided_slice %37 {offsets = [0, 64], sizes = [16, 32], strides = [1, 1]} : vector<16x128xbf16> to vector<16x32xbf16>
    %107 = vector.extract_strided_slice %38 {offsets = [0, 64], sizes = [16, 32], strides = [1, 1]} : vector<16x128xbf16> to vector<16x32xbf16>
    %108 = vector.extract_strided_slice %39 {offsets = [0, 64], sizes = [16, 32], strides = [1, 1]} : vector<16x128xbf16> to vector<16x32xbf16>
    %cst_66 = arith.constant dense<0.000000e+00> : vector<16x16xf32>
    %109 = tpu.matmul %106, %107, %cst_66 {dimension_numbers = #tpu.dot_dimension_numbers<[1], [1], [0], [0], [0, 0, 1, 0], [], []>} : vector<16x32xbf16>, vector<16x32xbf16>, vector<16x16xf32> -> vector<16x16xf32>
    %cst_67 = arith.constant 0.176776692 : f32
    %110 = vector.broadcast %cst_67 : f32 to vector<16x16xf32>
    %111 = arith.mulf %109, %110 : vector<16x16xf32>
    %112 = arith.addf %111, %36 : vector<16x16xf32>
    %c0_68 = arith.constant 0 : index
    %c2 = arith.constant 2 : index
    %c0_69 = arith.constant 0 : index
    %c0_70 = arith.constant 0 : index
    %113 = vector.load %arg16[%c0_68, %c2, %c0_69, %c0_70] : memref<1x4x16x16xf32, #tpu.memory_space<vmem>>, vector<1x1x16x16xf32>
    %114 = vector.shape_cast %113 : vector<1x1x16x16xf32> to vector<16x16xf32>
    %115 = arith.addf %114, %112 : vector<16x16xf32>
    %c0_71 = arith.constant 0 : index
    %c2_72 = arith.constant 2 : index
    %c0_73 = arith.constant 0 : index
    %c0_74 = arith.constant 0 : index
    %116 = vector.load %arg20[%c0_71, %c2_72, %c0_73, %c0_74] : memref<1x4x16x16xf32, #tpu.memory_space<vmem>>, vector<1x1x16x16xf32>
    %117 = vector.shape_cast %116 : vector<1x1x16x16xf32> to vector<16x16xf32>
    %118 = vector.shape_cast %115 : vector<16x16xf32> to vector<1x1x16x16xf32>
    tpu.vector_store %arg20[%c0_71, %c2_72, %c0_73, %c0_74], %118 {strides = array<i32>} : memref<1x4x16x16xf32, #tpu.memory_space<vmem>>, vector<1x1x16x16xf32>,
    %cst_75 = arith.constant 5.000000e-01 : f32
    %119 = vector.broadcast %cst_75 : f32 to vector<16x16xf32>
    %120 = arith.mulf %115, %119 : vector<16x16xf32>
    %cst_76 = arith.constant dense<0xFF800000> : vector<16xf32>
    %121 = vector.multi_reduction <maximumf>, %120, %cst_76 [1] : vector<16x16xf32> to vector<16xf32>
    %122 = vector.shape_cast %121 : vector<16xf32> to vector<16x1xf32>
    %cst_77 = arith.constant -3.000000e+38 : f32
    %123 = vector.broadcast %cst_77 : f32 to vector<16x1xf32>
    %124 = arith.maximumf %122, %123 : vector<16x1xf32>
    %125 = vector.broadcast %124 : vector<16x1xf32> to vector<16x16xf32>
    %126 = arith.subf %120, %125 : vector<16x16xf32>
    %127 = math.exp %126 : vector<16x16xf32>
    %cst_78 = arith.constant dense<0.000000e+00> : vector<16xf32>
    %128 = vector.multi_reduction <add>, %127, %cst_78 [1] : vector<16x16xf32> to vector<16xf32>
    %129 = vector.shape_cast %128 : vector<16xf32> to vector<16x1xf32>
    %cst_79 = arith.constant 0.000000e+00 : f32
    %130 = vector.broadcast %cst_79 : f32 to vector<16x1xf32>
    %131 = arith.cmpf ogt, %129, %130 : vector<16x1xf32>
    %cst_80 = arith.constant 1.000000e+00 : f32
    %132 = vector.broadcast %cst_80 : f32 to vector<16x1xf32>
    %133 = arith.select %131, %129, %132 : vector<16x1xi1>, vector<16x1xf32>
    %134 = tpu.reciprocal %133 {approx = true} : vector<16x1xf32> -> vector<16x1xf32>
    %135 = vector.broadcast %134 : vector<16x1xf32> to vector<16x16xf32>
    %136 = arith.mulf %127, %135 : vector<16x16xf32>
    %137 = arith.truncf %136 : vector<16x16xf32> to vector<16x16xbf16>
    %cst_81 = arith.constant dense<0.000000e+00> : vector<16x32xf32>
    %138 = tpu.matmul %137, %108, %cst_81 {dimension_numbers = #tpu.dot_dimension_numbers<[1], [0], [0], [1], [0, 0, 1, 1], [], []>} : vector<16x16xbf16>, vector<16x32xbf16>, vector<16x32xf32> -> vector<16x32xf32>
    %139 = vector.extract_strided_slice %37 {offsets = [0, 96], sizes = [16, 32], strides = [1, 1]} : vector<16x128xbf16> to vector<16x32xbf16>
    %140 = vector.extract_strided_slice %38 {offsets = [0, 96], sizes = [16, 32], strides = [1, 1]} : vector<16x128xbf16> to vector<16x32xbf16>
    %141 = vector.extract_strided_slice %39 {offsets = [0, 96], sizes = [16, 32], strides = [1, 1]} : vector<16x128xbf16> to vector<16x32xbf16>
    %cst_82 = arith.constant dense<0.000000e+00> : vector<16x16xf32>
    %142 = tpu.matmul %139, %140, %cst_82 {dimension_numbers = #tpu.dot_dimension_numbers<[1], [1], [0], [0], [0, 0, 1, 0], [], []>} : vector<16x32xbf16>, vector<16x32xbf16>, vector<16x16xf32> -> vector<16x16xf32>
    %cst_83 = arith.constant 0.176776692 : f32
    %143 = vector.broadcast %cst_83 : f32 to vector<16x16xf32>
    %144 = arith.mulf %142, %143 : vector<16x16xf32>
    %145 = arith.addf %144, %36 : vector<16x16xf32>
    %c0_84 = arith.constant 0 : index
    %c3 = arith.constant 3 : index
    %c0_85 = arith.constant 0 : index
    %c0_86 = arith.constant 0 : index
    %146 = vector.load %arg16[%c0_84, %c3, %c0_85, %c0_86] : memref<1x4x16x16xf32, #tpu.memory_space<vmem>>, vector<1x1x16x16xf32>
    %147 = vector.shape_cast %146 : vector<1x1x16x16xf32> to vector<16x16xf32>
    %148 = arith.addf %147, %145 : vector<16x16xf32>
    %c0_87 = arith.constant 0 : index
    %c3_88 = arith.constant 3 : index
    %c0_89 = arith.constant 0 : index
    %c0_90 = arith.constant 0 : index
    %149 = vector.load %arg20[%c0_87, %c3_88, %c0_89, %c0_90] : memref<1x4x16x16xf32, #tpu.memory_space<vmem>>, vector<1x1x16x16xf32>
    %150 = vector.shape_cast %149 : vector<1x1x16x16xf32> to vector<16x16xf32>
    %151 = vector.shape_cast %148 : vector<16x16xf32> to vector<1x1x16x16xf32>
    tpu.vector_store %arg20[%c0_87, %c3_88, %c0_89, %c0_90], %151 {strides = array<i32>} : memref<1x4x16x16xf32, #tpu.memory_space<vmem>>, vector<1x1x16x16xf32>,
    %cst_91 = arith.constant 5.000000e-01 : f32
    %152 = vector.broadcast %cst_91 : f32 to vector<16x16xf32>
    %153 = arith.mulf %148, %152 : vector<16x16xf32>
    %cst_92 = arith.constant dense<0xFF800000> : vector<16xf32>
    %154 = vector.multi_reduction <maximumf>, %153, %cst_92 [1] : vector<16x16xf32> to vector<16xf32>
    %155 = vector.shape_cast %154 : vector<16xf32> to vector<16x1xf32>
    %cst_93 = arith.constant -3.000000e+38 : f32
    %156 = vector.broadcast %cst_93 : f32 to vector<16x1xf32>
    %157 = arith.maximumf %155, %156 : vector<16x1xf32>
    %158 = vector.broadcast %157 : vector<16x1xf32> to vector<16x16xf32>
    %159 = arith.subf %153, %158 : vector<16x16xf32>
    %160 = math.exp %159 : vector<16x16xf32>
    %cst_94 = arith.constant dense<0.000000e+00> : vector<16xf32>
    %161 = vector.multi_reduction <add>, %160, %cst_94 [1] : vector<16x16xf32> to vector<16xf32>
    %162 = vector.shape_cast %161 : vector<16xf32> to vector<16x1xf32>
    %cst_95 = arith.constant 0.000000e+00 : f32
    %163 = vector.broadcast %cst_95 : f32 to vector<16x1xf32>
    %164 = arith.cmpf ogt, %162, %163 : vector<16x1xf32>
    %cst_96 = arith.constant 1.000000e+00 : f32
    %165 = vector.broadcast %cst_96 : f32 to vector<16x1xf32>
    %166 = arith.select %164, %162, %165 : vector<16x1xi1>, vector<16x1xf32>
    %167 = tpu.reciprocal %166 {approx = true} : vector<16x1xf32> -> vector<16x1xf32>
    %168 = vector.broadcast %167 : vector<16x1xf32> to vector<16x16xf32>
    %169 = arith.mulf %160, %168 : vector<16x16xf32>
    %170 = arith.truncf %169 : vector<16x16xf32> to vector<16x16xbf16>
    %cst_97 = arith.constant dense<0.000000e+00> : vector<16x32xf32>
    %171 = tpu.matmul %170, %141, %cst_97 {dimension_numbers = #tpu.dot_dimension_numbers<[1], [0], [0], [1], [0, 0, 1, 1], [], []>} : vector<16x16xbf16>, vector<16x32xbf16>, vector<16x32xf32> -> vector<16x32xf32>
    %172 = tpu.concatenate %72, %105, %138, %171 in 1 : vector<16x32xf32>, vector<16x32xf32>, vector<16x32xf32>, vector<16x32xf32> -> vector<16x128xf32>
    %173 = arith.truncf %172 : vector<16x128xf32> to vector<16x128xbf16>
    %c0_98 = arith.constant 0 : index
    %c0_99 = arith.constant 0 : index
    %174 = vector.load %arg7[%c0_98, %c0_99] : memref<128x128xbf16, #tpu.memory_space<vmem>>, vector<128x128xbf16>
    %cst_100 = arith.constant dense<0.000000e+00> : vector<16x128xf32>
    %175 = tpu.matmul %173, %174, %cst_100 {dimension_numbers = #tpu.dot_dimension_numbers<[1], [0], [0], [1], [0, 0, 1, 1], [], []>} : vector<16x128xbf16>, vector<128x128xbf16>, vector<16x128xf32> -> vector<16x128xf32>
    %cst_101 = arith.constant 1.26863623 : f32
    %176 = vector.broadcast %cst_101 : f32 to vector<16x128xf32>
    %177 = arith.mulf %175, %176 : vector<16x128xf32>
    %178 = arith.extf %1 : vector<16x128xbf16> to vector<16x128xf32>
    %179 = arith.addf %177, %178 : vector<16x128xf32>
    %cst_102 = arith.constant dense<0.000000e+00> : vector<16xf32>
    %180 = vector.multi_reduction <add>, %179, %cst_102 [1] : vector<16x128xf32> to vector<16xf32>
    %181 = vector.shape_cast %180 : vector<16xf32> to vector<16x1xf32>
    %cst_103 = arith.constant 1.280000e+02 : f32
    %182 = vector.broadcast %cst_103 : f32 to vector<16x1xf32>
    %183 = arith.divf %181, %182 : vector<16x1xf32>
    %184 = vector.broadcast %183 : vector<16x1xf32> to vector<16x128xf32>
    %185 = arith.subf %179, %184 : vector<16x128xf32>
    %186 = arith.mulf %185, %185 : vector<16x128xf32>
    %cst_104 = arith.constant dense<0.000000e+00> : vector<16xf32>
    %187 = vector.multi_reduction <add>, %186, %cst_104 [1] : vector<16x128xf32> to vector<16xf32>
    %188 = vector.shape_cast %187 : vector<16xf32> to vector<16x1xf32>
    %cst_105 = arith.constant 1.280000e+02 : f32
    %189 = vector.broadcast %cst_105 : f32 to vector<16x1xf32>
    %190 = arith.divf %188, %189 : vector<16x1xf32>
    %191 = vector.broadcast %183 : vector<16x1xf32> to vector<16x128xf32>
    %192 = arith.subf %179, %191 : vector<16x128xf32>
    %cst_106 = arith.constant 9.99999974E-6 : f32
    %193 = vector.broadcast %cst_106 : f32 to vector<16x1xf32>
    %194 = arith.addf %190, %193 : vector<16x1xf32>
    %195 = math.rsqrt %194 : vector<16x1xf32>
    %196 = vector.broadcast %195 : vector<16x1xf32> to vector<16x128xf32>
    %197 = arith.mulf %192, %196 : vector<16x128xf32>
    %c0_107 = arith.constant 0 : index
    %c0_108 = arith.constant 0 : index
    %198 = vector.load %arg17[%c0_107, %c0_108] : memref<1x128xf32, #tpu.memory_space<vmem>>, vector<1x128xf32>
    %199 = vector.broadcast %198 : vector<1x128xf32> to vector<16x128xf32>
    %200 = arith.mulf %197, %199 : vector<16x128xf32>
    %c0_109 = arith.constant 0 : index
    %c0_110 = arith.constant 0 : index
    %201 = vector.load %arg18[%c0_109, %c0_110] : memref<1x128xf32, #tpu.memory_space<vmem>>, vector<1x128xf32>
    %202 = vector.broadcast %201 : vector<1x128xf32> to vector<16x128xf32>
    %203 = arith.addf %200, %202 : vector<16x128xf32>
    %204 = arith.truncf %203 : vector<16x128xf32> to vector<16x128xbf16>
    %c0_111 = arith.constant 0 : index
    %c0_112 = arith.constant 0 : index
    %c0_113 = arith.constant 0 : index
    %205 = vector.load %arg19[%c0_111, %c0_112, %c0_113] : memref<1x16x128xbf16, #tpu.memory_space<vmem>>, vector<1x16x128xbf16>
    %206 = vector.shape_cast %205 : vector<1x16x128xbf16> to vector<16x128xbf16>
    %207 = vector.shape_cast %204 : vector<16x128xbf16> to vector<1x16x128xbf16>
    tpu.vector_store %arg19[%c0_111, %c0_112, %c0_113], %207 {strides = array<i32>} : memref<1x16x128xbf16, #tpu.memory_space<vmem>>, vector<1x16x128xbf16>,
    return
  }
  func.func @transform_0(%arg0: i32, %arg1: i32) -> (i32, i32, i32) {
    %c0_i32 = arith.constant 0 : i32
    %c0_i32_0 = arith.constant 0 : i32
    return %arg0, %arg1, %c0_i32 : i32, i32, i32
  }
  func.func @transform_1(%arg0: i32, %arg1: i32) -> (i32, i32, i32) {
    %c0_i32 = arith.constant 0 : i32
    %c0_i32_0 = arith.constant 0 : i32
    %c0_i32_1 = arith.constant 0 : i32
    return %arg0, %c0_i32, %c0_i32_0 : i32, i32, i32
  }
  func.func @transform_2(%arg0: i32, %arg1: i32) -> (i32, i32) {
    %c0_i32 = arith.constant 0 : i32
    %c0_i32_0 = arith.constant 0 : i32
    %c0_i32_1 = arith.constant 0 : i32
    return %c0_i32, %c0_i32_0 : i32, i32
  }
  func.func @transform_3(%arg0: i32, %arg1: i32) -> (i32, i32) {
    %c0_i32 = arith.constant 0 : i32
    %c0_i32_0 = arith.constant 0 : i32
    %c0_i32_1 = arith.constant 0 : i32
    return %c0_i32, %c0_i32_0 : i32, i32
  }
  func.func @transform_4(%arg0: i32, %arg1: i32) -> (i32, i32) {
    %c0_i32 = arith.constant 0 : i32
    %c0_i32_0 = arith.constant 0 : i32
    %c0_i32_1 = arith.constant 0 : i32
    return %c0_i32, %c0_i32_0 : i32, i32
  }
  func.func @transform_5(%arg0: i32, %arg1: i32) -> (i32, i32) {
    %c0_i32 = arith.constant 0 : i32
    %c0_i32_0 = arith.constant 0 : i32
    %c0_i32_1 = arith.constant 0 : i32
    return %c0_i32, %c0_i32_0 : i32, i32
  }
  func.func @transform_6(%arg0: i32, %arg1: i32) -> (i32, i32) {
    %c0_i32 = arith.constant 0 : i32
    %c0_i32_0 = arith.constant 0 : i32
    return %arg1, %c0_i32 : i32, i32
  }
  func.func @transform_7(%arg0: i32, %arg1: i32) -> (i32, i32) {
    %c0_i32 = arith.constant 0 : i32
    %c0_i32_0 = arith.constant 0 : i32
    return %arg1, %c0_i32 : i32, i32
  }
  func.func @transform_8(%arg0: i32, %arg1: i32) -> (i32, i32) {
    %c0_i32 = arith.constant 0 : i32
    %c0_i32_0 = arith.constant 0 : i32
    return %arg1, %c0_i32 : i32, i32
  }
  func.func @transform_9(%arg0: i32, %arg1: i32) -> (i32, i32) {
    %c0_i32 = arith.constant 0 : i32
    %c0_i32_0 = arith.constant 0 : i32
    %c0_i32_1 = arith.constant 0 : i32
    return %c0_i32, %c0_i32_0 : i32, i32
  }
  func.func @transform_10(%arg0: i32, %arg1: i32) -> (i32, i32) {
    %c0_i32 = arith.constant 0 : i32
    %c0_i32_0 = arith.constant 0 : i32
    %c0_i32_1 = arith.constant 0 : i32
    return %c0_i32, %c0_i32_0 : i32, i32
  }
  func.func @transform_11(%arg0: i32, %arg1: i32) -> (i32, i32) {
    %c0_i32 = arith.constant 0 : i32
    %c0_i32_0 = arith.constant 0 : i32
    %c0_i32_1 = arith.constant 0 : i32
    return %c0_i32, %c0_i32_0 : i32, i32
  }
  func.func @transform_12(%arg0: i32, %arg1: i32) -> (i32, i32, i32) {
    %c0_i32 = arith.constant 0 : i32
    %c0_i32_0 = arith.constant 0 : i32
    return %arg0, %arg1, %c0_i32 : i32, i32, i32
  }
  func.func @transform_13(%arg0: i32, %arg1: i32) -> (i32, i32, i32) {
    %c0_i32 = arith.constant 0 : i32
    %c0_i32_0 = arith.constant 0 : i32
    %c0_i32_1 = arith.constant 0 : i32
    return %arg0, %c0_i32, %c0_i32_0 : i32, i32, i32
  }
  func.func @transform_14(%arg0: i32, %arg1: i32) -> (i32, i32, i32, i32) {
    %c0_i32 = arith.constant 0 : i32
    %c0_i32_0 = arith.constant 0 : i32
    %c0_i32_1 = arith.constant 0 : i32
    return %arg0, %c0_i32, %arg1, %c0_i32_0 : i32, i32, i32, i32
  }
  func.func @transform_15(%arg0: i32, %arg1: i32) -> (i32, i32) {
    %c0_i32 = arith.constant 0 : i32
    %c0_i32_0 = arith.constant 0 : i32
    %c0_i32_1 = arith.constant 0 : i32
    return %c0_i32, %c0_i32_0 : i32, i32
  }
  func.func @transform_16(%arg0: i32, %arg1: i32) -> (i32, i32) {
    %c0_i32 = arith.constant 0 : i32
    %c0_i32_0 = arith.constant 0 : i32
    %c0_i32_1 = arith.constant 0 : i32
    return %c0_i32, %c0_i32_0 : i32, i32
  }
  func.func @transform_17(%arg0: i32, %arg1: i32) -> (i32, i32, i32) {
    %c0_i32 = arith.constant 0 : i32
    %c0_i32_0 = arith.constant 0 : i32
    return %arg0, %arg1, %c0_i32 : i32, i32, i32
  }
  func.func @transform_18(%arg0: i32, %arg1: i32) -> (i32, i32, i32, i32) {
    %c0_i32 = arith.constant 0 : i32
    %c0_i32_0 = arith.constant 0 : i32
    %c0_i32_1 = arith.constant 0 : i32
    return %arg0, %c0_i32, %arg1, %c0_i32_0 : i32, i32, i32, i32
  }
}

module attributes {stable_mosaic.version = 11 : i64} {
  func.func @_attn_kernel(%arg0: i32, %arg1: i32, %arg2: memref<1x8x128xbf16, #tpu.memory_space<vmem>>, %arg3: memref<1x8x128xbf16, #tpu.memory_space<vmem>>, %arg4: memref<128x128xbf16, #tpu.memory_space<vmem>>, %arg5: memref<128x128xbf16, #tpu.memory_space<vmem>>, %arg6: memref<128x128xbf16, #tpu.memory_space<vmem>>, %arg7: memref<128x128xbf16, #tpu.memory_space<vmem>>, %arg8: memref<8x128xf32, #tpu.memory_space<vmem>>, %arg9: memref<8x128xf32, #tpu.memory_space<vmem>>, %arg10: memref<8x128xf32, #tpu.memory_space<vmem>>, %arg11: memref<8x128xf32, #tpu.memory_space<vmem>>, %arg12: memref<8x128xf32, #tpu.memory_space<vmem>>, %arg13: memref<8x128xf32, #tpu.memory_space<vmem>>, %arg14: memref<1x8x1xf32, #tpu.memory_space<vmem>>, %arg15: memref<1x1x8xf32, #tpu.memory_space<vmem>>, %arg16: memref<1x4x8x8xf32, #tpu.memory_space<vmem>>, %arg17: memref<1x128xf32, #tpu.memory_space<vmem>>, %arg18: memref<1x128xf32, #tpu.memory_space<vmem>>, %arg19: memref<1x8x128xbf16, #tpu.memory_space<vmem>>, %arg20: memref<1x4x8x8xf32, #tpu.memory_space<vmem>>) attributes {dimension_semantics = [#tpu.dimension_semantics<parallel>, #tpu.dimension_semantics<parallel>], iteration_bounds = array<i64: 2, 1>, scalar_prefetch = 0 : i64, scratch_operands = 0 : i64, tpu.core_type = #tpu.core_type<tc>, window_params = [{transform_indices = @transform_0, window_bounds = array<i64: 1, 8, 128>}, {transform_indices = @transform_1, window_bounds = array<i64: 1, 8, 128>}, {pipeline_mode = #tpu.pipeline_mode<synchronous>, transform_indices = @transform_2, window_bounds = array<i64: 128, 128>}, {pipeline_mode = #tpu.pipeline_mode<synchronous>, transform_indices = @transform_3, window_bounds = array<i64: 128, 128>}, {pipeline_mode = #tpu.pipeline_mode<synchronous>, transform_indices = @transform_4, window_bounds = array<i64: 128, 128>}, {pipeline_mode = #tpu.pipeline_mode<synchronous>, transform_indices = @transform_5, window_bounds = array<i64: 128, 128>}, {transform_indices = @transform_6, window_bounds = array<i64: 8, 128>}, {transform_indices = @transform_7, window_bounds = array<i64: 8, 128>}, {transform_indices = @transform_8, window_bounds = array<i64: 8, 128>}, {pipeline_mode = #tpu.pipeline_mode<synchronous>, transform_indices = @transform_9, window_bounds = array<i64: 8, 128>}, {pipeline_mode = #tpu.pipeline_mode<synchronous>, transform_indices = @transform_10, window_bounds = array<i64: 8, 128>}, {pipeline_mode = #tpu.pipeline_mode<synchronous>, transform_indices = @transform_11, window_bounds = array<i64: 8, 128>}, {transform_indices = @transform_12, window_bounds = array<i64: 1, 8, 1>}, {transform_indices = @transform_13, window_bounds = array<i64: 1, 1, 8>}, {transform_indices = @transform_14, window_bounds = array<i64: 1, 4, 8, 8>}, {pipeline_mode = #tpu.pipeline_mode<synchronous>, transform_indices = @transform_15, window_bounds = array<i64: 1, 128>}, {pipeline_mode = #tpu.pipeline_mode<synchronous>, transform_indices = @transform_16, window_bounds = array<i64: 1, 128>}, {transform_indices = @transform_17, window_bounds = array<i64: 1, 8, 128>}, {transform_indices = @transform_18, window_bounds = array<i64: 1, 4, 8, 8>}]} {
    %c0 = arith.constant 0 : index
    %c0_0 = arith.constant 0 : index
    %c0_1 = arith.constant 0 : index
    %0 = vector.load %arg2[%c0, %c0_0, %c0_1] : memref<1x8x128xbf16, #tpu.memory_space<vmem>>, vector<1x8x128xbf16>
    %1 = vector.shape_cast %0 : vector<1x8x128xbf16> to vector<8x128xbf16>
    %c0_2 = arith.constant 0 : index
    %c0_3 = arith.constant 0 : index
    %c0_4 = arith.constant 0 : index
    %2 = vector.load %arg3[%c0_2, %c0_3, %c0_4] : memref<1x8x128xbf16, #tpu.memory_space<vmem>>, vector<1x8x128xbf16>
    %3 = vector.shape_cast %2 : vector<1x8x128xbf16> to vector<8x128xbf16>
    %c0_5 = arith.constant 0 : index
    %c0_6 = arith.constant 0 : index
    %4 = vector.load %arg4[%c0_5, %c0_6] : memref<128x128xbf16, #tpu.memory_space<vmem>>, vector<128x128xbf16>
    %cst = arith.constant dense<0.000000e+00> : vector<8x128xf32>
    %5 = tpu.matmul %1, %4, %cst {dimension_numbers = #tpu.dot_dimension_numbers<[1], [0], [0], [1], [0, 0, 1, 1], [], []>} : vector<8x128xbf16>, vector<128x128xbf16>, vector<8x128xf32> -> vector<8x128xf32>
    %c0_7 = arith.constant 0 : index
    %c0_8 = arith.constant 0 : index
    %6 = vector.load %arg8[%c0_7, %c0_8] : memref<8x128xf32, #tpu.memory_space<vmem>>, vector<8x128xf32>
    %c0_9 = arith.constant 0 : index
    %c0_10 = arith.constant 0 : index
    %7 = vector.load %arg9[%c0_9, %c0_10] : memref<8x128xf32, #tpu.memory_space<vmem>>, vector<8x128xf32>
    %c0_11 = arith.constant 0 : index
    %c0_12 = arith.constant 0 : index
    %8 = vector.load %arg10[%c0_11, %c0_12] : memref<8x128xf32, #tpu.memory_space<vmem>>, vector<8x128xf32>
    %c127_i32 = arith.constant 127 : i32
    %9 = tpu.dynamic_rotate %5 by %c127_i32 dim 1 : vector<8x128xf32>, i32 -> vector<8x128xf32>
    %c1_i32 = arith.constant 1 : i32
    %10 = tpu.dynamic_rotate %5 by %c1_i32 dim 1 : vector<8x128xf32>, i32 -> vector<8x128xf32>
    %11 = arith.mulf %5, %6 : vector<8x128xf32>
    %12 = arith.mulf %9, %7 : vector<8x128xf32>
    %13 = arith.addf %11, %12 : vector<8x128xf32>
    %14 = arith.mulf %10, %8 : vector<8x128xf32>
    %15 = arith.addf %13, %14 : vector<8x128xf32>
    %c0_13 = arith.constant 0 : index
    %c0_14 = arith.constant 0 : index
    %16 = vector.load %arg5[%c0_13, %c0_14] : memref<128x128xbf16, #tpu.memory_space<vmem>>, vector<128x128xbf16>
    %cst_15 = arith.constant dense<0.000000e+00> : vector<8x128xf32>
    %17 = tpu.matmul %3, %16, %cst_15 {dimension_numbers = #tpu.dot_dimension_numbers<[1], [0], [0], [1], [0, 0, 1, 1], [], []>} : vector<8x128xbf16>, vector<128x128xbf16>, vector<8x128xf32> -> vector<8x128xf32>
    %c0_16 = arith.constant 0 : index
    %c0_17 = arith.constant 0 : index
    %18 = vector.load %arg11[%c0_16, %c0_17] : memref<8x128xf32, #tpu.memory_space<vmem>>, vector<8x128xf32>
    %c0_18 = arith.constant 0 : index
    %c0_19 = arith.constant 0 : index
    %19 = vector.load %arg12[%c0_18, %c0_19] : memref<8x128xf32, #tpu.memory_space<vmem>>, vector<8x128xf32>
    %c0_20 = arith.constant 0 : index
    %c0_21 = arith.constant 0 : index
    %20 = vector.load %arg13[%c0_20, %c0_21] : memref<8x128xf32, #tpu.memory_space<vmem>>, vector<8x128xf32>
    %c127_i32_22 = arith.constant 127 : i32
    %21 = tpu.dynamic_rotate %17 by %c127_i32_22 dim 1 : vector<8x128xf32>, i32 -> vector<8x128xf32>
    %c1_i32_23 = arith.constant 1 : i32
    %22 = tpu.dynamic_rotate %17 by %c1_i32_23 dim 1 : vector<8x128xf32>, i32 -> vector<8x128xf32>
    %23 = arith.mulf %17, %18 : vector<8x128xf32>
    %24 = arith.mulf %21, %19 : vector<8x128xf32>
    %25 = arith.addf %23, %24 : vector<8x128xf32>
    %26 = arith.mulf %22, %20 : vector<8x128xf32>
    %27 = arith.addf %25, %26 : vector<8x128xf32>
    %c0_24 = arith.constant 0 : index
    %c0_25 = arith.constant 0 : index
    %28 = vector.load %arg6[%c0_24, %c0_25] : memref<128x128xbf16, #tpu.memory_space<vmem>>, vector<128x128xbf16>
    %cst_26 = arith.constant dense<0.000000e+00> : vector<8x128xf32>
    %29 = tpu.matmul %3, %28, %cst_26 {dimension_numbers = #tpu.dot_dimension_numbers<[1], [0], [0], [1], [0, 0, 1, 1], [], []>} : vector<8x128xbf16>, vector<128x128xbf16>, vector<8x128xf32> -> vector<8x128xf32>
    %c0_27 = arith.constant 0 : index
    %c0_28 = arith.constant 0 : index
    %c0_29 = arith.constant 0 : index
    %30 = vector.load %arg14[%c0_27, %c0_28, %c0_29] : memref<1x8x1xf32, #tpu.memory_space<vmem>>, vector<1x8x1xf32>
    %31 = vector.shape_cast %30 : vector<1x8x1xf32> to vector<8x1xf32>
    %c0_30 = arith.constant 0 : index
    %c0_31 = arith.constant 0 : index
    %c0_32 = arith.constant 0 : index
    %32 = vector.load %arg15[%c0_30, %c0_31, %c0_32] : memref<1x1x8xf32, #tpu.memory_space<vmem>>, vector<1x1x8xf32>
    %33 = vector.shape_cast %32 : vector<1x1x8xf32> to vector<1x8xf32>
    %34 = vector.broadcast %31 : vector<8x1xf32> to vector<8x8xf32>
    %35 = vector.broadcast %33 : vector<1x8xf32> to vector<8x8xf32>
    %36 = arith.addf %34, %35 : vector<8x8xf32>
    %37 = tpu.iota {dimensions = array<i32: 0>} : vector<8x8xi32>
    %c8_i32 = arith.constant 8 : i32
    %38 = arith.muli %arg1, %c8_i32 : i32
    %39 = vector.broadcast %38 : i32 to vector<8x8xi32>
    %40 = arith.addi %37, %39 : vector<8x8xi32>
    %41 = tpu.iota {dimensions = array<i32: 1>} : vector<8x8xi32>
    %42 = arith.cmpi sgt, %41, %40 : vector<8x8xi32>
    %cst_33 = arith.constant 0xFF800000 : f32
    %43 = vector.broadcast %cst_33 : f32 to vector<8x8xf32>
    %44 = arith.select %42, %43, %36 : vector<8x8xi1>, vector<8x8xf32>
    %45 = arith.truncf %15 : vector<8x128xf32> to vector<8x128xbf16>
    %46 = arith.truncf %27 : vector<8x128xf32> to vector<8x128xbf16>
    %47 = arith.truncf %29 : vector<8x128xf32> to vector<8x128xbf16>
    %48 = vector.extract_strided_slice %45 {offsets = [0, 0], sizes = [8, 32], strides = [1, 1]} : vector<8x128xbf16> to vector<8x32xbf16>
    %49 = vector.extract_strided_slice %46 {offsets = [0, 0], sizes = [8, 32], strides = [1, 1]} : vector<8x128xbf16> to vector<8x32xbf16>
    %50 = vector.extract_strided_slice %47 {offsets = [0, 0], sizes = [8, 32], strides = [1, 1]} : vector<8x128xbf16> to vector<8x32xbf16>
    %cst_34 = arith.constant dense<0.000000e+00> : vector<8x8xf32>
    %51 = tpu.matmul %48, %49, %cst_34 {dimension_numbers = #tpu.dot_dimension_numbers<[1], [1], [0], [0], [0, 0, 1, 0], [], []>} : vector<8x32xbf16>, vector<8x32xbf16>, vector<8x8xf32> -> vector<8x8xf32>
    %cst_35 = arith.constant 0.176776692 : f32
    %52 = vector.broadcast %cst_35 : f32 to vector<8x8xf32>
    %53 = arith.mulf %51, %52 : vector<8x8xf32>
    %54 = arith.addf %53, %44 : vector<8x8xf32>
    %c0_36 = arith.constant 0 : index
    %c0_37 = arith.constant 0 : index
    %c0_38 = arith.constant 0 : index
    %c0_39 = arith.constant 0 : index
    %55 = vector.load %arg16[%c0_36, %c0_37, %c0_38, %c0_39] : memref<1x4x8x8xf32, #tpu.memory_space<vmem>>, vector<1x1x8x8xf32>
    %56 = vector.shape_cast %55 : vector<1x1x8x8xf32> to vector<8x8xf32>
    %57 = arith.addf %56, %54 : vector<8x8xf32>
    %c0_40 = arith.constant 0 : index
    %c0_41 = arith.constant 0 : index
    %c0_42 = arith.constant 0 : index
    %c0_43 = arith.constant 0 : index
    %58 = vector.load %arg20[%c0_40, %c0_41, %c0_42, %c0_43] : memref<1x4x8x8xf32, #tpu.memory_space<vmem>>, vector<1x1x8x8xf32>
    %59 = vector.shape_cast %58 : vector<1x1x8x8xf32> to vector<8x8xf32>
    %60 = vector.shape_cast %57 : vector<8x8xf32> to vector<1x1x8x8xf32>
    tpu.vector_store %arg20[%c0_40, %c0_41, %c0_42, %c0_43], %60 {strides = array<i32>} : memref<1x4x8x8xf32, #tpu.memory_space<vmem>>, vector<1x1x8x8xf32>,
    %cst_44 = arith.constant 1.000000e+00 : f32
    %61 = vector.broadcast %cst_44 : f32 to vector<8x8xf32>
    %62 = arith.mulf %57, %61 : vector<8x8xf32>
    %cst_45 = arith.constant dense<0xFF800000> : vector<8xf32>
    %63 = vector.multi_reduction <maximumf>, %62, %cst_45 [1] : vector<8x8xf32> to vector<8xf32>
    %64 = vector.shape_cast %63 : vector<8xf32> to vector<8x1xf32>
    %cst_46 = arith.constant -3.000000e+38 : f32
    %65 = vector.broadcast %cst_46 : f32 to vector<8x1xf32>
    %66 = arith.maximumf %64, %65 : vector<8x1xf32>
    %67 = vector.broadcast %66 : vector<8x1xf32> to vector<8x8xf32>
    %68 = arith.subf %62, %67 : vector<8x8xf32>
    %69 = math.exp %68 : vector<8x8xf32>
    %cst_47 = arith.constant dense<0.000000e+00> : vector<8xf32>
    %70 = vector.multi_reduction <add>, %69, %cst_47 [1] : vector<8x8xf32> to vector<8xf32>
    %71 = vector.shape_cast %70 : vector<8xf32> to vector<8x1xf32>
    %cst_48 = arith.constant 0.000000e+00 : f32
    %72 = vector.broadcast %cst_48 : f32 to vector<8x1xf32>
    %73 = arith.cmpf ogt, %71, %72 : vector<8x1xf32>
    %cst_49 = arith.constant 1.000000e+00 : f32
    %74 = vector.broadcast %cst_49 : f32 to vector<8x1xf32>
    %75 = arith.select %73, %71, %74 : vector<8x1xi1>, vector<8x1xf32>
    %76 = tpu.reciprocal %75 {approx = true} : vector<8x1xf32> -> vector<8x1xf32>
    %77 = vector.broadcast %76 : vector<8x1xf32> to vector<8x8xf32>
    %78 = arith.mulf %69, %77 : vector<8x8xf32>
    %79 = arith.truncf %78 : vector<8x8xf32> to vector<8x8xbf16>
    %cst_50 = arith.constant dense<0.000000e+00> : vector<8x32xf32>
    %80 = tpu.matmul %79, %50, %cst_50 {dimension_numbers = #tpu.dot_dimension_numbers<[1], [0], [0], [1], [0, 0, 1, 1], [], []>} : vector<8x8xbf16>, vector<8x32xbf16>, vector<8x32xf32> -> vector<8x32xf32>
    %81 = vector.extract_strided_slice %45 {offsets = [0, 32], sizes = [8, 32], strides = [1, 1]} : vector<8x128xbf16> to vector<8x32xbf16>
    %82 = vector.extract_strided_slice %46 {offsets = [0, 32], sizes = [8, 32], strides = [1, 1]} : vector<8x128xbf16> to vector<8x32xbf16>
    %83 = vector.extract_strided_slice %47 {offsets = [0, 32], sizes = [8, 32], strides = [1, 1]} : vector<8x128xbf16> to vector<8x32xbf16>
    %cst_51 = arith.constant dense<0.000000e+00> : vector<8x8xf32>
    %84 = tpu.matmul %81, %82, %cst_51 {dimension_numbers = #tpu.dot_dimension_numbers<[1], [1], [0], [0], [0, 0, 1, 0], [], []>} : vector<8x32xbf16>, vector<8x32xbf16>, vector<8x8xf32> -> vector<8x8xf32>
    %cst_52 = arith.constant 0.176776692 : f32
    %85 = vector.broadcast %cst_52 : f32 to vector<8x8xf32>
    %86 = arith.mulf %84, %85 : vector<8x8xf32>
    %87 = arith.addf %86, %44 : vector<8x8xf32>
    %c0_53 = arith.constant 0 : index
    %c1 = arith.constant 1 : index
    %c0_54 = arith.constant 0 : index
    %c0_55 = arith.constant 0 : index
    %88 = vector.load %arg16[%c0_53, %c1, %c0_54, %c0_55] : memref<1x4x8x8xf32, #tpu.memory_space<vmem>>, vector<1x1x8x8xf32>
    %89 = vector.shape_cast %88 : vector<1x1x8x8xf32> to vector<8x8xf32>
    %90 = arith.addf %89, %87 : vector<8x8xf32>
    %c0_56 = arith.constant 0 : index
    %c1_57 = arith.constant 1 : index
    %c0_58 = arith.constant 0 : index
    %c0_59 = arith.constant 0 : index
    %91 = vector.load %arg20[%c0_56, %c1_57, %c0_58, %c0_59] : memref<1x4x8x8xf32, #tpu.memory_space<vmem>>, vector<1x1x8x8xf32>
    %92 = vector.shape_cast %91 : vector<1x1x8x8xf32> to vector<8x8xf32>
    %93 = vector.shape_cast %90 : vector<8x8xf32> to vector<1x1x8x8xf32>
    tpu.vector_store %arg20[%c0_56, %c1_57, %c0_58, %c0_59], %93 {strides = array<i32>} : memref<1x4x8x8xf32, #tpu.memory_space<vmem>>, vector<1x1x8x8xf32>,
    %cst_60 = arith.constant 1.000000e+00 : f32
    %94 = vector.broadcast %cst_60 : f32 to vector<8x8xf32>
    %95 = arith.mulf %90, %94 : vector<8x8xf32>
    %cst_61 = arith.constant dense<0xFF800000> : vector<8xf32>
    %96 = vector.multi_reduction <maximumf>, %95, %cst_61 [1] : vector<8x8xf32> to vector<8xf32>
    %97 = vector.shape_cast %96 : vector<8xf32> to vector<8x1xf32>
    %cst_62 = arith.constant -3.000000e+38 : f32
    %98 = vector.broadcast %cst_62 : f32 to vector<8x1xf32>
    %99 = arith.maximumf %97, %98 : vector<8x1xf32>
    %100 = vector.broadcast %99 : vector<8x1xf32> to vector<8x8xf32>
    %101 = arith.subf %95, %100 : vector<8x8xf32>
    %102 = math.exp %101 : vector<8x8xf32>
    %cst_63 = arith.constant dense<0.000000e+00> : vector<8xf32>
    %103 = vector.multi_reduction <add>, %102, %cst_63 [1] : vector<8x8xf32> to vector<8xf32>
    %104 = vector.shape_cast %103 : vector<8xf32> to vector<8x1xf32>
    %cst_64 = arith.constant 0.000000e+00 : f32
    %105 = vector.broadcast %cst_64 : f32 to vector<8x1xf32>
    %106 = arith.cmpf ogt, %104, %105 : vector<8x1xf32>
    %cst_65 = arith.constant 1.000000e+00 : f32
    %107 = vector.broadcast %cst_65 : f32 to vector<8x1xf32>
    %108 = arith.select %106, %104, %107 : vector<8x1xi1>, vector<8x1xf32>
    %109 = tpu.reciprocal %108 {approx = true} : vector<8x1xf32> -> vector<8x1xf32>
    %110 = vector.broadcast %109 : vector<8x1xf32> to vector<8x8xf32>
    %111 = arith.mulf %102, %110 : vector<8x8xf32>
    %112 = arith.truncf %111 : vector<8x8xf32> to vector<8x8xbf16>
    %cst_66 = arith.constant dense<0.000000e+00> : vector<8x32xf32>
    %113 = tpu.matmul %112, %83, %cst_66 {dimension_numbers = #tpu.dot_dimension_numbers<[1], [0], [0], [1], [0, 0, 1, 1], [], []>} : vector<8x8xbf16>, vector<8x32xbf16>, vector<8x32xf32> -> vector<8x32xf32>
    %114 = vector.extract_strided_slice %45 {offsets = [0, 64], sizes = [8, 32], strides = [1, 1]} : vector<8x128xbf16> to vector<8x32xbf16>
    %115 = vector.extract_strided_slice %46 {offsets = [0, 64], sizes = [8, 32], strides = [1, 1]} : vector<8x128xbf16> to vector<8x32xbf16>
    %116 = vector.extract_strided_slice %47 {offsets = [0, 64], sizes = [8, 32], strides = [1, 1]} : vector<8x128xbf16> to vector<8x32xbf16>
    %cst_67 = arith.constant dense<0.000000e+00> : vector<8x8xf32>
    %117 = tpu.matmul %114, %115, %cst_67 {dimension_numbers = #tpu.dot_dimension_numbers<[1], [1], [0], [0], [0, 0, 1, 0], [], []>} : vector<8x32xbf16>, vector<8x32xbf16>, vector<8x8xf32> -> vector<8x8xf32>
    %cst_68 = arith.constant 0.176776692 : f32
    %118 = vector.broadcast %cst_68 : f32 to vector<8x8xf32>
    %119 = arith.mulf %117, %118 : vector<8x8xf32>
    %120 = arith.addf %119, %44 : vector<8x8xf32>
    %c0_69 = arith.constant 0 : index
    %c2 = arith.constant 2 : index
    %c0_70 = arith.constant 0 : index
    %c0_71 = arith.constant 0 : index
    %121 = vector.load %arg16[%c0_69, %c2, %c0_70, %c0_71] : memref<1x4x8x8xf32, #tpu.memory_space<vmem>>, vector<1x1x8x8xf32>
    %122 = vector.shape_cast %121 : vector<1x1x8x8xf32> to vector<8x8xf32>
    %123 = arith.addf %122, %120 : vector<8x8xf32>
    %c0_72 = arith.constant 0 : index
    %c2_73 = arith.constant 2 : index
    %c0_74 = arith.constant 0 : index
    %c0_75 = arith.constant 0 : index
    %124 = vector.load %arg20[%c0_72, %c2_73, %c0_74, %c0_75] : memref<1x4x8x8xf32, #tpu.memory_space<vmem>>, vector<1x1x8x8xf32>
    %125 = vector.shape_cast %124 : vector<1x1x8x8xf32> to vector<8x8xf32>
    %126 = vector.shape_cast %123 : vector<8x8xf32> to vector<1x1x8x8xf32>
    tpu.vector_store %arg20[%c0_72, %c2_73, %c0_74, %c0_75], %126 {strides = array<i32>} : memref<1x4x8x8xf32, #tpu.memory_space<vmem>>, vector<1x1x8x8xf32>,
    %cst_76 = arith.constant 1.000000e+00 : f32
    %127 = vector.broadcast %cst_76 : f32 to vector<8x8xf32>
    %128 = arith.mulf %123, %127 : vector<8x8xf32>
    %cst_77 = arith.constant dense<0xFF800000> : vector<8xf32>
    %129 = vector.multi_reduction <maximumf>, %128, %cst_77 [1] : vector<8x8xf32> to vector<8xf32>
    %130 = vector.shape_cast %129 : vector<8xf32> to vector<8x1xf32>
    %cst_78 = arith.constant -3.000000e+38 : f32
    %131 = vector.broadcast %cst_78 : f32 to vector<8x1xf32>
    %132 = arith.maximumf %130, %131 : vector<8x1xf32>
    %133 = vector.broadcast %132 : vector<8x1xf32> to vector<8x8xf32>
    %134 = arith.subf %128, %133 : vector<8x8xf32>
    %135 = math.exp %134 : vector<8x8xf32>
    %cst_79 = arith.constant dense<0.000000e+00> : vector<8xf32>
    %136 = vector.multi_reduction <add>, %135, %cst_79 [1] : vector<8x8xf32> to vector<8xf32>
    %137 = vector.shape_cast %136 : vector<8xf32> to vector<8x1xf32>
    %cst_80 = arith.constant 0.000000e+00 : f32
    %138 = vector.broadcast %cst_80 : f32 to vector<8x1xf32>
    %139 = arith.cmpf ogt, %137, %138 : vector<8x1xf32>
    %cst_81 = arith.constant 1.000000e+00 : f32
    %140 = vector.broadcast %cst_81 : f32 to vector<8x1xf32>
    %141 = arith.select %139, %137, %140 : vector<8x1xi1>, vector<8x1xf32>
    %142 = tpu.reciprocal %141 {approx = true} : vector<8x1xf32> -> vector<8x1xf32>
    %143 = vector.broadcast %142 : vector<8x1xf32> to vector<8x8xf32>
    %144 = arith.mulf %135, %143 : vector<8x8xf32>
    %145 = arith.truncf %144 : vector<8x8xf32> to vector<8x8xbf16>
    %cst_82 = arith.constant dense<0.000000e+00> : vector<8x32xf32>
    %146 = tpu.matmul %145, %116, %cst_82 {dimension_numbers = #tpu.dot_dimension_numbers<[1], [0], [0], [1], [0, 0, 1, 1], [], []>} : vector<8x8xbf16>, vector<8x32xbf16>, vector<8x32xf32> -> vector<8x32xf32>
    %147 = vector.extract_strided_slice %45 {offsets = [0, 96], sizes = [8, 32], strides = [1, 1]} : vector<8x128xbf16> to vector<8x32xbf16>
    %148 = vector.extract_strided_slice %46 {offsets = [0, 96], sizes = [8, 32], strides = [1, 1]} : vector<8x128xbf16> to vector<8x32xbf16>
    %149 = vector.extract_strided_slice %47 {offsets = [0, 96], sizes = [8, 32], strides = [1, 1]} : vector<8x128xbf16> to vector<8x32xbf16>
    %cst_83 = arith.constant dense<0.000000e+00> : vector<8x8xf32>
    %150 = tpu.matmul %147, %148, %cst_83 {dimension_numbers = #tpu.dot_dimension_numbers<[1], [1], [0], [0], [0, 0, 1, 0], [], []>} : vector<8x32xbf16>, vector<8x32xbf16>, vector<8x8xf32> -> vector<8x8xf32>
    %cst_84 = arith.constant 0.176776692 : f32
    %151 = vector.broadcast %cst_84 : f32 to vector<8x8xf32>
    %152 = arith.mulf %150, %151 : vector<8x8xf32>
    %153 = arith.addf %152, %44 : vector<8x8xf32>
    %c0_85 = arith.constant 0 : index
    %c3 = arith.constant 3 : index
    %c0_86 = arith.constant 0 : index
    %c0_87 = arith.constant 0 : index
    %154 = vector.load %arg16[%c0_85, %c3, %c0_86, %c0_87] : memref<1x4x8x8xf32, #tpu.memory_space<vmem>>, vector<1x1x8x8xf32>
    %155 = vector.shape_cast %154 : vector<1x1x8x8xf32> to vector<8x8xf32>
    %156 = arith.addf %155, %153 : vector<8x8xf32>
    %c0_88 = arith.constant 0 : index
    %c3_89 = arith.constant 3 : index
    %c0_90 = arith.constant 0 : index
    %c0_91 = arith.constant 0 : index
    %157 = vector.load %arg20[%c0_88, %c3_89, %c0_90, %c0_91] : memref<1x4x8x8xf32, #tpu.memory_space<vmem>>, vector<1x1x8x8xf32>
    %158 = vector.shape_cast %157 : vector<1x1x8x8xf32> to vector<8x8xf32>
    %159 = vector.shape_cast %156 : vector<8x8xf32> to vector<1x1x8x8xf32>
    tpu.vector_store %arg20[%c0_88, %c3_89, %c0_90, %c0_91], %159 {strides = array<i32>} : memref<1x4x8x8xf32, #tpu.memory_space<vmem>>, vector<1x1x8x8xf32>,
    %cst_92 = arith.constant 1.000000e+00 : f32
    %160 = vector.broadcast %cst_92 : f32 to vector<8x8xf32>
    %161 = arith.mulf %156, %160 : vector<8x8xf32>
    %cst_93 = arith.constant dense<0xFF800000> : vector<8xf32>
    %162 = vector.multi_reduction <maximumf>, %161, %cst_93 [1] : vector<8x8xf32> to vector<8xf32>
    %163 = vector.shape_cast %162 : vector<8xf32> to vector<8x1xf32>
    %cst_94 = arith.constant -3.000000e+38 : f32
    %164 = vector.broadcast %cst_94 : f32 to vector<8x1xf32>
    %165 = arith.maximumf %163, %164 : vector<8x1xf32>
    %166 = vector.broadcast %165 : vector<8x1xf32> to vector<8x8xf32>
    %167 = arith.subf %161, %166 : vector<8x8xf32>
    %168 = math.exp %167 : vector<8x8xf32>
    %cst_95 = arith.constant dense<0.000000e+00> : vector<8xf32>
    %169 = vector.multi_reduction <add>, %168, %cst_95 [1] : vector<8x8xf32> to vector<8xf32>
    %170 = vector.shape_cast %169 : vector<8xf32> to vector<8x1xf32>
    %cst_96 = arith.constant 0.000000e+00 : f32
    %171 = vector.broadcast %cst_96 : f32 to vector<8x1xf32>
    %172 = arith.cmpf ogt, %170, %171 : vector<8x1xf32>
    %cst_97 = arith.constant 1.000000e+00 : f32
    %173 = vector.broadcast %cst_97 : f32 to vector<8x1xf32>
    %174 = arith.select %172, %170, %173 : vector<8x1xi1>, vector<8x1xf32>
    %175 = tpu.reciprocal %174 {approx = true} : vector<8x1xf32> -> vector<8x1xf32>
    %176 = vector.broadcast %175 : vector<8x1xf32> to vector<8x8xf32>
    %177 = arith.mulf %168, %176 : vector<8x8xf32>
    %178 = arith.truncf %177 : vector<8x8xf32> to vector<8x8xbf16>
    %cst_98 = arith.constant dense<0.000000e+00> : vector<8x32xf32>
    %179 = tpu.matmul %178, %149, %cst_98 {dimension_numbers = #tpu.dot_dimension_numbers<[1], [0], [0], [1], [0, 0, 1, 1], [], []>} : vector<8x8xbf16>, vector<8x32xbf16>, vector<8x32xf32> -> vector<8x32xf32>
    %180 = tpu.concatenate %80, %113, %146, %179 in 1 : vector<8x32xf32>, vector<8x32xf32>, vector<8x32xf32>, vector<8x32xf32> -> vector<8x128xf32>
    %181 = arith.truncf %180 : vector<8x128xf32> to vector<8x128xbf16>
    %c0_99 = arith.constant 0 : index
    %c0_100 = arith.constant 0 : index
    %182 = vector.load %arg7[%c0_99, %c0_100] : memref<128x128xbf16, #tpu.memory_space<vmem>>, vector<128x128xbf16>
    %cst_101 = arith.constant dense<0.000000e+00> : vector<8x128xf32>
    %183 = tpu.matmul %181, %182, %cst_101 {dimension_numbers = #tpu.dot_dimension_numbers<[1], [0], [0], [1], [0, 0, 1, 1], [], []>} : vector<8x128xbf16>, vector<128x128xbf16>, vector<8x128xf32> -> vector<8x128xf32>
    %cst_102 = arith.constant 1.39495885 : f32
    %184 = vector.broadcast %cst_102 : f32 to vector<8x128xf32>
    %185 = arith.mulf %183, %184 : vector<8x128xf32>
    %186 = arith.extf %1 : vector<8x128xbf16> to vector<8x128xf32>
    %187 = arith.addf %185, %186 : vector<8x128xf32>
    %cst_103 = arith.constant dense<0.000000e+00> : vector<8xf32>
    %188 = vector.multi_reduction <add>, %187, %cst_103 [1] : vector<8x128xf32> to vector<8xf32>
    %189 = vector.shape_cast %188 : vector<8xf32> to vector<8x1xf32>
    %cst_104 = arith.constant 1.280000e+02 : f32
    %190 = vector.broadcast %cst_104 : f32 to vector<8x1xf32>
    %191 = arith.divf %189, %190 : vector<8x1xf32>
    %192 = vector.broadcast %191 : vector<8x1xf32> to vector<8x128xf32>
    %193 = arith.subf %187, %192 : vector<8x128xf32>
    %194 = arith.mulf %193, %193 : vector<8x128xf32>
    %cst_105 = arith.constant dense<0.000000e+00> : vector<8xf32>
    %195 = vector.multi_reduction <add>, %194, %cst_105 [1] : vector<8x128xf32> to vector<8xf32>
    %196 = vector.shape_cast %195 : vector<8xf32> to vector<8x1xf32>
    %cst_106 = arith.constant 1.280000e+02 : f32
    %197 = vector.broadcast %cst_106 : f32 to vector<8x1xf32>
    %198 = arith.divf %196, %197 : vector<8x1xf32>
    %199 = vector.broadcast %191 : vector<8x1xf32> to vector<8x128xf32>
    %200 = arith.subf %187, %199 : vector<8x128xf32>
    %cst_107 = arith.constant 9.99999974E-6 : f32
    %201 = vector.broadcast %cst_107 : f32 to vector<8x1xf32>
    %202 = arith.addf %198, %201 : vector<8x1xf32>
    %203 = math.rsqrt %202 : vector<8x1xf32>
    %204 = vector.broadcast %203 : vector<8x1xf32> to vector<8x128xf32>
    %205 = arith.mulf %200, %204 : vector<8x128xf32>
    %c0_108 = arith.constant 0 : index
    %c0_109 = arith.constant 0 : index
    %206 = vector.load %arg17[%c0_108, %c0_109] : memref<1x128xf32, #tpu.memory_space<vmem>>, vector<1x128xf32>
    %207 = vector.broadcast %206 : vector<1x128xf32> to vector<8x128xf32>
    %208 = arith.mulf %205, %207 : vector<8x128xf32>
    %c0_110 = arith.constant 0 : index
    %c0_111 = arith.constant 0 : index
    %209 = vector.load %arg18[%c0_110, %c0_111] : memref<1x128xf32, #tpu.memory_space<vmem>>, vector<1x128xf32>
    %210 = vector.broadcast %209 : vector<1x128xf32> to vector<8x128xf32>
    %211 = arith.addf %208, %210 : vector<8x128xf32>
    %212 = arith.truncf %211 : vector<8x128xf32> to vector<8x128xbf16>
    %c0_112 = arith.constant 0 : index
    %c0_113 = arith.constant 0 : index
    %c0_114 = arith.constant 0 : index
    %213 = vector.load %arg19[%c0_112, %c0_113, %c0_114] : memref<1x8x128xbf16, #tpu.memory_space<vmem>>, vector<1x8x128xbf16>
    %214 = vector.shape_cast %213 : vector<1x8x128xbf16> to vector<8x128xbf16>
    %215 = vector.shape_cast %212 : vector<8x128xbf16> to vector<1x8x128xbf16>
    tpu.vector_store %arg19[%c0_112, %c0_113, %c0_114], %215 {strides = array<i32>} : memref<1x8x128xbf16, #tpu.memory_space<vmem>>, vector<1x8x128xbf16>,
    return
  }
  func.func @transform_0(%arg0: i32, %arg1: i32) -> (i32, i32, i32) {
    %c0_i32 = arith.constant 0 : i32
    %c0_i32_0 = arith.constant 0 : i32
    return %arg0, %arg1, %c0_i32 : i32, i32, i32
  }
  func.func @transform_1(%arg0: i32, %arg1: i32) -> (i32, i32, i32) {
    %c0_i32 = arith.constant 0 : i32
    %c0_i32_0 = arith.constant 0 : i32
    %c0_i32_1 = arith.constant 0 : i32
    return %arg0, %c0_i32, %c0_i32_0 : i32, i32, i32
  }
  func.func @transform_2(%arg0: i32, %arg1: i32) -> (i32, i32) {
    %c0_i32 = arith.constant 0 : i32
    %c0_i32_0 = arith.constant 0 : i32
    %c0_i32_1 = arith.constant 0 : i32
    return %c0_i32, %c0_i32_0 : i32, i32
  }
  func.func @transform_3(%arg0: i32, %arg1: i32) -> (i32, i32) {
    %c0_i32 = arith.constant 0 : i32
    %c0_i32_0 = arith.constant 0 : i32
    %c0_i32_1 = arith.constant 0 : i32
    return %c0_i32, %c0_i32_0 : i32, i32
  }
  func.func @transform_4(%arg0: i32, %arg1: i32) -> (i32, i32) {
    %c0_i32 = arith.constant 0 : i32
    %c0_i32_0 = arith.constant 0 : i32
    %c0_i32_1 = arith.constant 0 : i32
    return %c0_i32, %c0_i32_0 : i32, i32
  }
  func.func @transform_5(%arg0: i32, %arg1: i32) -> (i32, i32) {
    %c0_i32 = arith.constant 0 : i32
    %c0_i32_0 = arith.constant 0 : i32
    %c0_i32_1 = arith.constant 0 : i32
    return %c0_i32, %c0_i32_0 : i32, i32
  }
  func.func @transform_6(%arg0: i32, %arg1: i32) -> (i32, i32) {
    %c0_i32 = arith.constant 0 : i32
    %c0_i32_0 = arith.constant 0 : i32
    return %arg1, %c0_i32 : i32, i32
  }
  func.func @transform_7(%arg0: i32, %arg1: i32) -> (i32, i32) {
    %c0_i32 = arith.constant 0 : i32
    %c0_i32_0 = arith.constant 0 : i32
    return %arg1, %c0_i32 : i32, i32
  }
  func.func @transform_8(%arg0: i32, %arg1: i32) -> (i32, i32) {
    %c0_i32 = arith.constant 0 : i32
    %c0_i32_0 = arith.constant 0 : i32
    return %arg1, %c0_i32 : i32, i32
  }
  func.func @transform_9(%arg0: i32, %arg1: i32) -> (i32, i32) {
    %c0_i32 = arith.constant 0 : i32
    %c0_i32_0 = arith.constant 0 : i32
    %c0_i32_1 = arith.constant 0 : i32
    return %c0_i32, %c0_i32_0 : i32, i32
  }
  func.func @transform_10(%arg0: i32, %arg1: i32) -> (i32, i32) {
    %c0_i32 = arith.constant 0 : i32
    %c0_i32_0 = arith.constant 0 : i32
    %c0_i32_1 = arith.constant 0 : i32
    return %c0_i32, %c0_i32_0 : i32, i32
  }
  func.func @transform_11(%arg0: i32, %arg1: i32) -> (i32, i32) {
    %c0_i32 = arith.constant 0 : i32
    %c0_i32_0 = arith.constant 0 : i32
    %c0_i32_1 = arith.constant 0 : i32
    return %c0_i32, %c0_i32_0 : i32, i32
  }
  func.func @transform_12(%arg0: i32, %arg1: i32) -> (i32, i32, i32) {
    %c0_i32 = arith.constant 0 : i32
    %c0_i32_0 = arith.constant 0 : i32
    return %arg0, %arg1, %c0_i32 : i32, i32, i32
  }
  func.func @transform_13(%arg0: i32, %arg1: i32) -> (i32, i32, i32) {
    %c0_i32 = arith.constant 0 : i32
    %c0_i32_0 = arith.constant 0 : i32
    %c0_i32_1 = arith.constant 0 : i32
    return %arg0, %c0_i32, %c0_i32_0 : i32, i32, i32
  }
  func.func @transform_14(%arg0: i32, %arg1: i32) -> (i32, i32, i32, i32) {
    %c0_i32 = arith.constant 0 : i32
    %c0_i32_0 = arith.constant 0 : i32
    %c0_i32_1 = arith.constant 0 : i32
    return %arg0, %c0_i32, %arg1, %c0_i32_0 : i32, i32, i32, i32
  }
  func.func @transform_15(%arg0: i32, %arg1: i32) -> (i32, i32) {
    %c0_i32 = arith.constant 0 : i32
    %c0_i32_0 = arith.constant 0 : i32
    %c0_i32_1 = arith.constant 0 : i32
    return %c0_i32, %c0_i32_0 : i32, i32
  }
  func.func @transform_16(%arg0: i32, %arg1: i32) -> (i32, i32) {
    %c0_i32 = arith.constant 0 : i32
    %c0_i32_0 = arith.constant 0 : i32
    %c0_i32_1 = arith.constant 0 : i32
    return %c0_i32, %c0_i32_0 : i32, i32
  }
  func.func @transform_17(%arg0: i32, %arg1: i32) -> (i32, i32, i32) {
    %c0_i32 = arith.constant 0 : i32
    %c0_i32_0 = arith.constant 0 : i32
    return %arg0, %arg1, %c0_i32 : i32, i32, i32
  }
  func.func @transform_18(%arg0: i32, %arg1: i32) -> (i32, i32, i32, i32) {
    %c0_i32 = arith.constant 0 : i32
    %c0_i32_0 = arith.constant 0 : i32
    %c0_i32_1 = arith.constant 0 : i32
    return %arg0, %c0_i32, %arg1, %c0_i32_0 : i32, i32, i32, i32
  }
}

module attributes {stable_mosaic.version = 11 : i64} {
  func.func @_swiglu_kernel(%arg0: i32, %arg1: i32, %arg2: memref<16x128xbf16, #tpu.memory_space<vmem>>, %arg3: memref<128x256xbf16, #tpu.memory_space<vmem>>, %arg4: memref<128x256xbf16, #tpu.memory_space<vmem>>, %arg5: memref<256x128xbf16, #tpu.memory_space<vmem>>, %arg6: memref<1x128xf32, #tpu.memory_space<vmem>>, %arg7: memref<1x128xf32, #tpu.memory_space<vmem>>, %arg8: memref<16x128xbf16, #tpu.memory_space<vmem>>, %arg9: memref<16x128xf32, #tpu.memory_space<vmem>>) attributes {dimension_semantics = [#tpu.dimension_semantics<parallel>, #tpu.dimension_semantics<arbitrary>], iteration_bounds = array<i64: 1, 1>, scalar_prefetch = 0 : i64, scratch_operands = 1 : i64, tpu.core_type = #tpu.core_type<tc>, window_params = [{transform_indices = @transform_0, window_bounds = array<i64: 16, 128>}, {transform_indices = @transform_1, window_bounds = array<i64: 128, 256>}, {transform_indices = @transform_2, window_bounds = array<i64: 128, 256>}, {transform_indices = @transform_3, window_bounds = array<i64: 256, 128>}, {pipeline_mode = #tpu.pipeline_mode<synchronous>, transform_indices = @transform_4, window_bounds = array<i64: 1, 128>}, {pipeline_mode = #tpu.pipeline_mode<synchronous>, transform_indices = @transform_5, window_bounds = array<i64: 1, 128>}, {transform_indices = @transform_6, window_bounds = array<i64: 16, 128>}]} {
    %c0_i32 = arith.constant 0 : i32
    %0 = arith.cmpi eq, %arg1, %c0_i32 : i32
    %1 = arith.extui %0 : i1 to i32
    %c0_i32_0 = arith.constant 0 : i32
    %2 = arith.cmpi ne, %1, %c0_i32_0 : i32
    scf.if %2 {
      %cst_17 = arith.constant 0.000000e+00 : f32
      %24 = vector.broadcast %cst_17 : f32 to vector<16x128xf32>
      %c0_18 = arith.constant 0 : index
      %c0_19 = arith.constant 0 : index
      %25 = vector.load %arg9[%c0_18, %c0_19] : memref<16x128xf32, #tpu.memory_space<vmem>>, vector<16x128xf32>
      tpu.vector_store %arg9[%c0_18, %c0_19], %24 {strides = array<i32>} : memref<16x128xf32, #tpu.memory_space<vmem>>, vector<16x128xf32>,
    } else {
    }
    %c0 = arith.constant 0 : index
    %c0_1 = arith.constant 0 : index
    %3 = vector.load %arg2[%c0, %c0_1] : memref<16x128xbf16, #tpu.memory_space<vmem>>, vector<16x128xbf16>
    %c0_2 = arith.constant 0 : index
    %c0_3 = arith.constant 0 : index
    %4 = vector.load %arg3[%c0_2, %c0_3] : memref<128x256xbf16, #tpu.memory_space<vmem>>, vector<128x256xbf16>
    %cst = arith.constant dense<0.000000e+00> : vector<16x256xf32>
    %5 = tpu.matmul %3, %4, %cst {dimension_numbers = #tpu.dot_dimension_numbers<[1], [0], [0], [1], [0, 0, 1, 1], [], []>} : vector<16x128xbf16>, vector<128x256xbf16>, vector<16x256xf32> -> vector<16x256xf32>
    %c0_4 = arith.constant 0 : index
    %c0_5 = arith.constant 0 : index
    %6 = vector.load %arg4[%c0_4, %c0_5] : memref<128x256xbf16, #tpu.memory_space<vmem>>, vector<128x256xbf16>
    %cst_6 = arith.constant dense<0.000000e+00> : vector<16x256xf32>
    %7 = tpu.matmul %3, %6, %cst_6 {dimension_numbers = #tpu.dot_dimension_numbers<[1], [0], [0], [1], [0, 0, 1, 1], [], []>} : vector<16x128xbf16>, vector<128x256xbf16>, vector<16x256xf32> -> vector<16x256xf32>
    %8 = arith.negf %5 : vector<16x256xf32>
    %9 = math.exp %8 : vector<16x256xf32>
    %cst_7 = arith.constant 1.000000e+00 : f32
    %10 = vector.broadcast %cst_7 : f32 to vector<16x256xf32>
    %11 = arith.addf %10, %9 : vector<16x256xf32>
    %12 = arith.divf %10, %11 : vector<16x256xf32>
    %13 = arith.mulf %5, %12 : vector<16x256xf32>
    %14 = arith.mulf %13, %7 : vector<16x256xf32>
    %c0_8 = arith.constant 0 : index
    %c0_9 = arith.constant 0 : index
    %15 = vector.load %arg9[%c0_8, %c0_9] : memref<16x128xf32, #tpu.memory_space<vmem>>, vector<16x128xf32>
    %16 = arith.truncf %14 : vector<16x256xf32> to vector<16x256xbf16>
    %c0_10 = arith.constant 0 : index
    %c0_11 = arith.constant 0 : index
    %17 = vector.load %arg5[%c0_10, %c0_11] : memref<256x128xbf16, #tpu.memory_space<vmem>>, vector<256x128xbf16>
    %cst_12 = arith.constant dense<0.000000e+00> : vector<16x128xf32>
    %18 = tpu.matmul %16, %17, %cst_12 {dimension_numbers = #tpu.dot_dimension_numbers<[1], [0], [0], [1], [0, 0, 1, 1], [], []>} : vector<16x256xbf16>, vector<256x128xbf16>, vector<16x128xf32> -> vector<16x128xf32>
    %19 = arith.addf %15, %18 : vector<16x128xf32>
    %c0_13 = arith.constant 0 : index
    %c0_14 = arith.constant 0 : index
    %20 = vector.load %arg9[%c0_13, %c0_14] : memref<16x128xf32, #tpu.memory_space<vmem>>, vector<16x128xf32>
    tpu.vector_store %arg9[%c0_13, %c0_14], %19 {strides = array<i32>} : memref<16x128xf32, #tpu.memory_space<vmem>>, vector<16x128xf32>,
    %c0_i32_15 = arith.constant 0 : i32
    %21 = arith.cmpi eq, %arg1, %c0_i32_15 : i32
    %22 = arith.extui %21 : i1 to i32
    %c0_i32_16 = arith.constant 0 : i32
    %23 = arith.cmpi ne, %22, %c0_i32_16 : i32
    scf.if %23 {
      %c0_17 = arith.constant 0 : index
      %c0_18 = arith.constant 0 : index
      %24 = vector.load %arg9[%c0_17, %c0_18] : memref<16x128xf32, #tpu.memory_space<vmem>>, vector<16x128xf32>
      %cst_19 = arith.constant 1.39495885 : f32
      %25 = vector.broadcast %cst_19 : f32 to vector<16x128xf32>
      %26 = arith.mulf %24, %25 : vector<16x128xf32>
      %c0_20 = arith.constant 0 : index
      %c0_21 = arith.constant 0 : index
      %27 = vector.load %arg2[%c0_20, %c0_21] : memref<16x128xbf16, #tpu.memory_space<vmem>>, vector<16x128xbf16>
      %28 = arith.extf %27 : vector<16x128xbf16> to vector<16x128xf32>
      %29 = arith.addf %26, %28 : vector<16x128xf32>
      %cst_22 = arith.constant dense<0.000000e+00> : vector<16xf32>
      %30 = vector.multi_reduction <add>, %29, %cst_22 [1] : vector<16x128xf32> to vector<16xf32>
      %31 = vector.shape_cast %30 : vector<16xf32> to vector<16x1xf32>
      %cst_23 = arith.constant 1.280000e+02 : f32
      %32 = vector.broadcast %cst_23 : f32 to vector<16x1xf32>
      %33 = arith.divf %31, %32 : vector<16x1xf32>
      %34 = vector.broadcast %33 : vector<16x1xf32> to vector<16x128xf32>
      %35 = arith.subf %29, %34 : vector<16x128xf32>
      %36 = arith.mulf %35, %35 : vector<16x128xf32>
      %cst_24 = arith.constant dense<0.000000e+00> : vector<16xf32>
      %37 = vector.multi_reduction <add>, %36, %cst_24 [1] : vector<16x128xf32> to vector<16xf32>
      %38 = vector.shape_cast %37 : vector<16xf32> to vector<16x1xf32>
      %cst_25 = arith.constant 1.280000e+02 : f32
      %39 = vector.broadcast %cst_25 : f32 to vector<16x1xf32>
      %40 = arith.divf %38, %39 : vector<16x1xf32>
      %41 = vector.broadcast %33 : vector<16x1xf32> to vector<16x128xf32>
      %42 = arith.subf %29, %41 : vector<16x128xf32>
      %cst_26 = arith.constant 9.99999974E-6 : f32
      %43 = vector.broadcast %cst_26 : f32 to vector<16x1xf32>
      %44 = arith.addf %40, %43 : vector<16x1xf32>
      %45 = math.rsqrt %44 : vector<16x1xf32>
      %46 = vector.broadcast %45 : vector<16x1xf32> to vector<16x128xf32>
      %47 = arith.mulf %42, %46 : vector<16x128xf32>
      %c0_27 = arith.constant 0 : index
      %c0_28 = arith.constant 0 : index
      %48 = vector.load %arg6[%c0_27, %c0_28] : memref<1x128xf32, #tpu.memory_space<vmem>>, vector<1x128xf32>
      %49 = vector.broadcast %48 : vector<1x128xf32> to vector<16x128xf32>
      %50 = arith.mulf %47, %49 : vector<16x128xf32>
      %c0_29 = arith.constant 0 : index
      %c0_30 = arith.constant 0 : index
      %51 = vector.load %arg7[%c0_29, %c0_30] : memref<1x128xf32, #tpu.memory_space<vmem>>, vector<1x128xf32>
      %52 = vector.broadcast %51 : vector<1x128xf32> to vector<16x128xf32>
      %53 = arith.addf %50, %52 : vector<16x128xf32>
      %54 = arith.truncf %53 : vector<16x128xf32> to vector<16x128xbf16>
      %c0_31 = arith.constant 0 : index
      %c0_32 = arith.constant 0 : index
      %55 = vector.load %arg8[%c0_31, %c0_32] : memref<16x128xbf16, #tpu.memory_space<vmem>>, vector<16x128xbf16>
      tpu.vector_store %arg8[%c0_31, %c0_32], %54 {strides = array<i32>} : memref<16x128xbf16, #tpu.memory_space<vmem>>, vector<16x128xbf16>,
    } else {
    }
    return
  }
  func.func @transform_0(%arg0: i32, %arg1: i32) -> (i32, i32) {
    %c0_i32 = arith.constant 0 : i32
    %c0_i32_0 = arith.constant 0 : i32
    return %arg0, %c0_i32 : i32, i32
  }
  func.func @transform_1(%arg0: i32, %arg1: i32) -> (i32, i32) {
    %c0_i32 = arith.constant 0 : i32
    %c0_i32_0 = arith.constant 0 : i32
    return %c0_i32, %arg1 : i32, i32
  }
  func.func @transform_2(%arg0: i32, %arg1: i32) -> (i32, i32) {
    %c0_i32 = arith.constant 0 : i32
    %c0_i32_0 = arith.constant 0 : i32
    return %c0_i32, %arg1 : i32, i32
  }
  func.func @transform_3(%arg0: i32, %arg1: i32) -> (i32, i32) {
    %c0_i32 = arith.constant 0 : i32
    %c0_i32_0 = arith.constant 0 : i32
    return %arg1, %c0_i32 : i32, i32
  }
  func.func @transform_4(%arg0: i32, %arg1: i32) -> (i32, i32) {
    %c0_i32 = arith.constant 0 : i32
    %c0_i32_0 = arith.constant 0 : i32
    %c0_i32_1 = arith.constant 0 : i32
    return %c0_i32, %c0_i32_0 : i32, i32
  }
  func.func @transform_5(%arg0: i32, %arg1: i32) -> (i32, i32) {
    %c0_i32 = arith.constant 0 : i32
    %c0_i32_0 = arith.constant 0 : i32
    %c0_i32_1 = arith.constant 0 : i32
    return %c0_i32, %c0_i32_0 : i32, i32
  }
  func.func @transform_6(%arg0: i32, %arg1: i32) -> (i32, i32) {
    %c0_i32 = arith.constant 0 : i32
    %c0_i32_0 = arith.constant 0 : i32
    return %arg0, %c0_i32 : i32, i32
  }
}

module attributes {stable_mosaic.version = 11 : i64} {
  func.func @_attn_kernel(%arg0: i32, %arg1: i32, %arg2: memref<1x8x128xbf16, #tpu.memory_space<vmem>>, %arg3: memref<1x16x128xbf16, #tpu.memory_space<vmem>>, %arg4: memref<128x128xbf16, #tpu.memory_space<vmem>>, %arg5: memref<128x128xbf16, #tpu.memory_space<vmem>>, %arg6: memref<128x128xbf16, #tpu.memory_space<vmem>>, %arg7: memref<128x128xbf16, #tpu.memory_space<vmem>>, %arg8: memref<8x128xf32, #tpu.memory_space<vmem>>, %arg9: memref<8x128xf32, #tpu.memory_space<vmem>>, %arg10: memref<8x128xf32, #tpu.memory_space<vmem>>, %arg11: memref<16x128xf32, #tpu.memory_space<vmem>>, %arg12: memref<16x128xf32, #tpu.memory_space<vmem>>, %arg13: memref<16x128xf32, #tpu.memory_space<vmem>>, %arg14: memref<1x8x1xf32, #tpu.memory_space<vmem>>, %arg15: memref<1x1x16xf32, #tpu.memory_space<vmem>>, %arg16: memref<1x4x8x16xf32, #tpu.memory_space<vmem>>, %arg17: memref<1x128xf32, #tpu.memory_space<vmem>>, %arg18: memref<1x128xf32, #tpu.memory_space<vmem>>, %arg19: memref<1x8x128xbf16, #tpu.memory_space<vmem>>, %arg20: memref<1x4x8x16xf32, #tpu.memory_space<vmem>>) attributes {dimension_semantics = [#tpu.dimension_semantics<parallel>, #tpu.dimension_semantics<parallel>], iteration_bounds = array<i64: 2, 1>, scalar_prefetch = 0 : i64, scratch_operands = 0 : i64, tpu.core_type = #tpu.core_type<tc>, window_params = [{transform_indices = @transform_0, window_bounds = array<i64: 1, 8, 128>}, {transform_indices = @transform_1, window_bounds = array<i64: 1, 16, 128>}, {pipeline_mode = #tpu.pipeline_mode<synchronous>, transform_indices = @transform_2, window_bounds = array<i64: 128, 128>}, {pipeline_mode = #tpu.pipeline_mode<synchronous>, transform_indices = @transform_3, window_bounds = array<i64: 128, 128>}, {pipeline_mode = #tpu.pipeline_mode<synchronous>, transform_indices = @transform_4, window_bounds = array<i64: 128, 128>}, {pipeline_mode = #tpu.pipeline_mode<synchronous>, transform_indices = @transform_5, window_bounds = array<i64: 128, 128>}, {transform_indices = @transform_6, window_bounds = array<i64: 8, 128>}, {transform_indices = @transform_7, window_bounds = array<i64: 8, 128>}, {transform_indices = @transform_8, window_bounds = array<i64: 8, 128>}, {pipeline_mode = #tpu.pipeline_mode<synchronous>, transform_indices = @transform_9, window_bounds = array<i64: 16, 128>}, {pipeline_mode = #tpu.pipeline_mode<synchronous>, transform_indices = @transform_10, window_bounds = array<i64: 16, 128>}, {pipeline_mode = #tpu.pipeline_mode<synchronous>, transform_indices = @transform_11, window_bounds = array<i64: 16, 128>}, {transform_indices = @transform_12, window_bounds = array<i64: 1, 8, 1>}, {transform_indices = @transform_13, window_bounds = array<i64: 1, 1, 16>}, {transform_indices = @transform_14, window_bounds = array<i64: 1, 4, 8, 16>}, {pipeline_mode = #tpu.pipeline_mode<synchronous>, transform_indices = @transform_15, window_bounds = array<i64: 1, 128>}, {pipeline_mode = #tpu.pipeline_mode<synchronous>, transform_indices = @transform_16, window_bounds = array<i64: 1, 128>}, {transform_indices = @transform_17, window_bounds = array<i64: 1, 8, 128>}, {transform_indices = @transform_18, window_bounds = array<i64: 1, 4, 8, 16>}]} {
    %c0 = arith.constant 0 : index
    %c0_0 = arith.constant 0 : index
    %c0_1 = arith.constant 0 : index
    %0 = vector.load %arg2[%c0, %c0_0, %c0_1] : memref<1x8x128xbf16, #tpu.memory_space<vmem>>, vector<1x8x128xbf16>
    %1 = vector.shape_cast %0 : vector<1x8x128xbf16> to vector<8x128xbf16>
    %c0_2 = arith.constant 0 : index
    %c0_3 = arith.constant 0 : index
    %c0_4 = arith.constant 0 : index
    %2 = vector.load %arg3[%c0_2, %c0_3, %c0_4] : memref<1x16x128xbf16, #tpu.memory_space<vmem>>, vector<1x16x128xbf16>
    %3 = vector.shape_cast %2 : vector<1x16x128xbf16> to vector<16x128xbf16>
    %c0_5 = arith.constant 0 : index
    %c0_6 = arith.constant 0 : index
    %4 = vector.load %arg4[%c0_5, %c0_6] : memref<128x128xbf16, #tpu.memory_space<vmem>>, vector<128x128xbf16>
    %cst = arith.constant dense<0.000000e+00> : vector<8x128xf32>
    %5 = tpu.matmul %1, %4, %cst {dimension_numbers = #tpu.dot_dimension_numbers<[1], [0], [0], [1], [0, 0, 1, 1], [], []>} : vector<8x128xbf16>, vector<128x128xbf16>, vector<8x128xf32> -> vector<8x128xf32>
    %c0_7 = arith.constant 0 : index
    %c0_8 = arith.constant 0 : index
    %6 = vector.load %arg8[%c0_7, %c0_8] : memref<8x128xf32, #tpu.memory_space<vmem>>, vector<8x128xf32>
    %c0_9 = arith.constant 0 : index
    %c0_10 = arith.constant 0 : index
    %7 = vector.load %arg9[%c0_9, %c0_10] : memref<8x128xf32, #tpu.memory_space<vmem>>, vector<8x128xf32>
    %c0_11 = arith.constant 0 : index
    %c0_12 = arith.constant 0 : index
    %8 = vector.load %arg10[%c0_11, %c0_12] : memref<8x128xf32, #tpu.memory_space<vmem>>, vector<8x128xf32>
    %c127_i32 = arith.constant 127 : i32
    %9 = tpu.dynamic_rotate %5 by %c127_i32 dim 1 : vector<8x128xf32>, i32 -> vector<8x128xf32>
    %c1_i32 = arith.constant 1 : i32
    %10 = tpu.dynamic_rotate %5 by %c1_i32 dim 1 : vector<8x128xf32>, i32 -> vector<8x128xf32>
    %11 = arith.mulf %5, %6 : vector<8x128xf32>
    %12 = arith.mulf %9, %7 : vector<8x128xf32>
    %13 = arith.addf %11, %12 : vector<8x128xf32>
    %14 = arith.mulf %10, %8 : vector<8x128xf32>
    %15 = arith.addf %13, %14 : vector<8x128xf32>
    %c0_13 = arith.constant 0 : index
    %c0_14 = arith.constant 0 : index
    %16 = vector.load %arg5[%c0_13, %c0_14] : memref<128x128xbf16, #tpu.memory_space<vmem>>, vector<128x128xbf16>
    %cst_15 = arith.constant dense<0.000000e+00> : vector<16x128xf32>
    %17 = tpu.matmul %3, %16, %cst_15 {dimension_numbers = #tpu.dot_dimension_numbers<[1], [0], [0], [1], [0, 0, 1, 1], [], []>} : vector<16x128xbf16>, vector<128x128xbf16>, vector<16x128xf32> -> vector<16x128xf32>
    %c0_16 = arith.constant 0 : index
    %c0_17 = arith.constant 0 : index
    %18 = vector.load %arg11[%c0_16, %c0_17] : memref<16x128xf32, #tpu.memory_space<vmem>>, vector<16x128xf32>
    %c0_18 = arith.constant 0 : index
    %c0_19 = arith.constant 0 : index
    %19 = vector.load %arg12[%c0_18, %c0_19] : memref<16x128xf32, #tpu.memory_space<vmem>>, vector<16x128xf32>
    %c0_20 = arith.constant 0 : index
    %c0_21 = arith.constant 0 : index
    %20 = vector.load %arg13[%c0_20, %c0_21] : memref<16x128xf32, #tpu.memory_space<vmem>>, vector<16x128xf32>
    %c127_i32_22 = arith.constant 127 : i32
    %21 = tpu.dynamic_rotate %17 by %c127_i32_22 dim 1 : vector<16x128xf32>, i32 -> vector<16x128xf32>
    %c1_i32_23 = arith.constant 1 : i32
    %22 = tpu.dynamic_rotate %17 by %c1_i32_23 dim 1 : vector<16x128xf32>, i32 -> vector<16x128xf32>
    %23 = arith.mulf %17, %18 : vector<16x128xf32>
    %24 = arith.mulf %21, %19 : vector<16x128xf32>
    %25 = arith.addf %23, %24 : vector<16x128xf32>
    %26 = arith.mulf %22, %20 : vector<16x128xf32>
    %27 = arith.addf %25, %26 : vector<16x128xf32>
    %c0_24 = arith.constant 0 : index
    %c0_25 = arith.constant 0 : index
    %28 = vector.load %arg6[%c0_24, %c0_25] : memref<128x128xbf16, #tpu.memory_space<vmem>>, vector<128x128xbf16>
    %cst_26 = arith.constant dense<0.000000e+00> : vector<16x128xf32>
    %29 = tpu.matmul %3, %28, %cst_26 {dimension_numbers = #tpu.dot_dimension_numbers<[1], [0], [0], [1], [0, 0, 1, 1], [], []>} : vector<16x128xbf16>, vector<128x128xbf16>, vector<16x128xf32> -> vector<16x128xf32>
    %c0_27 = arith.constant 0 : index
    %c0_28 = arith.constant 0 : index
    %c0_29 = arith.constant 0 : index
    %30 = vector.load %arg14[%c0_27, %c0_28, %c0_29] : memref<1x8x1xf32, #tpu.memory_space<vmem>>, vector<1x8x1xf32>
    %31 = vector.shape_cast %30 : vector<1x8x1xf32> to vector<8x1xf32>
    %c0_30 = arith.constant 0 : index
    %c0_31 = arith.constant 0 : index
    %c0_32 = arith.constant 0 : index
    %32 = vector.load %arg15[%c0_30, %c0_31, %c0_32] : memref<1x1x16xf32, #tpu.memory_space<vmem>>, vector<1x1x16xf32>
    %33 = vector.shape_cast %32 : vector<1x1x16xf32> to vector<1x16xf32>
    %34 = vector.broadcast %31 : vector<8x1xf32> to vector<8x16xf32>
    %35 = vector.broadcast %33 : vector<1x16xf32> to vector<8x16xf32>
    %36 = arith.addf %34, %35 : vector<8x16xf32>
    %37 = arith.truncf %15 : vector<8x128xf32> to vector<8x128xbf16>
    %38 = arith.truncf %27 : vector<16x128xf32> to vector<16x128xbf16>
    %39 = arith.truncf %29 : vector<16x128xf32> to vector<16x128xbf16>
    %40 = vector.extract_strided_slice %37 {offsets = [0, 0], sizes = [8, 32], strides = [1, 1]} : vector<8x128xbf16> to vector<8x32xbf16>
    %41 = vector.extract_strided_slice %38 {offsets = [0, 0], sizes = [16, 32], strides = [1, 1]} : vector<16x128xbf16> to vector<16x32xbf16>
    %42 = vector.extract_strided_slice %39 {offsets = [0, 0], sizes = [16, 32], strides = [1, 1]} : vector<16x128xbf16> to vector<16x32xbf16>
    %cst_33 = arith.constant dense<0.000000e+00> : vector<8x16xf32>
    %43 = tpu.matmul %40, %41, %cst_33 {dimension_numbers = #tpu.dot_dimension_numbers<[1], [1], [0], [0], [0, 0, 1, 0], [], []>} : vector<8x32xbf16>, vector<16x32xbf16>, vector<8x16xf32> -> vector<8x16xf32>
    %cst_34 = arith.constant 0.176776692 : f32
    %44 = vector.broadcast %cst_34 : f32 to vector<8x16xf32>
    %45 = arith.mulf %43, %44 : vector<8x16xf32>
    %46 = arith.addf %45, %36 : vector<8x16xf32>
    %c0_35 = arith.constant 0 : index
    %c0_36 = arith.constant 0 : index
    %c0_37 = arith.constant 0 : index
    %c0_38 = arith.constant 0 : index
    %47 = vector.load %arg16[%c0_35, %c0_36, %c0_37, %c0_38] : memref<1x4x8x16xf32, #tpu.memory_space<vmem>>, vector<1x1x8x16xf32>
    %48 = vector.shape_cast %47 : vector<1x1x8x16xf32> to vector<8x16xf32>
    %49 = arith.addf %48, %46 : vector<8x16xf32>
    %c0_39 = arith.constant 0 : index
    %c0_40 = arith.constant 0 : index
    %c0_41 = arith.constant 0 : index
    %c0_42 = arith.constant 0 : index
    %50 = vector.load %arg20[%c0_39, %c0_40, %c0_41, %c0_42] : memref<1x4x8x16xf32, #tpu.memory_space<vmem>>, vector<1x1x8x16xf32>
    %51 = vector.shape_cast %50 : vector<1x1x8x16xf32> to vector<8x16xf32>
    %52 = vector.shape_cast %49 : vector<8x16xf32> to vector<1x1x8x16xf32>
    tpu.vector_store %arg20[%c0_39, %c0_40, %c0_41, %c0_42], %52 {strides = array<i32>} : memref<1x4x8x16xf32, #tpu.memory_space<vmem>>, vector<1x1x8x16xf32>,
    %cst_43 = arith.constant 1.000000e+00 : f32
    %53 = vector.broadcast %cst_43 : f32 to vector<8x16xf32>
    %54 = arith.mulf %49, %53 : vector<8x16xf32>
    %cst_44 = arith.constant dense<0xFF800000> : vector<8xf32>
    %55 = vector.multi_reduction <maximumf>, %54, %cst_44 [1] : vector<8x16xf32> to vector<8xf32>
    %56 = vector.shape_cast %55 : vector<8xf32> to vector<8x1xf32>
    %cst_45 = arith.constant -3.000000e+38 : f32
    %57 = vector.broadcast %cst_45 : f32 to vector<8x1xf32>
    %58 = arith.maximumf %56, %57 : vector<8x1xf32>
    %59 = vector.broadcast %58 : vector<8x1xf32> to vector<8x16xf32>
    %60 = arith.subf %54, %59 : vector<8x16xf32>
    %61 = math.exp %60 : vector<8x16xf32>
    %cst_46 = arith.constant dense<0.000000e+00> : vector<8xf32>
    %62 = vector.multi_reduction <add>, %61, %cst_46 [1] : vector<8x16xf32> to vector<8xf32>
    %63 = vector.shape_cast %62 : vector<8xf32> to vector<8x1xf32>
    %cst_47 = arith.constant 0.000000e+00 : f32
    %64 = vector.broadcast %cst_47 : f32 to vector<8x1xf32>
    %65 = arith.cmpf ogt, %63, %64 : vector<8x1xf32>
    %cst_48 = arith.constant 1.000000e+00 : f32
    %66 = vector.broadcast %cst_48 : f32 to vector<8x1xf32>
    %67 = arith.select %65, %63, %66 : vector<8x1xi1>, vector<8x1xf32>
    %68 = tpu.reciprocal %67 {approx = true} : vector<8x1xf32> -> vector<8x1xf32>
    %69 = vector.broadcast %68 : vector<8x1xf32> to vector<8x16xf32>
    %70 = arith.mulf %61, %69 : vector<8x16xf32>
    %71 = arith.truncf %70 : vector<8x16xf32> to vector<8x16xbf16>
    %cst_49 = arith.constant dense<0.000000e+00> : vector<8x32xf32>
    %72 = tpu.matmul %71, %42, %cst_49 {dimension_numbers = #tpu.dot_dimension_numbers<[1], [0], [0], [1], [0, 0, 1, 1], [], []>} : vector<8x16xbf16>, vector<16x32xbf16>, vector<8x32xf32> -> vector<8x32xf32>
    %73 = vector.extract_strided_slice %37 {offsets = [0, 32], sizes = [8, 32], strides = [1, 1]} : vector<8x128xbf16> to vector<8x32xbf16>
    %74 = vector.extract_strided_slice %38 {offsets = [0, 32], sizes = [16, 32], strides = [1, 1]} : vector<16x128xbf16> to vector<16x32xbf16>
    %75 = vector.extract_strided_slice %39 {offsets = [0, 32], sizes = [16, 32], strides = [1, 1]} : vector<16x128xbf16> to vector<16x32xbf16>
    %cst_50 = arith.constant dense<0.000000e+00> : vector<8x16xf32>
    %76 = tpu.matmul %73, %74, %cst_50 {dimension_numbers = #tpu.dot_dimension_numbers<[1], [1], [0], [0], [0, 0, 1, 0], [], []>} : vector<8x32xbf16>, vector<16x32xbf16>, vector<8x16xf32> -> vector<8x16xf32>
    %cst_51 = arith.constant 0.176776692 : f32
    %77 = vector.broadcast %cst_51 : f32 to vector<8x16xf32>
    %78 = arith.mulf %76, %77 : vector<8x16xf32>
    %79 = arith.addf %78, %36 : vector<8x16xf32>
    %c0_52 = arith.constant 0 : index
    %c1 = arith.constant 1 : index
    %c0_53 = arith.constant 0 : index
    %c0_54 = arith.constant 0 : index
    %80 = vector.load %arg16[%c0_52, %c1, %c0_53, %c0_54] : memref<1x4x8x16xf32, #tpu.memory_space<vmem>>, vector<1x1x8x16xf32>
    %81 = vector.shape_cast %80 : vector<1x1x8x16xf32> to vector<8x16xf32>
    %82 = arith.addf %81, %79 : vector<8x16xf32>
    %c0_55 = arith.constant 0 : index
    %c1_56 = arith.constant 1 : index
    %c0_57 = arith.constant 0 : index
    %c0_58 = arith.constant 0 : index
    %83 = vector.load %arg20[%c0_55, %c1_56, %c0_57, %c0_58] : memref<1x4x8x16xf32, #tpu.memory_space<vmem>>, vector<1x1x8x16xf32>
    %84 = vector.shape_cast %83 : vector<1x1x8x16xf32> to vector<8x16xf32>
    %85 = vector.shape_cast %82 : vector<8x16xf32> to vector<1x1x8x16xf32>
    tpu.vector_store %arg20[%c0_55, %c1_56, %c0_57, %c0_58], %85 {strides = array<i32>} : memref<1x4x8x16xf32, #tpu.memory_space<vmem>>, vector<1x1x8x16xf32>,
    %cst_59 = arith.constant 1.000000e+00 : f32
    %86 = vector.broadcast %cst_59 : f32 to vector<8x16xf32>
    %87 = arith.mulf %82, %86 : vector<8x16xf32>
    %cst_60 = arith.constant dense<0xFF800000> : vector<8xf32>
    %88 = vector.multi_reduction <maximumf>, %87, %cst_60 [1] : vector<8x16xf32> to vector<8xf32>
    %89 = vector.shape_cast %88 : vector<8xf32> to vector<8x1xf32>
    %cst_61 = arith.constant -3.000000e+38 : f32
    %90 = vector.broadcast %cst_61 : f32 to vector<8x1xf32>
    %91 = arith.maximumf %89, %90 : vector<8x1xf32>
    %92 = vector.broadcast %91 : vector<8x1xf32> to vector<8x16xf32>
    %93 = arith.subf %87, %92 : vector<8x16xf32>
    %94 = math.exp %93 : vector<8x16xf32>
    %cst_62 = arith.constant dense<0.000000e+00> : vector<8xf32>
    %95 = vector.multi_reduction <add>, %94, %cst_62 [1] : vector<8x16xf32> to vector<8xf32>
    %96 = vector.shape_cast %95 : vector<8xf32> to vector<8x1xf32>
    %cst_63 = arith.constant 0.000000e+00 : f32
    %97 = vector.broadcast %cst_63 : f32 to vector<8x1xf32>
    %98 = arith.cmpf ogt, %96, %97 : vector<8x1xf32>
    %cst_64 = arith.constant 1.000000e+00 : f32
    %99 = vector.broadcast %cst_64 : f32 to vector<8x1xf32>
    %100 = arith.select %98, %96, %99 : vector<8x1xi1>, vector<8x1xf32>
    %101 = tpu.reciprocal %100 {approx = true} : vector<8x1xf32> -> vector<8x1xf32>
    %102 = vector.broadcast %101 : vector<8x1xf32> to vector<8x16xf32>
    %103 = arith.mulf %94, %102 : vector<8x16xf32>
    %104 = arith.truncf %103 : vector<8x16xf32> to vector<8x16xbf16>
    %cst_65 = arith.constant dense<0.000000e+00> : vector<8x32xf32>
    %105 = tpu.matmul %104, %75, %cst_65 {dimension_numbers = #tpu.dot_dimension_numbers<[1], [0], [0], [1], [0, 0, 1, 1], [], []>} : vector<8x16xbf16>, vector<16x32xbf16>, vector<8x32xf32> -> vector<8x32xf32>
    %106 = vector.extract_strided_slice %37 {offsets = [0, 64], sizes = [8, 32], strides = [1, 1]} : vector<8x128xbf16> to vector<8x32xbf16>
    %107 = vector.extract_strided_slice %38 {offsets = [0, 64], sizes = [16, 32], strides = [1, 1]} : vector<16x128xbf16> to vector<16x32xbf16>
    %108 = vector.extract_strided_slice %39 {offsets = [0, 64], sizes = [16, 32], strides = [1, 1]} : vector<16x128xbf16> to vector<16x32xbf16>
    %cst_66 = arith.constant dense<0.000000e+00> : vector<8x16xf32>
    %109 = tpu.matmul %106, %107, %cst_66 {dimension_numbers = #tpu.dot_dimension_numbers<[1], [1], [0], [0], [0, 0, 1, 0], [], []>} : vector<8x32xbf16>, vector<16x32xbf16>, vector<8x16xf32> -> vector<8x16xf32>
    %cst_67 = arith.constant 0.176776692 : f32
    %110 = vector.broadcast %cst_67 : f32 to vector<8x16xf32>
    %111 = arith.mulf %109, %110 : vector<8x16xf32>
    %112 = arith.addf %111, %36 : vector<8x16xf32>
    %c0_68 = arith.constant 0 : index
    %c2 = arith.constant 2 : index
    %c0_69 = arith.constant 0 : index
    %c0_70 = arith.constant 0 : index
    %113 = vector.load %arg16[%c0_68, %c2, %c0_69, %c0_70] : memref<1x4x8x16xf32, #tpu.memory_space<vmem>>, vector<1x1x8x16xf32>
    %114 = vector.shape_cast %113 : vector<1x1x8x16xf32> to vector<8x16xf32>
    %115 = arith.addf %114, %112 : vector<8x16xf32>
    %c0_71 = arith.constant 0 : index
    %c2_72 = arith.constant 2 : index
    %c0_73 = arith.constant 0 : index
    %c0_74 = arith.constant 0 : index
    %116 = vector.load %arg20[%c0_71, %c2_72, %c0_73, %c0_74] : memref<1x4x8x16xf32, #tpu.memory_space<vmem>>, vector<1x1x8x16xf32>
    %117 = vector.shape_cast %116 : vector<1x1x8x16xf32> to vector<8x16xf32>
    %118 = vector.shape_cast %115 : vector<8x16xf32> to vector<1x1x8x16xf32>
    tpu.vector_store %arg20[%c0_71, %c2_72, %c0_73, %c0_74], %118 {strides = array<i32>} : memref<1x4x8x16xf32, #tpu.memory_space<vmem>>, vector<1x1x8x16xf32>,
    %cst_75 = arith.constant 1.000000e+00 : f32
    %119 = vector.broadcast %cst_75 : f32 to vector<8x16xf32>
    %120 = arith.mulf %115, %119 : vector<8x16xf32>
    %cst_76 = arith.constant dense<0xFF800000> : vector<8xf32>
    %121 = vector.multi_reduction <maximumf>, %120, %cst_76 [1] : vector<8x16xf32> to vector<8xf32>
    %122 = vector.shape_cast %121 : vector<8xf32> to vector<8x1xf32>
    %cst_77 = arith.constant -3.000000e+38 : f32
    %123 = vector.broadcast %cst_77 : f32 to vector<8x1xf32>
    %124 = arith.maximumf %122, %123 : vector<8x1xf32>
    %125 = vector.broadcast %124 : vector<8x1xf32> to vector<8x16xf32>
    %126 = arith.subf %120, %125 : vector<8x16xf32>
    %127 = math.exp %126 : vector<8x16xf32>
    %cst_78 = arith.constant dense<0.000000e+00> : vector<8xf32>
    %128 = vector.multi_reduction <add>, %127, %cst_78 [1] : vector<8x16xf32> to vector<8xf32>
    %129 = vector.shape_cast %128 : vector<8xf32> to vector<8x1xf32>
    %cst_79 = arith.constant 0.000000e+00 : f32
    %130 = vector.broadcast %cst_79 : f32 to vector<8x1xf32>
    %131 = arith.cmpf ogt, %129, %130 : vector<8x1xf32>
    %cst_80 = arith.constant 1.000000e+00 : f32
    %132 = vector.broadcast %cst_80 : f32 to vector<8x1xf32>
    %133 = arith.select %131, %129, %132 : vector<8x1xi1>, vector<8x1xf32>
    %134 = tpu.reciprocal %133 {approx = true} : vector<8x1xf32> -> vector<8x1xf32>
    %135 = vector.broadcast %134 : vector<8x1xf32> to vector<8x16xf32>
    %136 = arith.mulf %127, %135 : vector<8x16xf32>
    %137 = arith.truncf %136 : vector<8x16xf32> to vector<8x16xbf16>
    %cst_81 = arith.constant dense<0.000000e+00> : vector<8x32xf32>
    %138 = tpu.matmul %137, %108, %cst_81 {dimension_numbers = #tpu.dot_dimension_numbers<[1], [0], [0], [1], [0, 0, 1, 1], [], []>} : vector<8x16xbf16>, vector<16x32xbf16>, vector<8x32xf32> -> vector<8x32xf32>
    %139 = vector.extract_strided_slice %37 {offsets = [0, 96], sizes = [8, 32], strides = [1, 1]} : vector<8x128xbf16> to vector<8x32xbf16>
    %140 = vector.extract_strided_slice %38 {offsets = [0, 96], sizes = [16, 32], strides = [1, 1]} : vector<16x128xbf16> to vector<16x32xbf16>
    %141 = vector.extract_strided_slice %39 {offsets = [0, 96], sizes = [16, 32], strides = [1, 1]} : vector<16x128xbf16> to vector<16x32xbf16>
    %cst_82 = arith.constant dense<0.000000e+00> : vector<8x16xf32>
    %142 = tpu.matmul %139, %140, %cst_82 {dimension_numbers = #tpu.dot_dimension_numbers<[1], [1], [0], [0], [0, 0, 1, 0], [], []>} : vector<8x32xbf16>, vector<16x32xbf16>, vector<8x16xf32> -> vector<8x16xf32>
    %cst_83 = arith.constant 0.176776692 : f32
    %143 = vector.broadcast %cst_83 : f32 to vector<8x16xf32>
    %144 = arith.mulf %142, %143 : vector<8x16xf32>
    %145 = arith.addf %144, %36 : vector<8x16xf32>
    %c0_84 = arith.constant 0 : index
    %c3 = arith.constant 3 : index
    %c0_85 = arith.constant 0 : index
    %c0_86 = arith.constant 0 : index
    %146 = vector.load %arg16[%c0_84, %c3, %c0_85, %c0_86] : memref<1x4x8x16xf32, #tpu.memory_space<vmem>>, vector<1x1x8x16xf32>
    %147 = vector.shape_cast %146 : vector<1x1x8x16xf32> to vector<8x16xf32>
    %148 = arith.addf %147, %145 : vector<8x16xf32>
    %c0_87 = arith.constant 0 : index
    %c3_88 = arith.constant 3 : index
    %c0_89 = arith.constant 0 : index
    %c0_90 = arith.constant 0 : index
    %149 = vector.load %arg20[%c0_87, %c3_88, %c0_89, %c0_90] : memref<1x4x8x16xf32, #tpu.memory_space<vmem>>, vector<1x1x8x16xf32>
    %150 = vector.shape_cast %149 : vector<1x1x8x16xf32> to vector<8x16xf32>
    %151 = vector.shape_cast %148 : vector<8x16xf32> to vector<1x1x8x16xf32>
    tpu.vector_store %arg20[%c0_87, %c3_88, %c0_89, %c0_90], %151 {strides = array<i32>} : memref<1x4x8x16xf32, #tpu.memory_space<vmem>>, vector<1x1x8x16xf32>,
    %cst_91 = arith.constant 1.000000e+00 : f32
    %152 = vector.broadcast %cst_91 : f32 to vector<8x16xf32>
    %153 = arith.mulf %148, %152 : vector<8x16xf32>
    %cst_92 = arith.constant dense<0xFF800000> : vector<8xf32>
    %154 = vector.multi_reduction <maximumf>, %153, %cst_92 [1] : vector<8x16xf32> to vector<8xf32>
    %155 = vector.shape_cast %154 : vector<8xf32> to vector<8x1xf32>
    %cst_93 = arith.constant -3.000000e+38 : f32
    %156 = vector.broadcast %cst_93 : f32 to vector<8x1xf32>
    %157 = arith.maximumf %155, %156 : vector<8x1xf32>
    %158 = vector.broadcast %157 : vector<8x1xf32> to vector<8x16xf32>
    %159 = arith.subf %153, %158 : vector<8x16xf32>
    %160 = math.exp %159 : vector<8x16xf32>
    %cst_94 = arith.constant dense<0.000000e+00> : vector<8xf32>
    %161 = vector.multi_reduction <add>, %160, %cst_94 [1] : vector<8x16xf32> to vector<8xf32>
    %162 = vector.shape_cast %161 : vector<8xf32> to vector<8x1xf32>
    %cst_95 = arith.constant 0.000000e+00 : f32
    %163 = vector.broadcast %cst_95 : f32 to vector<8x1xf32>
    %164 = arith.cmpf ogt, %162, %163 : vector<8x1xf32>
    %cst_96 = arith.constant 1.000000e+00 : f32
    %165 = vector.broadcast %cst_96 : f32 to vector<8x1xf32>
    %166 = arith.select %164, %162, %165 : vector<8x1xi1>, vector<8x1xf32>
    %167 = tpu.reciprocal %166 {approx = true} : vector<8x1xf32> -> vector<8x1xf32>
    %168 = vector.broadcast %167 : vector<8x1xf32> to vector<8x16xf32>
    %169 = arith.mulf %160, %168 : vector<8x16xf32>
    %170 = arith.truncf %169 : vector<8x16xf32> to vector<8x16xbf16>
    %cst_97 = arith.constant dense<0.000000e+00> : vector<8x32xf32>
    %171 = tpu.matmul %170, %141, %cst_97 {dimension_numbers = #tpu.dot_dimension_numbers<[1], [0], [0], [1], [0, 0, 1, 1], [], []>} : vector<8x16xbf16>, vector<16x32xbf16>, vector<8x32xf32> -> vector<8x32xf32>
    %172 = tpu.concatenate %72, %105, %138, %171 in 1 : vector<8x32xf32>, vector<8x32xf32>, vector<8x32xf32>, vector<8x32xf32> -> vector<8x128xf32>
    %173 = arith.truncf %172 : vector<8x128xf32> to vector<8x128xbf16>
    %c0_98 = arith.constant 0 : index
    %c0_99 = arith.constant 0 : index
    %174 = vector.load %arg7[%c0_98, %c0_99] : memref<128x128xbf16, #tpu.memory_space<vmem>>, vector<128x128xbf16>
    %cst_100 = arith.constant dense<0.000000e+00> : vector<8x128xf32>
    %175 = tpu.matmul %173, %174, %cst_100 {dimension_numbers = #tpu.dot_dimension_numbers<[1], [0], [0], [1], [0, 0, 1, 1], [], []>} : vector<8x128xbf16>, vector<128x128xbf16>, vector<8x128xf32> -> vector<8x128xf32>
    %cst_101 = arith.constant 1.39495885 : f32
    %176 = vector.broadcast %cst_101 : f32 to vector<8x128xf32>
    %177 = arith.mulf %175, %176 : vector<8x128xf32>
    %178 = arith.extf %1 : vector<8x128xbf16> to vector<8x128xf32>
    %179 = arith.addf %177, %178 : vector<8x128xf32>
    %cst_102 = arith.constant dense<0.000000e+00> : vector<8xf32>
    %180 = vector.multi_reduction <add>, %179, %cst_102 [1] : vector<8x128xf32> to vector<8xf32>
    %181 = vector.shape_cast %180 : vector<8xf32> to vector<8x1xf32>
    %cst_103 = arith.constant 1.280000e+02 : f32
    %182 = vector.broadcast %cst_103 : f32 to vector<8x1xf32>
    %183 = arith.divf %181, %182 : vector<8x1xf32>
    %184 = vector.broadcast %183 : vector<8x1xf32> to vector<8x128xf32>
    %185 = arith.subf %179, %184 : vector<8x128xf32>
    %186 = arith.mulf %185, %185 : vector<8x128xf32>
    %cst_104 = arith.constant dense<0.000000e+00> : vector<8xf32>
    %187 = vector.multi_reduction <add>, %186, %cst_104 [1] : vector<8x128xf32> to vector<8xf32>
    %188 = vector.shape_cast %187 : vector<8xf32> to vector<8x1xf32>
    %cst_105 = arith.constant 1.280000e+02 : f32
    %189 = vector.broadcast %cst_105 : f32 to vector<8x1xf32>
    %190 = arith.divf %188, %189 : vector<8x1xf32>
    %191 = vector.broadcast %183 : vector<8x1xf32> to vector<8x128xf32>
    %192 = arith.subf %179, %191 : vector<8x128xf32>
    %cst_106 = arith.constant 9.99999974E-6 : f32
    %193 = vector.broadcast %cst_106 : f32 to vector<8x1xf32>
    %194 = arith.addf %190, %193 : vector<8x1xf32>
    %195 = math.rsqrt %194 : vector<8x1xf32>
    %196 = vector.broadcast %195 : vector<8x1xf32> to vector<8x128xf32>
    %197 = arith.mulf %192, %196 : vector<8x128xf32>
    %c0_107 = arith.constant 0 : index
    %c0_108 = arith.constant 0 : index
    %198 = vector.load %arg17[%c0_107, %c0_108] : memref<1x128xf32, #tpu.memory_space<vmem>>, vector<1x128xf32>
    %199 = vector.broadcast %198 : vector<1x128xf32> to vector<8x128xf32>
    %200 = arith.mulf %197, %199 : vector<8x128xf32>
    %c0_109 = arith.constant 0 : index
    %c0_110 = arith.constant 0 : index
    %201 = vector.load %arg18[%c0_109, %c0_110] : memref<1x128xf32, #tpu.memory_space<vmem>>, vector<1x128xf32>
    %202 = vector.broadcast %201 : vector<1x128xf32> to vector<8x128xf32>
    %203 = arith.addf %200, %202 : vector<8x128xf32>
    %204 = arith.truncf %203 : vector<8x128xf32> to vector<8x128xbf16>
    %c0_111 = arith.constant 0 : index
    %c0_112 = arith.constant 0 : index
    %c0_113 = arith.constant 0 : index
    %205 = vector.load %arg19[%c0_111, %c0_112, %c0_113] : memref<1x8x128xbf16, #tpu.memory_space<vmem>>, vector<1x8x128xbf16>
    %206 = vector.shape_cast %205 : vector<1x8x128xbf16> to vector<8x128xbf16>
    %207 = vector.shape_cast %204 : vector<8x128xbf16> to vector<1x8x128xbf16>
    tpu.vector_store %arg19[%c0_111, %c0_112, %c0_113], %207 {strides = array<i32>} : memref<1x8x128xbf16, #tpu.memory_space<vmem>>, vector<1x8x128xbf16>,
    return
  }
  func.func @transform_0(%arg0: i32, %arg1: i32) -> (i32, i32, i32) {
    %c0_i32 = arith.constant 0 : i32
    %c0_i32_0 = arith.constant 0 : i32
    return %arg0, %arg1, %c0_i32 : i32, i32, i32
  }
  func.func @transform_1(%arg0: i32, %arg1: i32) -> (i32, i32, i32) {
    %c0_i32 = arith.constant 0 : i32
    %c0_i32_0 = arith.constant 0 : i32
    %c0_i32_1 = arith.constant 0 : i32
    return %arg0, %c0_i32, %c0_i32_0 : i32, i32, i32
  }
  func.func @transform_2(%arg0: i32, %arg1: i32) -> (i32, i32) {
    %c0_i32 = arith.constant 0 : i32
    %c0_i32_0 = arith.constant 0 : i32
    %c0_i32_1 = arith.constant 0 : i32
    return %c0_i32, %c0_i32_0 : i32, i32
  }
  func.func @transform_3(%arg0: i32, %arg1: i32) -> (i32, i32) {
    %c0_i32 = arith.constant 0 : i32
    %c0_i32_0 = arith.constant 0 : i32
    %c0_i32_1 = arith.constant 0 : i32
    return %c0_i32, %c0_i32_0 : i32, i32
  }
  func.func @transform_4(%arg0: i32, %arg1: i32) -> (i32, i32) {
    %c0_i32 = arith.constant 0 : i32
    %c0_i32_0 = arith.constant 0 : i32
    %c0_i32_1 = arith.constant 0 : i32
    return %c0_i32, %c0_i32_0 : i32, i32
  }
  func.func @transform_5(%arg0: i32, %arg1: i32) -> (i32, i32) {
    %c0_i32 = arith.constant 0 : i32
    %c0_i32_0 = arith.constant 0 : i32
    %c0_i32_1 = arith.constant 0 : i32
    return %c0_i32, %c0_i32_0 : i32, i32
  }
  func.func @transform_6(%arg0: i32, %arg1: i32) -> (i32, i32) {
    %c0_i32 = arith.constant 0 : i32
    %c0_i32_0 = arith.constant 0 : i32
    return %arg1, %c0_i32 : i32, i32
  }
  func.func @transform_7(%arg0: i32, %arg1: i32) -> (i32, i32) {
    %c0_i32 = arith.constant 0 : i32
    %c0_i32_0 = arith.constant 0 : i32
    return %arg1, %c0_i32 : i32, i32
  }
  func.func @transform_8(%arg0: i32, %arg1: i32) -> (i32, i32) {
    %c0_i32 = arith.constant 0 : i32
    %c0_i32_0 = arith.constant 0 : i32
    return %arg1, %c0_i32 : i32, i32
  }
  func.func @transform_9(%arg0: i32, %arg1: i32) -> (i32, i32) {
    %c0_i32 = arith.constant 0 : i32
    %c0_i32_0 = arith.constant 0 : i32
    %c0_i32_1 = arith.constant 0 : i32
    return %c0_i32, %c0_i32_0 : i32, i32
  }
  func.func @transform_10(%arg0: i32, %arg1: i32) -> (i32, i32) {
    %c0_i32 = arith.constant 0 : i32
    %c0_i32_0 = arith.constant 0 : i32
    %c0_i32_1 = arith.constant 0 : i32
    return %c0_i32, %c0_i32_0 : i32, i32
  }
  func.func @transform_11(%arg0: i32, %arg1: i32) -> (i32, i32) {
    %c0_i32 = arith.constant 0 : i32
    %c0_i32_0 = arith.constant 0 : i32
    %c0_i32_1 = arith.constant 0 : i32
    return %c0_i32, %c0_i32_0 : i32, i32
  }
  func.func @transform_12(%arg0: i32, %arg1: i32) -> (i32, i32, i32) {
    %c0_i32 = arith.constant 0 : i32
    %c0_i32_0 = arith.constant 0 : i32
    return %arg0, %arg1, %c0_i32 : i32, i32, i32
  }
  func.func @transform_13(%arg0: i32, %arg1: i32) -> (i32, i32, i32) {
    %c0_i32 = arith.constant 0 : i32
    %c0_i32_0 = arith.constant 0 : i32
    %c0_i32_1 = arith.constant 0 : i32
    return %arg0, %c0_i32, %c0_i32_0 : i32, i32, i32
  }
  func.func @transform_14(%arg0: i32, %arg1: i32) -> (i32, i32, i32, i32) {
    %c0_i32 = arith.constant 0 : i32
    %c0_i32_0 = arith.constant 0 : i32
    %c0_i32_1 = arith.constant 0 : i32
    return %arg0, %c0_i32, %arg1, %c0_i32_0 : i32, i32, i32, i32
  }
  func.func @transform_15(%arg0: i32, %arg1: i32) -> (i32, i32) {
    %c0_i32 = arith.constant 0 : i32
    %c0_i32_0 = arith.constant 0 : i32
    %c0_i32_1 = arith.constant 0 : i32
    return %c0_i32, %c0_i32_0 : i32, i32
  }
  func.func @transform_16(%arg0: i32, %arg1: i32) -> (i32, i32) {
    %c0_i32 = arith.constant 0 : i32
    %c0_i32_0 = arith.constant 0 : i32
    %c0_i32_1 = arith.constant 0 : i32
    return %c0_i32, %c0_i32_0 : i32, i32
  }
  func.func @transform_17(%arg0: i32, %arg1: i32) -> (i32, i32, i32) {
    %c0_i32 = arith.constant 0 : i32
    %c0_i32_0 = arith.constant 0 : i32
    return %arg0, %arg1, %c0_i32 : i32, i32, i32
  }
  func.func @transform_18(%arg0: i32, %arg1: i32) -> (i32, i32, i32, i32) {
    %c0_i32 = arith.constant 0 : i32
    %c0_i32_0 = arith.constant 0 : i32
    %c0_i32_1 = arith.constant 0 : i32
    return %arg0, %c0_i32, %arg1, %c0_i32_0 : i32, i32, i32, i32
  }
}

module attributes {stable_mosaic.version = 11 : i64} {
  func.func @_attn_kernel(%arg0: i32, %arg1: i32, %arg2: memref<1x8x128xbf16, #tpu.memory_space<vmem>>, %arg3: memref<1x8x128xbf16, #tpu.memory_space<vmem>>, %arg4: memref<128x128xbf16, #tpu.memory_space<vmem>>, %arg5: memref<128x128xbf16, #tpu.memory_space<vmem>>, %arg6: memref<128x128xbf16, #tpu.memory_space<vmem>>, %arg7: memref<128x128xbf16, #tpu.memory_space<vmem>>, %arg8: memref<8x128xf32, #tpu.memory_space<vmem>>, %arg9: memref<8x128xf32, #tpu.memory_space<vmem>>, %arg10: memref<8x128xf32, #tpu.memory_space<vmem>>, %arg11: memref<8x128xf32, #tpu.memory_space<vmem>>, %arg12: memref<8x128xf32, #tpu.memory_space<vmem>>, %arg13: memref<8x128xf32, #tpu.memory_space<vmem>>, %arg14: memref<1x8x1xf32, #tpu.memory_space<vmem>>, %arg15: memref<1x1x8xf32, #tpu.memory_space<vmem>>, %arg16: memref<1x4x8x8xf32, #tpu.memory_space<vmem>>, %arg17: memref<1x128xf32, #tpu.memory_space<vmem>>, %arg18: memref<1x128xf32, #tpu.memory_space<vmem>>, %arg19: memref<1x8x128xbf16, #tpu.memory_space<vmem>>, %arg20: memref<1x4x8x8xf32, #tpu.memory_space<vmem>>) attributes {dimension_semantics = [#tpu.dimension_semantics<parallel>, #tpu.dimension_semantics<parallel>], iteration_bounds = array<i64: 2, 1>, scalar_prefetch = 0 : i64, scratch_operands = 0 : i64, tpu.core_type = #tpu.core_type<tc>, window_params = [{transform_indices = @transform_0, window_bounds = array<i64: 1, 8, 128>}, {transform_indices = @transform_1, window_bounds = array<i64: 1, 8, 128>}, {pipeline_mode = #tpu.pipeline_mode<synchronous>, transform_indices = @transform_2, window_bounds = array<i64: 128, 128>}, {pipeline_mode = #tpu.pipeline_mode<synchronous>, transform_indices = @transform_3, window_bounds = array<i64: 128, 128>}, {pipeline_mode = #tpu.pipeline_mode<synchronous>, transform_indices = @transform_4, window_bounds = array<i64: 128, 128>}, {pipeline_mode = #tpu.pipeline_mode<synchronous>, transform_indices = @transform_5, window_bounds = array<i64: 128, 128>}, {transform_indices = @transform_6, window_bounds = array<i64: 8, 128>}, {transform_indices = @transform_7, window_bounds = array<i64: 8, 128>}, {transform_indices = @transform_8, window_bounds = array<i64: 8, 128>}, {pipeline_mode = #tpu.pipeline_mode<synchronous>, transform_indices = @transform_9, window_bounds = array<i64: 8, 128>}, {pipeline_mode = #tpu.pipeline_mode<synchronous>, transform_indices = @transform_10, window_bounds = array<i64: 8, 128>}, {pipeline_mode = #tpu.pipeline_mode<synchronous>, transform_indices = @transform_11, window_bounds = array<i64: 8, 128>}, {transform_indices = @transform_12, window_bounds = array<i64: 1, 8, 1>}, {transform_indices = @transform_13, window_bounds = array<i64: 1, 1, 8>}, {transform_indices = @transform_14, window_bounds = array<i64: 1, 4, 8, 8>}, {pipeline_mode = #tpu.pipeline_mode<synchronous>, transform_indices = @transform_15, window_bounds = array<i64: 1, 128>}, {pipeline_mode = #tpu.pipeline_mode<synchronous>, transform_indices = @transform_16, window_bounds = array<i64: 1, 128>}, {transform_indices = @transform_17, window_bounds = array<i64: 1, 8, 128>}, {transform_indices = @transform_18, window_bounds = array<i64: 1, 4, 8, 8>}]} {
    %c0 = arith.constant 0 : index
    %c0_0 = arith.constant 0 : index
    %c0_1 = arith.constant 0 : index
    %0 = vector.load %arg2[%c0, %c0_0, %c0_1] : memref<1x8x128xbf16, #tpu.memory_space<vmem>>, vector<1x8x128xbf16>
    %1 = vector.shape_cast %0 : vector<1x8x128xbf16> to vector<8x128xbf16>
    %c0_2 = arith.constant 0 : index
    %c0_3 = arith.constant 0 : index
    %c0_4 = arith.constant 0 : index
    %2 = vector.load %arg3[%c0_2, %c0_3, %c0_4] : memref<1x8x128xbf16, #tpu.memory_space<vmem>>, vector<1x8x128xbf16>
    %3 = vector.shape_cast %2 : vector<1x8x128xbf16> to vector<8x128xbf16>
    %c0_5 = arith.constant 0 : index
    %c0_6 = arith.constant 0 : index
    %4 = vector.load %arg4[%c0_5, %c0_6] : memref<128x128xbf16, #tpu.memory_space<vmem>>, vector<128x128xbf16>
    %cst = arith.constant dense<0.000000e+00> : vector<8x128xf32>
    %5 = tpu.matmul %1, %4, %cst {dimension_numbers = #tpu.dot_dimension_numbers<[1], [0], [0], [1], [0, 0, 1, 1], [], []>} : vector<8x128xbf16>, vector<128x128xbf16>, vector<8x128xf32> -> vector<8x128xf32>
    %c0_7 = arith.constant 0 : index
    %c0_8 = arith.constant 0 : index
    %6 = vector.load %arg8[%c0_7, %c0_8] : memref<8x128xf32, #tpu.memory_space<vmem>>, vector<8x128xf32>
    %c0_9 = arith.constant 0 : index
    %c0_10 = arith.constant 0 : index
    %7 = vector.load %arg9[%c0_9, %c0_10] : memref<8x128xf32, #tpu.memory_space<vmem>>, vector<8x128xf32>
    %c0_11 = arith.constant 0 : index
    %c0_12 = arith.constant 0 : index
    %8 = vector.load %arg10[%c0_11, %c0_12] : memref<8x128xf32, #tpu.memory_space<vmem>>, vector<8x128xf32>
    %c127_i32 = arith.constant 127 : i32
    %9 = tpu.dynamic_rotate %5 by %c127_i32 dim 1 : vector<8x128xf32>, i32 -> vector<8x128xf32>
    %c1_i32 = arith.constant 1 : i32
    %10 = tpu.dynamic_rotate %5 by %c1_i32 dim 1 : vector<8x128xf32>, i32 -> vector<8x128xf32>
    %11 = arith.mulf %5, %6 : vector<8x128xf32>
    %12 = arith.mulf %9, %7 : vector<8x128xf32>
    %13 = arith.addf %11, %12 : vector<8x128xf32>
    %14 = arith.mulf %10, %8 : vector<8x128xf32>
    %15 = arith.addf %13, %14 : vector<8x128xf32>
    %c0_13 = arith.constant 0 : index
    %c0_14 = arith.constant 0 : index
    %16 = vector.load %arg5[%c0_13, %c0_14] : memref<128x128xbf16, #tpu.memory_space<vmem>>, vector<128x128xbf16>
    %cst_15 = arith.constant dense<0.000000e+00> : vector<8x128xf32>
    %17 = tpu.matmul %3, %16, %cst_15 {dimension_numbers = #tpu.dot_dimension_numbers<[1], [0], [0], [1], [0, 0, 1, 1], [], []>} : vector<8x128xbf16>, vector<128x128xbf16>, vector<8x128xf32> -> vector<8x128xf32>
    %c0_16 = arith.constant 0 : index
    %c0_17 = arith.constant 0 : index
    %18 = vector.load %arg11[%c0_16, %c0_17] : memref<8x128xf32, #tpu.memory_space<vmem>>, vector<8x128xf32>
    %c0_18 = arith.constant 0 : index
    %c0_19 = arith.constant 0 : index
    %19 = vector.load %arg12[%c0_18, %c0_19] : memref<8x128xf32, #tpu.memory_space<vmem>>, vector<8x128xf32>
    %c0_20 = arith.constant 0 : index
    %c0_21 = arith.constant 0 : index
    %20 = vector.load %arg13[%c0_20, %c0_21] : memref<8x128xf32, #tpu.memory_space<vmem>>, vector<8x128xf32>
    %c127_i32_22 = arith.constant 127 : i32
    %21 = tpu.dynamic_rotate %17 by %c127_i32_22 dim 1 : vector<8x128xf32>, i32 -> vector<8x128xf32>
    %c1_i32_23 = arith.constant 1 : i32
    %22 = tpu.dynamic_rotate %17 by %c1_i32_23 dim 1 : vector<8x128xf32>, i32 -> vector<8x128xf32>
    %23 = arith.mulf %17, %18 : vector<8x128xf32>
    %24 = arith.mulf %21, %19 : vector<8x128xf32>
    %25 = arith.addf %23, %24 : vector<8x128xf32>
    %26 = arith.mulf %22, %20 : vector<8x128xf32>
    %27 = arith.addf %25, %26 : vector<8x128xf32>
    %c0_24 = arith.constant 0 : index
    %c0_25 = arith.constant 0 : index
    %28 = vector.load %arg6[%c0_24, %c0_25] : memref<128x128xbf16, #tpu.memory_space<vmem>>, vector<128x128xbf16>
    %cst_26 = arith.constant dense<0.000000e+00> : vector<8x128xf32>
    %29 = tpu.matmul %3, %28, %cst_26 {dimension_numbers = #tpu.dot_dimension_numbers<[1], [0], [0], [1], [0, 0, 1, 1], [], []>} : vector<8x128xbf16>, vector<128x128xbf16>, vector<8x128xf32> -> vector<8x128xf32>
    %c0_27 = arith.constant 0 : index
    %c0_28 = arith.constant 0 : index
    %c0_29 = arith.constant 0 : index
    %30 = vector.load %arg14[%c0_27, %c0_28, %c0_29] : memref<1x8x1xf32, #tpu.memory_space<vmem>>, vector<1x8x1xf32>
    %31 = vector.shape_cast %30 : vector<1x8x1xf32> to vector<8x1xf32>
    %c0_30 = arith.constant 0 : index
    %c0_31 = arith.constant 0 : index
    %c0_32 = arith.constant 0 : index
    %32 = vector.load %arg15[%c0_30, %c0_31, %c0_32] : memref<1x1x8xf32, #tpu.memory_space<vmem>>, vector<1x1x8xf32>
    %33 = vector.shape_cast %32 : vector<1x1x8xf32> to vector<1x8xf32>
    %34 = vector.broadcast %31 : vector<8x1xf32> to vector<8x8xf32>
    %35 = vector.broadcast %33 : vector<1x8xf32> to vector<8x8xf32>
    %36 = arith.addf %34, %35 : vector<8x8xf32>
    %37 = tpu.iota {dimensions = array<i32: 0>} : vector<8x8xi32>
    %c8_i32 = arith.constant 8 : i32
    %38 = arith.muli %arg1, %c8_i32 : i32
    %39 = vector.broadcast %38 : i32 to vector<8x8xi32>
    %40 = arith.addi %37, %39 : vector<8x8xi32>
    %41 = tpu.iota {dimensions = array<i32: 1>} : vector<8x8xi32>
    %42 = arith.cmpi sgt, %41, %40 : vector<8x8xi32>
    %cst_33 = arith.constant 0xFF800000 : f32
    %43 = vector.broadcast %cst_33 : f32 to vector<8x8xf32>
    %44 = arith.select %42, %43, %36 : vector<8x8xi1>, vector<8x8xf32>
    %45 = arith.truncf %15 : vector<8x128xf32> to vector<8x128xbf16>
    %46 = arith.truncf %27 : vector<8x128xf32> to vector<8x128xbf16>
    %47 = arith.truncf %29 : vector<8x128xf32> to vector<8x128xbf16>
    %48 = vector.extract_strided_slice %45 {offsets = [0, 0], sizes = [8, 32], strides = [1, 1]} : vector<8x128xbf16> to vector<8x32xbf16>
    %49 = vector.extract_strided_slice %46 {offsets = [0, 0], sizes = [8, 32], strides = [1, 1]} : vector<8x128xbf16> to vector<8x32xbf16>
    %50 = vector.extract_strided_slice %47 {offsets = [0, 0], sizes = [8, 32], strides = [1, 1]} : vector<8x128xbf16> to vector<8x32xbf16>
    %cst_34 = arith.constant dense<0.000000e+00> : vector<8x8xf32>
    %51 = tpu.matmul %48, %49, %cst_34 {dimension_numbers = #tpu.dot_dimension_numbers<[1], [1], [0], [0], [0, 0, 1, 0], [], []>} : vector<8x32xbf16>, vector<8x32xbf16>, vector<8x8xf32> -> vector<8x8xf32>
    %cst_35 = arith.constant 0.176776692 : f32
    %52 = vector.broadcast %cst_35 : f32 to vector<8x8xf32>
    %53 = arith.mulf %51, %52 : vector<8x8xf32>
    %54 = arith.addf %53, %44 : vector<8x8xf32>
    %c0_36 = arith.constant 0 : index
    %c0_37 = arith.constant 0 : index
    %c0_38 = arith.constant 0 : index
    %c0_39 = arith.constant 0 : index
    %55 = vector.load %arg16[%c0_36, %c0_37, %c0_38, %c0_39] : memref<1x4x8x8xf32, #tpu.memory_space<vmem>>, vector<1x1x8x8xf32>
    %56 = vector.shape_cast %55 : vector<1x1x8x8xf32> to vector<8x8xf32>
    %57 = arith.addf %56, %54 : vector<8x8xf32>
    %c0_40 = arith.constant 0 : index
    %c0_41 = arith.constant 0 : index
    %c0_42 = arith.constant 0 : index
    %c0_43 = arith.constant 0 : index
    %58 = vector.load %arg20[%c0_40, %c0_41, %c0_42, %c0_43] : memref<1x4x8x8xf32, #tpu.memory_space<vmem>>, vector<1x1x8x8xf32>
    %59 = vector.shape_cast %58 : vector<1x1x8x8xf32> to vector<8x8xf32>
    %60 = vector.shape_cast %57 : vector<8x8xf32> to vector<1x1x8x8xf32>
    tpu.vector_store %arg20[%c0_40, %c0_41, %c0_42, %c0_43], %60 {strides = array<i32>} : memref<1x4x8x8xf32, #tpu.memory_space<vmem>>, vector<1x1x8x8xf32>,
    %cst_44 = arith.constant 5.000000e-01 : f32
    %61 = vector.broadcast %cst_44 : f32 to vector<8x8xf32>
    %62 = arith.mulf %57, %61 : vector<8x8xf32>
    %cst_45 = arith.constant dense<0xFF800000> : vector<8xf32>
    %63 = vector.multi_reduction <maximumf>, %62, %cst_45 [1] : vector<8x8xf32> to vector<8xf32>
    %64 = vector.shape_cast %63 : vector<8xf32> to vector<8x1xf32>
    %cst_46 = arith.constant -3.000000e+38 : f32
    %65 = vector.broadcast %cst_46 : f32 to vector<8x1xf32>
    %66 = arith.maximumf %64, %65 : vector<8x1xf32>
    %67 = vector.broadcast %66 : vector<8x1xf32> to vector<8x8xf32>
    %68 = arith.subf %62, %67 : vector<8x8xf32>
    %69 = math.exp %68 : vector<8x8xf32>
    %cst_47 = arith.constant dense<0.000000e+00> : vector<8xf32>
    %70 = vector.multi_reduction <add>, %69, %cst_47 [1] : vector<8x8xf32> to vector<8xf32>
    %71 = vector.shape_cast %70 : vector<8xf32> to vector<8x1xf32>
    %cst_48 = arith.constant 0.000000e+00 : f32
    %72 = vector.broadcast %cst_48 : f32 to vector<8x1xf32>
    %73 = arith.cmpf ogt, %71, %72 : vector<8x1xf32>
    %cst_49 = arith.constant 1.000000e+00 : f32
    %74 = vector.broadcast %cst_49 : f32 to vector<8x1xf32>
    %75 = arith.select %73, %71, %74 : vector<8x1xi1>, vector<8x1xf32>
    %76 = tpu.reciprocal %75 {approx = true} : vector<8x1xf32> -> vector<8x1xf32>
    %77 = vector.broadcast %76 : vector<8x1xf32> to vector<8x8xf32>
    %78 = arith.mulf %69, %77 : vector<8x8xf32>
    %79 = arith.truncf %78 : vector<8x8xf32> to vector<8x8xbf16>
    %cst_50 = arith.constant dense<0.000000e+00> : vector<8x32xf32>
    %80 = tpu.matmul %79, %50, %cst_50 {dimension_numbers = #tpu.dot_dimension_numbers<[1], [0], [0], [1], [0, 0, 1, 1], [], []>} : vector<8x8xbf16>, vector<8x32xbf16>, vector<8x32xf32> -> vector<8x32xf32>
    %81 = vector.extract_strided_slice %45 {offsets = [0, 32], sizes = [8, 32], strides = [1, 1]} : vector<8x128xbf16> to vector<8x32xbf16>
    %82 = vector.extract_strided_slice %46 {offsets = [0, 32], sizes = [8, 32], strides = [1, 1]} : vector<8x128xbf16> to vector<8x32xbf16>
    %83 = vector.extract_strided_slice %47 {offsets = [0, 32], sizes = [8, 32], strides = [1, 1]} : vector<8x128xbf16> to vector<8x32xbf16>
    %cst_51 = arith.constant dense<0.000000e+00> : vector<8x8xf32>
    %84 = tpu.matmul %81, %82, %cst_51 {dimension_numbers = #tpu.dot_dimension_numbers<[1], [1], [0], [0], [0, 0, 1, 0], [], []>} : vector<8x32xbf16>, vector<8x32xbf16>, vector<8x8xf32> -> vector<8x8xf32>
    %cst_52 = arith.constant 0.176776692 : f32
    %85 = vector.broadcast %cst_52 : f32 to vector<8x8xf32>
    %86 = arith.mulf %84, %85 : vector<8x8xf32>
    %87 = arith.addf %86, %44 : vector<8x8xf32>
    %c0_53 = arith.constant 0 : index
    %c1 = arith.constant 1 : index
    %c0_54 = arith.constant 0 : index
    %c0_55 = arith.constant 0 : index
    %88 = vector.load %arg16[%c0_53, %c1, %c0_54, %c0_55] : memref<1x4x8x8xf32, #tpu.memory_space<vmem>>, vector<1x1x8x8xf32>
    %89 = vector.shape_cast %88 : vector<1x1x8x8xf32> to vector<8x8xf32>
    %90 = arith.addf %89, %87 : vector<8x8xf32>
    %c0_56 = arith.constant 0 : index
    %c1_57 = arith.constant 1 : index
    %c0_58 = arith.constant 0 : index
    %c0_59 = arith.constant 0 : index
    %91 = vector.load %arg20[%c0_56, %c1_57, %c0_58, %c0_59] : memref<1x4x8x8xf32, #tpu.memory_space<vmem>>, vector<1x1x8x8xf32>
    %92 = vector.shape_cast %91 : vector<1x1x8x8xf32> to vector<8x8xf32>
    %93 = vector.shape_cast %90 : vector<8x8xf32> to vector<1x1x8x8xf32>
    tpu.vector_store %arg20[%c0_56, %c1_57, %c0_58, %c0_59], %93 {strides = array<i32>} : memref<1x4x8x8xf32, #tpu.memory_space<vmem>>, vector<1x1x8x8xf32>,
    %cst_60 = arith.constant 5.000000e-01 : f32
    %94 = vector.broadcast %cst_60 : f32 to vector<8x8xf32>
    %95 = arith.mulf %90, %94 : vector<8x8xf32>
    %cst_61 = arith.constant dense<0xFF800000> : vector<8xf32>
    %96 = vector.multi_reduction <maximumf>, %95, %cst_61 [1] : vector<8x8xf32> to vector<8xf32>
    %97 = vector.shape_cast %96 : vector<8xf32> to vector<8x1xf32>
    %cst_62 = arith.constant -3.000000e+38 : f32
    %98 = vector.broadcast %cst_62 : f32 to vector<8x1xf32>
    %99 = arith.maximumf %97, %98 : vector<8x1xf32>
    %100 = vector.broadcast %99 : vector<8x1xf32> to vector<8x8xf32>
    %101 = arith.subf %95, %100 : vector<8x8xf32>
    %102 = math.exp %101 : vector<8x8xf32>
    %cst_63 = arith.constant dense<0.000000e+00> : vector<8xf32>
    %103 = vector.multi_reduction <add>, %102, %cst_63 [1] : vector<8x8xf32> to vector<8xf32>
    %104 = vector.shape_cast %103 : vector<8xf32> to vector<8x1xf32>
    %cst_64 = arith.constant 0.000000e+00 : f32
    %105 = vector.broadcast %cst_64 : f32 to vector<8x1xf32>
    %106 = arith.cmpf ogt, %104, %105 : vector<8x1xf32>
    %cst_65 = arith.constant 1.000000e+00 : f32
    %107 = vector.broadcast %cst_65 : f32 to vector<8x1xf32>
    %108 = arith.select %106, %104, %107 : vector<8x1xi1>, vector<8x1xf32>
    %109 = tpu.reciprocal %108 {approx = true} : vector<8x1xf32> -> vector<8x1xf32>
    %110 = vector.broadcast %109 : vector<8x1xf32> to vector<8x8xf32>
    %111 = arith.mulf %102, %110 : vector<8x8xf32>
    %112 = arith.truncf %111 : vector<8x8xf32> to vector<8x8xbf16>
    %cst_66 = arith.constant dense<0.000000e+00> : vector<8x32xf32>
    %113 = tpu.matmul %112, %83, %cst_66 {dimension_numbers = #tpu.dot_dimension_numbers<[1], [0], [0], [1], [0, 0, 1, 1], [], []>} : vector<8x8xbf16>, vector<8x32xbf16>, vector<8x32xf32> -> vector<8x32xf32>
    %114 = vector.extract_strided_slice %45 {offsets = [0, 64], sizes = [8, 32], strides = [1, 1]} : vector<8x128xbf16> to vector<8x32xbf16>
    %115 = vector.extract_strided_slice %46 {offsets = [0, 64], sizes = [8, 32], strides = [1, 1]} : vector<8x128xbf16> to vector<8x32xbf16>
    %116 = vector.extract_strided_slice %47 {offsets = [0, 64], sizes = [8, 32], strides = [1, 1]} : vector<8x128xbf16> to vector<8x32xbf16>
    %cst_67 = arith.constant dense<0.000000e+00> : vector<8x8xf32>
    %117 = tpu.matmul %114, %115, %cst_67 {dimension_numbers = #tpu.dot_dimension_numbers<[1], [1], [0], [0], [0, 0, 1, 0], [], []>} : vector<8x32xbf16>, vector<8x32xbf16>, vector<8x8xf32> -> vector<8x8xf32>
    %cst_68 = arith.constant 0.176776692 : f32
    %118 = vector.broadcast %cst_68 : f32 to vector<8x8xf32>
    %119 = arith.mulf %117, %118 : vector<8x8xf32>
    %120 = arith.addf %119, %44 : vector<8x8xf32>
    %c0_69 = arith.constant 0 : index
    %c2 = arith.constant 2 : index
    %c0_70 = arith.constant 0 : index
    %c0_71 = arith.constant 0 : index
    %121 = vector.load %arg16[%c0_69, %c2, %c0_70, %c0_71] : memref<1x4x8x8xf32, #tpu.memory_space<vmem>>, vector<1x1x8x8xf32>
    %122 = vector.shape_cast %121 : vector<1x1x8x8xf32> to vector<8x8xf32>
    %123 = arith.addf %122, %120 : vector<8x8xf32>
    %c0_72 = arith.constant 0 : index
    %c2_73 = arith.constant 2 : index
    %c0_74 = arith.constant 0 : index
    %c0_75 = arith.constant 0 : index
    %124 = vector.load %arg20[%c0_72, %c2_73, %c0_74, %c0_75] : memref<1x4x8x8xf32, #tpu.memory_space<vmem>>, vector<1x1x8x8xf32>
    %125 = vector.shape_cast %124 : vector<1x1x8x8xf32> to vector<8x8xf32>
    %126 = vector.shape_cast %123 : vector<8x8xf32> to vector<1x1x8x8xf32>
    tpu.vector_store %arg20[%c0_72, %c2_73, %c0_74, %c0_75], %126 {strides = array<i32>} : memref<1x4x8x8xf32, #tpu.memory_space<vmem>>, vector<1x1x8x8xf32>,
    %cst_76 = arith.constant 5.000000e-01 : f32
    %127 = vector.broadcast %cst_76 : f32 to vector<8x8xf32>
    %128 = arith.mulf %123, %127 : vector<8x8xf32>
    %cst_77 = arith.constant dense<0xFF800000> : vector<8xf32>
    %129 = vector.multi_reduction <maximumf>, %128, %cst_77 [1] : vector<8x8xf32> to vector<8xf32>
    %130 = vector.shape_cast %129 : vector<8xf32> to vector<8x1xf32>
    %cst_78 = arith.constant -3.000000e+38 : f32
    %131 = vector.broadcast %cst_78 : f32 to vector<8x1xf32>
    %132 = arith.maximumf %130, %131 : vector<8x1xf32>
    %133 = vector.broadcast %132 : vector<8x1xf32> to vector<8x8xf32>
    %134 = arith.subf %128, %133 : vector<8x8xf32>
    %135 = math.exp %134 : vector<8x8xf32>
    %cst_79 = arith.constant dense<0.000000e+00> : vector<8xf32>
    %136 = vector.multi_reduction <add>, %135, %cst_79 [1] : vector<8x8xf32> to vector<8xf32>
    %137 = vector.shape_cast %136 : vector<8xf32> to vector<8x1xf32>
    %cst_80 = arith.constant 0.000000e+00 : f32
    %138 = vector.broadcast %cst_80 : f32 to vector<8x1xf32>
    %139 = arith.cmpf ogt, %137, %138 : vector<8x1xf32>
    %cst_81 = arith.constant 1.000000e+00 : f32
    %140 = vector.broadcast %cst_81 : f32 to vector<8x1xf32>
    %141 = arith.select %139, %137, %140 : vector<8x1xi1>, vector<8x1xf32>
    %142 = tpu.reciprocal %141 {approx = true} : vector<8x1xf32> -> vector<8x1xf32>
    %143 = vector.broadcast %142 : vector<8x1xf32> to vector<8x8xf32>
    %144 = arith.mulf %135, %143 : vector<8x8xf32>
    %145 = arith.truncf %144 : vector<8x8xf32> to vector<8x8xbf16>
    %cst_82 = arith.constant dense<0.000000e+00> : vector<8x32xf32>
    %146 = tpu.matmul %145, %116, %cst_82 {dimension_numbers = #tpu.dot_dimension_numbers<[1], [0], [0], [1], [0, 0, 1, 1], [], []>} : vector<8x8xbf16>, vector<8x32xbf16>, vector<8x32xf32> -> vector<8x32xf32>
    %147 = vector.extract_strided_slice %45 {offsets = [0, 96], sizes = [8, 32], strides = [1, 1]} : vector<8x128xbf16> to vector<8x32xbf16>
    %148 = vector.extract_strided_slice %46 {offsets = [0, 96], sizes = [8, 32], strides = [1, 1]} : vector<8x128xbf16> to vector<8x32xbf16>
    %149 = vector.extract_strided_slice %47 {offsets = [0, 96], sizes = [8, 32], strides = [1, 1]} : vector<8x128xbf16> to vector<8x32xbf16>
    %cst_83 = arith.constant dense<0.000000e+00> : vector<8x8xf32>
    %150 = tpu.matmul %147, %148, %cst_83 {dimension_numbers = #tpu.dot_dimension_numbers<[1], [1], [0], [0], [0, 0, 1, 0], [], []>} : vector<8x32xbf16>, vector<8x32xbf16>, vector<8x8xf32> -> vector<8x8xf32>
    %cst_84 = arith.constant 0.176776692 : f32
    %151 = vector.broadcast %cst_84 : f32 to vector<8x8xf32>
    %152 = arith.mulf %150, %151 : vector<8x8xf32>
    %153 = arith.addf %152, %44 : vector<8x8xf32>
    %c0_85 = arith.constant 0 : index
    %c3 = arith.constant 3 : index
    %c0_86 = arith.constant 0 : index
    %c0_87 = arith.constant 0 : index
    %154 = vector.load %arg16[%c0_85, %c3, %c0_86, %c0_87] : memref<1x4x8x8xf32, #tpu.memory_space<vmem>>, vector<1x1x8x8xf32>
    %155 = vector.shape_cast %154 : vector<1x1x8x8xf32> to vector<8x8xf32>
    %156 = arith.addf %155, %153 : vector<8x8xf32>
    %c0_88 = arith.constant 0 : index
    %c3_89 = arith.constant 3 : index
    %c0_90 = arith.constant 0 : index
    %c0_91 = arith.constant 0 : index
    %157 = vector.load %arg20[%c0_88, %c3_89, %c0_90, %c0_91] : memref<1x4x8x8xf32, #tpu.memory_space<vmem>>, vector<1x1x8x8xf32>
    %158 = vector.shape_cast %157 : vector<1x1x8x8xf32> to vector<8x8xf32>
    %159 = vector.shape_cast %156 : vector<8x8xf32> to vector<1x1x8x8xf32>
    tpu.vector_store %arg20[%c0_88, %c3_89, %c0_90, %c0_91], %159 {strides = array<i32>} : memref<1x4x8x8xf32, #tpu.memory_space<vmem>>, vector<1x1x8x8xf32>,
    %cst_92 = arith.constant 5.000000e-01 : f32
    %160 = vector.broadcast %cst_92 : f32 to vector<8x8xf32>
    %161 = arith.mulf %156, %160 : vector<8x8xf32>
    %cst_93 = arith.constant dense<0xFF800000> : vector<8xf32>
    %162 = vector.multi_reduction <maximumf>, %161, %cst_93 [1] : vector<8x8xf32> to vector<8xf32>
    %163 = vector.shape_cast %162 : vector<8xf32> to vector<8x1xf32>
    %cst_94 = arith.constant -3.000000e+38 : f32
    %164 = vector.broadcast %cst_94 : f32 to vector<8x1xf32>
    %165 = arith.maximumf %163, %164 : vector<8x1xf32>
    %166 = vector.broadcast %165 : vector<8x1xf32> to vector<8x8xf32>
    %167 = arith.subf %161, %166 : vector<8x8xf32>
    %168 = math.exp %167 : vector<8x8xf32>
    %cst_95 = arith.constant dense<0.000000e+00> : vector<8xf32>
    %169 = vector.multi_reduction <add>, %168, %cst_95 [1] : vector<8x8xf32> to vector<8xf32>
    %170 = vector.shape_cast %169 : vector<8xf32> to vector<8x1xf32>
    %cst_96 = arith.constant 0.000000e+00 : f32
    %171 = vector.broadcast %cst_96 : f32 to vector<8x1xf32>
    %172 = arith.cmpf ogt, %170, %171 : vector<8x1xf32>
    %cst_97 = arith.constant 1.000000e+00 : f32
    %173 = vector.broadcast %cst_97 : f32 to vector<8x1xf32>
    %174 = arith.select %172, %170, %173 : vector<8x1xi1>, vector<8x1xf32>
    %175 = tpu.reciprocal %174 {approx = true} : vector<8x1xf32> -> vector<8x1xf32>
    %176 = vector.broadcast %175 : vector<8x1xf32> to vector<8x8xf32>
    %177 = arith.mulf %168, %176 : vector<8x8xf32>
    %178 = arith.truncf %177 : vector<8x8xf32> to vector<8x8xbf16>
    %cst_98 = arith.constant dense<0.000000e+00> : vector<8x32xf32>
    %179 = tpu.matmul %178, %149, %cst_98 {dimension_numbers = #tpu.dot_dimension_numbers<[1], [0], [0], [1], [0, 0, 1, 1], [], []>} : vector<8x8xbf16>, vector<8x32xbf16>, vector<8x32xf32> -> vector<8x32xf32>
    %180 = tpu.concatenate %80, %113, %146, %179 in 1 : vector<8x32xf32>, vector<8x32xf32>, vector<8x32xf32>, vector<8x32xf32> -> vector<8x128xf32>
    %181 = arith.truncf %180 : vector<8x128xf32> to vector<8x128xbf16>
    %c0_99 = arith.constant 0 : index
    %c0_100 = arith.constant 0 : index
    %182 = vector.load %arg7[%c0_99, %c0_100] : memref<128x128xbf16, #tpu.memory_space<vmem>>, vector<128x128xbf16>
    %cst_101 = arith.constant dense<0.000000e+00> : vector<8x128xf32>
    %183 = tpu.matmul %181, %182, %cst_101 {dimension_numbers = #tpu.dot_dimension_numbers<[1], [0], [0], [1], [0, 0, 1, 1], [], []>} : vector<8x128xbf16>, vector<128x128xbf16>, vector<8x128xf32> -> vector<8x128xf32>
    %cst_102 = arith.constant 1.39495885 : f32
    %184 = vector.broadcast %cst_102 : f32 to vector<8x128xf32>
    %185 = arith.mulf %183, %184 : vector<8x128xf32>
    %186 = arith.extf %1 : vector<8x128xbf16> to vector<8x128xf32>
    %187 = arith.addf %185, %186 : vector<8x128xf32>
    %cst_103 = arith.constant dense<0.000000e+00> : vector<8xf32>
    %188 = vector.multi_reduction <add>, %187, %cst_103 [1] : vector<8x128xf32> to vector<8xf32>
    %189 = vector.shape_cast %188 : vector<8xf32> to vector<8x1xf32>
    %cst_104 = arith.constant 1.280000e+02 : f32
    %190 = vector.broadcast %cst_104 : f32 to vector<8x1xf32>
    %191 = arith.divf %189, %190 : vector<8x1xf32>
    %192 = vector.broadcast %191 : vector<8x1xf32> to vector<8x128xf32>
    %193 = arith.subf %187, %192 : vector<8x128xf32>
    %194 = arith.mulf %193, %193 : vector<8x128xf32>
    %cst_105 = arith.constant dense<0.000000e+00> : vector<8xf32>
    %195 = vector.multi_reduction <add>, %194, %cst_105 [1] : vector<8x128xf32> to vector<8xf32>
    %196 = vector.shape_cast %195 : vector<8xf32> to vector<8x1xf32>
    %cst_106 = arith.constant 1.280000e+02 : f32
    %197 = vector.broadcast %cst_106 : f32 to vector<8x1xf32>
    %198 = arith.divf %196, %197 : vector<8x1xf32>
    %199 = vector.broadcast %191 : vector<8x1xf32> to vector<8x128xf32>
    %200 = arith.subf %187, %199 : vector<8x128xf32>
    %cst_107 = arith.constant 9.99999974E-6 : f32
    %201 = vector.broadcast %cst_107 : f32 to vector<8x1xf32>
    %202 = arith.addf %198, %201 : vector<8x1xf32>
    %203 = math.rsqrt %202 : vector<8x1xf32>
    %204 = vector.broadcast %203 : vector<8x1xf32> to vector<8x128xf32>
    %205 = arith.mulf %200, %204 : vector<8x128xf32>
    %c0_108 = arith.constant 0 : index
    %c0_109 = arith.constant 0 : index
    %206 = vector.load %arg17[%c0_108, %c0_109] : memref<1x128xf32, #tpu.memory_space<vmem>>, vector<1x128xf32>
    %207 = vector.broadcast %206 : vector<1x128xf32> to vector<8x128xf32>
    %208 = arith.mulf %205, %207 : vector<8x128xf32>
    %c0_110 = arith.constant 0 : index
    %c0_111 = arith.constant 0 : index
    %209 = vector.load %arg18[%c0_110, %c0_111] : memref<1x128xf32, #tpu.memory_space<vmem>>, vector<1x128xf32>
    %210 = vector.broadcast %209 : vector<1x128xf32> to vector<8x128xf32>
    %211 = arith.addf %208, %210 : vector<8x128xf32>
    %212 = arith.truncf %211 : vector<8x128xf32> to vector<8x128xbf16>
    %c0_112 = arith.constant 0 : index
    %c0_113 = arith.constant 0 : index
    %c0_114 = arith.constant 0 : index
    %213 = vector.load %arg19[%c0_112, %c0_113, %c0_114] : memref<1x8x128xbf16, #tpu.memory_space<vmem>>, vector<1x8x128xbf16>
    %214 = vector.shape_cast %213 : vector<1x8x128xbf16> to vector<8x128xbf16>
    %215 = vector.shape_cast %212 : vector<8x128xbf16> to vector<1x8x128xbf16>
    tpu.vector_store %arg19[%c0_112, %c0_113, %c0_114], %215 {strides = array<i32>} : memref<1x8x128xbf16, #tpu.memory_space<vmem>>, vector<1x8x128xbf16>,
    return
  }
  func.func @transform_0(%arg0: i32, %arg1: i32) -> (i32, i32, i32) {
    %c0_i32 = arith.constant 0 : i32
    %c0_i32_0 = arith.constant 0 : i32
    return %arg0, %arg1, %c0_i32 : i32, i32, i32
  }
  func.func @transform_1(%arg0: i32, %arg1: i32) -> (i32, i32, i32) {
    %c0_i32 = arith.constant 0 : i32
    %c0_i32_0 = arith.constant 0 : i32
    %c0_i32_1 = arith.constant 0 : i32
    return %arg0, %c0_i32, %c0_i32_0 : i32, i32, i32
  }
  func.func @transform_2(%arg0: i32, %arg1: i32) -> (i32, i32) {
    %c0_i32 = arith.constant 0 : i32
    %c0_i32_0 = arith.constant 0 : i32
    %c0_i32_1 = arith.constant 0 : i32
    return %c0_i32, %c0_i32_0 : i32, i32
  }
  func.func @transform_3(%arg0: i32, %arg1: i32) -> (i32, i32) {
    %c0_i32 = arith.constant 0 : i32
    %c0_i32_0 = arith.constant 0 : i32
    %c0_i32_1 = arith.constant 0 : i32
    return %c0_i32, %c0_i32_0 : i32, i32
  }
  func.func @transform_4(%arg0: i32, %arg1: i32) -> (i32, i32) {
    %c0_i32 = arith.constant 0 : i32
    %c0_i32_0 = arith.constant 0 : i32
    %c0_i32_1 = arith.constant 0 : i32
    return %c0_i32, %c0_i32_0 : i32, i32
  }
  func.func @transform_5(%arg0: i32, %arg1: i32) -> (i32, i32) {
    %c0_i32 = arith.constant 0 : i32
    %c0_i32_0 = arith.constant 0 : i32
    %c0_i32_1 = arith.constant 0 : i32
    return %c0_i32, %c0_i32_0 : i32, i32
  }
  func.func @transform_6(%arg0: i32, %arg1: i32) -> (i32, i32) {
    %c0_i32 = arith.constant 0 : i32
    %c0_i32_0 = arith.constant 0 : i32
    return %arg1, %c0_i32 : i32, i32
  }
  func.func @transform_7(%arg0: i32, %arg1: i32) -> (i32, i32) {
    %c0_i32 = arith.constant 0 : i32
    %c0_i32_0 = arith.constant 0 : i32
    return %arg1, %c0_i32 : i32, i32
  }
  func.func @transform_8(%arg0: i32, %arg1: i32) -> (i32, i32) {
    %c0_i32 = arith.constant 0 : i32
    %c0_i32_0 = arith.constant 0 : i32
    return %arg1, %c0_i32 : i32, i32
  }
  func.func @transform_9(%arg0: i32, %arg1: i32) -> (i32, i32) {
    %c0_i32 = arith.constant 0 : i32
    %c0_i32_0 = arith.constant 0 : i32
    %c0_i32_1 = arith.constant 0 : i32
    return %c0_i32, %c0_i32_0 : i32, i32
  }
  func.func @transform_10(%arg0: i32, %arg1: i32) -> (i32, i32) {
    %c0_i32 = arith.constant 0 : i32
    %c0_i32_0 = arith.constant 0 : i32
    %c0_i32_1 = arith.constant 0 : i32
    return %c0_i32, %c0_i32_0 : i32, i32
  }
  func.func @transform_11(%arg0: i32, %arg1: i32) -> (i32, i32) {
    %c0_i32 = arith.constant 0 : i32
    %c0_i32_0 = arith.constant 0 : i32
    %c0_i32_1 = arith.constant 0 : i32
    return %c0_i32, %c0_i32_0 : i32, i32
  }
  func.func @transform_12(%arg0: i32, %arg1: i32) -> (i32, i32, i32) {
    %c0_i32 = arith.constant 0 : i32
    %c0_i32_0 = arith.constant 0 : i32
    return %arg0, %arg1, %c0_i32 : i32, i32, i32
  }
  func.func @transform_13(%arg0: i32, %arg1: i32) -> (i32, i32, i32) {
    %c0_i32 = arith.constant 0 : i32
    %c0_i32_0 = arith.constant 0 : i32
    %c0_i32_1 = arith.constant 0 : i32
    return %arg0, %c0_i32, %c0_i32_0 : i32, i32, i32
  }
  func.func @transform_14(%arg0: i32, %arg1: i32) -> (i32, i32, i32, i32) {
    %c0_i32 = arith.constant 0 : i32
    %c0_i32_0 = arith.constant 0 : i32
    %c0_i32_1 = arith.constant 0 : i32
    return %arg0, %c0_i32, %arg1, %c0_i32_0 : i32, i32, i32, i32
  }
  func.func @transform_15(%arg0: i32, %arg1: i32) -> (i32, i32) {
    %c0_i32 = arith.constant 0 : i32
    %c0_i32_0 = arith.constant 0 : i32
    %c0_i32_1 = arith.constant 0 : i32
    return %c0_i32, %c0_i32_0 : i32, i32
  }
  func.func @transform_16(%arg0: i32, %arg1: i32) -> (i32, i32) {
    %c0_i32 = arith.constant 0 : i32
    %c0_i32_0 = arith.constant 0 : i32
    %c0_i32_1 = arith.constant 0 : i32
    return %c0_i32, %c0_i32_0 : i32, i32
  }
  func.func @transform_17(%arg0: i32, %arg1: i32) -> (i32, i32, i32) {
    %c0_i32 = arith.constant 0 : i32
    %c0_i32_0 = arith.constant 0 : i32
    return %arg0, %arg1, %c0_i32 : i32, i32, i32
  }
  func.func @transform_18(%arg0: i32, %arg1: i32) -> (i32, i32, i32, i32) {
    %c0_i32 = arith.constant 0 : i32
    %c0_i32_0 = arith.constant 0 : i32
    %c0_i32_1 = arith.constant 0 : i32
    return %arg0, %c0_i32, %arg1, %c0_i32_0 : i32, i32, i32, i32
  }
}

module attributes {stable_mosaic.version = 11 : i64} {
  func.func @_attn_kernel(%arg0: i32, %arg1: i32, %arg2: memref<1x8x128xbf16, #tpu.memory_space<vmem>>, %arg3: memref<1x16x128xbf16, #tpu.memory_space<vmem>>, %arg4: memref<128x128xbf16, #tpu.memory_space<vmem>>, %arg5: memref<128x128xbf16, #tpu.memory_space<vmem>>, %arg6: memref<128x128xbf16, #tpu.memory_space<vmem>>, %arg7: memref<128x128xbf16, #tpu.memory_space<vmem>>, %arg8: memref<8x128xf32, #tpu.memory_space<vmem>>, %arg9: memref<8x128xf32, #tpu.memory_space<vmem>>, %arg10: memref<8x128xf32, #tpu.memory_space<vmem>>, %arg11: memref<16x128xf32, #tpu.memory_space<vmem>>, %arg12: memref<16x128xf32, #tpu.memory_space<vmem>>, %arg13: memref<16x128xf32, #tpu.memory_space<vmem>>, %arg14: memref<1x8x1xf32, #tpu.memory_space<vmem>>, %arg15: memref<1x1x16xf32, #tpu.memory_space<vmem>>, %arg16: memref<1x4x8x16xf32, #tpu.memory_space<vmem>>, %arg17: memref<1x128xf32, #tpu.memory_space<vmem>>, %arg18: memref<1x128xf32, #tpu.memory_space<vmem>>, %arg19: memref<1x8x128xbf16, #tpu.memory_space<vmem>>, %arg20: memref<1x4x8x16xf32, #tpu.memory_space<vmem>>) attributes {dimension_semantics = [#tpu.dimension_semantics<parallel>, #tpu.dimension_semantics<parallel>], iteration_bounds = array<i64: 2, 1>, scalar_prefetch = 0 : i64, scratch_operands = 0 : i64, tpu.core_type = #tpu.core_type<tc>, window_params = [{transform_indices = @transform_0, window_bounds = array<i64: 1, 8, 128>}, {transform_indices = @transform_1, window_bounds = array<i64: 1, 16, 128>}, {pipeline_mode = #tpu.pipeline_mode<synchronous>, transform_indices = @transform_2, window_bounds = array<i64: 128, 128>}, {pipeline_mode = #tpu.pipeline_mode<synchronous>, transform_indices = @transform_3, window_bounds = array<i64: 128, 128>}, {pipeline_mode = #tpu.pipeline_mode<synchronous>, transform_indices = @transform_4, window_bounds = array<i64: 128, 128>}, {pipeline_mode = #tpu.pipeline_mode<synchronous>, transform_indices = @transform_5, window_bounds = array<i64: 128, 128>}, {transform_indices = @transform_6, window_bounds = array<i64: 8, 128>}, {transform_indices = @transform_7, window_bounds = array<i64: 8, 128>}, {transform_indices = @transform_8, window_bounds = array<i64: 8, 128>}, {pipeline_mode = #tpu.pipeline_mode<synchronous>, transform_indices = @transform_9, window_bounds = array<i64: 16, 128>}, {pipeline_mode = #tpu.pipeline_mode<synchronous>, transform_indices = @transform_10, window_bounds = array<i64: 16, 128>}, {pipeline_mode = #tpu.pipeline_mode<synchronous>, transform_indices = @transform_11, window_bounds = array<i64: 16, 128>}, {transform_indices = @transform_12, window_bounds = array<i64: 1, 8, 1>}, {transform_indices = @transform_13, window_bounds = array<i64: 1, 1, 16>}, {transform_indices = @transform_14, window_bounds = array<i64: 1, 4, 8, 16>}, {pipeline_mode = #tpu.pipeline_mode<synchronous>, transform_indices = @transform_15, window_bounds = array<i64: 1, 128>}, {pipeline_mode = #tpu.pipeline_mode<synchronous>, transform_indices = @transform_16, window_bounds = array<i64: 1, 128>}, {transform_indices = @transform_17, window_bounds = array<i64: 1, 8, 128>}, {transform_indices = @transform_18, window_bounds = array<i64: 1, 4, 8, 16>}]} {
    %c0 = arith.constant 0 : index
    %c0_0 = arith.constant 0 : index
    %c0_1 = arith.constant 0 : index
    %0 = vector.load %arg2[%c0, %c0_0, %c0_1] : memref<1x8x128xbf16, #tpu.memory_space<vmem>>, vector<1x8x128xbf16>
    %1 = vector.shape_cast %0 : vector<1x8x128xbf16> to vector<8x128xbf16>
    %c0_2 = arith.constant 0 : index
    %c0_3 = arith.constant 0 : index
    %c0_4 = arith.constant 0 : index
    %2 = vector.load %arg3[%c0_2, %c0_3, %c0_4] : memref<1x16x128xbf16, #tpu.memory_space<vmem>>, vector<1x16x128xbf16>
    %3 = vector.shape_cast %2 : vector<1x16x128xbf16> to vector<16x128xbf16>
    %c0_5 = arith.constant 0 : index
    %c0_6 = arith.constant 0 : index
    %4 = vector.load %arg4[%c0_5, %c0_6] : memref<128x128xbf16, #tpu.memory_space<vmem>>, vector<128x128xbf16>
    %cst = arith.constant dense<0.000000e+00> : vector<8x128xf32>
    %5 = tpu.matmul %1, %4, %cst {dimension_numbers = #tpu.dot_dimension_numbers<[1], [0], [0], [1], [0, 0, 1, 1], [], []>} : vector<8x128xbf16>, vector<128x128xbf16>, vector<8x128xf32> -> vector<8x128xf32>
    %c0_7 = arith.constant 0 : index
    %c0_8 = arith.constant 0 : index
    %6 = vector.load %arg8[%c0_7, %c0_8] : memref<8x128xf32, #tpu.memory_space<vmem>>, vector<8x128xf32>
    %c0_9 = arith.constant 0 : index
    %c0_10 = arith.constant 0 : index
    %7 = vector.load %arg9[%c0_9, %c0_10] : memref<8x128xf32, #tpu.memory_space<vmem>>, vector<8x128xf32>
    %c0_11 = arith.constant 0 : index
    %c0_12 = arith.constant 0 : index
    %8 = vector.load %arg10[%c0_11, %c0_12] : memref<8x128xf32, #tpu.memory_space<vmem>>, vector<8x128xf32>
    %c127_i32 = arith.constant 127 : i32
    %9 = tpu.dynamic_rotate %5 by %c127_i32 dim 1 : vector<8x128xf32>, i32 -> vector<8x128xf32>
    %c1_i32 = arith.constant 1 : i32
    %10 = tpu.dynamic_rotate %5 by %c1_i32 dim 1 : vector<8x128xf32>, i32 -> vector<8x128xf32>
    %11 = arith.mulf %5, %6 : vector<8x128xf32>
    %12 = arith.mulf %9, %7 : vector<8x128xf32>
    %13 = arith.addf %11, %12 : vector<8x128xf32>
    %14 = arith.mulf %10, %8 : vector<8x128xf32>
    %15 = arith.addf %13, %14 : vector<8x128xf32>
    %c0_13 = arith.constant 0 : index
    %c0_14 = arith.constant 0 : index
    %16 = vector.load %arg5[%c0_13, %c0_14] : memref<128x128xbf16, #tpu.memory_space<vmem>>, vector<128x128xbf16>
    %cst_15 = arith.constant dense<0.000000e+00> : vector<16x128xf32>
    %17 = tpu.matmul %3, %16, %cst_15 {dimension_numbers = #tpu.dot_dimension_numbers<[1], [0], [0], [1], [0, 0, 1, 1], [], []>} : vector<16x128xbf16>, vector<128x128xbf16>, vector<16x128xf32> -> vector<16x128xf32>
    %c0_16 = arith.constant 0 : index
    %c0_17 = arith.constant 0 : index
    %18 = vector.load %arg11[%c0_16, %c0_17] : memref<16x128xf32, #tpu.memory_space<vmem>>, vector<16x128xf32>
    %c0_18 = arith.constant 0 : index
    %c0_19 = arith.constant 0 : index
    %19 = vector.load %arg12[%c0_18, %c0_19] : memref<16x128xf32, #tpu.memory_space<vmem>>, vector<16x128xf32>
    %c0_20 = arith.constant 0 : index
    %c0_21 = arith.constant 0 : index
    %20 = vector.load %arg13[%c0_20, %c0_21] : memref<16x128xf32, #tpu.memory_space<vmem>>, vector<16x128xf32>
    %c127_i32_22 = arith.constant 127 : i32
    %21 = tpu.dynamic_rotate %17 by %c127_i32_22 dim 1 : vector<16x128xf32>, i32 -> vector<16x128xf32>
    %c1_i32_23 = arith.constant 1 : i32
    %22 = tpu.dynamic_rotate %17 by %c1_i32_23 dim 1 : vector<16x128xf32>, i32 -> vector<16x128xf32>
    %23 = arith.mulf %17, %18 : vector<16x128xf32>
    %24 = arith.mulf %21, %19 : vector<16x128xf32>
    %25 = arith.addf %23, %24 : vector<16x128xf32>
    %26 = arith.mulf %22, %20 : vector<16x128xf32>
    %27 = arith.addf %25, %26 : vector<16x128xf32>
    %c0_24 = arith.constant 0 : index
    %c0_25 = arith.constant 0 : index
    %28 = vector.load %arg6[%c0_24, %c0_25] : memref<128x128xbf16, #tpu.memory_space<vmem>>, vector<128x128xbf16>
    %cst_26 = arith.constant dense<0.000000e+00> : vector<16x128xf32>
    %29 = tpu.matmul %3, %28, %cst_26 {dimension_numbers = #tpu.dot_dimension_numbers<[1], [0], [0], [1], [0, 0, 1, 1], [], []>} : vector<16x128xbf16>, vector<128x128xbf16>, vector<16x128xf32> -> vector<16x128xf32>
    %c0_27 = arith.constant 0 : index
    %c0_28 = arith.constant 0 : index
    %c0_29 = arith.constant 0 : index
    %30 = vector.load %arg14[%c0_27, %c0_28, %c0_29] : memref<1x8x1xf32, #tpu.memory_space<vmem>>, vector<1x8x1xf32>
    %31 = vector.shape_cast %30 : vector<1x8x1xf32> to vector<8x1xf32>
    %c0_30 = arith.constant 0 : index
    %c0_31 = arith.constant 0 : index
    %c0_32 = arith.constant 0 : index
    %32 = vector.load %arg15[%c0_30, %c0_31, %c0_32] : memref<1x1x16xf32, #tpu.memory_space<vmem>>, vector<1x1x16xf32>
    %33 = vector.shape_cast %32 : vector<1x1x16xf32> to vector<1x16xf32>
    %34 = vector.broadcast %31 : vector<8x1xf32> to vector<8x16xf32>
    %35 = vector.broadcast %33 : vector<1x16xf32> to vector<8x16xf32>
    %36 = arith.addf %34, %35 : vector<8x16xf32>
    %37 = arith.truncf %15 : vector<8x128xf32> to vector<8x128xbf16>
    %38 = arith.truncf %27 : vector<16x128xf32> to vector<16x128xbf16>
    %39 = arith.truncf %29 : vector<16x128xf32> to vector<16x128xbf16>
    %40 = vector.extract_strided_slice %37 {offsets = [0, 0], sizes = [8, 32], strides = [1, 1]} : vector<8x128xbf16> to vector<8x32xbf16>
    %41 = vector.extract_strided_slice %38 {offsets = [0, 0], sizes = [16, 32], strides = [1, 1]} : vector<16x128xbf16> to vector<16x32xbf16>
    %42 = vector.extract_strided_slice %39 {offsets = [0, 0], sizes = [16, 32], strides = [1, 1]} : vector<16x128xbf16> to vector<16x32xbf16>
    %cst_33 = arith.constant dense<0.000000e+00> : vector<8x16xf32>
    %43 = tpu.matmul %40, %41, %cst_33 {dimension_numbers = #tpu.dot_dimension_numbers<[1], [1], [0], [0], [0, 0, 1, 0], [], []>} : vector<8x32xbf16>, vector<16x32xbf16>, vector<8x16xf32> -> vector<8x16xf32>
    %cst_34 = arith.constant 0.176776692 : f32
    %44 = vector.broadcast %cst_34 : f32 to vector<8x16xf32>
    %45 = arith.mulf %43, %44 : vector<8x16xf32>
    %46 = arith.addf %45, %36 : vector<8x16xf32>
    %c0_35 = arith.constant 0 : index
    %c0_36 = arith.constant 0 : index
    %c0_37 = arith.constant 0 : index
    %c0_38 = arith.constant 0 : index
    %47 = vector.load %arg16[%c0_35, %c0_36, %c0_37, %c0_38] : memref<1x4x8x16xf32, #tpu.memory_space<vmem>>, vector<1x1x8x16xf32>
    %48 = vector.shape_cast %47 : vector<1x1x8x16xf32> to vector<8x16xf32>
    %49 = arith.addf %48, %46 : vector<8x16xf32>
    %c0_39 = arith.constant 0 : index
    %c0_40 = arith.constant 0 : index
    %c0_41 = arith.constant 0 : index
    %c0_42 = arith.constant 0 : index
    %50 = vector.load %arg20[%c0_39, %c0_40, %c0_41, %c0_42] : memref<1x4x8x16xf32, #tpu.memory_space<vmem>>, vector<1x1x8x16xf32>
    %51 = vector.shape_cast %50 : vector<1x1x8x16xf32> to vector<8x16xf32>
    %52 = vector.shape_cast %49 : vector<8x16xf32> to vector<1x1x8x16xf32>
    tpu.vector_store %arg20[%c0_39, %c0_40, %c0_41, %c0_42], %52 {strides = array<i32>} : memref<1x4x8x16xf32, #tpu.memory_space<vmem>>, vector<1x1x8x16xf32>,
    %cst_43 = arith.constant 5.000000e-01 : f32
    %53 = vector.broadcast %cst_43 : f32 to vector<8x16xf32>
    %54 = arith.mulf %49, %53 : vector<8x16xf32>
    %cst_44 = arith.constant dense<0xFF800000> : vector<8xf32>
    %55 = vector.multi_reduction <maximumf>, %54, %cst_44 [1] : vector<8x16xf32> to vector<8xf32>
    %56 = vector.shape_cast %55 : vector<8xf32> to vector<8x1xf32>
    %cst_45 = arith.constant -3.000000e+38 : f32
    %57 = vector.broadcast %cst_45 : f32 to vector<8x1xf32>
    %58 = arith.maximumf %56, %57 : vector<8x1xf32>
    %59 = vector.broadcast %58 : vector<8x1xf32> to vector<8x16xf32>
    %60 = arith.subf %54, %59 : vector<8x16xf32>
    %61 = math.exp %60 : vector<8x16xf32>
    %cst_46 = arith.constant dense<0.000000e+00> : vector<8xf32>
    %62 = vector.multi_reduction <add>, %61, %cst_46 [1] : vector<8x16xf32> to vector<8xf32>
    %63 = vector.shape_cast %62 : vector<8xf32> to vector<8x1xf32>
    %cst_47 = arith.constant 0.000000e+00 : f32
    %64 = vector.broadcast %cst_47 : f32 to vector<8x1xf32>
    %65 = arith.cmpf ogt, %63, %64 : vector<8x1xf32>
    %cst_48 = arith.constant 1.000000e+00 : f32
    %66 = vector.broadcast %cst_48 : f32 to vector<8x1xf32>
    %67 = arith.select %65, %63, %66 : vector<8x1xi1>, vector<8x1xf32>
    %68 = tpu.reciprocal %67 {approx = true} : vector<8x1xf32> -> vector<8x1xf32>
    %69 = vector.broadcast %68 : vector<8x1xf32> to vector<8x16xf32>
    %70 = arith.mulf %61, %69 : vector<8x16xf32>
    %71 = arith.truncf %70 : vector<8x16xf32> to vector<8x16xbf16>
    %cst_49 = arith.constant dense<0.000000e+00> : vector<8x32xf32>
    %72 = tpu.matmul %71, %42, %cst_49 {dimension_numbers = #tpu.dot_dimension_numbers<[1], [0], [0], [1], [0, 0, 1, 1], [], []>} : vector<8x16xbf16>, vector<16x32xbf16>, vector<8x32xf32> -> vector<8x32xf32>
    %73 = vector.extract_strided_slice %37 {offsets = [0, 32], sizes = [8, 32], strides = [1, 1]} : vector<8x128xbf16> to vector<8x32xbf16>
    %74 = vector.extract_strided_slice %38 {offsets = [0, 32], sizes = [16, 32], strides = [1, 1]} : vector<16x128xbf16> to vector<16x32xbf16>
    %75 = vector.extract_strided_slice %39 {offsets = [0, 32], sizes = [16, 32], strides = [1, 1]} : vector<16x128xbf16> to vector<16x32xbf16>
    %cst_50 = arith.constant dense<0.000000e+00> : vector<8x16xf32>
    %76 = tpu.matmul %73, %74, %cst_50 {dimension_numbers = #tpu.dot_dimension_numbers<[1], [1], [0], [0], [0, 0, 1, 0], [], []>} : vector<8x32xbf16>, vector<16x32xbf16>, vector<8x16xf32> -> vector<8x16xf32>
    %cst_51 = arith.constant 0.176776692 : f32
    %77 = vector.broadcast %cst_51 : f32 to vector<8x16xf32>
    %78 = arith.mulf %76, %77 : vector<8x16xf32>
    %79 = arith.addf %78, %36 : vector<8x16xf32>
    %c0_52 = arith.constant 0 : index
    %c1 = arith.constant 1 : index
    %c0_53 = arith.constant 0 : index
    %c0_54 = arith.constant 0 : index
    %80 = vector.load %arg16[%c0_52, %c1, %c0_53, %c0_54] : memref<1x4x8x16xf32, #tpu.memory_space<vmem>>, vector<1x1x8x16xf32>
    %81 = vector.shape_cast %80 : vector<1x1x8x16xf32> to vector<8x16xf32>
    %82 = arith.addf %81, %79 : vector<8x16xf32>
    %c0_55 = arith.constant 0 : index
    %c1_56 = arith.constant 1 : index
    %c0_57 = arith.constant 0 : index
    %c0_58 = arith.constant 0 : index
    %83 = vector.load %arg20[%c0_55, %c1_56, %c0_57, %c0_58] : memref<1x4x8x16xf32, #tpu.memory_space<vmem>>, vector<1x1x8x16xf32>
    %84 = vector.shape_cast %83 : vector<1x1x8x16xf32> to vector<8x16xf32>
    %85 = vector.shape_cast %82 : vector<8x16xf32> to vector<1x1x8x16xf32>
    tpu.vector_store %arg20[%c0_55, %c1_56, %c0_57, %c0_58], %85 {strides = array<i32>} : memref<1x4x8x16xf32, #tpu.memory_space<vmem>>, vector<1x1x8x16xf32>,
    %cst_59 = arith.constant 5.000000e-01 : f32
    %86 = vector.broadcast %cst_59 : f32 to vector<8x16xf32>
    %87 = arith.mulf %82, %86 : vector<8x16xf32>
    %cst_60 = arith.constant dense<0xFF800000> : vector<8xf32>
    %88 = vector.multi_reduction <maximumf>, %87, %cst_60 [1] : vector<8x16xf32> to vector<8xf32>
    %89 = vector.shape_cast %88 : vector<8xf32> to vector<8x1xf32>
    %cst_61 = arith.constant -3.000000e+38 : f32
    %90 = vector.broadcast %cst_61 : f32 to vector<8x1xf32>
    %91 = arith.maximumf %89, %90 : vector<8x1xf32>
    %92 = vector.broadcast %91 : vector<8x1xf32> to vector<8x16xf32>
    %93 = arith.subf %87, %92 : vector<8x16xf32>
    %94 = math.exp %93 : vector<8x16xf32>
    %cst_62 = arith.constant dense<0.000000e+00> : vector<8xf32>
    %95 = vector.multi_reduction <add>, %94, %cst_62 [1] : vector<8x16xf32> to vector<8xf32>
    %96 = vector.shape_cast %95 : vector<8xf32> to vector<8x1xf32>
    %cst_63 = arith.constant 0.000000e+00 : f32
    %97 = vector.broadcast %cst_63 : f32 to vector<8x1xf32>
    %98 = arith.cmpf ogt, %96, %97 : vector<8x1xf32>
    %cst_64 = arith.constant 1.000000e+00 : f32
    %99 = vector.broadcast %cst_64 : f32 to vector<8x1xf32>
    %100 = arith.select %98, %96, %99 : vector<8x1xi1>, vector<8x1xf32>
    %101 = tpu.reciprocal %100 {approx = true} : vector<8x1xf32> -> vector<8x1xf32>
    %102 = vector.broadcast %101 : vector<8x1xf32> to vector<8x16xf32>
    %103 = arith.mulf %94, %102 : vector<8x16xf32>
    %104 = arith.truncf %103 : vector<8x16xf32> to vector<8x16xbf16>
    %cst_65 = arith.constant dense<0.000000e+00> : vector<8x32xf32>
    %105 = tpu.matmul %104, %75, %cst_65 {dimension_numbers = #tpu.dot_dimension_numbers<[1], [0], [0], [1], [0, 0, 1, 1], [], []>} : vector<8x16xbf16>, vector<16x32xbf16>, vector<8x32xf32> -> vector<8x32xf32>
    %106 = vector.extract_strided_slice %37 {offsets = [0, 64], sizes = [8, 32], strides = [1, 1]} : vector<8x128xbf16> to vector<8x32xbf16>
    %107 = vector.extract_strided_slice %38 {offsets = [0, 64], sizes = [16, 32], strides = [1, 1]} : vector<16x128xbf16> to vector<16x32xbf16>
    %108 = vector.extract_strided_slice %39 {offsets = [0, 64], sizes = [16, 32], strides = [1, 1]} : vector<16x128xbf16> to vector<16x32xbf16>
    %cst_66 = arith.constant dense<0.000000e+00> : vector<8x16xf32>
    %109 = tpu.matmul %106, %107, %cst_66 {dimension_numbers = #tpu.dot_dimension_numbers<[1], [1], [0], [0], [0, 0, 1, 0], [], []>} : vector<8x32xbf16>, vector<16x32xbf16>, vector<8x16xf32> -> vector<8x16xf32>
    %cst_67 = arith.constant 0.176776692 : f32
    %110 = vector.broadcast %cst_67 : f32 to vector<8x16xf32>
    %111 = arith.mulf %109, %110 : vector<8x16xf32>
    %112 = arith.addf %111, %36 : vector<8x16xf32>
    %c0_68 = arith.constant 0 : index
    %c2 = arith.constant 2 : index
    %c0_69 = arith.constant 0 : index
    %c0_70 = arith.constant 0 : index
    %113 = vector.load %arg16[%c0_68, %c2, %c0_69, %c0_70] : memref<1x4x8x16xf32, #tpu.memory_space<vmem>>, vector<1x1x8x16xf32>
    %114 = vector.shape_cast %113 : vector<1x1x8x16xf32> to vector<8x16xf32>
    %115 = arith.addf %114, %112 : vector<8x16xf32>
    %c0_71 = arith.constant 0 : index
    %c2_72 = arith.constant 2 : index
    %c0_73 = arith.constant 0 : index
    %c0_74 = arith.constant 0 : index
    %116 = vector.load %arg20[%c0_71, %c2_72, %c0_73, %c0_74] : memref<1x4x8x16xf32, #tpu.memory_space<vmem>>, vector<1x1x8x16xf32>
    %117 = vector.shape_cast %116 : vector<1x1x8x16xf32> to vector<8x16xf32>
    %118 = vector.shape_cast %115 : vector<8x16xf32> to vector<1x1x8x16xf32>
    tpu.vector_store %arg20[%c0_71, %c2_72, %c0_73, %c0_74], %118 {strides = array<i32>} : memref<1x4x8x16xf32, #tpu.memory_space<vmem>>, vector<1x1x8x16xf32>,
    %cst_75 = arith.constant 5.000000e-01 : f32
    %119 = vector.broadcast %cst_75 : f32 to vector<8x16xf32>
    %120 = arith.mulf %115, %119 : vector<8x16xf32>
    %cst_76 = arith.constant dense<0xFF800000> : vector<8xf32>
    %121 = vector.multi_reduction <maximumf>, %120, %cst_76 [1] : vector<8x16xf32> to vector<8xf32>
    %122 = vector.shape_cast %121 : vector<8xf32> to vector<8x1xf32>
    %cst_77 = arith.constant -3.000000e+38 : f32
    %123 = vector.broadcast %cst_77 : f32 to vector<8x1xf32>
    %124 = arith.maximumf %122, %123 : vector<8x1xf32>
    %125 = vector.broadcast %124 : vector<8x1xf32> to vector<8x16xf32>
    %126 = arith.subf %120, %125 : vector<8x16xf32>
    %127 = math.exp %126 : vector<8x16xf32>
    %cst_78 = arith.constant dense<0.000000e+00> : vector<8xf32>
    %128 = vector.multi_reduction <add>, %127, %cst_78 [1] : vector<8x16xf32> to vector<8xf32>
    %129 = vector.shape_cast %128 : vector<8xf32> to vector<8x1xf32>
    %cst_79 = arith.constant 0.000000e+00 : f32
    %130 = vector.broadcast %cst_79 : f32 to vector<8x1xf32>
    %131 = arith.cmpf ogt, %129, %130 : vector<8x1xf32>
    %cst_80 = arith.constant 1.000000e+00 : f32
    %132 = vector.broadcast %cst_80 : f32 to vector<8x1xf32>
    %133 = arith.select %131, %129, %132 : vector<8x1xi1>, vector<8x1xf32>
    %134 = tpu.reciprocal %133 {approx = true} : vector<8x1xf32> -> vector<8x1xf32>
    %135 = vector.broadcast %134 : vector<8x1xf32> to vector<8x16xf32>
    %136 = arith.mulf %127, %135 : vector<8x16xf32>
    %137 = arith.truncf %136 : vector<8x16xf32> to vector<8x16xbf16>
    %cst_81 = arith.constant dense<0.000000e+00> : vector<8x32xf32>
    %138 = tpu.matmul %137, %108, %cst_81 {dimension_numbers = #tpu.dot_dimension_numbers<[1], [0], [0], [1], [0, 0, 1, 1], [], []>} : vector<8x16xbf16>, vector<16x32xbf16>, vector<8x32xf32> -> vector<8x32xf32>
    %139 = vector.extract_strided_slice %37 {offsets = [0, 96], sizes = [8, 32], strides = [1, 1]} : vector<8x128xbf16> to vector<8x32xbf16>
    %140 = vector.extract_strided_slice %38 {offsets = [0, 96], sizes = [16, 32], strides = [1, 1]} : vector<16x128xbf16> to vector<16x32xbf16>
    %141 = vector.extract_strided_slice %39 {offsets = [0, 96], sizes = [16, 32], strides = [1, 1]} : vector<16x128xbf16> to vector<16x32xbf16>
    %cst_82 = arith.constant dense<0.000000e+00> : vector<8x16xf32>
    %142 = tpu.matmul %139, %140, %cst_82 {dimension_numbers = #tpu.dot_dimension_numbers<[1], [1], [0], [0], [0, 0, 1, 0], [], []>} : vector<8x32xbf16>, vector<16x32xbf16>, vector<8x16xf32> -> vector<8x16xf32>
    %cst_83 = arith.constant 0.176776692 : f32
    %143 = vector.broadcast %cst_83 : f32 to vector<8x16xf32>
    %144 = arith.mulf %142, %143 : vector<8x16xf32>
    %145 = arith.addf %144, %36 : vector<8x16xf32>
    %c0_84 = arith.constant 0 : index
    %c3 = arith.constant 3 : index
    %c0_85 = arith.constant 0 : index
    %c0_86 = arith.constant 0 : index
    %146 = vector.load %arg16[%c0_84, %c3, %c0_85, %c0_86] : memref<1x4x8x16xf32, #tpu.memory_space<vmem>>, vector<1x1x8x16xf32>
    %147 = vector.shape_cast %146 : vector<1x1x8x16xf32> to vector<8x16xf32>
    %148 = arith.addf %147, %145 : vector<8x16xf32>
    %c0_87 = arith.constant 0 : index
    %c3_88 = arith.constant 3 : index
    %c0_89 = arith.constant 0 : index
    %c0_90 = arith.constant 0 : index
    %149 = vector.load %arg20[%c0_87, %c3_88, %c0_89, %c0_90] : memref<1x4x8x16xf32, #tpu.memory_space<vmem>>, vector<1x1x8x16xf32>
    %150 = vector.shape_cast %149 : vector<1x1x8x16xf32> to vector<8x16xf32>
    %151 = vector.shape_cast %148 : vector<8x16xf32> to vector<1x1x8x16xf32>
    tpu.vector_store %arg20[%c0_87, %c3_88, %c0_89, %c0_90], %151 {strides = array<i32>} : memref<1x4x8x16xf32, #tpu.memory_space<vmem>>, vector<1x1x8x16xf32>,
    %cst_91 = arith.constant 5.000000e-01 : f32
    %152 = vector.broadcast %cst_91 : f32 to vector<8x16xf32>
    %153 = arith.mulf %148, %152 : vector<8x16xf32>
    %cst_92 = arith.constant dense<0xFF800000> : vector<8xf32>
    %154 = vector.multi_reduction <maximumf>, %153, %cst_92 [1] : vector<8x16xf32> to vector<8xf32>
    %155 = vector.shape_cast %154 : vector<8xf32> to vector<8x1xf32>
    %cst_93 = arith.constant -3.000000e+38 : f32
    %156 = vector.broadcast %cst_93 : f32 to vector<8x1xf32>
    %157 = arith.maximumf %155, %156 : vector<8x1xf32>
    %158 = vector.broadcast %157 : vector<8x1xf32> to vector<8x16xf32>
    %159 = arith.subf %153, %158 : vector<8x16xf32>
    %160 = math.exp %159 : vector<8x16xf32>
    %cst_94 = arith.constant dense<0.000000e+00> : vector<8xf32>
    %161 = vector.multi_reduction <add>, %160, %cst_94 [1] : vector<8x16xf32> to vector<8xf32>
    %162 = vector.shape_cast %161 : vector<8xf32> to vector<8x1xf32>
    %cst_95 = arith.constant 0.000000e+00 : f32
    %163 = vector.broadcast %cst_95 : f32 to vector<8x1xf32>
    %164 = arith.cmpf ogt, %162, %163 : vector<8x1xf32>
    %cst_96 = arith.constant 1.000000e+00 : f32
    %165 = vector.broadcast %cst_96 : f32 to vector<8x1xf32>
    %166 = arith.select %164, %162, %165 : vector<8x1xi1>, vector<8x1xf32>
    %167 = tpu.reciprocal %166 {approx = true} : vector<8x1xf32> -> vector<8x1xf32>
    %168 = vector.broadcast %167 : vector<8x1xf32> to vector<8x16xf32>
    %169 = arith.mulf %160, %168 : vector<8x16xf32>
    %170 = arith.truncf %169 : vector<8x16xf32> to vector<8x16xbf16>
    %cst_97 = arith.constant dense<0.000000e+00> : vector<8x32xf32>
    %171 = tpu.matmul %170, %141, %cst_97 {dimension_numbers = #tpu.dot_dimension_numbers<[1], [0], [0], [1], [0, 0, 1, 1], [], []>} : vector<8x16xbf16>, vector<16x32xbf16>, vector<8x32xf32> -> vector<8x32xf32>
    %172 = tpu.concatenate %72, %105, %138, %171 in 1 : vector<8x32xf32>, vector<8x32xf32>, vector<8x32xf32>, vector<8x32xf32> -> vector<8x128xf32>
    %173 = arith.truncf %172 : vector<8x128xf32> to vector<8x128xbf16>
    %c0_98 = arith.constant 0 : index
    %c0_99 = arith.constant 0 : index
    %174 = vector.load %arg7[%c0_98, %c0_99] : memref<128x128xbf16, #tpu.memory_space<vmem>>, vector<128x128xbf16>
    %cst_100 = arith.constant dense<0.000000e+00> : vector<8x128xf32>
    %175 = tpu.matmul %173, %174, %cst_100 {dimension_numbers = #tpu.dot_dimension_numbers<[1], [0], [0], [1], [0, 0, 1, 1], [], []>} : vector<8x128xbf16>, vector<128x128xbf16>, vector<8x128xf32> -> vector<8x128xf32>
    %cst_101 = arith.constant 1.39495885 : f32
    %176 = vector.broadcast %cst_101 : f32 to vector<8x128xf32>
    %177 = arith.mulf %175, %176 : vector<8x128xf32>
    %178 = arith.extf %1 : vector<8x128xbf16> to vector<8x128xf32>
    %179 = arith.addf %177, %178 : vector<8x128xf32>
    %cst_102 = arith.constant dense<0.000000e+00> : vector<8xf32>
    %180 = vector.multi_reduction <add>, %179, %cst_102 [1] : vector<8x128xf32> to vector<8xf32>
    %181 = vector.shape_cast %180 : vector<8xf32> to vector<8x1xf32>
    %cst_103 = arith.constant 1.280000e+02 : f32
    %182 = vector.broadcast %cst_103 : f32 to vector<8x1xf32>
    %183 = arith.divf %181, %182 : vector<8x1xf32>
    %184 = vector.broadcast %183 : vector<8x1xf32> to vector<8x128xf32>
    %185 = arith.subf %179, %184 : vector<8x128xf32>
    %186 = arith.mulf %185, %185 : vector<8x128xf32>
    %cst_104 = arith.constant dense<0.000000e+00> : vector<8xf32>
    %187 = vector.multi_reduction <add>, %186, %cst_104 [1] : vector<8x128xf32> to vector<8xf32>
    %188 = vector.shape_cast %187 : vector<8xf32> to vector<8x1xf32>
    %cst_105 = arith.constant 1.280000e+02 : f32
    %189 = vector.broadcast %cst_105 : f32 to vector<8x1xf32>
    %190 = arith.divf %188, %189 : vector<8x1xf32>
    %191 = vector.broadcast %183 : vector<8x1xf32> to vector<8x128xf32>
    %192 = arith.subf %179, %191 : vector<8x128xf32>
    %cst_106 = arith.constant 9.99999974E-6 : f32
    %193 = vector.broadcast %cst_106 : f32 to vector<8x1xf32>
    %194 = arith.addf %190, %193 : vector<8x1xf32>
    %195 = math.rsqrt %194 : vector<8x1xf32>
    %196 = vector.broadcast %195 : vector<8x1xf32> to vector<8x128xf32>
    %197 = arith.mulf %192, %196 : vector<8x128xf32>
    %c0_107 = arith.constant 0 : index
    %c0_108 = arith.constant 0 : index
    %198 = vector.load %arg17[%c0_107, %c0_108] : memref<1x128xf32, #tpu.memory_space<vmem>>, vector<1x128xf32>
    %199 = vector.broadcast %198 : vector<1x128xf32> to vector<8x128xf32>
    %200 = arith.mulf %197, %199 : vector<8x128xf32>
    %c0_109 = arith.constant 0 : index
    %c0_110 = arith.constant 0 : index
    %201 = vector.load %arg18[%c0_109, %c0_110] : memref<1x128xf32, #tpu.memory_space<vmem>>, vector<1x128xf32>
    %202 = vector.broadcast %201 : vector<1x128xf32> to vector<8x128xf32>
    %203 = arith.addf %200, %202 : vector<8x128xf32>
    %204 = arith.truncf %203 : vector<8x128xf32> to vector<8x128xbf16>
    %c0_111 = arith.constant 0 : index
    %c0_112 = arith.constant 0 : index
    %c0_113 = arith.constant 0 : index
    %205 = vector.load %arg19[%c0_111, %c0_112, %c0_113] : memref<1x8x128xbf16, #tpu.memory_space<vmem>>, vector<1x8x128xbf16>
    %206 = vector.shape_cast %205 : vector<1x8x128xbf16> to vector<8x128xbf16>
    %207 = vector.shape_cast %204 : vector<8x128xbf16> to vector<1x8x128xbf16>
    tpu.vector_store %arg19[%c0_111, %c0_112, %c0_113], %207 {strides = array<i32>} : memref<1x8x128xbf16, #tpu.memory_space<vmem>>, vector<1x8x128xbf16>,
    return
  }
  func.func @transform_0(%arg0: i32, %arg1: i32) -> (i32, i32, i32) {
    %c0_i32 = arith.constant 0 : i32
    %c0_i32_0 = arith.constant 0 : i32
    return %arg0, %arg1, %c0_i32 : i32, i32, i32
  }
  func.func @transform_1(%arg0: i32, %arg1: i32) -> (i32, i32, i32) {
    %c0_i32 = arith.constant 0 : i32
    %c0_i32_0 = arith.constant 0 : i32
    %c0_i32_1 = arith.constant 0 : i32
    return %arg0, %c0_i32, %c0_i32_0 : i32, i32, i32
  }
  func.func @transform_2(%arg0: i32, %arg1: i32) -> (i32, i32) {
    %c0_i32 = arith.constant 0 : i32
    %c0_i32_0 = arith.constant 0 : i32
    %c0_i32_1 = arith.constant 0 : i32
    return %c0_i32, %c0_i32_0 : i32, i32
  }
  func.func @transform_3(%arg0: i32, %arg1: i32) -> (i32, i32) {
    %c0_i32 = arith.constant 0 : i32
    %c0_i32_0 = arith.constant 0 : i32
    %c0_i32_1 = arith.constant 0 : i32
    return %c0_i32, %c0_i32_0 : i32, i32
  }
  func.func @transform_4(%arg0: i32, %arg1: i32) -> (i32, i32) {
    %c0_i32 = arith.constant 0 : i32
    %c0_i32_0 = arith.constant 0 : i32
    %c0_i32_1 = arith.constant 0 : i32
    return %c0_i32, %c0_i32_0 : i32, i32
  }
  func.func @transform_5(%arg0: i32, %arg1: i32) -> (i32, i32) {
    %c0_i32 = arith.constant 0 : i32
    %c0_i32_0 = arith.constant 0 : i32
    %c0_i32_1 = arith.constant 0 : i32
    return %c0_i32, %c0_i32_0 : i32, i32
  }
  func.func @transform_6(%arg0: i32, %arg1: i32) -> (i32, i32) {
    %c0_i32 = arith.constant 0 : i32
    %c0_i32_0 = arith.constant 0 : i32
    return %arg1, %c0_i32 : i32, i32
  }
  func.func @transform_7(%arg0: i32, %arg1: i32) -> (i32, i32) {
    %c0_i32 = arith.constant 0 : i32
    %c0_i32_0 = arith.constant 0 : i32
    return %arg1, %c0_i32 : i32, i32
  }
  func.func @transform_8(%arg0: i32, %arg1: i32) -> (i32, i32) {
    %c0_i32 = arith.constant 0 : i32
    %c0_i32_0 = arith.constant 0 : i32
    return %arg1, %c0_i32 : i32, i32
  }
  func.func @transform_9(%arg0: i32, %arg1: i32) -> (i32, i32) {
    %c0_i32 = arith.constant 0 : i32
    %c0_i32_0 = arith.constant 0 : i32
    %c0_i32_1 = arith.constant 0 : i32
    return %c0_i32, %c0_i32_0 : i32, i32
  }
  func.func @transform_10(%arg0: i32, %arg1: i32) -> (i32, i32) {
    %c0_i32 = arith.constant 0 : i32
    %c0_i32_0 = arith.constant 0 : i32
    %c0_i32_1 = arith.constant 0 : i32
    return %c0_i32, %c0_i32_0 : i32, i32
  }
  func.func @transform_11(%arg0: i32, %arg1: i32) -> (i32, i32) {
    %c0_i32 = arith.constant 0 : i32
    %c0_i32_0 = arith.constant 0 : i32
    %c0_i32_1 = arith.constant 0 : i32
    return %c0_i32, %c0_i32_0 : i32, i32
  }
  func.func @transform_12(%arg0: i32, %arg1: i32) -> (i32, i32, i32) {
    %c0_i32 = arith.constant 0 : i32
    %c0_i32_0 = arith.constant 0 : i32
    return %arg0, %arg1, %c0_i32 : i32, i32, i32
  }
  func.func @transform_13(%arg0: i32, %arg1: i32) -> (i32, i32, i32) {
    %c0_i32 = arith.constant 0 : i32
    %c0_i32_0 = arith.constant 0 : i32
    %c0_i32_1 = arith.constant 0 : i32
    return %arg0, %c0_i32, %c0_i32_0 : i32, i32, i32
  }
  func.func @transform_14(%arg0: i32, %arg1: i32) -> (i32, i32, i32, i32) {
    %c0_i32 = arith.constant 0 : i32
    %c0_i32_0 = arith.constant 0 : i32
    %c0_i32_1 = arith.constant 0 : i32
    return %arg0, %c0_i32, %arg1, %c0_i32_0 : i32, i32, i32, i32
  }
  func.func @transform_15(%arg0: i32, %arg1: i32) -> (i32, i32) {
    %c0_i32 = arith.constant 0 : i32
    %c0_i32_0 = arith.constant 0 : i32
    %c0_i32_1 = arith.constant 0 : i32
    return %c0_i32, %c0_i32_0 : i32, i32
  }
  func.func @transform_16(%arg0: i32, %arg1: i32) -> (i32, i32) {
    %c0_i32 = arith.constant 0 : i32
    %c0_i32_0 = arith.constant 0 : i32
    %c0_i32_1 = arith.constant 0 : i32
    return %c0_i32, %c0_i32_0 : i32, i32
  }
  func.func @transform_17(%arg0: i32, %arg1: i32) -> (i32, i32, i32) {
    %c0_i32 = arith.constant 0 : i32
    %c0_i32_0 = arith.constant 0 : i32
    return %arg0, %arg1, %c0_i32 : i32, i32, i32
  }
  func.func @transform_18(%arg0: i32, %arg1: i32) -> (i32, i32, i32, i32) {
    %c0_i32 = arith.constant 0 : i32
    %c0_i32_0 = arith.constant 0 : i32
    %c0_i32_1 = arith.constant 0 : i32
    return %arg0, %c0_i32, %arg1, %c0_i32_0 : i32, i32, i32, i32
  }
}

module attributes {stable_mosaic.version = 11 : i64} {
  func.func @_linear_kernel(%arg0: i32, %arg1: i32, %arg2: memref<16x128xbf16, #tpu.memory_space<vmem>>, %arg3: memref<128x32xbf16, #tpu.memory_space<vmem>>, %arg4: memref<16x32xf32, #tpu.memory_space<vmem>>) attributes {dimension_semantics = [#tpu.dimension_semantics<parallel>, #tpu.dimension_semantics<parallel>], iteration_bounds = array<i64: 1, 1>, scalar_prefetch = 0 : i64, scratch_operands = 0 : i64, tpu.core_type = #tpu.core_type<tc>, window_params = [{transform_indices = @transform_0, window_bounds = array<i64: 16, 128>}, {transform_indices = @transform_1, window_bounds = array<i64: 128, 32>}, {transform_indices = @transform_2, window_bounds = array<i64: 16, 32>}]} {
    %c0 = arith.constant 0 : index
    %c0_0 = arith.constant 0 : index
    %0 = vector.load %arg2[%c0, %c0_0] : memref<16x128xbf16, #tpu.memory_space<vmem>>, vector<16x128xbf16>
    %c0_1 = arith.constant 0 : index
    %c0_2 = arith.constant 0 : index
    %1 = vector.load %arg3[%c0_1, %c0_2] : memref<128x32xbf16, #tpu.memory_space<vmem>>, vector<128x32xbf16>
    %cst = arith.constant dense<0.000000e+00> : vector<16x32xf32>
    %2 = tpu.matmul %0, %1, %cst {dimension_numbers = #tpu.dot_dimension_numbers<[1], [0], [0], [1], [0, 0, 1, 1], [], []>} : vector<16x128xbf16>, vector<128x32xbf16>, vector<16x32xf32> -> vector<16x32xf32>
    %c0_3 = arith.constant 0 : index
    %c0_4 = arith.constant 0 : index
    %3 = vector.load %arg4[%c0_3, %c0_4] : memref<16x32xf32, #tpu.memory_space<vmem>>, vector<16x32xf32>
    tpu.vector_store %arg4[%c0_3, %c0_4], %2 {strides = array<i32>} : memref<16x32xf32, #tpu.memory_space<vmem>>, vector<16x32xf32>,
    return
  }
  func.func @transform_0(%arg0: i32, %arg1: i32) -> (i32, i32) {
    %c0_i32 = arith.constant 0 : i32
    %c0_i32_0 = arith.constant 0 : i32
    return %arg0, %c0_i32 : i32, i32
  }
  func.func @transform_1(%arg0: i32, %arg1: i32) -> (i32, i32) {
    %c0_i32 = arith.constant 0 : i32
    %c0_i32_0 = arith.constant 0 : i32
    return %c0_i32, %arg1 : i32, i32
  }
  func.func @transform_2(%arg0: i32, %arg1: i32) -> (i32, i32) {
    %c0_i32 = arith.constant 0 : i32
    return %arg0, %arg1 : i32, i32
  }
}

</mosaic_0001>

<bundles_post_ra>
// kernel: tile.34
= control target key start
LH: loop header
LB: loop body
LE: loop exit
PB: predicated region body
PF: predicated region fallthrough
CT: control target
= control target key end

     0   :  { %vm83_vm0 = vcmask 1047556   ;;  %vm85_vm1 = vcmask 261120   ;;  %s196_s9 = smov 96   ;;  %s197_s14 = smov 32   ;;  %vm104_vm2 = vcmask 1048320   ;;  %vm125_vm3 = vcmask 785920   ;;  %s290_s0 = inlined_call_operand.vmem [shape: f32[16,4,32], index: 0, kind: input, shape index: {}]   ;;  %s291_s1 = inlined_call_operand.vmem [shape: f32[16,128], index: 1, kind: output, shape index: {}]  }
   0x1   :  { %v181_v0 = vld [vmem:[%s290_s0 + $0x1c] sm:$0xf]  ;;  %v182_v1 = vld [vmem:[%s290_s0 + $0x18] sm:$0xf]  ;;  %v183_v2 = vld [vmem:[%s290_s0 + $0x14] sm:$0xf] }
   0x2   :  { %49 = vst [vmem:[#allocation0 + $0x38] sm:$0xf] %v181_v0  ;;  %54 = vst [vmem:[#allocation0 + $0x30] sm:$0xf] %v182_v1  ;;  %v184_v3 = vld [vmem:[%s290_s0 + $0x10] sm:$0xf] }
   0x3   :  { %59 = vst [vmem:[#allocation0 + $0x28] sm:$0xf] %v183_v2  ;;  %v185_v4 = vld [vmem:[%s290_s0 + $0xc] sm:$0xf]  ;;  %v186_v5 = vld [vmem:[%s290_s0 + $0x8] sm:$0xf] }
   0x4   :  { %64 = vst [vmem:[#allocation0 + $0x20] sm:$0xf] %v184_v3  ;;  %69 = vst [vmem:[#allocation0 + $0x18] sm:$0xf] %v185_v4  ;;  %v187_v6 = vld [vmem:[%s290_s0 + $0x4] sm:$0xf] }
   0x5   :  { %74 = vst [vmem:[#allocation0 + $0x10] sm:$0xf] %v186_v5  ;;  %v79_v7 = vld [vmem:[%s290_s0] sm:$0xf]  ;;  %78 = vst [vmem:[#allocation0 + $0x8] sm:$0xf] %v187_v6 }
   0x6   :  { %80 = vst [vmem:[#allocation0] sm:$0xf] %v79_v7  ;;  %v173_v8 = vld [vmem:[%s290_s0 + $0x3c] sm:$0xf]  ;;  %v174_v9 = vld [vmem:[%s290_s0 + $0x38] sm:$0xf] }
   0x7   :  { %9 = vst [vmem:[#allocation0 + $0x78] sm:$0xf] %v173_v8  ;;  %14 = vst [vmem:[#allocation0 + $0x70] sm:$0xf] %v174_v9  ;;  %v175_v10 = vld [vmem:[%s290_s0 + $0x34] sm:$0xf] }
   0x8   :  { %v176_v11 = vld [vmem:[%s290_s0 + $0x30] sm:$0xf]  ;;  %v177_v12 = vld [vmem:[%s290_s0 + $0x2c] sm:$0xf]  ;;  %19 = vst [vmem:[#allocation0 + $0x68] sm:$0xf] %v175_v10 }
   0x9   :  { %24 = vst [vmem:[#allocation0 + $0x60] sm:$0xf] %v176_v11  ;;  %29 = vst [vmem:[#allocation0 + $0x58] sm:$0xf] %v177_v12  ;;  %v178_v13 = vld [vmem:[%s290_s0 + $0x28] sm:$0xf] }
   0xa   :  { %v179_v14 = vld [vmem:[%s290_s0 + $0x24] sm:$0xf]  ;;  %v180_v15 = vld [vmem:[%s290_s0 + $0x20] sm:$0xf]  ;;  %34 = vst [vmem:[#allocation0 + $0x50] sm:$0xf] %v178_v13 }
   0xb   :  { %39 = vst [vmem:[#allocation0 + $0x48] sm:$0xf] %v179_v14  ;;  %44 = vst [vmem:[#allocation0 + $0x40] sm:$0xf] %v180_v15  ;;  %s195_s0 = smov 64   ;;  %vm146_vm4 = vcmask 523520  }
   0xc   :  { %v120_v16 = vld [vmem:[#allocation0 + $0x2] ss:$8 sm:$0xf0]   ;;  %v99_v17 = vld [vmem:[#allocation0 + $0x3] ss:$8 sm:$0xf0]  }
   0xd   :  { %v118_v18 = vld [vmem:[#allocation0 + $0x2] ss:$8 sm:$0xf]   ;;  %v97_v19 = vld [vmem:[#allocation0 + $0x3] ss:$8 sm:$0xf]  }
   0xe   :  { %v122_v20 = vsel %vm83_vm0, %v120_v16, %v118_v18  ;;  %v101_v21 = vsel %vm83_vm0, %v99_v17, %v97_v19  ;;  %v139_v24 = vld [vmem:[#allocation0 + $0x1] ss:$8 sm:$0xf]   ;;  %v81_v32 = vld [vmem:[#allocation0] ss:$8 sm:$0xf]  }
   0xf   :  { %123 = vrot.lane.b32.xlu1 %v122_v20, %s195_s0  ;;  %102 = vrot.lane.b32.xlu0 %v101_v21, %s196_s9  ;;  %v141_v25 = vld [vmem:[#allocation0 + $0x1] ss:$8 sm:$0xf0]   ;;  %v82_v33 = vld [vmem:[#allocation0] ss:$8 sm:$0xf0]  }
  0x10   :  { %v130_v22 = vld [vmem:[#allocation0 + $0x42] ss:$8 sm:$0xf0]   ;;  %v109_v23 = vld [vmem:[#allocation0 + $0x43] ss:$8 sm:$0xf0]   ;;  %v84_v34 = vsel %vm83_vm0, %v82_v33, %v81_v32  ;;  %v143_v38 = vsel %vm83_vm0, %v141_v25, %v139_v24 }
  0x11   :  { %v151_v31 = vld [vmem:[#allocation0 + $0x41] ss:$8 sm:$0xf0]   ;;  %v90_v36 = vld [vmem:[#allocation0 + $0x40] ss:$8 sm:$0xf0]  }
  0x12   :  { %v128_v26 = vld [vmem:[#allocation0 + $0x42] ss:$8 sm:$0xf]   ;;  %v107_v27 = vld [vmem:[#allocation0 + $0x43] ss:$8 sm:$0xf]  }
  0x13   :  { %v132_v28 = vsel %vm83_vm0, %v130_v22, %v128_v26  ;;  %v111_v29 = vsel %vm83_vm0, %v109_v23, %v107_v27  ;;  %v149_v30 = vld [vmem:[#allocation0 + $0x41] ss:$8 sm:$0xf]   ;;  %v88_v35 = vld [vmem:[#allocation0 + $0x40] ss:$8 sm:$0xf]  }
  0x14   :  { %133 = vrot.lane.b32.xlu1 %v132_v28, %s195_s0  ;;  %112 = vrot.lane.b32.xlu0 %v111_v29, %s196_s9  ;;  %v153_v37 = vsel %vm83_vm0, %v151_v31, %v149_v30  ;;  %86 = vst.msk [vmem:[%s291_s1] sm:$0xff] %vm85_vm1, %v84_v34   ;;  %v92_v39 = vsel %vm83_vm0, %v90_v36, %v88_v35 }
  0x15   :  { %188 = vst.msk [vmem:[%s291_s1 + $0x8] sm:$0xff] %vm85_vm1, %v92_v39  }
  0x18   :  { %154 = vrot.lane.b32.xlu1 %v153_v37, %s197_s14  ;;  %144 = vrot.lane.b32.xlu0 %v143_v38, %s197_s14 }
  0x81   :  { %v124_v40 = vpop.permute.xlu1 %123   ;;  %v103_v41 = vpop.permute.xlu0 %102  }
  0x82   :  { %105 = vst.msk [vmem:[%s291_s1] sm:$0xff] %vm104_vm2, %v103_v41  }
  0x83   :  { %126 = vst.msk [vmem:[%s291_s1] sm:$0xff] %vm125_vm3, %v124_v40  }
  0x86   :  { %v134_v42 = vpop.permute.xlu1 %133   ;;  %v113_v43 = vpop.permute.xlu0 %112  }
  0x87   :  { %189 = vst.msk [vmem:[%s291_s1 + $0x8] sm:$0xff] %vm104_vm2, %v113_v43  }
  0x88   :  { %190 = vst.msk [vmem:[%s291_s1 + $0x8] sm:$0xff] %vm125_vm3, %v134_v42  }
  0x8a   :  { %v155_v44 = vpop.permute.xlu1 %154   ;;  %v145_v45 = vpop.permute.xlu0 %144  }
  0x8b   :  { %191 = vst.msk [vmem:[%s291_s1 + $0x8] sm:$0xff] %vm146_vm4, %v155_v44   ;;  %147 = vst.msk [vmem:[%s291_s1] sm:$0xff] %vm146_vm4, %v145_v45  }

// kernel: tile.49
= control target key start
LH: loop header
LB: loop body
LE: loop exit
PB: predicated region body
PF: predicated region fallthrough
CT: control target
= control target key end

     0   :  { %vm43_vm0 = vcmask 1047556   ;;  %vm45_vm1 = vcmask 261120   ;;  %s94_s22 = smov 32   ;;  %s95_s25 = smov 64   ;;  %vm55_vm2 = vcmask 1048320   ;;  %vm65_vm3 = vcmask 785920   ;;  %s147_s0 = inlined_call_operand.vmem [shape: f32[8,4,32], index: 0, kind: input, shape index: {}]   ;;  %s148_s1 = inlined_call_operand.vmem [shape: f32[8,128], index: 1, kind: output, shape index: {}]  }
   0x1   :  { %v83_v0 = vld [vmem:[%s147_s0 + $0x1c] sm:$0xf]  ;;  %v84_v1 = vld [vmem:[%s147_s0 + $0x18] sm:$0xf]  ;;  %v85_v2 = vld [vmem:[%s147_s0 + $0x14] sm:$0xf] }
   0x2   :  { %9 = vst [vmem:[#allocation0 + $0x38] sm:$0xf] %v83_v0  ;;  %14 = vst [vmem:[#allocation0 + $0x30] sm:$0xf] %v84_v1  ;;  %v86_v3 = vld [vmem:[%s147_s0 + $0x10] sm:$0xf] }
   0x3   :  { %19 = vst [vmem:[#allocation0 + $0x28] sm:$0xf] %v85_v2  ;;  %v87_v4 = vld [vmem:[%s147_s0 + $0xc] sm:$0xf]  ;;  %v88_v5 = vld [vmem:[%s147_s0 + $0x8] sm:$0xf] }
   0x4   :  { %24 = vst [vmem:[#allocation0 + $0x20] sm:$0xf] %v86_v3  ;;  %29 = vst [vmem:[#allocation0 + $0x18] sm:$0xf] %v87_v4  ;;  %v89_v6 = vld [vmem:[%s147_s0 + $0x4] sm:$0xf] }
   0x5   :  { %34 = vst [vmem:[#allocation0 + $0x10] sm:$0xf] %v88_v5  ;;  %v39_v7 = vld [vmem:[%s147_s0] sm:$0xf]  ;;  %38 = vst [vmem:[#allocation0 + $0x8] sm:$0xf] %v89_v6 }
   0x6   :  { %40 = vst [vmem:[#allocation0] sm:$0xf] %v39_v7  ;;  %s93_s0 = smov 96   ;;  %vm75_vm4 = vcmask 523520  }
   0xb   :  { %v50_v8 = vld [vmem:[#allocation0 + $0x3] ss:$8 sm:$0xf0]   ;;  %v60_v9 = vld [vmem:[#allocation0 + $0x2] ss:$8 sm:$0xf0]  }
   0xc   :  { %v70_v14 = vld [vmem:[#allocation0 + $0x1] ss:$8 sm:$0xf0]   ;;  %v42_v17 = vld [vmem:[#allocation0] ss:$8 sm:$0xf0]  }
   0xd   :  { %v48_v10 = vld [vmem:[#allocation0 + $0x3] ss:$8 sm:$0xf]   ;;  %v58_v11 = vld [vmem:[#allocation0 + $0x2] ss:$8 sm:$0xf]  }
   0xe   :  { %v52_v12 = vsel %vm43_vm0, %v50_v8, %v48_v10  ;;  %v68_v13 = vld [vmem:[#allocation0 + $0x1] ss:$8 sm:$0xf]   ;;  %v41_v16 = vld [vmem:[#allocation0] ss:$8 sm:$0xf]   ;;  %v62_v18 = vsel %vm43_vm0, %v60_v9, %v58_v11 }
   0xf   :  { %53 = vrot.lane.b32.xlu0 %v52_v12, %s93_s0  ;;  %v72_v15 = vsel %vm43_vm0, %v70_v14, %v68_v13  ;;  %v44_v19 = vsel %vm43_vm0, %v42_v17, %v41_v16 }
  0x10   :  { %73 = vrot.lane.b32.xlu1 %v72_v15, %s94_s22  ;;  %46 = vst.msk [vmem:[%s148_s1] sm:$0xff] %vm45_vm1, %v44_v19  }
  0x13   :  { %63 = vrot.lane.b32.xlu0 %v62_v18, %s95_s25 }
  0x81   :  { %v54_v20 = vpop.permute.xlu0 %53  }
  0x82   :  { %56 = vst.msk [vmem:[%s148_s1] sm:$0xff] %vm55_vm2, %v54_v20   ;;  %v74_v21 = vpop.permute.xlu1 %73  }
  0x85   :  { %v64_v22 = vpop.permute.xlu0 %63  }
  0x86   :  { %66 = vst.msk [vmem:[%s148_s1] sm:$0xff] %vm65_vm3, %v64_v22  }
  0x87   :  { %76 = vst.msk [vmem:[%s148_s1] sm:$0xff] %vm75_vm4, %v74_v21  }

// kernel: transformer_forward.12
= control target key start
LH: loop header
LB: loop body
LE: loop exit
PB: predicated region body
PF: predicated region fallthrough
CT: control target
= control target key end

     0   :  { %v956_v1 = vmov 0   ;;  %s1168_s1 = inlined_call_operand.vmem [shape: bf16[128,256], index: 1, kind: input, shape index: {}]   ;;  %s1169_s2 = inlined_call_operand.vmem [shape: bf16[128,256], index: 2, kind: input, shape index: {}]   ;;  %s1170_s0 = inlined_call_operand.vmem [shape: bf16[32,128], index: 0, kind: input, shape index: {}]   ;;  %s1171_s3 = inlined_call_operand.vmem [shape: bf16[256,128], index: 3, kind: input, shape index: {}]   ;;  %s1172_s4 = inlined_call_operand.vmem [shape: f32[1,128], index: 4, kind: input, shape index: {}]   ;;  %s1173_s5 = inlined_call_operand.vmem [shape: f32[1,128], index: 5, kind: input, shape index: {}]   ;;  %s1174_s6 = inlined_call_operand.vmem [shape: bf16[32,128], index: 6, kind: output, shape index: {}]  }
   0x1   :  { %v850_v0 = vld [vmem:[%s1168_s1 + $0x74] ss:$8 sps:$4 sm:$0xff]   ;;  %176 = vmatprep.mubr.bf16.mxu0 %v956_v1  ;;  %325 = vmatprep.mubr.bf16.mxu1 %v956_v1  ;;  %v852_v2 = vld [vmem:[%s1168_s1 + $0x70] ss:$8 sps:$4 sm:$0xff]   ;;  %v853_v3 = vld [vmem:[%s1168_s1 + $0x64] ss:$8 sps:$4 sm:$0xff]  }
   0x2   :  { %144 = vmatprep.subr.bf16.mxu0 %v850_v0  ;;  %v855_v4 = vld [vmem:[%s1168_s1 + $0x60] ss:$8 sps:$4 sm:$0xff]   ;;  %v856_v5 = vld [vmem:[%s1168_s1 + $0x54] ss:$8 sps:$4 sm:$0xff]   ;;  %v858_v6 = vld [vmem:[%s1168_s1 + $0x50] ss:$8 sps:$4 sm:$0xff]  }
   0x3   :  { %145 = vmatpush1.bf16.msra.mxu0 %v852_v2  ;;  %v859_v7 = vld [vmem:[%s1168_s1 + $0x44] ss:$8 sps:$4 sm:$0xff]   ;;  %v861_v8 = vld [vmem:[%s1168_s1 + $0x40] ss:$8 sps:$4 sm:$0xff]   ;;  %v873_v9 = vld [vmem:[%s1169_s2 + $0x74] ss:$8 sps:$4 sm:$0xff]  }
   0x4   :  { %146 = vmatprep.subr.bf16.mxu0 %v853_v3  ;;  %v876_v10 = vld [vmem:[%s1169_s2 + $0x70] ss:$8 sps:$4 sm:$0xff]   ;;  %v862_v11 = vld [vmem:[%s1168_s1 + $0x34] ss:$8 sps:$4 sm:$0xff]   ;;  %293 = vmatprep.subr.bf16.mxu1 %v873_v9  ;;  %v878_v12 = vld [vmem:[%s1169_s2 + $0x64] ss:$8 sps:$4 sm:$0xff]  }
   0x5   :  { %294 = vmatpush1.bf16.msra.mxu1 %v876_v10  ;;  %v880_v13 = vld [vmem:[%s1169_s2 + $0x60] ss:$8 sps:$4 sm:$0xff]   ;;  %v864_v14 = vld [vmem:[%s1168_s1 + $0x30] ss:$8 sps:$4 sm:$0xff]   ;;  %v881_v15 = vld [vmem:[%s1169_s2 + $0x54] ss:$8 sps:$4 sm:$0xff]  }
   0x6   :  { %295 = vmatprep.subr.bf16.mxu1 %v878_v12  ;;  %v865_v16 = vld [vmem:[%s1168_s1 + $0x24] ss:$8 sps:$4 sm:$0xff]   ;;  %v867_v17 = vld [vmem:[%s1168_s1 + $0x20] ss:$8 sps:$4 sm:$0xff]   ;;  %v883_v18 = vld [vmem:[%s1169_s2 + $0x50] ss:$8 sps:$4 sm:$0xff]  }
   0x7   :  { %147 = vmatpush1.bf16.msra.mxu0 %v855_v4  ;;  %v885_v19 = vld [vmem:[%s1169_s2 + $0x44] ss:$8 sps:$4 sm:$0xff]   ;;  %v868_v20 = vld [vmem:[%s1168_s1 + $0x14] ss:$8 sps:$4 sm:$0xff]   ;;  %v887_v21 = vld [vmem:[%s1169_s2 + $0x40] ss:$8 sps:$4 sm:$0xff]  }
   0x8   :  { %148 = vmatprep.subr.bf16.mxu0 %v856_v5  ;;  %v870_v22 = vld [vmem:[%s1168_s1 + $0x10] ss:$8 sps:$4 sm:$0xff]   ;;  %v888_v23 = vld [vmem:[%s1169_s2 + $0x34] ss:$8 sps:$4 sm:$0xff]   ;;  %v871_v24 = vld [vmem:[%s1168_s1 + $0x4] ss:$8 sps:$4 sm:$0xff]  }
   0x9   :  { %296 = vmatpush1.bf16.msra.mxu1 %v880_v13  ;;  %v890_v25 = vld [vmem:[%s1169_s2 + $0x30] ss:$8 sps:$4 sm:$0xff]   ;;  %v875_v26 = vld [vmem:[%s1168_s1] ss:$8 sps:$4 sm:$0xff]   ;;  %v891_v27 = vld [vmem:[%s1169_s2 + $0x24] ss:$8 sps:$4 sm:$0xff]  }
   0xa   :  { %297 = vmatprep.subr.bf16.mxu1 %v881_v15  ;;  %v877_v28 = vld [vmem:[%s1170_s0] sm:$0xff]   ;;  %v894_v30 = vld [vmem:[%s1169_s2 + $0x14] ss:$8 sps:$4 sm:$0xff]   ;;  %v896_v31 = vld [vmem:[%s1169_s2 + $0x10] ss:$8 sps:$4 sm:$0xff]  }
   0xb   :  { %149 = vmatpush1.bf16.msra.mxu0 %v858_v6  ;;  %v893_v29 = vld [vmem:[%s1169_s2 + $0x20] ss:$8 sps:$4 sm:$0xff]   ;;  %v897_v32 = vld [vmem:[%s1169_s2 + $0x4] ss:$8 sps:$4 sm:$0xff]   ;;  %v900_v35 = vld [vmem:[%s1171_s3 + $0x78] sm:$0xff]  }
   0xc   :  { %150 = vmatprep.subr.bf16.mxu0 %v859_v7  ;;  %v884_v33 = vld [vmem:[%s1170_s0 + $0x8] sm:$0xff]   ;;  %v901_v36 = vld [vmem:[%s1171_s3 + $0x38] sm:$0xff]   ;;  %v902_v37 = vld [vmem:[%s1171_s3 + $0x70] sm:$0xff]  }
   0xd   :  { %298 = vmatpush1.bf16.msra.mxu1 %v883_v18  ;;  %v899_v34 = vld [vmem:[%s1169_s2] ss:$8 sps:$4 sm:$0xff]   ;;  %v903_v38 = vld [vmem:[%s1171_s3 + $0x30] sm:$0xff]   ;;  %v908_v43 = vld [vmem:[%s1171_s3 + $0x58] sm:$0xff]  }
   0xe   :  { %299 = vmatprep.subr.bf16.mxu1 %v885_v19  ;;  %v904_v39 = vld [vmem:[%s1171_s3 + $0x68] sm:$0xff]   ;;  %v906_v41 = vld [vmem:[%s1171_s3 + $0x60] sm:$0xff]   ;;  %v909_v44 = vld [vmem:[%s1171_s3 + $0x18] sm:$0xff]  }
   0xf   :  { %151 = vmatpush1.bf16.msra.mxu0 %v861_v8  ;;  %v905_v40 = vld [vmem:[%s1171_s3 + $0x28] sm:$0xff]   ;;  %v907_v42 = vld [vmem:[%s1171_s3 + $0x20] sm:$0xff]   ;;  %v910_v45 = vld [vmem:[%s1171_s3 + $0x50] sm:$0xff]  }
  0x10   :  { %152 = vmatprep.subr.bf16.mxu0 %v862_v11  ;;  %v911_v46 = vld [vmem:[%s1171_s3 + $0x10] sm:$0xff]   ;;  %v912_v47 = vld [vmem:[%s1171_s3 + $0x48] sm:$0xff]   ;;  %v914_v49 = vld [vmem:[%s1171_s3 + $0x40] sm:$0xff]  }
  0x11   :  { %300 = vmatpush1.bf16.msra.mxu1 %v887_v21  ;;  %v913_v48 = vld [vmem:[%s1171_s3 + $0x8] sm:$0xff]   ;;  %v915_v50 = vld [vmem:[%s1171_s3] sm:$0xff]  }
  0x12   :  { %301 = vmatprep.subr.bf16.mxu1 %v888_v23 }
  0x13   :  { %153 = vmatpush1.bf16.msra.mxu0 %v864_v14 }
  0x14   :  { %154 = vmatprep.subr.bf16.mxu0 %v865_v16 }
  0x15   :  { %302 = vmatpush1.bf16.msra.mxu1 %v890_v25 }
  0x16   :  { %303 = vmatprep.subr.bf16.mxu1 %v891_v27 }
  0x17   :  { %155 = vmatpush1.bf16.msra.mxu0 %v867_v17 }
  0x18   :  { %156 = vmatprep.subr.bf16.mxu0 %v868_v20 }
  0x19   :  { %304 = vmatpush1.bf16.msra.mxu1 %v893_v29 }
  0x1a   :  { %305 = vmatprep.subr.bf16.mxu1 %v894_v30 }
  0x1b   :  { %157 = vmatpush1.bf16.msra.mxu0 %v870_v22 }
  0x1c   :  { %158 = vmatprep.subr.bf16.mxu0 %v871_v24 }
  0x1d   :  { %306 = vmatpush1.bf16.msra.mxu1 %v896_v31 }
  0x1e   :  { %307 = vmatprep.subr.bf16.mxu1 %v897_v32 }
  0x1f   :  { %159 = vmatpush1.bf16.msra.mxu0 %v875_v26 }
  0x20   :  { %805 = vmatprep.subr.bf16.mxu0 %v900_v35 }
  0x21   :  { %308 = vmatpush1.bf16.msra.mxu1 %v899_v34 }
  0x22   :  { %177 = vmatmul.mubr.bf16.vlgmr.msra.gmra.mxu0 %v877_v28  ;;  %833 = vmatprep.subr.bf16.mxu1 %v900_v35 }
  0x23   :  { %186 = vmatprep.mubr.bf16.mxu0 %v956_v1  ;;  %806 = vmatpush3.bf16.msra.mxu0 %v901_v36 }
  0x24   :  { %326 = vmatmul.mubr.bf16.vlgmr.msra.gmra.mxu1 %v877_v28  ;;  %807 = vmatprep.subr.bf16.mxu0 %v902_v37 }
  0x25   :  { %335 = vmatprep.mubr.bf16.mxu1 %v956_v1  ;;  %841 = vmatpush3.bf16.msra.mxu1 %v901_v36 }
  0x26   :  { %834 = vmatprep.subr.bf16.mxu1 %v902_v37 }
  0x27   :  { %808 = vmatpush3.bf16.msra.mxu0 %v903_v38 }
  0x28   :  { %809 = vmatprep.subr.bf16.mxu0 %v904_v39 }
  0x29   :  { %842 = vmatpush3.bf16.msra.mxu1 %v903_v38 }
  0x2a   :  { %187 = vmatmul.mubr.bf16.gmra.mxu0 %v884_v33  ;;  %835 = vmatprep.subr.bf16.mxu1 %v904_v39 }
  0x2b   :  { %810 = vmatpush3.bf16.msra.mxu0 %v905_v40 }
  0x2c   :  { %336 = vmatmul.mubr.bf16.gmra.mxu1 %v884_v33  ;;  %811 = vmatprep.subr.bf16.mxu0 %v906_v41 }
  0x2d   :  { %843 = vmatpush3.bf16.msra.mxu1 %v905_v40 }
  0x2e   :  { %836 = vmatprep.subr.bf16.mxu1 %v906_v41 }
  0x2f   :  { %812 = vmatpush3.bf16.msra.mxu0 %v907_v42 }
  0x30   :  { %813 = vmatprep.subr.bf16.mxu0 %v908_v43 }
  0x31   :  { %844 = vmatpush3.bf16.msra.mxu1 %v907_v42 }
  0x32   :  { %837 = vmatprep.subr.bf16.mxu1 %v908_v43 }
  0x33   :  { %814 = vmatpush3.bf16.msra.mxu0 %v909_v44 }
  0x34   :  { %815 = vmatprep.subr.bf16.mxu0 %v910_v45 }
  0x35   :  { %845 = vmatpush3.bf16.msra.mxu1 %v909_v44 }
  0x36   :  { %838 = vmatprep.subr.bf16.mxu1 %v910_v45 }
  0x37   :  { %816 = vmatpush3.bf16.msra.mxu0 %v911_v46 }
  0x38   :  { %817 = vmatprep.subr.bf16.mxu0 %v912_v47 }
  0x39   :  { %846 = vmatpush3.bf16.msra.mxu1 %v911_v46 }
  0x3a   :  { %839 = vmatprep.subr.bf16.mxu1 %v912_v47 }
  0x3b   :  { %818 = vmatpush3.bf16.msra.mxu0 %v913_v48 }
  0x3c   :  { %819 = vmatprep.subr.bf16.mxu0 %v914_v49 }
  0x3d   :  { %847 = vmatpush3.bf16.msra.mxu1 %v913_v48 }
  0x3e   :  { %840 = vmatprep.subr.bf16.mxu1 %v914_v49 }
  0x3f   :  { %820 = vmatpush3.bf16.msra.mxu0 %v915_v50 }
  0x41   :  { %848 = vmatpush3.bf16.msra.mxu1 %v915_v50 }
  0xe2   :  { %v178_v51 = vpop.f32.mrf.mxu0 }
  0xe3   :  { %v751_v52 = vmul.f32 -1.442695, %v178_v51 }
  0xe4   :  { %v180_v53 = vpop.f32.mrf.mxu0  ;;  %v327_v8 = vpop.f32.mrf.mxu1 }
  0xe5   :  { %916 = vpow2.f32 %v751_v52  ;;  %v752_v54 = vmul.f32 -1.442695, %v180_v53 }
  0xe6   :  { %v182_v55 = vpop.f32.mrf.mxu0  ;;  %v329_v13 = vpop.f32.mrf.mxu1 }
  0xe7   :  { %918 = vpow2.f32 %v752_v54  ;;  %v753_v56 = vmul.f32 -1.442695, %v182_v55 }
  0xe8   :  { %v184_v57 = vpop.f32.mrf.mxu0  ;;  %v331_v18 = vpop.f32.mrf.mxu1 }
  0xe9   :  { %920 = vpow2.f32 %v753_v56  ;;  %v754_v58 = vmul.f32 -1.442695, %v184_v57  ;;  %v786_v56 = vld [vmem:[%s1170_s0] sm:$0xff]  }
  0xea   :  { %v1146_v59 = vpop.f32.mrf.mxu0  ;;  %v333_v22 = vpop.f32.mrf.mxu1 }
  0xeb   :  { %922 = vpow2.f32 %v754_v58  ;;  %v755_v60 = vmul.f32 -1.442695, %v1146_v59 }
  0xec   :  { %v190_v61 = vpop.f32.mrf.mxu0  ;;  %v337_v26 = vpop.f32.mrf.mxu1 }
  0xed   :  { %924 = vpow2.f32 %v755_v60  ;;  %v756_v62 = vmul.f32 -1.442695, %v190_v61  ;;  %v787_v60 = vunpack.c.l.bf16 %v786_v56 }
  0xee   :  { %v192_v63 = vpop.f32.mrf.mxu0  ;;  %v339_v33 = vpop.f32.mrf.mxu1 }
  0xef   :  { %926 = vpow2.f32 %v756_v62  ;;  %v757_v0 = vmul.f32 -1.442695, %v192_v63 }
  0xf0   :  { %v194_v1 = vpop.f32.mrf.mxu0  ;;  %v341_v42 = vpop.f32.mrf.mxu1 }
  0xf1   :  { %928 = vpow2.f32 %v757_v0  ;;  %v758_v2 = vmul.f32 -1.442695, %v194_v1 }
  0xf2   :  { %v917_v3 = vpop.eup %916  ;;  %v343_v49 = vpop.f32.mrf.mxu1 }
  0xf3   :  { %930 = vpow2.f32 %v758_v2  ;;  %v370_v5 = vadd.f32 1.0, %v917_v3  ;;  %v803_v3 = vld [vmem:[%s1170_s0 + $0x8] sm:$0xff]  }
  0xf4   :  { %v919_v4 = vpop.eup %918 }
  0xf5   :  { %v371_v6 = vadd.f32 1.0, %v919_v4 }
  0xf6   :  { %v921_v7 = vpop.eup %920 }
  0xf7   :  { %932 = vrcp.f32 %v371_v6  ;;  %v372_v9 = vadd.f32 1.0, %v921_v7 }
  0xf8   :  { %v923_v10 = vpop.eup %922  ;;  %934 = vrcp.f32 %v370_v5 }
  0xf9   :  { %936 = vrcp.f32 %v372_v9  ;;  %v373_v11 = vadd.f32 1.0, %v923_v10 }
  0xfa   :  { %v925_v12 = vpop.eup %924 }
  0xfb   :  { %938 = vrcp.f32 %v373_v11  ;;  %v374_v15 = vadd.f32 1.0, %v925_v12 }
  0xfc   :  { %v927_v14 = vpop.eup %926 }
  0xfd   :  { %v375_v16 = vadd.f32 1.0, %v927_v14  ;;  %v792_v14 = vunpack.c.h.bf16 %v803_v3 }
  0xfe   :  { %v929_v17 = vpop.eup %928 }
  0xff   :  { %940 = vrcp.f32 %v375_v16  ;;  %v376_v19 = vadd.f32 1.0, %v929_v17 }
 0x100   :  { %v931_v20 = vpop.eup %930  ;;  %942 = vrcp.f32 %v374_v15 }
 0x101   :  { %944 = vrcp.f32 %v376_v19  ;;  %v377_v21 = vadd.f32 1.0, %v931_v20 }
 0x103   :  { %946 = vrcp.f32 %v377_v21 }
 0x104   :  { %v933_v23 = vpop.eup %932 }
 0x105   :  { %v935_v24 = vpop.eup %934  ;;  %v395_v27 = vmul.f32 %v933_v23, %v180_v53 }
 0x106   :  { %v937_v25 = vpop.eup %936  ;;  %v394_v30 = vmul.f32 %v935_v24, %v178_v51 }
 0x107   :  { %v396_v28 = vmul.f32 %v937_v25, %v182_v55  ;;  %v403_v34 = vmul.f32 %v395_v27, %v329_v13 }
 0x108   :  { %v939_v29 = vpop.eup %938  ;;  %v402_v37 = vmul.f32 %v394_v30, %v327_v8  ;;  %v791_v8 = vunpack.c.l.bf16 %v803_v3 }
 0x109   :  { %v397_v31 = vmul.f32 %v939_v29, %v184_v57  ;;  %v404_v32 = vmul.f32 %v396_v28, %v331_v18 }
 0x10b   :  { %v405_v35 = vmul.f32 %v397_v31, %v333_v22  ;;  %v414_v41 = vpack.c.bf16 %v404_v32, %v402_v37 }
 0x10c   :  { %v941_v36 = vpop.eup %940 }
 0x10d   :  { %v943_v38 = vpop.eup %942  ;;  %v415_v39 = vpack.c.bf16 %v405_v35, %v403_v34  ;;  %v399_v43 = vmul.f32 %v941_v36, %v190_v61 }
 0x10e   :  { %v945_v40 = vpop.eup %944  ;;  %v398_v46 = vmul.f32 %v943_v38, %v1146_v59 }
 0x10f   :  { %v400_v44 = vmul.f32 %v945_v40, %v192_v63  ;;  %578 = vmatprep.mubr.bf16.mxu0 %v415_v39  ;;  %v407_v50 = vmul.f32 %v399_v43, %v339_v33 }
 0x110   :  { %v947_v45 = vpop.eup %946  ;;  %579 = vmatmul.mubr.bf16.vlgmr.msra.gmra.mxu0 %v414_v41  ;;  %v406_v52 = vmul.f32 %v398_v46, %v337_v26 }
 0x111   :  { %v401_v47 = vmul.f32 %v947_v45, %v194_v1  ;;  %v408_v48 = vmul.f32 %v400_v44, %v341_v42  ;;  %v788_v1 = vunpack.c.h.bf16 %v786_v56 }
 0x113   :  { %v409_v51 = vmul.f32 %v401_v47, %v343_v49  ;;  %v416_v54 = vpack.c.bf16 %v408_v48, %v406_v52  ;;  %v775_v47 = vld [vmem:[%s1172_s4] ss:$0 sm:$0xff] }
 0x115   :  { %v417_v53 = vpack.c.bf16 %v409_v51, %v407_v50  ;;  %v776_v51 = vld [vmem:[%s1173_s5] ss:$0 sm:$0xff] }
 0x117   :  { %586 = vmatprep.mubr.bf16.mxu1 %v417_v53 }
 0x118   :  { %587 = vmatmul.mubr.bf16.vlgmr.msra.gmra.mxu1 %v416_v54 }
 0x1d0   :  { %v821_v55 = vpop.f32.mrf.mxu0 }
 0x1d2   :  { %v822_v57 = vpop.f32.mrf.mxu0 }
 0x1d3   :  { %v823_v58 = vadd.f32 %v822_v57, %v821_v55 }
 0x1d4   :  { %v824_v59 = vpop.f32.mrf.mxu0 }
 0x1d5   :  { %v610_v61 = vmul.f32 1.2686362, %v823_v58 }
 0x1d6   :  { %v825_v62 = vpop.f32.mrf.mxu0 }
 0x1d7   :  { %v826_v63 = vadd.f32 %v825_v62, %v824_v59  ;;  %v622_v0 = vadd.f32 %v787_v60, %v610_v61 }
 0x1d8   :  { %v827_v2 = vpop.f32.mrf.mxu1 }
 0x1d9   :  { %v611_v4 = vmul.f32 1.2686362, %v826_v63  ;;  %626 = vadd.xlane.f32.xlu0 %v622_v0 }
 0x1da   :  { %v828_v5 = vpop.f32.mrf.mxu1 }
 0x1db   :  { %v829_v6 = vadd.f32 %v828_v5, %v827_v2  ;;  %v623_v7 = vadd.f32 %v788_v1, %v611_v4 }
 0x1dc   :  { %v830_v9 = vpop.f32.mrf.mxu1 }
 0x1dd   :  { %v612_v10 = vmul.f32 1.2686362, %v829_v6  ;;  %628 = vadd.xlane.f32.xlu0 %v623_v7 }
 0x1de   :  { %v831_v11 = vpop.f32.mrf.mxu1 }
 0x1df   :  { %v832_v12 = vadd.f32 %v831_v11, %v830_v9  ;;  %v624_v13 = vadd.f32 %v791_v8, %v612_v10 }
 0x1e1   :  { %v613_v15 = vmul.f32 1.2686362, %v832_v12  ;;  %630 = vadd.xlane.f32.xlu1 %v624_v13 }
 0x1e3   :  { %v625_v16 = vadd.f32 %v792_v14, %v613_v15 }
 0x1e5   :  { %632 = vadd.xlane.f32.xlu1 %v625_v16 }
 0x262   :  { %v627_v17 = vpop.xlane.xlu0 %626 }
 0x263   :  { %v635_v18 = vmul.f32 0.0078125, %v627_v17 }
 0x265   :  { %v639_v19 = vsub.f32 %v622_v0, %v635_v18 }
 0x266   :  { %v629_v20 = vpop.xlane.xlu0 %628 }
 0x267   :  { %v636_v21 = vmul.f32 0.0078125, %v629_v20  ;;  %v643_v22 = vmul.f32 %v639_v19, %v639_v19 }
 0x269   :  { %v640_v23 = vsub.f32 %v623_v7, %v636_v21  ;;  %647 = vadd.xlane.f32.xlu0 %v643_v22 }
 0x26a   :  { %v631_v24 = vpop.xlane.xlu1 %630 }
 0x26b   :  { %v637_v25 = vmul.f32 0.0078125, %v631_v24  ;;  %v644_v26 = vmul.f32 %v640_v23, %v640_v23 }
 0x26d   :  { %v641_v27 = vsub.f32 %v624_v13, %v637_v25  ;;  %649 = vadd.xlane.f32.xlu1 %v644_v26 }
 0x26e   :  { %v633_v28 = vpop.xlane.xlu1 %632 }
 0x26f   :  { %v638_v29 = vmul.f32 0.0078125, %v633_v28  ;;  %v645_v30 = vmul.f32 %v641_v27, %v641_v27 }
 0x271   :  { %v642_v31 = vsub.f32 %v625_v16, %v638_v29  ;;  %651 = vadd.xlane.f32.xlu0 %v645_v30 }
 0x273   :  { %v646_v32 = vmul.f32 %v642_v31, %v642_v31 }
 0x275   :  { %653 = vadd.xlane.f32.xlu1 %v646_v32 }
 0x2f2   :  { %v648_v33 = vpop.xlane.xlu0 %647 }
 0x2f3   :  { %v655_v34 = vmul.f32 0.0078125, %v648_v33 }
 0x2f5   :  { %v659_v35 = vadd.f32 1e-05, %v655_v34 }
 0x2f6   :  { %v650_v36 = vpop.xlane.xlu1 %649 }
 0x2f7   :  { %948 = vrsqrt.f32 %v659_v35  ;;  %v656_v37 = vmul.f32 0.0078125, %v650_v36 }
 0x2f9   :  { %v660_v38 = vadd.f32 1e-05, %v656_v37 }
 0x2fa   :  { %v652_v39 = vpop.xlane.xlu0 %651 }
 0x2fb   :  { %950 = vrsqrt.f32 %v660_v38  ;;  %v657_v40 = vmul.f32 0.0078125, %v652_v39 }
 0x2fd   :  { %v661_v41 = vadd.f32 1e-05, %v657_v40 }
 0x2fe   :  { %v654_v42 = vpop.xlane.xlu1 %653 }
 0x2ff   :  { %952 = vrsqrt.f32 %v661_v41  ;;  %v658_v43 = vmul.f32 0.0078125, %v654_v42 }
 0x301   :  { %v662_v44 = vadd.f32 1e-05, %v658_v43 }
 0x303   :  { %954 = vrsqrt.f32 %v662_v44 }
 0x304   :  { %v949_v45 = vpop.eup %948 }
 0x305   :  { %v667_v46 = vmul.f32 %v949_v45, %v639_v19 }
 0x307   :  { %v678_v49 = vmul.f32 %v775_v47, %v667_v46 }
 0x308   :  { %v951_v48 = vpop.eup %950 }
 0x309   :  { %v668_v50 = vmul.f32 %v951_v48, %v640_v23  ;;  %v689_v54 = vadd.f32 %v776_v51, %v678_v49 }
 0x30b   :  { %v679_v52 = vmul.f32 %v775_v47, %v668_v50 }
 0x30c   :  { %v953_v53 = vpop.eup %952 }
 0x30d   :  { %v690_v55 = vadd.f32 %v776_v51, %v679_v52  ;;  %v669_v56 = vmul.f32 %v953_v53, %v641_v27 }
 0x30f   :  { %v796_v57 = vpack.c.bf16 %v690_v55, %v689_v54  ;;  %v680_v60 = vmul.f32 %v775_v47, %v669_v56 }
 0x310   :  { %v955_v58 = vpop.eup %954 }
 0x311   :  { %797 = vst [vmem:[%s1174_s6] sm:$0xff] %v796_v57   ;;  %v670_v59 = vmul.f32 %v955_v58, %v642_v31  ;;  %v691_v62 = vadd.f32 %v776_v51, %v680_v60 }
 0x313   :  { %v681_v61 = vmul.f32 %v775_v47, %v670_v59 }
 0x315   :  { %v692_v63 = vadd.f32 %v776_v51, %v681_v61 }
 0x317   :  { %v801_v0 = vpack.c.bf16 %v692_v63, %v691_v62 }
 0x319   :  { %804 = vst [vmem:[%s1174_s6 + $0x8] sm:$0xff] %v801_v0  }

// kernel: transformer_forward.11
= control target key start
LH: loop header
LB: loop body
LE: loop exit
PB: predicated region body
PF: predicated region fallthrough
CT: control target
= control target key end

     0   :  { %s2722_s27 = smov 0   ;;  %s2724_s28 = smov 0   ;;  %s3111_s0 = inlined_call_operand.vmem [shape: bf16[2,16,128], index: 0, kind: input, shape index: {}, may-alias: {0,1}]   ;;  %s3112_s1 = inlined_call_operand.vmem [shape: bf16[2,16,128], index: 1, kind: input, shape index: {}, may-alias: {0,1}]   ;;  %s3113_s2 = inlined_call_operand.vmem [shape: bf16[128,128], index: 2, kind: input, shape index: {}]   ;;  %s3114_s3 = inlined_call_operand.vmem [shape: bf16[128,128], index: 3, kind: input, shape index: {}]   ;;  %s3115_s4 = inlined_call_operand.vmem [shape: bf16[128,128], index: 4, kind: input, shape index: {}]   ;;  %s3116_s5 = inlined_call_operand.vmem [shape: bf16[128,128], index: 5, kind: input, shape index: {}]   ;;  %s3117_s6 = inlined_call_operand.vmem [shape: f32[16,128], index: 6, kind: input, shape index: {}, may-alias: {6,9}]   ;;  %s3118_s7 = inlined_call_operand.vmem [shape: f32[16,128], index: 7, kind: input, shape index: {}, may-alias: {7,10}]   ;;  %s3119_s8 = inlined_call_operand.vmem [shape: f32[16,128], index: 8, kind: input, shape index: {}, may-alias: {8,11}]   ;;  %s3120_s9 = inlined_call_operand.vmem [shape: f32[16,128], index: 9, kind: input, shape index: {}, may-alias: {6,9}]   ;;  %s3121_s10 = inlined_call_operand.vmem [shape: f32[16,128], index: 10, kind: input, shape index: {}, may-alias: {7,10}]   ;;  %s3122_s11 = inlined_call_operand.vmem [shape: f32[16,128], index: 11, kind: input, shape index: {}, may-alias: {8,11}]   ;;  %s3123_s12 = inlined_call_operand.vmem [shape: f32[2,16,1], index: 12, kind: input, shape index: {}]   ;;  %s3124_s13 = inlined_call_operand.vmem [shape: f32[2,1,16], index: 13, kind: input, shape index: {}]   ;;  %s3125_s14 = inlined_call_operand.vmem [shape: f32[2,4,16,16], index: 14, kind: input, shape index: {}, may-alias: {14,18}]   ;;  %s3126_s15 = inlined_call_operand.vmem [shape: f32[1,128], index: 15, kind: input, shape index: {}]   ;;  %s3127_s16 = inlined_call_operand.vmem [shape: f32[1,128], index: 16, kind: input, shape index: {}]   ;;  %s3128_s17 = inlined_call_operand.vmem [shape: bf16[2,16,128], index: 17, kind: output, shape index: {0}]   ;;  %s3129_s18 = inlined_call_operand.vmem [shape: f32[2,4,16,16], index: 18, kind: output, shape index: {1}, may-alias: {14,18}]  }
   0x1   :  { %3132 = sst [smem:[#allocation4_spill]] %s3111_s0  ;;  %s2726_s29 = smov 0  }
   0x2   :  { %3133 = sst [smem:[#allocation5_spill]] %s3112_s1 }
   0x3   :  { %3134 = sst [smem:[#allocation6_spill]] %s3113_s2 }
   0x4 LB: > { %3135 = sst [smem:[#allocation2_spill]] %s2613_s28  ;;  %s41_s30 = sadd.s32 1, %s2613_s28  ;;  %s2617_s29 = sphi %s2726_s29, %s29_s29   ;;  %s2613_s28 = sphi %s2724_s28, %s3141_s28   ;;  %s2609_s27 = sphi %s2722_s27, %s3140_s27  }
   0x5   : > { %p2208_p0 = scmp.ge.s32.totalorder %s2617_s29, 1  ;;  %p43_p1 = scmp.ge.s32.totalorder %s41_s30, 2 }
   0x6   : > { %p623_p2 = scmp.lt.s32.totalorder %s2617_s29, 3 }
   0x7   : > { %s3143_s30 = smov (%p43_p1, %s41_s30), 0 }
   0x8   : > { %3136 = sst [smem:[#allocation3_spill]] %s3143_s30  ;;  %p624_p3 = pnand %p2208_p0, %p623_p2 }
   0x9   : > { %s3137_s21 = sld [smem:[#allocation6_spill]] (!%p624_p3)  ;;  %p736_p4 = scmp.lt.s32.totalorder (!%p624_p3), %s2609_s27, 1 }
   0xa   : > { %627 = sbr.rel (%p624_p3) target bundleno = 3313 (0xcf1), region = 88  ;;  %s3138_s20 = sld [smem:[#allocation5_spill]] (!%p624_p3) }
   0xb   : > { %s3139_s2 = sld [smem:[#allocation4_spill]] (!%p624_p3)  ;;  %s2621_s28 = smov (!%p624_p3), 1  }
   0xf   : > { %v2524_v0 = vld [vmem:[%s3114_s3 + $0x38] sm:$0xff]   ;;  %v2619_v1 = vmov 0.0   ;;  %v2526_v3 = vld [vmem:[%s3114_s3 + $0x30] sm:$0xff]   ;;  %vm2620_vm0 = vmmov 0   ;;  %v2528_v5 = vld [vmem:[%s3114_s3 + $0x28] sm:$0xff]   ;;  %s3145_s27 = smov (!%p736_p4, %s2609_s27), 1 }
  0x10   : > { %2367 = vmatprep.subr.bf16.mxu1 %v2619_v1  ;;  %2347 = vmatprep.subr.bf16.mxu0 %v2619_v1  ;;  %v2525_v2 = vld [vmem:[%s3137_s21 + $0x38] sm:$0xff]   ;;  %v2527_v4 = vld [vmem:[%s3137_s21 + $0x30] sm:$0xff]   ;;  %v2529_v6 = vld [vmem:[%s3137_s21 + $0x28] sm:$0xff]   ;;  %s2783_s23 = sshll.u32 %s3145_s27, 3  ;;  %s2284_s19 = sshll.u32 %s3145_s27, 4  ;;  %v2623_v27 = vmov 0  }
  0x11   : > { %2368 = vmatpush3.bf16.msra.mxu1 %v2524_v0  ;;  %2383 = vmatprep.mubr.msk.bf16.mxu1 %vm2620_vm0, %v2619_v1  ;;  %v2530_v7 = vld [vmem:[%s3114_s3 + $0x20] sm:$0xff]   ;;  %v2532_v9 = vld [vmem:[%s3114_s3 + $0x18] sm:$0xff]   ;;  %s749_s22 = scalar_lea.vmem %s3138_s20, %s2783_s23  ;;  %v2534_v11 = vld [vmem:[%s3114_s3 + $0x10] sm:$0xff]   ;;  %s743_s24 = scalar_lea.vmem %s3139_s2, %s2783_s23  ;;  %vm1215_vm1 = vcmask 261120   ;;  %vm1271_vm2 = vcmask 130048   ;;  %vm1793_vm11 = vcmask 523264  }
  0x12   : > { %2348 = vmatpush3.bf16.msra.mxu0 %v2525_v2  ;;  %2369 = vmatprep.subr.bf16.mxu1 %v2619_v1  ;;  %v2531_v8 = vld [vmem:[%s3137_s21 + $0x20] sm:$0xff]   ;;  %v2533_v10 = vld [vmem:[%s3137_s21 + $0x18] sm:$0xff]   ;;  %v2535_v12 = vld [vmem:[%s3137_s21 + $0x10] sm:$0xff]   ;;  %s776_s20 = scalar_lea.vmem %s3123_s12, %s2284_s19  ;;  %s780_s30 = scalar_lea.vmem %s3124_s13, %s3145_s27  ;;  %vm1796_vm12 = vcmask 785408  }
  0x13   : > { %2349 = vmatprep.subr.bf16.mxu0 %v2619_v1  ;;  %2363 = vmatprep.mubr.msk.bf16.mxu0 %vm2620_vm0, %v2619_v1  ;;  %v2536_v13 = vld [vmem:[%s3114_s3 + $0x8] sm:$0xff]   ;;  %v2538_v15 = vld [vmem:[%s3114_s3] sm:$0xff]   ;;  %s2626_s19 = smov 32  }
  0x14   : > { %v2537_v14 = vld [vmem:[%s3137_s21 + $0x8] sm:$0xff]   ;;  %v2539_v16 = vld [vmem:[%s3137_s21] sm:$0xff]   ;;  %2507 = vset.pattern.permute.xlu0 %v2623_v27  ;;  %2508 = vset.pattern.permute.xlu1 %v2623_v27 }
  0x15   : > { %2370 = vmatpush3.bf16.msra.mxu1 %v2526_v3  ;;  %v2823_v17 = vld [vmem:[%s743_s24] sm:$0xff]   ;;  %v1192_v29 = vld [vmem:[%s776_s20 + $0x8] sm:$0xff] }
  0x16   : > { %2350 = vmatpush3.bf16.msra.mxu0 %v2527_v4  ;;  %2371 = vmatprep.subr.bf16.mxu1 %v2619_v1  ;;  %v2827_v18 = vld [vmem:[%s749_s22] sm:$0xff]   ;;  %s2622_s22 = smov 127   ;;  %v1063_v35 = vld [vmem:[%s3120_s9 + $0x8] sm:$0xff] }
  0x17   : > { %2351 = vmatprep.subr.bf16.mxu0 %v2619_v1  ;;  %v1191_v28 = vld [vmem:[%s776_s20] sm:$0xff]  ;;  %v1065_v36 = vld [vmem:[%s3121_s10 + $0x8] sm:$0xff]  ;;  %s2285_s20 = sshll.u32 %s3145_s27, 6 }
  0x18   : > { %v1064_v30 = vld [vmem:[%s3121_s10] sm:$0xff]  ;;  %v1067_v39 = vld [vmem:[%s3122_s11 + $0x8] sm:$0xff]  ;;  %s2931_s25 = scalar_lea.vmem %s3125_s14, %s2285_s20  ;;  %s2942_s0 = scalar_lea.vmem %s3129_s18, %s2285_s20 }
  0x19   : > { %2372 = vmatpush3.bf16.msra.mxu1 %v2528_v5  ;;  %v1062_v31 = vld [vmem:[%s3120_s9] sm:$0xff]  ;;  %v930_v46 = vld [vmem:[%s3118_s7 + $0x8] sm:$0xff] }
  0x1a   : > { %2352 = vmatpush3.bf16.msra.mxu0 %v2529_v6  ;;  %2373 = vmatprep.subr.bf16.mxu1 %v2619_v1  ;;  %v1066_v38 = vld [vmem:[%s3122_s11] sm:$0xff]  ;;  %v928_v51 = vld [vmem:[%s3117_s6 + $0x8] sm:$0xff] }
  0x1b   : > { %2353 = vmatprep.subr.bf16.mxu0 %v2619_v1  ;;  %v929_v45 = vld [vmem:[%s3118_s7] sm:$0xff]  ;;  %v932_v60 = vld [vmem:[%s3119_s8 + $0x8] sm:$0xff] }
  0x1c   : > { %v927_v47 = vld [vmem:[%s3117_s6] sm:$0xff] }
  0x1d   : > { %2374 = vmatpush3.bf16.msra.mxu1 %v2530_v7  ;;  %v931_v59 = vld [vmem:[%s3119_s8] sm:$0xff] }
  0x1e   : > { %2354 = vmatpush3.bf16.msra.mxu0 %v2531_v8  ;;  %2375 = vmatprep.subr.bf16.mxu1 %v2619_v1 }
  0x1f   : > { %2355 = vmatprep.subr.bf16.mxu0 %v2619_v1 }
  0x21   : > { %2376 = vmatpush3.bf16.msra.mxu1 %v2532_v9 }
  0x22   : > { %2356 = vmatpush3.bf16.msra.mxu0 %v2533_v10  ;;  %2377 = vmatprep.subr.bf16.mxu1 %v2619_v1  ;;  %v2542_v10 = vld [vmem:[%s3115_s4 + $0x38] sm:$0xff]  }
  0x23   : > { %2357 = vmatprep.subr.bf16.mxu0 %v2619_v1 }
  0x25   : > { %2378 = vmatpush3.bf16.msra.mxu1 %v2534_v11  ;;  %v2543_v11 = vld [vmem:[%s3115_s4 + $0x30] sm:$0xff]  }
  0x26   : > { %2358 = vmatpush3.bf16.msra.mxu0 %v2535_v12  ;;  %2379 = vmatprep.subr.bf16.mxu1 %v2619_v1  ;;  %v2544_v12 = vld [vmem:[%s3115_s4 + $0x28] sm:$0xff]  }
  0x27   : > { %2359 = vmatprep.subr.bf16.mxu0 %v2619_v1 }
  0x29   : > { %2380 = vmatpush3.bf16.msra.mxu1 %v2536_v13  ;;  %v2545_v13 = vld [vmem:[%s3115_s4 + $0x20] sm:$0xff]  }
  0x2a   : > { %2360 = vmatpush3.bf16.msra.mxu0 %v2537_v14  ;;  %2381 = vmatprep.subr.bf16.mxu1 %v2619_v1  ;;  %v2546_v14 = vld [vmem:[%s3115_s4 + $0x18] sm:$0xff]  }
  0x2b   : > { %2361 = vmatprep.subr.bf16.mxu0 %v2619_v1 }
  0x2d   : > { %2382 = vmatpush3.bf16.msra.mxu1 %v2538_v15  ;;  %v2547_v15 = vld [vmem:[%s3115_s4 + $0x10] sm:$0xff]  }
  0x2e   : > { %2362 = vmatpush3.bf16.msra.mxu0 %v2539_v16  ;;  %2407 = vmatprep.subr.bf16.mxu1 %v2619_v1  ;;  %v2548_v16 = vld [vmem:[%s3115_s4 + $0x8] sm:$0xff]  }
  0x2f   : > { %2387 = vmatprep.subr.bf16.mxu0 %v2619_v1 }
  0x30   : > { %2384 = vmatmul.mubr.bf16.vlgmr.msra.gmra.mxu1 %v2827_v18 }
  0x31   : > { %2364 = vmatmul.mubr.bf16.vlgmr.msra.gmra.mxu0 %v2823_v17  ;;  %2409 = vmatprep.mubr.msk.bf16.mxu1 %vm2620_vm0, %v2619_v1 }
  0x32   : > { %2403 = vmatprep.mubr.msk.bf16.mxu0 %vm2620_vm0, %v2619_v1  ;;  %2388 = vmatpush3.bf16.msra.mxu0 %v2542_v10 }
  0x33   : > { %2389 = vmatprep.subr.bf16.mxu0 %v2619_v1 }
  0x36   : > { %2390 = vmatpush3.bf16.msra.mxu0 %v2543_v11 }
  0x37   : > { %2391 = vmatprep.subr.bf16.mxu0 %v2619_v1 }
  0x3a   : > { %2392 = vmatpush3.bf16.msra.mxu0 %v2544_v12 }
  0x3b   : > { %2393 = vmatprep.subr.bf16.mxu0 %v2619_v1 }
  0x3e   : > { %2394 = vmatpush3.bf16.msra.mxu0 %v2545_v13 }
  0x3f   : > { %2395 = vmatprep.subr.bf16.mxu0 %v2619_v1 }
  0x42   : > { %2396 = vmatpush3.bf16.msra.mxu0 %v2546_v14 }
  0x43   : > { %2397 = vmatprep.subr.bf16.mxu0 %v2619_v1 }
  0x46   : > { %2398 = vmatpush3.bf16.msra.mxu0 %v2547_v15 }
  0x47   : > { %2399 = vmatprep.subr.bf16.mxu0 %v2619_v1 }
  0x4a   : > { %2400 = vmatpush3.bf16.msra.mxu0 %v2548_v16 }
  0x4b   : > { %2401 = vmatprep.subr.bf16.mxu0 %v2619_v1 }
  0xf0   : > { %v1055_v19 = vpop.f32.mrf.mxu1 }
  0xf1   : > { %1072 = vrot.lane.b32.xlu1 %v1055_v19, %s2621_s28  ;;  %1068 = vrot.lane.b32.xlu0 %v1055_v19, %s2622_s22  ;;  %v920_v20 = vpop.f32.mrf.mxu0  ;;  %v1076_v37 = vmul.f32 %v1062_v31, %v1055_v19  ;;  %v2549_v19 = vld [vmem:[%s3115_s4] sm:$0xff]  }
  0xf2   : > { %v2385_v21 = vpop.f32.mrf.mxu1  ;;  %v941_v58 = vmul.f32 %v927_v47, %v920_v20  ;;  %2402 = vmatpush3.bf16.msra.mxu0 %v2549_v19 }
  0xf3   : > { %v2365_v22 = vpop.f32.mrf.mxu0  ;;  %2455 = vmatprep.subr.bf16.mxu0 %v2619_v1 }
  0xf4   : > { %v1058_v23 = vpop.f32.mrf.mxu1 }
  0xf5   : > { %1074 = vrot.lane.b32.xlu1 %v1058_v23, %s2621_s28  ;;  %1070 = vrot.lane.b32.xlu0 %v1058_v23, %s2622_s22  ;;  %v923_v24 = vpop.f32.mrf.mxu0  ;;  %v1077_v42 = vmul.f32 %v1063_v35, %v1058_v23 }
  0xf6   : > { %v2386_v25 = vpop.f32.mrf.mxu1  ;;  %v942_v61 = vmul.f32 %v928_v51, %v923_v24  ;;  %2404 = vmatmul.mubr.bf16.vlgmr.msra.gmra.mxu0 %v2827_v18 }
  0xf7   : > { %v2366_v26 = vpop.f32.mrf.mxu0  ;;  %2471 = vmatprep.mubr.msk.bf16.mxu0 %vm2620_vm0, %v2619_v1  ;;  %v1267_v25 = vld [vmem:[%s2931_s25] sm:$0xff] }
  0xf9   : > { %933 = vrot.lane.b32.xlu0 %v920_v20, %s2622_s22  ;;  %935 = vrot.lane.b32.xlu1 %v923_v24, %s2622_s22  ;;  %s2624_s22 = smov 96  }
  0xfd   : > { %937 = vrot.lane.b32.xlu0 %v920_v20, %s2621_s28  ;;  %939 = vrot.lane.b32.xlu1 %v923_v24, %s2621_s28  ;;  %v2247_v20 = vld [vmem:[%s780_s30] ss:$0 sm:$0xff]  ;;  %s2625_s28 = smov 64  }
 0x101   : > { %1196 = vperm.xlu0 %2507, %v1191_v28   ;;  %1201 = vperm.xlu1 %2508, %v1192_v29   ;;  %v1268_v29 = vld [vmem:[%s2931_s25 + $0x8] sm:$0xff] }
 0x163   : > { %v1073_v32 = vpop.permute.xlu1 %1072  ;;  %v1069_v33 = vpop.permute.xlu0 %1068 }
 0x164   : > { %v1078_v34 = vmul.f32 %v1069_v33, %v1064_v30  ;;  %v1082_v48 = vmul.f32 %v1073_v32, %v1066_v38 }
 0x166   : > { %v1080_v43 = vadd.f32 %v1078_v34, %v1076_v37 }
 0x167   : > { %v1075_v40 = vpop.permute.xlu1 %1074  ;;  %v1071_v41 = vpop.permute.xlu0 %1070 }
 0x168   : > { %v1079_v44 = vmul.f32 %v1071_v41, %v1065_v36  ;;  %v1083_v49 = vmul.f32 %v1075_v40, %v1067_v39  ;;  %v1084_v54 = vadd.f32 %v1082_v48, %v1080_v43 }
 0x16a   : > { %v1081_v50 = vadd.f32 %v1079_v44, %v1077_v42 }
 0x16b   : > { %v934_v52 = vpop.permute.xlu0 %933  ;;  %v936_v53 = vpop.permute.xlu1 %935 }
 0x16c   : > { %v1085_v55 = vadd.f32 %v1083_v49, %v1081_v50  ;;  %v943_v56 = vmul.f32 %v934_v52, %v929_v45  ;;  %v944_v57 = vmul.f32 %v936_v53, %v930_v46 }
 0x16e   : > { %v2877_v62 = vpack.c.bf16 %v1085_v55, %v1084_v54  ;;  %v945_v63 = vadd.f32 %v943_v56, %v941_v58  ;;  %v946_v3 = vadd.f32 %v944_v57, %v942_v61 }
 0x16f   : > { %v938_v0 = vpop.permute.xlu0 %937  ;;  %v940_v2 = vpop.permute.xlu1 %939 }
 0x170   : > { %v947_v4 = vmul.f32 %v938_v0, %v931_v59  ;;  %v948_v5 = vmul.f32 %v940_v2, %v932_v60  ;;  %v1220_v6 = vsel %vm1215_vm1, %v2877_v62, 0 }
 0x171   : > { %2408 = vmatpush3.bf16.xpose.msra.mxu1 %v1220_v6 }
 0x172   : > { %v949_v7 = vadd.f32 %v947_v4, %v945_v63  ;;  %v950_v8 = vadd.f32 %v948_v5, %v946_v3  ;;  %2413 = vmatprep.subr.bf16.mxu1 %v2619_v1 }
 0x174   : > { %v2882_v9 = vpack.c.bf16 %v950_v8, %v949_v7 }
 0x178   : > { %2410 = vmatmul.mubr.msk.bf16.vlgmr.msra.gmra.mxu1 %vm1215_vm1, %v2882_v9 }
 0x179   : > { %2415 = vmatprep.mubr.msk.bf16.mxu1 %vm2620_vm0, %v2619_v1 }
 0x17c   : > { %v1197_v21 = vpop.permute.xlu0 %1196  ;;  %v1202_v23 = vpop.permute.xlu1 %1201 }
 0x17d   : > { %v2933_v22 = vadd.f32 %v2247_v20, %v1197_v21  ;;  %v2937_v28 = vadd.f32 %v2247_v20, %v1202_v23 }
 0x1b6   : > { %v1184_v50 = vpop.f32.mrf.mxu0 }
 0x1b8   : > { %v2405_v51 = vpop.f32.mrf.mxu0 }
 0x1ba   : > { %v1187_v52 = vpop.f32.mrf.mxu0 }
 0x1bb   : > { %v2956_v53 = vpack.c.bf16 %v1187_v52, %v1184_v50 }
 0x1bc   : > { %v2406_v54 = vpop.f32.mrf.mxu0 }
 0x1bd   : > { %2414 = vmatpush3.bf16.msra.mxu1 %v2956_v53 }
 0x1be   : > { %2419 = vmatprep.subr.bf16.mxu1 %v2619_v1 }
 0x238   : > { %v1256_v18 = vpop.f32.mrf.mxu1 }
 0x239   : > { %v1263_v24 = vmul.f32 0.17677669, %v1256_v18 }
 0x23a   : > { %v2411_v26 = vpop.f32.mrf.mxu1 }
 0x23b   : > { %v1265_v27 = vadd.f32 %v1263_v24, %v2933_v22 }
 0x23c   : > { %v1259_v30 = vpop.f32.mrf.mxu1 }
 0x23d   : > { %v1269_v31 = vadd.f32 %v1267_v25, %v1265_v27  ;;  %v1264_v32 = vmul.f32 0.17677669, %v1259_v30 }
 0x23e   : > { %v2412_v33 = vpop.f32.mrf.mxu1 }
 0x23f   : > { %1272 = vst.msk [vmem:[%s2942_s0] sm:$0xff] %vm1271_vm2, %v1269_v31  ;;  %v1266_v34 = vadd.f32 %v1264_v32, %v2937_v28  ;;  %v1274_v35 = vsel %vm1271_vm2, %v1269_v31, -inf }
 0x240   : > { %1275 = vmax.xlane.f32.xlu1 %v1274_v35 }
 0x241   : > { %v1270_v36 = vadd.f32 %v1268_v29, %v1266_v34 }
 0x243   : > { %1273 = vst.msk [vmem:[%s2942_s0 + $0x8] sm:$0xff] %vm1271_vm2, %v1270_v36  ;;  %v1277_v37 = vsel %vm1271_vm2, %v1270_v36, -inf }
 0x244   : > { %1278 = vmax.xlane.f32.xlu0 %v1277_v37 }
 0x24a   : > { %v2251_v14 = vld [vmem:[%s2931_s25 + $0x10] sm:$0xff]  ;;  %v2252_v20 = vld [vmem:[%s2931_s25 + $0x18] sm:$0xff] }
 0x2c9   : > { %v1276_v38 = vpop.xlane.xlu1 %1275 }
 0x2ca   : > { %v1280_v39 = vmax.f32 %v1276_v38, -3e+38 }
 0x2cc   : > { %v1282_v40 = vsub.f32 %v1269_v31, %v1280_v39 }
 0x2cd   : > { %v1279_v41 = vpop.xlane.xlu0 %1278 }
 0x2ce   : > { %v1284_v42 = vmul.f32 1.442695, %v1282_v40  ;;  %v1281_v43 = vmax.f32 %v1279_v41, -3e+38 }
 0x2d0   : > { %2559 = vpow2.f32 %v1284_v42  ;;  %v1283_v44 = vsub.f32 %v1270_v36, %v1281_v43 }
 0x2d2   : > { %v1286_v45 = vmul.f32 1.442695, %v1283_v44 }
 0x2d4   : > { %2561 = vpow2.f32 %v1286_v45 }
 0x2dd   : > { %v2560_v46 = vpop.eup %2559 }
 0x2de   : > { %v1288_v47 = vsel %vm1271_vm2, %v2560_v46, 0.0 }
 0x2df   : > { %1289 = vadd.xlane.f32.xlu0 %v1288_v47 }
 0x2e1   : > { %v2562_v48 = vpop.eup %2561 }
 0x2e2   : > { %v1291_v49 = vsel %vm1271_vm2, %v2562_v48, 0.0 }
 0x2e3   : > { %1292 = vadd.xlane.f32.xlu1 %v1291_v49 }
 0x2f4   : > { %1348 = vrot.lane.b32.xlu1 %v2882_v9, %s2624_s22 }
 0x2f5   : > { %1351 = vrot.lane.b32.xlu0 %v2877_v62, %s2624_s22 }
 0x368   : > { %v1290_v55 = vpop.xlane.xlu0 %1289 }
 0x369   : > { %vm1294_vm3 = vcmp.gt.f32.partialorder %v1290_v55, 0.0 }
 0x36a   : > { %v1296_v56 = vsel %vm1294_vm3, %v1290_v55, 1.0 }
 0x36b   : > { %2563 = vrcp.f32 %v1296_v56 }
 0x36c   : > { %v1293_v57 = vpop.xlane.xlu1 %1292  ;;  %v1352_v0 = vpop.permute.xlu0 %1351 }
 0x36d   : > { %vm1295_vm4 = vcmp.gt.f32.partialorder %v1293_v57, 0.0  ;;  %v1357_v3 = vsel %vm1215_vm1, %v1352_v0, 0 }
 0x36e   : > { %v1297_v58 = vsel %vm1295_vm4, %v1293_v57, 1.0 }
 0x36f   : > { %2565 = vrcp.f32 %v1297_v58 }
 0x370   : > { %v1349_v4 = vpop.permute.xlu1 %1348 }
 0x378   : > { %v2564_v59 = vpop.eup %2563 }
 0x379   : > { %v1300_v61 = vmul.f32 %v2564_v59, %v2560_v46 }
 0x37c   : > { %v2566_v60 = vpop.eup %2565 }
 0x37d   : > { %v1301_v63 = vmul.f32 %v2566_v60, %v2562_v48 }
 0x37f   : > { %v1302_v2 = vpack.c.bf16 %v1301_v63, %v1300_v61 }
 0x381   : > { %2416 = vmatmul.mubr.msk.bf16.vlgmr.msra.gmra.mxu1 %vm1271_vm2, %v1302_v2 }
 0x382   : > { %2420 = vmatpush3.bf16.xpose.msra.mxu1 %v1357_v3  ;;  %2421 = vmatprep.mubr.msk.bf16.mxu1 %vm2620_vm0, %v2619_v1 }
 0x383   : > { %2425 = vmatprep.subr.bf16.mxu1 %v2619_v1 }
 0x389   : > { %2422 = vmatmul.mubr.msk.bf16.vlgmr.msra.gmra.mxu1 %vm1215_vm1, %v1349_v4 }
 0x38a   : > { %2427 = vmatprep.mubr.msk.bf16.mxu1 %vm2620_vm0, %v2619_v1 }
 0x441   : > { %v2970_v5 = vpop.f32.mrf.mxu1 }
 0x443   : > { %v2417_v6 = vpop.f32.mrf.mxu1 }
 0x445   : > { %v2972_v7 = vpop.f32.mrf.mxu1 }
 0x447   : > { %v2418_v8 = vpop.f32.mrf.mxu1 }
 0x449   : > { %v1393_v10 = vpop.f32.mrf.mxu1 }
 0x44a   : > { %v1400_v11 = vmul.f32 0.17677669, %v1393_v10 }
 0x44b   : > { %v2423_v12 = vpop.f32.mrf.mxu1 }
 0x44c   : > { %v1402_v13 = vadd.f32 %v1400_v11, %v2933_v22 }
 0x44d   : > { %v1396_v15 = vpop.f32.mrf.mxu1 }
 0x44e   : > { %v1407_v16 = vadd.f32 %v2251_v14, %v1402_v13  ;;  %v1401_v19 = vmul.f32 0.17677669, %v1396_v15 }
 0x44f   : > { %v2424_v21 = vpop.f32.mrf.mxu1 }
 0x450   : > { %v1403_v18 = vadd.f32 %v1401_v19, %v2937_v28  ;;  %2253 = vst.msk [vmem:[%s2942_s0 + $0x10] sm:$0xff] %vm1271_vm2, %v1407_v16  ;;  %v1412_v23 = vsel %vm1271_vm2, %v1407_v16, -inf }
 0x451   : > { %1413 = vmax.xlane.f32.xlu1 %v1412_v23 }
 0x452   : > { %v1408_v24 = vadd.f32 %v2252_v20, %v1403_v18 }
 0x454   : > { %2254 = vst.msk [vmem:[%s2942_s0 + $0x18] sm:$0xff] %vm1271_vm2, %v1408_v24  ;;  %v1415_v25 = vsel %vm1271_vm2, %v1408_v24, -inf }
 0x455   : > { %1416 = vmax.xlane.f32.xlu0 %v1415_v25 }
 0x45b   : > { %v2257_v63 = vld [vmem:[%s2931_s25 + $0x20] sm:$0xff]  ;;  %v2258_v4 = vld [vmem:[%s2931_s25 + $0x28] sm:$0xff] }
 0x4da   : > { %v1414_v26 = vpop.xlane.xlu1 %1413 }
 0x4db   : > { %v1418_v27 = vmax.f32 %v1414_v26, -3e+38 }
 0x4dd   : > { %v1420_v29 = vsub.f32 %v1407_v16, %v1418_v27 }
 0x4de   : > { %v1417_v30 = vpop.xlane.xlu0 %1416 }
 0x4df   : > { %v1422_v31 = vmul.f32 1.442695, %v1420_v29  ;;  %v1419_v32 = vmax.f32 %v1417_v30, -3e+38 }
 0x4e1   : > { %2567 = vpow2.f32 %v1422_v31  ;;  %v1421_v33 = vsub.f32 %v1408_v24, %v1419_v32 }
 0x4e3   : > { %v1424_v34 = vmul.f32 1.442695, %v1421_v33 }
 0x4e5   : > { %2569 = vpow2.f32 %v1424_v34 }
 0x4ee   : > { %v2568_v35 = vpop.eup %2567 }
 0x4ef   : > { %v1426_v36 = vsel %vm1271_vm2, %v2568_v35, 0.0 }
 0x4f0   : > { %1427 = vadd.xlane.f32.xlu0 %v1426_v36 }
 0x4f2   : > { %v2570_v37 = vpop.eup %2569 }
 0x4f3   : > { %v1429_v38 = vsel %vm1271_vm2, %v2570_v37, 0.0 }
 0x4f4   : > { %1430 = vadd.xlane.f32.xlu1 %v1429_v38 }
 0x505   : > { %1491 = vrot.lane.b32.xlu1 %v2877_v62, %s2625_s28 }
 0x506   : > { %1442 = vrot.lane.b32.xlu0 %v2956_v53, %s2624_s22 }
 0x509   : > { %1489 = vrot.lane.b32.xlu1 %v2882_v9, %s2625_s28 }
 0x579   : > { %v1428_v39 = vpop.xlane.xlu0 %1427 }
 0x57a   : > { %vm1432_vm5 = vcmp.gt.f32.partialorder %v1428_v39, 0.0 }
 0x57b   : > { %v1434_v40 = vsel %vm1432_vm5, %v1428_v39, 1.0 }
 0x57c   : > { %2571 = vrcp.f32 %v1434_v40 }
 0x57d   : > { %v1431_v41 = vpop.xlane.xlu1 %1430  ;;  %v1443_v42 = vpop.permute.xlu0 %1442 }
 0x57e   : > { %vm1433_vm6 = vcmp.gt.f32.partialorder %v1431_v41, 0.0  ;;  %2426 = vmatpush3.bf16.msra.mxu1 %v1443_v42 }
 0x57f   : > { %v1435_v43 = vsel %vm1433_vm6, %v1431_v41, 1.0  ;;  %2431 = vmatprep.subr.bf16.mxu1 %v2619_v1 }
 0x580   : > { %2573 = vrcp.f32 %v1435_v43 }
 0x581   : > { %v1492_v48 = vpop.permute.xlu1 %1491 }
 0x582   : > { %v1497_v50 = vsel %vm1215_vm1, %v1492_v48, 0 }
 0x585   : > { %v1490_v51 = vpop.permute.xlu1 %1489 }
 0x589   : > { %v2572_v44 = vpop.eup %2571 }
 0x58a   : > { %v1438_v46 = vmul.f32 %v2572_v44, %v2568_v35 }
 0x58d   : > { %v2574_v45 = vpop.eup %2573 }
 0x58e   : > { %v1439_v47 = vmul.f32 %v2574_v45, %v2570_v37 }
 0x590   : > { %v1440_v49 = vpack.c.bf16 %v1439_v47, %v1438_v46 }
 0x592   : > { %2428 = vmatmul.mubr.msk.bf16.vlgmr.msra.gmra.mxu1 %vm1271_vm2, %v1440_v49 }
 0x593   : > { %2432 = vmatpush3.bf16.xpose.msra.mxu1 %v1497_v50  ;;  %2433 = vmatprep.mubr.msk.bf16.mxu1 %vm2620_vm0, %v2619_v1 }
 0x594   : > { %2437 = vmatprep.subr.bf16.mxu1 %v2619_v1 }
 0x59a   : > { %2434 = vmatmul.mubr.msk.bf16.vlgmr.msra.gmra.mxu1 %vm1215_vm1, %v1490_v51 }
 0x59b   : > { %2439 = vmatprep.mubr.msk.bf16.mxu1 %vm2620_vm0, %v2619_v1 }
 0x652   : > { %v3001_v52 = vpop.f32.mrf.mxu1 }
 0x654   : > { %v2429_v54 = vpop.f32.mrf.mxu1 }
 0x656   : > { %v3003_v55 = vpop.f32.mrf.mxu1 }
 0x657   : > { %v2509_v56 = vpack.i.bf16 %v3003_v55, %v3001_v52 }
 0x658   : > { %v2430_v57 = vpop.f32.mrf.mxu1 }
 0x65a   : > { %v1533_v58 = vpop.f32.mrf.mxu1 }
 0x65b   : > { %v1540_v59 = vmul.f32 0.17677669, %v1533_v58 }
 0x65c   : > { %v2435_v60 = vpop.f32.mrf.mxu1 }
 0x65d   : > { %v1542_v61 = vadd.f32 %v1540_v59, %v2933_v22 }
 0x65e   : > { %v1536_v0 = vpop.f32.mrf.mxu1 }
 0x65f   : > { %v1547_v2 = vadd.f32 %v2257_v63, %v1542_v61  ;;  %v1541_v3 = vmul.f32 0.17677669, %v1536_v0 }
 0x660   : > { %v2436_v6 = vpop.f32.mrf.mxu1 }
 0x661   : > { %v1543_v8 = vadd.f32 %v1541_v3, %v2937_v28  ;;  %2259 = vst.msk [vmem:[%s2942_s0 + $0x20] sm:$0xff] %vm1271_vm2, %v1547_v2  ;;  %v1552_v10 = vsel %vm1271_vm2, %v1547_v2, -inf }
 0x662   : > { %1553 = vmax.xlane.f32.xlu0 %v1552_v10 }
 0x663   : > { %v1548_v11 = vadd.f32 %v2258_v4, %v1543_v8 }
 0x665   : > { %2260 = vst.msk [vmem:[%s2942_s0 + $0x28] sm:$0xff] %vm1271_vm2, %v1548_v11  ;;  %v1555_v12 = vsel %vm1271_vm2, %v1548_v11, -inf }
 0x666   : > { %1556 = vmax.xlane.f32.xlu1 %v1555_v12 }
 0x66c   : > { %v2263_v48 = vld [vmem:[%s2931_s25 + $0x30] sm:$0xff]  ;;  %v2264_v54 = vld [vmem:[%s2931_s25 + $0x38] sm:$0xff] }
 0x677   : > { %1581 = vrot.lane.b32.xlu1 %v2956_v53, %s2625_s28 }
 0x67b   : > { %1628 = vrot.lane.b32.xlu1 %v2882_v9, %s2626_s19 }
 0x6eb   : > { %v1554_v13 = vpop.xlane.xlu0 %1553 }
 0x6ec   : > { %v1558_v14 = vmax.f32 %v1554_v13, -3e+38 }
 0x6ee   : > { %v1560_v15 = vsub.f32 %v1547_v2, %v1558_v14 }
 0x6ef   : > { %v1557_v16 = vpop.xlane.xlu1 %1556 }
 0x6f0   : > { %v1562_v19 = vmul.f32 1.442695, %v1560_v15  ;;  %v1559_v20 = vmax.f32 %v1557_v16, -3e+38 }
 0x6f2   : > { %2575 = vpow2.f32 %v1562_v19  ;;  %v1561_v21 = vsub.f32 %v1548_v11, %v1559_v20 }
 0x6f3   : > { %v1582_v18 = vpop.permute.xlu1 %1581 }
 0x6f4   : > { %v1564_v23 = vmul.f32 1.442695, %v1561_v21  ;;  %2438 = vmatpush3.bf16.msra.mxu1 %v1582_v18 }
 0x6f5   : > { %2443 = vmatprep.subr.bf16.mxu1 %v2619_v1 }
 0x6f6   : > { %2577 = vpow2.f32 %v1564_v23  ;;  %v2552_v23 = vld [vmem:[%s3116_s5 + $0x28] sm:$0xff]  }
 0x6ff   : > { %v2576_v24 = vpop.eup %2575 }
 0x700   : > { %v1566_v25 = vsel %vm1271_vm2, %v2576_v24, 0.0 }
 0x701   : > { %1567 = vadd.xlane.f32.xlu0 %v1566_v25  ;;  %v2554_v25 = vld [vmem:[%s3116_s5 + $0x18] sm:$0xff]  }
 0x703   : > { %v2578_v26 = vpop.eup %2577 }
 0x704   : > { %v1569_v9 = vsel %vm1271_vm2, %v2578_v26, 0.0 }
 0x705   : > { %1570 = vadd.xlane.f32.xlu0 %v1569_v9  ;;  %v2556_v9 = vld [vmem:[%s3116_s5 + $0x8] sm:$0xff]  }
 0x71b   : > { %1630 = vrot.lane.b32.xlu0 %v2877_v62, %s2626_s19  ;;  %v1629_v62 = vpop.permute.xlu1 %1628 }
 0x78a   : > { %v1568_v27 = vpop.xlane.xlu0 %1567 }
 0x78b   : > { %vm1572_vm7 = vcmp.gt.f32.partialorder %v1568_v27, 0.0 }
 0x78c   : > { %v1574_v29 = vsel %vm1572_vm7, %v1568_v27, 1.0  ;;  %v2557_v27 = vld [vmem:[%s3116_s5] sm:$0xff]  }
 0x78d   : > { %2579 = vrcp.f32 %v1574_v29 }
 0x78e   : > { %v1571_v30 = vpop.xlane.xlu0 %1570 }
 0x78f   : > { %vm1573_vm8 = vcmp.gt.f32.partialorder %v1571_v30, 0.0 }
 0x790   : > { %v1575_v31 = vsel %vm1573_vm8, %v1571_v30, 1.0 }
 0x791   : > { %2581 = vrcp.f32 %v1575_v31 }
 0x792   : > { %v1631_v36 = vpop.permute.xlu0 %1630 }
 0x793   : > { %v1636_v38 = vsel %vm1215_vm1, %v1631_v36, 0 }
 0x79a   : > { %v2580_v32 = vpop.eup %2579 }
 0x79b   : > { %v1578_v34 = vmul.f32 %v2580_v32, %v2576_v24  ;;  %v2553_v24 = vld [vmem:[%s3116_s5 + $0x20] sm:$0xff]  }
 0x79e   : > { %v2582_v33 = vpop.eup %2581 }
 0x79f   : > { %v1579_v35 = vmul.f32 %v2582_v33, %v2578_v26  ;;  %v2555_v26 = vld [vmem:[%s3116_s5 + $0x10] sm:$0xff]  }
 0x7a1   : > { %v1580_v37 = vpack.c.bf16 %v1579_v35, %v1578_v34 }
 0x7a3   : > { %2440 = vmatmul.mubr.msk.bf16.vlgmr.msra.gmra.mxu1 %vm1271_vm2, %v1580_v37 }
 0x7a4   : > { %2444 = vmatpush3.bf16.xpose.msra.mxu1 %v1636_v38  ;;  %2445 = vmatprep.mubr.msk.bf16.mxu1 %vm2620_vm0, %v2619_v1 }
 0x7a5   : > { %2449 = vmatprep.subr.bf16.mxu1 %v2619_v1 }
 0x7ab   : > { %2446 = vmatmul.mubr.msk.bf16.vlgmr.msra.gmra.mxu1 %vm1215_vm1, %v1629_v62 }
 0x7ac   : > { %2451 = vmatprep.mubr.msk.bf16.mxu1 %vm2620_vm0, %v2619_v1 }
 0x863   : > { %v1621_v39 = vpop.f32.mrf.mxu1 }
 0x865   : > { %v2441_v40 = vpop.f32.mrf.mxu1 }
 0x867   : > { %v1624_v41 = vpop.f32.mrf.mxu1 }
 0x868   : > { %v2514_v42 = vpack.i.bf16 %v1624_v41, %v1621_v39 }
 0x869   : > { %v2442_v43 = vpop.f32.mrf.mxu1 }
 0x86b   : > { %v1672_v44 = vpop.f32.mrf.mxu1 }
 0x86c   : > { %v1679_v45 = vmul.f32 0.17677669, %v1672_v44 }
 0x86d   : > { %v2447_v46 = vpop.f32.mrf.mxu1 }
 0x86e   : > { %v1681_v47 = vadd.f32 %v1679_v45, %v2933_v22 }
 0x86f   : > { %v1675_v49 = vpop.f32.mrf.mxu1 }
 0x870   : > { %v1686_v50 = vadd.f32 %v2263_v48, %v1681_v47  ;;  %v1680_v51 = vmul.f32 0.17677669, %v1675_v49  ;;  %v1907_v48 = vunpack.c.l.bf16 %v2823_v17 }
 0x871   : > { %v2448_v57 = vpop.f32.mrf.mxu1 }
 0x872   : > { %v1682_v58 = vadd.f32 %v1680_v51, %v2937_v28  ;;  %2265 = vst.msk [vmem:[%s2942_s0 + $0x30] sm:$0xff] %vm1271_vm2, %v1686_v50  ;;  %v1691_v59 = vsel %vm1271_vm2, %v1686_v50, -inf  ;;  %v1908_v57 = vunpack.c.h.bf16 %v2823_v17 }
 0x873   : > { %1692 = vmax.xlane.f32.xlu1 %v1691_v59 }
 0x874   : > { %v1687_v60 = vadd.f32 %v2264_v54, %v1682_v58 }
 0x876   : > { %2266 = vst.msk [vmem:[%s2942_s0 + $0x38] sm:$0xff] %vm1271_vm2, %v1687_v60  ;;  %v1694_v61 = vsel %vm1271_vm2, %v1687_v60, -inf }
 0x877   : > { %1695 = vmax.xlane.f32.xlu0 %v1694_v61 }
 0x8fc   : > { %v1693_v22 = vpop.xlane.xlu1 %1692 }
 0x8fd   : > { %v1697_v63 = vmax.f32 %v1693_v22, -3e+38 }
 0x8ff   : > { %v1699_v0 = vsub.f32 %v1686_v50, %v1697_v63 }
 0x900   : > { %v1696_v2 = vpop.xlane.xlu0 %1695 }
 0x901   : > { %v1701_v3 = vmul.f32 1.442695, %v1699_v0  ;;  %v1698_v4 = vmax.f32 %v1696_v2, -3e+38 }
 0x903   : > { %2583 = vpow2.f32 %v1701_v3  ;;  %v1700_v6 = vsub.f32 %v1687_v60, %v1698_v4 }
 0x905   : > { %v1703_v28 = vmul.f32 1.442695, %v1700_v6 }
 0x907   : > { %2585 = vpow2.f32 %v1703_v28 }
 0x910   : > { %v2584_v8 = vpop.eup %2583 }
 0x911   : > { %v1705_v10 = vsel %vm1271_vm2, %v2584_v8, 0.0 }
 0x912   : > { %1706 = vadd.xlane.f32.xlu0 %v1705_v10 }
 0x914   : > { %v2586_v11 = vpop.eup %2585 }
 0x915   : > { %v1708_v12 = vsel %vm1271_vm2, %v2586_v11, 0.0 }
 0x916   : > { %1709 = vadd.xlane.f32.xlu1 %v1708_v12 }
 0x927   : > { %2510 = vrot.lane.b32.xlu1 %v2509_v56, %s2626_s19  ;;  %v2551_v56 = vld [vmem:[%s3116_s5 + $0x30] sm:$0xff]  }
 0x928   : > { %1720 = vrot.lane.b32.xlu0 %v2956_v53, %s2626_s19  ;;  %v2550_v53 = vld [vmem:[%s3116_s5 + $0x38] sm:$0xff]   ;;  %s799_s19 = scalar_lea.vmem %s3128_s17, %s2783_s23 }
 0x929   : > { %2456 = vmatpush3.bf16.msra.mxu0 %v2550_v53 }
 0x92a   : > { %2457 = vmatprep.subr.bf16.mxu0 %v2619_v1 }
 0x92b   : > { %2515 = vrot.lane.b32.xlu1 %v2514_v42, %s2625_s28 }
 0x92d   : > { %2458 = vmatpush3.bf16.msra.mxu0 %v2551_v56 }
 0x92e   : > { %2459 = vmatprep.subr.bf16.mxu0 %v2619_v1 }
 0x931   : > { %2460 = vmatpush3.bf16.msra.mxu0 %v2552_v23 }
 0x932   : > { %2461 = vmatprep.subr.bf16.mxu0 %v2619_v1 }
 0x935   : > { %2462 = vmatpush3.bf16.msra.mxu0 %v2553_v24 }
 0x936   : > { %2463 = vmatprep.subr.bf16.mxu0 %v2619_v1 }
 0x939   : > { %2464 = vmatpush3.bf16.msra.mxu0 %v2554_v25 }
 0x93a   : > { %2465 = vmatprep.subr.bf16.mxu0 %v2619_v1 }
 0x93d   : > { %2466 = vmatpush3.bf16.msra.mxu0 %v2555_v26 }
 0x93e   : > { %2467 = vmatprep.subr.bf16.mxu0 %v2619_v1 }
 0x941   : > { %2468 = vmatpush3.bf16.msra.mxu0 %v2556_v9 }
 0x942   : > { %2469 = vmatprep.subr.bf16.mxu0 %v2619_v1 }
 0x945   : > { %2470 = vmatpush3.bf16.msra.mxu0 %v2557_v27 }
 0x99b   : > { %v1707_v13 = vpop.xlane.xlu0 %1706 }
 0x99c   : > { %vm1711_vm9 = vcmp.gt.f32.partialorder %v1707_v13, 0.0 }
 0x99d   : > { %v1713_v14 = vsel %vm1711_vm9, %v1707_v13, 1.0 }
 0x99e   : > { %2587 = vrcp.f32 %v1713_v14  ;;  %v2276_v14 = vld [vmem:[%s3126_s15] ss:$0 sm:$0xff] }
 0x99f   : > { %v1710_v15 = vpop.xlane.xlu1 %1709  ;;  %v1721_v16 = vpop.permute.xlu0 %1720 }
 0x9a0   : > { %vm1712_vm10 = vcmp.gt.f32.partialorder %v1710_v15, 0.0  ;;  %2450 = vmatpush3.bf16.msra.mxu1 %v1721_v16 }
 0x9a1   : > { %v1714_v19 = vsel %vm1712_vm10, %v1710_v15, 1.0 }
 0x9a2   : > { %2589 = vrcp.f32 %v1714_v19 }
 0x9a3   : > { %v2511_v34 = vpop.permute.xlu1 %2510 }
 0x9a4   : > { %v2513_v36 = vunpack.i.h.bf16 %v2511_v34  ;;  %v2512_v37 = vunpack.i.l.bf16 %v2511_v34 }
 0x9a6   : > { %v1792_v39 = vsel %vm1215_vm1, %v2972_v7, %v2513_v36  ;;  %v1791_v40 = vsel %vm1215_vm1, %v2970_v5, %v2512_v37 }
 0x9a7   : > { %v2516_v35 = vpop.permute.xlu1 %2515 }
 0x9a8   : > { %v2518_v38 = vunpack.i.h.bf16 %v2516_v35  ;;  %v2517_v62 = vunpack.i.l.bf16 %v2516_v35 }
 0x9aa   : > { %v1794_v43 = vsel %vm1793_vm11, %v1791_v40, %v2517_v62  ;;  %v1795_v44 = vsel %vm1793_vm11, %v1792_v39, %v2518_v38 }
 0x9ab   : > { %v2588_v20 = vpop.eup %2587 }
 0x9ac   : > { %v1717_v18 = vmul.f32 %v2588_v20, %v2584_v8  ;;  %v2277_v20 = vld [vmem:[%s3127_s16] ss:$0 sm:$0xff] }
 0x9af   : > { %v2590_v21 = vpop.eup %2589 }
 0x9b0   : > { %v1718_v52 = vmul.f32 %v2590_v21, %v2586_v11 }
 0x9b2   : > { %v1719_v55 = vpack.c.bf16 %v1718_v52, %v1717_v18 }
 0x9b4   : > { %2452 = vmatmul.mubr.msk.bf16.vlgmr.msra.gmra.mxu1 %vm1271_vm2, %v1719_v55 }
 0xa74   : > { %v1760_v29 = vpop.f32.mrf.mxu1 }
 0xa76   : > { %v2453_v30 = vpop.f32.mrf.mxu1 }
 0xa78   : > { %v1763_v31 = vpop.f32.mrf.mxu1 }
 0xa79   : > { %v2519_v32 = vpack.i.bf16 %v1763_v31, %v1760_v29 }
 0xa7a   : > { %v2454_v33 = vpop.f32.mrf.mxu1 }
 0xa7b   : > { %2520 = vrot.lane.b32.xlu0 %v2519_v32, %s2624_s22 }
 0xaed   : > { %v2521_v1 = vpop.permute.xlu0 %2520 }
 0xaee   : > { %v2523_v41 = vunpack.i.h.bf16 %v2521_v1  ;;  %v2522_v42 = vunpack.i.l.bf16 %v2521_v1 }
 0xaf0   : > { %v1798_v45 = vsel %vm1796_vm12, %v1795_v44, %v2523_v41  ;;  %v1797_v46 = vsel %vm1796_vm12, %v1794_v43, %v2522_v42 }
 0xaf1   : > { %v1799_v47 = vpack.c.bf16 %v1798_v45, %v1797_v46 }
 0xaf3   : > { %2472 = vmatmul.mubr.bf16.vlgmr.msra.gmra.mxu0 %v1799_v47 }
 0xbb3   : > { %v1898_v49 = vpop.f32.mrf.mxu0 }
 0xbb4   : > { %v1905_v50 = vmul.f32 1.2686362, %v1898_v49 }
 0xbb5   : > { %v2473_v51 = vpop.f32.mrf.mxu0 }
 0xbb6   : > { %v1909_v54 = vadd.f32 %v1907_v48, %v1905_v50 }
 0xbb7   : > { %v1901_v7 = vpop.f32.mrf.mxu0 }
 0xbb8   : > { %v1906_v58 = vmul.f32 1.2686362, %v1901_v7  ;;  %1911 = vadd.xlane.f32.xlu1 %v1909_v54 }
 0xbb9   : > { %v2474_v5 = vpop.f32.mrf.mxu0 }
 0xbba   : > { %v1910_v59 = vadd.f32 %v1908_v57, %v1906_v58 }
 0xbbc   : > { %1913 = vadd.xlane.f32.xlu0 %v1910_v59 }
 0xc41   : > { %v1912_v60 = vpop.xlane.xlu1 %1911 }
 0xc42   : > { %v1916_v61 = vmul.f32 0.0078125, %v1912_v60 }
 0xc44   : > { %v1918_v22 = vsub.f32 %v1909_v54, %v1916_v61 }
 0xc45   : > { %v1914_v63 = vpop.xlane.xlu0 %1913 }
 0xc46   : > { %v1917_v0 = vmul.f32 0.0078125, %v1914_v63  ;;  %v1920_v2 = vmul.f32 %v1918_v22, %v1918_v22 }
 0xc48   : > { %v1919_v3 = vsub.f32 %v1910_v59, %v1917_v0  ;;  %1922 = vadd.xlane.f32.xlu0 %v1920_v2 }
 0xc4a   : > { %v1921_v4 = vmul.f32 %v1919_v3, %v1919_v3 }
 0xc4c   : > { %1924 = vadd.xlane.f32.xlu1 %v1921_v4 }
 0xcd1   : > { %v1923_v6 = vpop.xlane.xlu0 %1922 }
 0xcd2   : > { %v1926_v28 = vmul.f32 0.0078125, %v1923_v6 }
 0xcd4   : > { %v1928_v8 = vadd.f32 1e-05, %v1926_v28 }
 0xcd5   : > { %v1925_v17 = vpop.xlane.xlu1 %1924 }
 0xcd6   : > { %2591 = vrsqrt.f32 %v1928_v8  ;;  %v1927_v10 = vmul.f32 0.0078125, %v1925_v17 }
 0xcd8   : > { %v1929_v11 = vadd.f32 1e-05, %v1927_v10 }
 0xcda   : > { %2593 = vrsqrt.f32 %v1929_v11 }
 0xce3   : > { %v2592_v12 = vpop.eup %2591 }
 0xce4   : > { %v1932_v13 = vmul.f32 %v2592_v12, %v1918_v22 }
 0xce6   : > { %v1941_v16 = vmul.f32 %v2276_v14, %v1932_v13 }
 0xce7   : > { %v2594_v15 = vpop.eup %2593 }
 0xce8   : > { %v1933_v19 = vmul.f32 %v2594_v15, %v1919_v3  ;;  %v1950_v18 = vadd.f32 %v2277_v20, %v1941_v16 }
 0xcea   : > { %v1942_v21 = vmul.f32 %v2276_v14, %v1933_v19 }
 0xcec   : > { %v1951_v52 = vadd.f32 %v2277_v20, %v1942_v21 }
 0xcee   : > { %v2293_v55 = vpack.c.bf16 %v1951_v52, %v1950_v18 }
 0xcf0   : > { %2294 = vst [vmem:[%s799_s19] sm:$0xff] %v2293_v55  }
 0xcf1 PF: > { %s29_s29 = sadd.s32 1, %s2617_s29   ;;  %s3140_s27 = sld [smem:[#allocation2_spill]] }
 0xcf2   : > { %p26_p5 = scmp.ge.s32.totalorder %s29_s29, 4   ;;  %s3141_s28 = sld [smem:[#allocation3_spill]] }
 0xcf4   :  { %28 = sbr.rel (!%p26_p5) target bundleno = 4 (0x4), region = 157 }

// kernel: transformer_forward.13
= control target key start
LH: loop header
LB: loop body
LE: loop exit
PB: predicated region body
PF: predicated region fallthrough
CT: control target
= control target key end

     0   :  { %s2730_s27 = smov 0   ;;  %s2732_s28 = smov 0   ;;  %s3119_s0 = inlined_call_operand.vmem [shape: bf16[2,16,128], index: 0, kind: input, shape index: {}, may-alias: {0,1}]   ;;  %s3120_s1 = inlined_call_operand.vmem [shape: bf16[2,16,128], index: 1, kind: input, shape index: {}, may-alias: {0,1}]   ;;  %s3121_s2 = inlined_call_operand.vmem [shape: bf16[128,128], index: 2, kind: input, shape index: {}]   ;;  %s3122_s3 = inlined_call_operand.vmem [shape: bf16[128,128], index: 3, kind: input, shape index: {}]   ;;  %s3123_s4 = inlined_call_operand.vmem [shape: bf16[128,128], index: 4, kind: input, shape index: {}]   ;;  %s3124_s5 = inlined_call_operand.vmem [shape: bf16[128,128], index: 5, kind: input, shape index: {}]   ;;  %s3125_s6 = inlined_call_operand.vmem [shape: f32[16,128], index: 6, kind: input, shape index: {}, may-alias: {6,9}]   ;;  %s3126_s7 = inlined_call_operand.vmem [shape: f32[16,128], index: 7, kind: input, shape index: {}, may-alias: {7,10}]   ;;  %s3127_s8 = inlined_call_operand.vmem [shape: f32[16,128], index: 8, kind: input, shape index: {}, may-alias: {8,11}]   ;;  %s3128_s9 = inlined_call_operand.vmem [shape: f32[16,128], index: 9, kind: input, shape index: {}, may-alias: {6,9}]   ;;  %s3129_s10 = inlined_call_operand.vmem [shape: f32[16,128], index: 10, kind: input, shape index: {}, may-alias: {7,10}]   ;;  %s3130_s11 = inlined_call_operand.vmem [shape: f32[16,128], index: 11, kind: input, shape index: {}, may-alias: {8,11}]   ;;  %s3131_s12 = inlined_call_operand.vmem [shape: f32[2,16,1], index: 12, kind: input, shape index: {}]   ;;  %s3132_s13 = inlined_call_operand.vmem [shape: f32[2,1,16], index: 13, kind: input, shape index: {}]   ;;  %s3133_s14 = inlined_call_operand.vmem [shape: f32[2,4,16,16], index: 14, kind: input, shape index: {}, may-alias: {14,18}]   ;;  %s3134_s15 = inlined_call_operand.vmem [shape: f32[1,128], index: 15, kind: input, shape index: {}]   ;;  %s3135_s16 = inlined_call_operand.vmem [shape: f32[1,128], index: 16, kind: input, shape index: {}]   ;;  %s3136_s17 = inlined_call_operand.vmem [shape: bf16[2,16,128], index: 17, kind: output, shape index: {0}]   ;;  %s3137_s18 = inlined_call_operand.vmem [shape: f32[2,4,16,16], index: 18, kind: output, shape index: {1}, may-alias: {14,18}]  }
   0x1   :  { %3140 = sst [smem:[#allocation4_spill]] %s3119_s0  ;;  %s2734_s29 = smov 0  }
   0x2   :  { %3141 = sst [smem:[#allocation5_spill]] %s3120_s1 }
   0x3   :  { %3142 = sst [smem:[#allocation6_spill]] %s3121_s2 }
   0x4 LB: > { %3143 = sst [smem:[#allocation2_spill]] %s2621_s28  ;;  %s41_s30 = sadd.s32 1, %s2621_s28  ;;  %s2625_s29 = sphi %s2734_s29, %s29_s29   ;;  %s2621_s28 = sphi %s2732_s28, %s3149_s28   ;;  %s2617_s27 = sphi %s2730_s27, %s3148_s27  }
   0x5   : > { %p2216_p0 = scmp.ge.s32.totalorder %s2625_s29, 1  ;;  %p43_p1 = scmp.ge.s32.totalorder %s41_s30, 2 }
   0x6   : > { %p623_p2 = scmp.lt.s32.totalorder %s2625_s29, 3 }
   0x7   : > { %s3151_s30 = smov (%p43_p1, %s41_s30), 0 }
   0x8   : > { %3144 = sst [smem:[#allocation3_spill]] %s3151_s30  ;;  %p624_p3 = pnand %p2216_p0, %p623_p2 }
   0x9   : > { %s3145_s21 = sld [smem:[#allocation6_spill]] (!%p624_p3)  ;;  %p736_p4 = scmp.lt.s32.totalorder (!%p624_p3), %s2617_s27, 1 }
   0xa   : > { %627 = sbr.rel (%p624_p3) target bundleno = 3321 (0xcf9), region = 88  ;;  %s3146_s20 = sld [smem:[#allocation5_spill]] (!%p624_p3) }
   0xb   : > { %s3147_s2 = sld [smem:[#allocation4_spill]] (!%p624_p3)  ;;  %s2629_s28 = smov (!%p624_p3), 1  }
   0xf   : > { %v2532_v0 = vld [vmem:[%s3122_s3 + $0x38] sm:$0xff]   ;;  %v2627_v1 = vmov 0.0   ;;  %v2534_v3 = vld [vmem:[%s3122_s3 + $0x30] sm:$0xff]   ;;  %vm2628_vm0 = vmmov 0   ;;  %v2536_v5 = vld [vmem:[%s3122_s3 + $0x28] sm:$0xff]   ;;  %s3153_s27 = smov (!%p736_p4, %s2617_s27), 1 }
  0x10   : > { %2375 = vmatprep.subr.bf16.mxu1 %v2627_v1  ;;  %2355 = vmatprep.subr.bf16.mxu0 %v2627_v1  ;;  %v2533_v2 = vld [vmem:[%s3145_s21 + $0x38] sm:$0xff]   ;;  %v2535_v4 = vld [vmem:[%s3145_s21 + $0x30] sm:$0xff]   ;;  %v2537_v6 = vld [vmem:[%s3145_s21 + $0x28] sm:$0xff]   ;;  %s2791_s23 = sshll.u32 %s3153_s27, 3  ;;  %s2292_s19 = sshll.u32 %s3153_s27, 4  ;;  %v2631_v27 = vmov 0  }
  0x11   : > { %2376 = vmatpush3.bf16.msra.mxu1 %v2532_v0  ;;  %2391 = vmatprep.mubr.msk.bf16.mxu1 %vm2628_vm0, %v2627_v1  ;;  %v2538_v7 = vld [vmem:[%s3122_s3 + $0x20] sm:$0xff]   ;;  %v2540_v9 = vld [vmem:[%s3122_s3 + $0x18] sm:$0xff]   ;;  %s749_s22 = scalar_lea.vmem %s3146_s20, %s2791_s23  ;;  %v2542_v11 = vld [vmem:[%s3122_s3 + $0x10] sm:$0xff]   ;;  %s743_s24 = scalar_lea.vmem %s3147_s2, %s2791_s23  ;;  %vm1215_vm1 = vcmask 261120   ;;  %vm1271_vm2 = vcmask 130048   ;;  %vm1801_vm11 = vcmask 523264  }
  0x12   : > { %2356 = vmatpush3.bf16.msra.mxu0 %v2533_v2  ;;  %2377 = vmatprep.subr.bf16.mxu1 %v2627_v1  ;;  %v2539_v8 = vld [vmem:[%s3145_s21 + $0x20] sm:$0xff]   ;;  %v2541_v10 = vld [vmem:[%s3145_s21 + $0x18] sm:$0xff]   ;;  %v2543_v12 = vld [vmem:[%s3145_s21 + $0x10] sm:$0xff]   ;;  %s776_s20 = scalar_lea.vmem %s3131_s12, %s2292_s19  ;;  %s780_s30 = scalar_lea.vmem %s3132_s13, %s3153_s27  ;;  %vm1804_vm12 = vcmask 785408  }
  0x13   : > { %2357 = vmatprep.subr.bf16.mxu0 %v2627_v1  ;;  %2371 = vmatprep.mubr.msk.bf16.mxu0 %vm2628_vm0, %v2627_v1  ;;  %v2544_v13 = vld [vmem:[%s3122_s3 + $0x8] sm:$0xff]   ;;  %v2546_v15 = vld [vmem:[%s3122_s3] sm:$0xff]   ;;  %s2634_s19 = smov 32  }
  0x14   : > { %v2545_v14 = vld [vmem:[%s3145_s21 + $0x8] sm:$0xff]   ;;  %v2547_v16 = vld [vmem:[%s3145_s21] sm:$0xff]   ;;  %2515 = vset.pattern.permute.xlu0 %v2631_v27  ;;  %2516 = vset.pattern.permute.xlu1 %v2631_v27 }
  0x15   : > { %2378 = vmatpush3.bf16.msra.mxu1 %v2534_v3  ;;  %v2831_v17 = vld [vmem:[%s743_s24] sm:$0xff]   ;;  %v1192_v29 = vld [vmem:[%s776_s20 + $0x8] sm:$0xff] }
  0x16   : > { %2358 = vmatpush3.bf16.msra.mxu0 %v2535_v4  ;;  %2379 = vmatprep.subr.bf16.mxu1 %v2627_v1  ;;  %v2835_v18 = vld [vmem:[%s749_s22] sm:$0xff]   ;;  %s2630_s22 = smov 127   ;;  %v1063_v35 = vld [vmem:[%s3128_s9 + $0x8] sm:$0xff] }
  0x17   : > { %2359 = vmatprep.subr.bf16.mxu0 %v2627_v1  ;;  %v1191_v28 = vld [vmem:[%s776_s20] sm:$0xff]  ;;  %v1065_v36 = vld [vmem:[%s3129_s10 + $0x8] sm:$0xff]  ;;  %s2293_s20 = sshll.u32 %s3153_s27, 6 }
  0x18   : > { %v1064_v30 = vld [vmem:[%s3129_s10] sm:$0xff]  ;;  %v1067_v39 = vld [vmem:[%s3130_s11 + $0x8] sm:$0xff]  ;;  %s2939_s25 = scalar_lea.vmem %s3133_s14, %s2293_s20  ;;  %s2950_s0 = scalar_lea.vmem %s3137_s18, %s2293_s20 }
  0x19   : > { %2380 = vmatpush3.bf16.msra.mxu1 %v2536_v5  ;;  %v1062_v31 = vld [vmem:[%s3128_s9] sm:$0xff]  ;;  %v930_v46 = vld [vmem:[%s3126_s7 + $0x8] sm:$0xff] }
  0x1a   : > { %2360 = vmatpush3.bf16.msra.mxu0 %v2537_v6  ;;  %2381 = vmatprep.subr.bf16.mxu1 %v2627_v1  ;;  %v1066_v38 = vld [vmem:[%s3130_s11] sm:$0xff]  ;;  %v928_v51 = vld [vmem:[%s3125_s6 + $0x8] sm:$0xff] }
  0x1b   : > { %2361 = vmatprep.subr.bf16.mxu0 %v2627_v1  ;;  %v929_v45 = vld [vmem:[%s3126_s7] sm:$0xff]  ;;  %v932_v60 = vld [vmem:[%s3127_s8 + $0x8] sm:$0xff] }
  0x1c   : > { %v927_v47 = vld [vmem:[%s3125_s6] sm:$0xff] }
  0x1d   : > { %2382 = vmatpush3.bf16.msra.mxu1 %v2538_v7  ;;  %v931_v59 = vld [vmem:[%s3127_s8] sm:$0xff] }
  0x1e   : > { %2362 = vmatpush3.bf16.msra.mxu0 %v2539_v8  ;;  %2383 = vmatprep.subr.bf16.mxu1 %v2627_v1 }
  0x1f   : > { %2363 = vmatprep.subr.bf16.mxu0 %v2627_v1 }
  0x21   : > { %2384 = vmatpush3.bf16.msra.mxu1 %v2540_v9 }
  0x22   : > { %2364 = vmatpush3.bf16.msra.mxu0 %v2541_v10  ;;  %2385 = vmatprep.subr.bf16.mxu1 %v2627_v1  ;;  %v2550_v10 = vld [vmem:[%s3123_s4 + $0x38] sm:$0xff]  }
  0x23   : > { %2365 = vmatprep.subr.bf16.mxu0 %v2627_v1 }
  0x25   : > { %2386 = vmatpush3.bf16.msra.mxu1 %v2542_v11  ;;  %v2551_v11 = vld [vmem:[%s3123_s4 + $0x30] sm:$0xff]  }
  0x26   : > { %2366 = vmatpush3.bf16.msra.mxu0 %v2543_v12  ;;  %2387 = vmatprep.subr.bf16.mxu1 %v2627_v1  ;;  %v2552_v12 = vld [vmem:[%s3123_s4 + $0x28] sm:$0xff]  }
  0x27   : > { %2367 = vmatprep.subr.bf16.mxu0 %v2627_v1 }
  0x29   : > { %2388 = vmatpush3.bf16.msra.mxu1 %v2544_v13  ;;  %v2553_v13 = vld [vmem:[%s3123_s4 + $0x20] sm:$0xff]  }
  0x2a   : > { %2368 = vmatpush3.bf16.msra.mxu0 %v2545_v14  ;;  %2389 = vmatprep.subr.bf16.mxu1 %v2627_v1  ;;  %v2554_v14 = vld [vmem:[%s3123_s4 + $0x18] sm:$0xff]  }
  0x2b   : > { %2369 = vmatprep.subr.bf16.mxu0 %v2627_v1 }
  0x2d   : > { %2390 = vmatpush3.bf16.msra.mxu1 %v2546_v15  ;;  %v2555_v15 = vld [vmem:[%s3123_s4 + $0x10] sm:$0xff]  }
  0x2e   : > { %2370 = vmatpush3.bf16.msra.mxu0 %v2547_v16  ;;  %2415 = vmatprep.subr.bf16.mxu1 %v2627_v1  ;;  %v2556_v16 = vld [vmem:[%s3123_s4 + $0x8] sm:$0xff]  }
  0x2f   : > { %2395 = vmatprep.subr.bf16.mxu0 %v2627_v1 }
  0x30   : > { %2392 = vmatmul.mubr.bf16.vlgmr.msra.gmra.mxu1 %v2835_v18 }
  0x31   : > { %2372 = vmatmul.mubr.bf16.vlgmr.msra.gmra.mxu0 %v2831_v17  ;;  %2417 = vmatprep.mubr.msk.bf16.mxu1 %vm2628_vm0, %v2627_v1 }
  0x32   : > { %2411 = vmatprep.mubr.msk.bf16.mxu0 %vm2628_vm0, %v2627_v1  ;;  %2396 = vmatpush3.bf16.msra.mxu0 %v2550_v10 }
  0x33   : > { %2397 = vmatprep.subr.bf16.mxu0 %v2627_v1 }
  0x36   : > { %2398 = vmatpush3.bf16.msra.mxu0 %v2551_v11 }
  0x37   : > { %2399 = vmatprep.subr.bf16.mxu0 %v2627_v1 }
  0x3a   : > { %2400 = vmatpush3.bf16.msra.mxu0 %v2552_v12 }
  0x3b   : > { %2401 = vmatprep.subr.bf16.mxu0 %v2627_v1 }
  0x3e   : > { %2402 = vmatpush3.bf16.msra.mxu0 %v2553_v13 }
  0x3f   : > { %2403 = vmatprep.subr.bf16.mxu0 %v2627_v1 }
  0x42   : > { %2404 = vmatpush3.bf16.msra.mxu0 %v2554_v14 }
  0x43   : > { %2405 = vmatprep.subr.bf16.mxu0 %v2627_v1 }
  0x46   : > { %2406 = vmatpush3.bf16.msra.mxu0 %v2555_v15 }
  0x47   : > { %2407 = vmatprep.subr.bf16.mxu0 %v2627_v1 }
  0x4a   : > { %2408 = vmatpush3.bf16.msra.mxu0 %v2556_v16 }
  0x4b   : > { %2409 = vmatprep.subr.bf16.mxu0 %v2627_v1 }
  0xf0   : > { %v1055_v19 = vpop.f32.mrf.mxu1 }
  0xf1   : > { %1072 = vrot.lane.b32.xlu1 %v1055_v19, %s2629_s28  ;;  %1068 = vrot.lane.b32.xlu0 %v1055_v19, %s2630_s22  ;;  %v920_v20 = vpop.f32.mrf.mxu0  ;;  %v1076_v37 = vmul.f32 %v1062_v31, %v1055_v19  ;;  %v2557_v19 = vld [vmem:[%s3123_s4] sm:$0xff]  }
  0xf2   : > { %v2393_v21 = vpop.f32.mrf.mxu1  ;;  %v941_v58 = vmul.f32 %v927_v47, %v920_v20  ;;  %2410 = vmatpush3.bf16.msra.mxu0 %v2557_v19 }
  0xf3   : > { %v2373_v22 = vpop.f32.mrf.mxu0  ;;  %2463 = vmatprep.subr.bf16.mxu0 %v2627_v1 }
  0xf4   : > { %v1058_v23 = vpop.f32.mrf.mxu1 }
  0xf5   : > { %1074 = vrot.lane.b32.xlu1 %v1058_v23, %s2629_s28  ;;  %1070 = vrot.lane.b32.xlu0 %v1058_v23, %s2630_s22  ;;  %v923_v24 = vpop.f32.mrf.mxu0  ;;  %v1077_v42 = vmul.f32 %v1063_v35, %v1058_v23 }
  0xf6   : > { %v2394_v25 = vpop.f32.mrf.mxu1  ;;  %v942_v61 = vmul.f32 %v928_v51, %v923_v24  ;;  %2412 = vmatmul.mubr.bf16.vlgmr.msra.gmra.mxu0 %v2835_v18 }
  0xf7   : > { %v2374_v26 = vpop.f32.mrf.mxu0  ;;  %2479 = vmatprep.mubr.msk.bf16.mxu0 %vm2628_vm0, %v2627_v1 }
  0xf8   : > { %v1267_v26 = vld [vmem:[%s2939_s25] sm:$0xff] }
  0xf9   : > { %933 = vrot.lane.b32.xlu0 %v920_v20, %s2630_s22  ;;  %935 = vrot.lane.b32.xlu1 %v923_v24, %s2630_s22  ;;  %s2632_s22 = smov 96  }
  0xfd   : > { %937 = vrot.lane.b32.xlu0 %v920_v20, %s2629_s28  ;;  %939 = vrot.lane.b32.xlu1 %v923_v24, %s2629_s28  ;;  %v2255_v20 = vld [vmem:[%s780_s30] ss:$0 sm:$0xff]  ;;  %s2633_s28 = smov 64  }
 0x101   : > { %1196 = vperm.xlu0 %2515, %v1191_v28   ;;  %1201 = vperm.xlu1 %2516, %v1192_v29  }
 0x163   : > { %v1073_v32 = vpop.permute.xlu1 %1072  ;;  %v1069_v33 = vpop.permute.xlu0 %1068 }
 0x164   : > { %v1078_v34 = vmul.f32 %v1069_v33, %v1064_v30  ;;  %v1082_v48 = vmul.f32 %v1073_v32, %v1066_v38  ;;  %v1268_v30 = vld [vmem:[%s2939_s25 + $0x8] sm:$0xff] }
 0x166   : > { %v1080_v43 = vadd.f32 %v1078_v34, %v1076_v37 }
 0x167   : > { %v1075_v40 = vpop.permute.xlu1 %1074  ;;  %v1071_v41 = vpop.permute.xlu0 %1070 }
 0x168   : > { %v1079_v44 = vmul.f32 %v1071_v41, %v1065_v36  ;;  %v1083_v49 = vmul.f32 %v1075_v40, %v1067_v39  ;;  %v1084_v54 = vadd.f32 %v1082_v48, %v1080_v43 }
 0x16a   : > { %v1081_v50 = vadd.f32 %v1079_v44, %v1077_v42 }
 0x16b   : > { %v934_v52 = vpop.permute.xlu0 %933  ;;  %v936_v53 = vpop.permute.xlu1 %935 }
 0x16c   : > { %v1085_v55 = vadd.f32 %v1083_v49, %v1081_v50  ;;  %v943_v56 = vmul.f32 %v934_v52, %v929_v45  ;;  %v944_v57 = vmul.f32 %v936_v53, %v930_v46 }
 0x16e   : > { %v2885_v62 = vpack.c.bf16 %v1085_v55, %v1084_v54  ;;  %v945_v63 = vadd.f32 %v943_v56, %v941_v58  ;;  %v946_v3 = vadd.f32 %v944_v57, %v942_v61 }
 0x16f   : > { %v938_v0 = vpop.permute.xlu0 %937  ;;  %v940_v2 = vpop.permute.xlu1 %939 }
 0x170   : > { %v947_v4 = vmul.f32 %v938_v0, %v931_v59  ;;  %v948_v5 = vmul.f32 %v940_v2, %v932_v60  ;;  %v1220_v6 = vsel %vm1215_vm1, %v2885_v62, 0 }
 0x171   : > { %2416 = vmatpush3.bf16.xpose.msra.mxu1 %v1220_v6 }
 0x172   : > { %v949_v7 = vadd.f32 %v947_v4, %v945_v63  ;;  %v950_v8 = vadd.f32 %v948_v5, %v946_v3  ;;  %2421 = vmatprep.subr.bf16.mxu1 %v2627_v1 }
 0x174   : > { %v2890_v9 = vpack.c.bf16 %v950_v8, %v949_v7 }
 0x178   : > { %2418 = vmatmul.mubr.msk.bf16.vlgmr.msra.gmra.mxu1 %vm1215_vm1, %v2890_v9 }
 0x179   : > { %2423 = vmatprep.mubr.msk.bf16.mxu1 %vm2628_vm0, %v2627_v1 }
 0x17c   : > { %v1197_v21 = vpop.permute.xlu0 %1196  ;;  %v1202_v23 = vpop.permute.xlu1 %1201 }
 0x17d   : > { %v2941_v22 = vadd.f32 %v2255_v20, %v1197_v21  ;;  %v2945_v28 = vadd.f32 %v2255_v20, %v1202_v23 }
 0x1b6   : > { %v1184_v52 = vpop.f32.mrf.mxu0 }
 0x1b8   : > { %v2413_v53 = vpop.f32.mrf.mxu0 }
 0x1ba   : > { %v1187_v54 = vpop.f32.mrf.mxu0 }
 0x1bb   : > { %v2964_v55 = vpack.c.bf16 %v1187_v54, %v1184_v52 }
 0x1bc   : > { %v2414_v56 = vpop.f32.mrf.mxu0 }
 0x1bd   : > { %2422 = vmatpush3.bf16.msra.mxu1 %v2964_v55 }
 0x1be   : > { %2427 = vmatprep.subr.bf16.mxu1 %v2627_v1 }
 0x238   : > { %v1256_v18 = vpop.f32.mrf.mxu1 }
 0x239   : > { %v1263_v24 = vmul.f32 0.17677669, %v1256_v18 }
 0x23a   : > { %v2419_v25 = vpop.f32.mrf.mxu1 }
 0x23b   : > { %v1265_v27 = vadd.f32 %v1263_v24, %v2941_v22 }
 0x23c   : > { %v1259_v29 = vpop.f32.mrf.mxu1 }
 0x23d   : > { %v1264_v31 = vmul.f32 0.17677669, %v1259_v29  ;;  %v1269_v32 = vadd.f32 %v1267_v26, %v1265_v27 }
 0x23e   : > { %v2420_v33 = vpop.f32.mrf.mxu1 }
 0x23f   : > { %v1266_v34 = vadd.f32 %v1264_v31, %v2945_v28  ;;  %v1274_v35 = vmul.f32 0.5, %v1269_v32  ;;  %1272 = vst.msk [vmem:[%s2950_s0] sm:$0xff] %vm1271_vm2, %v1269_v32 }
 0x241   : > { %v1276_v36 = vsel %vm1271_vm2, %v1274_v35, -inf  ;;  %v1270_v37 = vadd.f32 %v1268_v30, %v1266_v34 }
 0x242   : > { %1277 = vmax.xlane.f32.xlu1 %v1276_v36 }
 0x243   : > { %v1275_v38 = vmul.f32 0.5, %v1270_v37  ;;  %1273 = vst.msk [vmem:[%s2950_s0 + $0x8] sm:$0xff] %vm1271_vm2, %v1270_v37 }
 0x245   : > { %v1279_v39 = vsel %vm1271_vm2, %v1275_v38, -inf }
 0x246   : > { %1280 = vmax.xlane.f32.xlu0 %v1279_v39 }
 0x24a   : > { %v2259_v19 = vld [vmem:[%s2939_s25 + $0x10] sm:$0xff]  ;;  %v2260_v23 = vld [vmem:[%s2939_s25 + $0x18] sm:$0xff] }
 0x2cb   : > { %v1278_v40 = vpop.xlane.xlu1 %1277 }
 0x2cc   : > { %v1282_v41 = vmax.f32 %v1278_v40, -3e+38 }
 0x2ce   : > { %v1284_v42 = vsub.f32 %v1274_v35, %v1282_v41 }
 0x2cf   : > { %v1281_v43 = vpop.xlane.xlu0 %1280 }
 0x2d0   : > { %v1286_v44 = vmul.f32 1.442695, %v1284_v42  ;;  %v1283_v45 = vmax.f32 %v1281_v43, -3e+38 }
 0x2d2   : > { %2567 = vpow2.f32 %v1286_v44  ;;  %v1285_v46 = vsub.f32 %v1275_v38, %v1283_v45 }
 0x2d4   : > { %v1288_v47 = vmul.f32 1.442695, %v1285_v46 }
 0x2d6   : > { %2569 = vpow2.f32 %v1288_v47 }
 0x2df   : > { %v2568_v48 = vpop.eup %2567 }
 0x2e0   : > { %v1290_v49 = vsel %vm1271_vm2, %v2568_v48, 0.0 }
 0x2e1   : > { %1291 = vadd.xlane.f32.xlu0 %v1290_v49 }
 0x2e3   : > { %v2570_v50 = vpop.eup %2569 }
 0x2e4   : > { %v1293_v51 = vsel %vm1271_vm2, %v2570_v50, 0.0 }
 0x2e5   : > { %1294 = vadd.xlane.f32.xlu1 %v1293_v51 }
 0x2f6   : > { %1350 = vrot.lane.b32.xlu1 %v2890_v9, %s2632_s22 }
 0x2f7   : > { %1353 = vrot.lane.b32.xlu0 %v2885_v62, %s2632_s22 }
 0x36a   : > { %v1292_v57 = vpop.xlane.xlu0 %1291 }
 0x36b   : > { %vm1296_vm3 = vcmp.gt.f32.partialorder %v1292_v57, 0.0 }
 0x36c   : > { %v1298_v58 = vsel %vm1296_vm3, %v1292_v57, 1.0 }
 0x36d   : > { %2571 = vrcp.f32 %v1298_v58 }
 0x36e   : > { %v1295_v59 = vpop.xlane.xlu1 %1294  ;;  %v1354_v3 = vpop.permute.xlu0 %1353 }
 0x36f   : > { %vm1297_vm4 = vcmp.gt.f32.partialorder %v1295_v59, 0.0  ;;  %v1359_v5 = vsel %vm1215_vm1, %v1354_v3, 0 }
 0x370   : > { %v1299_v60 = vsel %vm1297_vm4, %v1295_v59, 1.0 }
 0x371   : > { %2573 = vrcp.f32 %v1299_v60 }
 0x372   : > { %v1351_v6 = vpop.permute.xlu1 %1350 }
 0x37a   : > { %v2572_v61 = vpop.eup %2571 }
 0x37b   : > { %v1302_v0 = vmul.f32 %v2572_v61, %v2568_v48 }
 0x37e   : > { %v2574_v63 = vpop.eup %2573 }
 0x37f   : > { %v1303_v2 = vmul.f32 %v2574_v63, %v2570_v50 }
 0x381   : > { %v1304_v4 = vpack.c.bf16 %v1303_v2, %v1302_v0 }
 0x383   : > { %2424 = vmatmul.mubr.msk.bf16.vlgmr.msra.gmra.mxu1 %vm1271_vm2, %v1304_v4 }
 0x384   : > { %2428 = vmatpush3.bf16.xpose.msra.mxu1 %v1359_v5  ;;  %2429 = vmatprep.mubr.msk.bf16.mxu1 %vm2628_vm0, %v2627_v1 }
 0x385   : > { %2433 = vmatprep.subr.bf16.mxu1 %v2627_v1 }
 0x38b   : > { %2430 = vmatmul.mubr.msk.bf16.vlgmr.msra.gmra.mxu1 %vm1215_vm1, %v1351_v6 }
 0x38c   : > { %2435 = vmatprep.mubr.msk.bf16.mxu1 %vm2628_vm0, %v2627_v1 }
 0x443   : > { %v2978_v7 = vpop.f32.mrf.mxu1 }
 0x445   : > { %v2425_v8 = vpop.f32.mrf.mxu1 }
 0x447   : > { %v2980_v10 = vpop.f32.mrf.mxu1 }
 0x449   : > { %v2426_v11 = vpop.f32.mrf.mxu1 }
 0x44b   : > { %v1395_v12 = vpop.f32.mrf.mxu1 }
 0x44c   : > { %v1402_v13 = vmul.f32 0.17677669, %v1395_v12 }
 0x44d   : > { %v2431_v14 = vpop.f32.mrf.mxu1 }
 0x44e   : > { %v1404_v15 = vadd.f32 %v1402_v13, %v2941_v22 }
 0x44f   : > { %v1398_v16 = vpop.f32.mrf.mxu1 }
 0x450   : > { %v1403_v20 = vmul.f32 0.17677669, %v1398_v16  ;;  %v1409_v21 = vadd.f32 %v2259_v19, %v1404_v15 }
 0x451   : > { %v2432_v18 = vpop.f32.mrf.mxu1 }
 0x452   : > { %v1405_v24 = vadd.f32 %v1403_v20, %v2945_v28  ;;  %v1414_v25 = vmul.f32 0.5, %v1409_v21  ;;  %2261 = vst.msk [vmem:[%s2950_s0 + $0x10] sm:$0xff] %vm1271_vm2, %v1409_v21 }
 0x454   : > { %v1416_v26 = vsel %vm1271_vm2, %v1414_v25, -inf  ;;  %v1410_v27 = vadd.f32 %v2260_v23, %v1405_v24 }
 0x455   : > { %1417 = vmax.xlane.f32.xlu1 %v1416_v26 }
 0x456   : > { %v1415_v29 = vmul.f32 0.5, %v1410_v27  ;;  %2262 = vst.msk [vmem:[%s2950_s0 + $0x18] sm:$0xff] %vm1271_vm2, %v1410_v27 }
 0x458   : > { %v1419_v30 = vsel %vm1271_vm2, %v1415_v29, -inf }
 0x459   : > { %1420 = vmax.xlane.f32.xlu0 %v1419_v30 }
 0x45d   : > { %v2265_v5 = vld [vmem:[%s2939_s25 + $0x20] sm:$0xff]  ;;  %v2266_v12 = vld [vmem:[%s2939_s25 + $0x28] sm:$0xff] }
 0x4de   : > { %v1418_v31 = vpop.xlane.xlu1 %1417 }
 0x4df   : > { %v1422_v32 = vmax.f32 %v1418_v31, -3e+38 }
 0x4e1   : > { %v1424_v33 = vsub.f32 %v1414_v25, %v1422_v32 }
 0x4e2   : > { %v1421_v34 = vpop.xlane.xlu0 %1420 }
 0x4e3   : > { %v1426_v35 = vmul.f32 1.442695, %v1424_v33  ;;  %v1423_v36 = vmax.f32 %v1421_v34, -3e+38 }
 0x4e5   : > { %2575 = vpow2.f32 %v1426_v35  ;;  %v1425_v37 = vsub.f32 %v1415_v29, %v1423_v36 }
 0x4e7   : > { %v1428_v38 = vmul.f32 1.442695, %v1425_v37 }
 0x4e9   : > { %2577 = vpow2.f32 %v1428_v38 }
 0x4f2   : > { %v2576_v39 = vpop.eup %2575 }
 0x4f3   : > { %v1430_v40 = vsel %vm1271_vm2, %v2576_v39, 0.0 }
 0x4f4   : > { %1431 = vadd.xlane.f32.xlu0 %v1430_v40 }
 0x4f6   : > { %v2578_v41 = vpop.eup %2577 }
 0x4f7   : > { %v1433_v42 = vsel %vm1271_vm2, %v2578_v41, 0.0 }
 0x4f8   : > { %1434 = vadd.xlane.f32.xlu1 %v1433_v42 }
 0x509   : > { %1495 = vrot.lane.b32.xlu1 %v2885_v62, %s2633_s28 }
 0x50a   : > { %1446 = vrot.lane.b32.xlu0 %v2964_v55, %s2632_s22 }
 0x50d   : > { %1493 = vrot.lane.b32.xlu1 %v2890_v9, %s2633_s28 }
 0x57d   : > { %v1432_v43 = vpop.xlane.xlu0 %1431 }
 0x57e   : > { %vm1436_vm5 = vcmp.gt.f32.partialorder %v1432_v43, 0.0 }
 0x57f   : > { %v1438_v44 = vsel %vm1436_vm5, %v1432_v43, 1.0 }
 0x580   : > { %2579 = vrcp.f32 %v1438_v44 }
 0x581   : > { %v1435_v45 = vpop.xlane.xlu1 %1434  ;;  %v1447_v46 = vpop.permute.xlu0 %1446 }
 0x582   : > { %vm1437_vm6 = vcmp.gt.f32.partialorder %v1435_v45, 0.0  ;;  %2434 = vmatpush3.bf16.msra.mxu1 %v1447_v46 }
 0x583   : > { %v1439_v47 = vsel %vm1437_vm6, %v1435_v45, 1.0  ;;  %2439 = vmatprep.subr.bf16.mxu1 %v2627_v1 }
 0x584   : > { %2581 = vrcp.f32 %v1439_v47 }
 0x585   : > { %v1496_v52 = vpop.permute.xlu1 %1495 }
 0x586   : > { %v1501_v54 = vsel %vm1215_vm1, %v1496_v52, 0 }
 0x589   : > { %v1494_v56 = vpop.permute.xlu1 %1493 }
 0x58d   : > { %v2580_v48 = vpop.eup %2579 }
 0x58e   : > { %v1442_v50 = vmul.f32 %v2580_v48, %v2576_v39 }
 0x591   : > { %v2582_v49 = vpop.eup %2581 }
 0x592   : > { %v1443_v51 = vmul.f32 %v2582_v49, %v2578_v41 }
 0x594   : > { %v1444_v53 = vpack.c.bf16 %v1443_v51, %v1442_v50 }
 0x596   : > { %2436 = vmatmul.mubr.msk.bf16.vlgmr.msra.gmra.mxu1 %vm1271_vm2, %v1444_v53 }
 0x597   : > { %2440 = vmatpush3.bf16.xpose.msra.mxu1 %v1501_v54  ;;  %2441 = vmatprep.mubr.msk.bf16.mxu1 %vm2628_vm0, %v2627_v1 }
 0x598   : > { %2445 = vmatprep.subr.bf16.mxu1 %v2627_v1 }
 0x59e   : > { %2442 = vmatmul.mubr.msk.bf16.vlgmr.msra.gmra.mxu1 %vm1215_vm1, %v1494_v56 }
 0x59f   : > { %2447 = vmatprep.mubr.msk.bf16.mxu1 %vm2628_vm0, %v2627_v1 }
 0x656   : > { %v3009_v57 = vpop.f32.mrf.mxu1 }
 0x658   : > { %v2437_v58 = vpop.f32.mrf.mxu1 }
 0x65a   : > { %v3011_v59 = vpop.f32.mrf.mxu1 }
 0x65b   : > { %v2517_v60 = vpack.i.bf16 %v3011_v59, %v3009_v57 }
 0x65c   : > { %v2438_v61 = vpop.f32.mrf.mxu1 }
 0x65e   : > { %v1537_v63 = vpop.f32.mrf.mxu1 }
 0x65f   : > { %v1544_v0 = vmul.f32 0.17677669, %v1537_v63 }
 0x660   : > { %v2443_v2 = vpop.f32.mrf.mxu1 }
 0x661   : > { %v1546_v3 = vadd.f32 %v1544_v0, %v2941_v22 }
 0x662   : > { %v1540_v4 = vpop.f32.mrf.mxu1 }
 0x663   : > { %v1545_v6 = vmul.f32 0.17677669, %v1540_v4  ;;  %v1551_v8 = vadd.f32 %v2265_v5, %v1546_v3 }
 0x664   : > { %v2444_v11 = vpop.f32.mrf.mxu1 }
 0x665   : > { %v1547_v13 = vadd.f32 %v1545_v6, %v2945_v28  ;;  %v1556_v14 = vmul.f32 0.5, %v1551_v8  ;;  %2267 = vst.msk [vmem:[%s2950_s0 + $0x20] sm:$0xff] %vm1271_vm2, %v1551_v8 }
 0x667   : > { %v1558_v15 = vsel %vm1271_vm2, %v1556_v14, -inf  ;;  %v1552_v16 = vadd.f32 %v2266_v12, %v1547_v13 }
 0x668   : > { %1559 = vmax.xlane.f32.xlu0 %v1558_v15 }
 0x669   : > { %v1557_v19 = vmul.f32 0.5, %v1552_v16  ;;  %2268 = vst.msk [vmem:[%s2950_s0 + $0x28] sm:$0xff] %vm1271_vm2, %v1552_v16 }
 0x66b   : > { %v1561_v20 = vsel %vm1271_vm2, %v1557_v19, -inf }
 0x66c   : > { %1562 = vmax.xlane.f32.xlu1 %v1561_v20 }
 0x670   : > { %v2271_v56 = vld [vmem:[%s2939_s25 + $0x30] sm:$0xff]  ;;  %v2272_v0 = vld [vmem:[%s2939_s25 + $0x38] sm:$0xff] }
 0x67d   : > { %1587 = vrot.lane.b32.xlu1 %v2964_v55, %s2633_s28 }
 0x681   : > { %1634 = vrot.lane.b32.xlu1 %v2890_v9, %s2634_s19 }
 0x6f1   : > { %v1560_v21 = vpop.xlane.xlu0 %1559 }
 0x6f2   : > { %v1564_v18 = vmax.f32 %v1560_v21, -3e+38 }
 0x6f4   : > { %v1566_v23 = vsub.f32 %v1556_v14, %v1564_v18 }
 0x6f5   : > { %v1563_v24 = vpop.xlane.xlu1 %1562 }
 0x6f6   : > { %v1568_v25 = vmul.f32 1.442695, %v1566_v23  ;;  %v1565_v26 = vmax.f32 %v1563_v24, -3e+38 }
 0x6f8   : > { %2583 = vpow2.f32 %v1568_v25  ;;  %v1567_v27 = vsub.f32 %v1557_v19, %v1565_v26 }
 0x6f9   : > { %v1588_v29 = vpop.permute.xlu1 %1587 }
 0x6fa   : > { %v1570_v30 = vmul.f32 1.442695, %v1567_v27  ;;  %2446 = vmatpush3.bf16.msra.mxu1 %v1588_v29 }
 0x6fb   : > { %2451 = vmatprep.subr.bf16.mxu1 %v2627_v1 }
 0x6fc   : > { %2585 = vpow2.f32 %v1570_v30 }
 0x705   : > { %v2584_v31 = vpop.eup %2583 }
 0x706   : > { %v1572_v32 = vsel %vm1271_vm2, %v2584_v31, 0.0 }
 0x707   : > { %1573 = vadd.xlane.f32.xlu0 %v1572_v32  ;;  %v2560_v32 = vld [vmem:[%s3124_s5 + $0x28] sm:$0xff]  }
 0x709   : > { %v2586_v33 = vpop.eup %2585 }
 0x70a   : > { %v1575_v9 = vsel %vm1271_vm2, %v2586_v33, 0.0 }
 0x70b   : > { %1576 = vadd.xlane.f32.xlu0 %v1575_v9  ;;  %v2562_v9 = vld [vmem:[%s3124_s5 + $0x18] sm:$0xff]  }
 0x721   : > { %1636 = vrot.lane.b32.xlu0 %v2885_v62, %s2634_s19  ;;  %v1635_v62 = vpop.permute.xlu1 %1634 }
 0x790   : > { %v1574_v34 = vpop.xlane.xlu0 %1573 }
 0x791   : > { %vm1578_vm7 = vcmp.gt.f32.partialorder %v1574_v34, 0.0 }
 0x792   : > { %v1580_v35 = vsel %vm1578_vm7, %v1574_v34, 1.0  ;;  %v2563_v34 = vld [vmem:[%s3124_s5 + $0x10] sm:$0xff]  }
 0x793   : > { %2587 = vrcp.f32 %v1580_v35  ;;  %v2564_v35 = vld [vmem:[%s3124_s5 + $0x8] sm:$0xff]  }
 0x794   : > { %v1577_v36 = vpop.xlane.xlu0 %1576 }
 0x795   : > { %vm1579_vm8 = vcmp.gt.f32.partialorder %v1577_v36, 0.0 }
 0x796   : > { %v1581_v37 = vsel %vm1579_vm8, %v1577_v36, 1.0  ;;  %v2565_v36 = vld [vmem:[%s3124_s5] sm:$0xff]  }
 0x797   : > { %2589 = vrcp.f32 %v1581_v37 }
 0x798   : > { %v1637_v42 = vpop.permute.xlu0 %1636 }
 0x799   : > { %v1642_v44 = vsel %vm1215_vm1, %v1637_v42, 0 }
 0x7a0   : > { %v2588_v38 = vpop.eup %2587 }
 0x7a1   : > { %v1584_v40 = vmul.f32 %v2588_v38, %v2584_v31 }
 0x7a4   : > { %v2590_v39 = vpop.eup %2589 }
 0x7a5   : > { %v1585_v41 = vmul.f32 %v2590_v39, %v2586_v33  ;;  %v2561_v33 = vld [vmem:[%s3124_s5 + $0x20] sm:$0xff]  }
 0x7a7   : > { %v1586_v43 = vpack.c.bf16 %v1585_v41, %v1584_v40 }
 0x7a9   : > { %2448 = vmatmul.mubr.msk.bf16.vlgmr.msra.gmra.mxu1 %vm1271_vm2, %v1586_v43 }
 0x7aa   : > { %2452 = vmatpush3.bf16.xpose.msra.mxu1 %v1642_v44  ;;  %2453 = vmatprep.mubr.msk.bf16.mxu1 %vm2628_vm0, %v2627_v1 }
 0x7ab   : > { %2457 = vmatprep.subr.bf16.mxu1 %v2627_v1 }
 0x7b1   : > { %2454 = vmatmul.mubr.msk.bf16.vlgmr.msra.gmra.mxu1 %vm1215_vm1, %v1635_v62 }
 0x7b2   : > { %2459 = vmatprep.mubr.msk.bf16.mxu1 %vm2628_vm0, %v2627_v1 }
 0x869   : > { %v1627_v45 = vpop.f32.mrf.mxu1 }
 0x86b   : > { %v2449_v46 = vpop.f32.mrf.mxu1 }
 0x86d   : > { %v1630_v47 = vpop.f32.mrf.mxu1 }
 0x86e   : > { %v2522_v48 = vpack.i.bf16 %v1630_v47, %v1627_v45 }
 0x86f   : > { %v2450_v49 = vpop.f32.mrf.mxu1 }
 0x871   : > { %v1678_v50 = vpop.f32.mrf.mxu1 }
 0x872   : > { %v1685_v51 = vmul.f32 0.17677669, %v1678_v50 }
 0x873   : > { %v2455_v52 = vpop.f32.mrf.mxu1 }
 0x874   : > { %v1687_v53 = vadd.f32 %v1685_v51, %v2941_v22 }
 0x875   : > { %v1681_v54 = vpop.f32.mrf.mxu1 }
 0x876   : > { %v1686_v58 = vmul.f32 0.17677669, %v1681_v54  ;;  %v1692_v61 = vadd.f32 %v2271_v56, %v1687_v53 }
 0x877   : > { %v2456_v63 = vpop.f32.mrf.mxu1 }
 0x878   : > { %v1688_v2 = vadd.f32 %v1686_v58, %v2945_v28  ;;  %v1697_v3 = vmul.f32 0.5, %v1692_v61  ;;  %2273 = vst.msk [vmem:[%s2950_s0 + $0x30] sm:$0xff] %vm1271_vm2, %v1692_v61  ;;  %v1915_v58 = vunpack.c.l.bf16 %v2831_v17 }
 0x87a   : > { %v1699_v4 = vsel %vm1271_vm2, %v1697_v3, -inf  ;;  %v1693_v5 = vadd.f32 %v2272_v0, %v1688_v2 }
 0x87b   : > { %1700 = vmax.xlane.f32.xlu1 %v1699_v4 }
 0x87c   : > { %v1698_v6 = vmul.f32 0.5, %v1693_v5  ;;  %2274 = vst.msk [vmem:[%s2950_s0 + $0x38] sm:$0xff] %vm1271_vm2, %v1693_v5 }
 0x87e   : > { %v1702_v22 = vsel %vm1271_vm2, %v1698_v6, -inf }
 0x87f   : > { %1703 = vmax.xlane.f32.xlu0 %v1702_v22 }
 0x904   : > { %v1701_v8 = vpop.xlane.xlu1 %1700 }
 0x905   : > { %v1705_v11 = vmax.f32 %v1701_v8, -3e+38 }
 0x907   : > { %v1707_v12 = vsub.f32 %v1697_v3, %v1705_v11  ;;  %v1916_v3 = vunpack.c.h.bf16 %v2831_v17 }
 0x908   : > { %v1704_v13 = vpop.xlane.xlu0 %1703 }
 0x909   : > { %v1709_v14 = vmul.f32 1.442695, %v1707_v12  ;;  %v1706_v15 = vmax.f32 %v1704_v13, -3e+38 }
 0x90b   : > { %2591 = vpow2.f32 %v1709_v14  ;;  %v1708_v28 = vsub.f32 %v1698_v6, %v1706_v15 }
 0x90d   : > { %v1711_v16 = vmul.f32 1.442695, %v1708_v28 }
 0x90f   : > { %2593 = vpow2.f32 %v1711_v16 }
 0x918   : > { %v2592_v19 = vpop.eup %2591 }
 0x919   : > { %v1713_v20 = vsel %vm1271_vm2, %v2592_v19, 0.0 }
 0x91a   : > { %1714 = vadd.xlane.f32.xlu0 %v1713_v20 }
 0x91c   : > { %v2594_v21 = vpop.eup %2593 }
 0x91d   : > { %v1716_v18 = vsel %vm1271_vm2, %v2594_v21, 0.0 }
 0x91e   : > { %1717 = vadd.xlane.f32.xlu1 %v1716_v18 }
 0x92f   : > { %2518 = vrot.lane.b32.xlu1 %v2517_v60, %s2634_s19  ;;  %v2559_v60 = vld [vmem:[%s3124_s5 + $0x30] sm:$0xff]  }
 0x930   : > { %1728 = vrot.lane.b32.xlu0 %v2964_v55, %s2634_s19  ;;  %v2558_v55 = vld [vmem:[%s3124_s5 + $0x38] sm:$0xff]   ;;  %s799_s19 = scalar_lea.vmem %s3136_s17, %s2791_s23 }
 0x931   : > { %2464 = vmatpush3.bf16.msra.mxu0 %v2558_v55 }
 0x932   : > { %2465 = vmatprep.subr.bf16.mxu0 %v2627_v1 }
 0x933   : > { %2523 = vrot.lane.b32.xlu1 %v2522_v48, %s2633_s28 }
 0x935   : > { %2466 = vmatpush3.bf16.msra.mxu0 %v2559_v60 }
 0x936   : > { %2467 = vmatprep.subr.bf16.mxu0 %v2627_v1 }
 0x939   : > { %2468 = vmatpush3.bf16.msra.mxu0 %v2560_v32 }
 0x93a   : > { %2469 = vmatprep.subr.bf16.mxu0 %v2627_v1 }
 0x93d   : > { %2470 = vmatpush3.bf16.msra.mxu0 %v2561_v33 }
 0x93e   : > { %2471 = vmatprep.subr.bf16.mxu0 %v2627_v1 }
 0x941   : > { %2472 = vmatpush3.bf16.msra.mxu0 %v2562_v9 }
 0x942   : > { %2473 = vmatprep.subr.bf16.mxu0 %v2627_v1 }
 0x945   : > { %2474 = vmatpush3.bf16.msra.mxu0 %v2563_v34 }
 0x946   : > { %2475 = vmatprep.subr.bf16.mxu0 %v2627_v1 }
 0x949   : > { %2476 = vmatpush3.bf16.msra.mxu0 %v2564_v35 }
 0x94a   : > { %2477 = vmatprep.subr.bf16.mxu0 %v2627_v1 }
 0x94d   : > { %2478 = vmatpush3.bf16.msra.mxu0 %v2565_v36 }
 0x9a3   : > { %v1715_v23 = vpop.xlane.xlu0 %1714 }
 0x9a4   : > { %vm1719_vm9 = vcmp.gt.f32.partialorder %v1715_v23, 0.0 }
 0x9a5   : > { %v1721_v24 = vsel %vm1719_vm9, %v1715_v23, 1.0 }
 0x9a6   : > { %2595 = vrcp.f32 %v1721_v24  ;;  %v2284_v24 = vld [vmem:[%s3134_s15] ss:$0 sm:$0xff] }
 0x9a7   : > { %v1718_v25 = vpop.xlane.xlu1 %1717  ;;  %v1729_v26 = vpop.permute.xlu0 %1728 }
 0x9a8   : > { %vm1720_vm10 = vcmp.gt.f32.partialorder %v1718_v25, 0.0  ;;  %2458 = vmatpush3.bf16.msra.mxu1 %v1729_v26 }
 0x9a9   : > { %v1722_v27 = vsel %vm1720_vm10, %v1718_v25, 1.0 }
 0x9aa   : > { %2597 = vrcp.f32 %v1722_v27 }
 0x9ab   : > { %v2519_v42 = vpop.permute.xlu1 %2518 }
 0x9ac   : > { %v2521_v44 = vunpack.i.h.bf16 %v2519_v42  ;;  %v2520_v62 = vunpack.i.l.bf16 %v2519_v42 }
 0x9ae   : > { %v1800_v47 = vsel %vm1215_vm1, %v2980_v10, %v2521_v44  ;;  %v1799_v48 = vsel %vm1215_vm1, %v2978_v7, %v2520_v62 }
 0x9af   : > { %v2524_v43 = vpop.permute.xlu1 %2523 }
 0x9b0   : > { %v2526_v45 = vunpack.i.h.bf16 %v2524_v43  ;;  %v2525_v46 = vunpack.i.l.bf16 %v2524_v43 }
 0x9b2   : > { %v1802_v51 = vsel %vm1801_vm11, %v1799_v48, %v2525_v46  ;;  %v1803_v52 = vsel %vm1801_vm11, %v1800_v47, %v2526_v45 }
 0x9b3   : > { %v2596_v29 = vpop.eup %2595 }
 0x9b4   : > { %v1725_v31 = vmul.f32 %v2596_v29, %v2592_v19  ;;  %v2285_v29 = vld [vmem:[%s3135_s16] ss:$0 sm:$0xff] }
 0x9b7   : > { %v2598_v30 = vpop.eup %2597 }
 0x9b8   : > { %v1726_v57 = vmul.f32 %v2598_v30, %v2594_v21 }
 0x9ba   : > { %v1727_v59 = vpack.c.bf16 %v1726_v57, %v1725_v31 }
 0x9bc   : > { %2460 = vmatmul.mubr.msk.bf16.vlgmr.msra.gmra.mxu1 %vm1271_vm2, %v1727_v59 }
 0xa7c   : > { %v1768_v37 = vpop.f32.mrf.mxu1 }
 0xa7e   : > { %v2461_v38 = vpop.f32.mrf.mxu1 }
 0xa80   : > { %v1771_v39 = vpop.f32.mrf.mxu1 }
 0xa81   : > { %v2527_v40 = vpack.i.bf16 %v1771_v39, %v1768_v37 }
 0xa82   : > { %v2462_v41 = vpop.f32.mrf.mxu1 }
 0xa83   : > { %2528 = vrot.lane.b32.xlu0 %v2527_v40, %s2632_s22 }
 0xaf5   : > { %v2529_v1 = vpop.permute.xlu0 %2528 }
 0xaf6   : > { %v2531_v49 = vunpack.i.h.bf16 %v2529_v1  ;;  %v2530_v50 = vunpack.i.l.bf16 %v2529_v1 }
 0xaf8   : > { %v1806_v53 = vsel %vm1804_vm12, %v1803_v52, %v2531_v49  ;;  %v1805_v54 = vsel %vm1804_vm12, %v1802_v51, %v2530_v50 }
 0xaf9   : > { %v1807_v56 = vpack.c.bf16 %v1806_v53, %v1805_v54 }
 0xafb   : > { %2480 = vmatmul.mubr.bf16.vlgmr.msra.gmra.mxu0 %v1807_v56 }
 0xbbb   : > { %v1906_v61 = vpop.f32.mrf.mxu0 }
 0xbbc   : > { %v1913_v63 = vmul.f32 1.2686362, %v1906_v61 }
 0xbbd   : > { %v2481_v0 = vpop.f32.mrf.mxu0 }
 0xbbe   : > { %v1917_v2 = vadd.f32 %v1915_v58, %v1913_v63 }
 0xbbf   : > { %v1909_v10 = vpop.f32.mrf.mxu0 }
 0xbc0   : > { %v1914_v4 = vmul.f32 1.2686362, %v1909_v10  ;;  %1919 = vadd.xlane.f32.xlu1 %v1917_v2 }
 0xbc1   : > { %v2482_v7 = vpop.f32.mrf.mxu0 }
 0xbc2   : > { %v1918_v5 = vadd.f32 %v1916_v3, %v1914_v4 }
 0xbc4   : > { %1921 = vadd.xlane.f32.xlu0 %v1918_v5 }
 0xc49   : > { %v1920_v6 = vpop.xlane.xlu1 %1919 }
 0xc4a   : > { %v1924_v22 = vmul.f32 0.0078125, %v1920_v6 }
 0xc4c   : > { %v1926_v8 = vsub.f32 %v1917_v2, %v1924_v22 }
 0xc4d   : > { %v1922_v11 = vpop.xlane.xlu0 %1921 }
 0xc4e   : > { %v1925_v12 = vmul.f32 0.0078125, %v1922_v11  ;;  %v1928_v13 = vmul.f32 %v1926_v8, %v1926_v8 }
 0xc50   : > { %v1927_v14 = vsub.f32 %v1918_v5, %v1925_v12  ;;  %1930 = vadd.xlane.f32.xlu0 %v1928_v13 }
 0xc52   : > { %v1929_v15 = vmul.f32 %v1927_v14, %v1927_v14 }
 0xc54   : > { %1932 = vadd.xlane.f32.xlu1 %v1929_v15 }
 0xcd9   : > { %v1931_v28 = vpop.xlane.xlu0 %1930 }
 0xcda   : > { %v1934_v16 = vmul.f32 0.0078125, %v1931_v28 }
 0xcdc   : > { %v1936_v19 = vadd.f32 1e-05, %v1934_v16 }
 0xcdd   : > { %v1933_v17 = vpop.xlane.xlu1 %1932 }
 0xcde   : > { %2599 = vrsqrt.f32 %v1936_v19  ;;  %v1935_v20 = vmul.f32 0.0078125, %v1933_v17 }
 0xce0   : > { %v1937_v21 = vadd.f32 1e-05, %v1935_v20 }
 0xce2   : > { %2601 = vrsqrt.f32 %v1937_v21 }
 0xceb   : > { %v2600_v18 = vpop.eup %2599 }
 0xcec   : > { %v1940_v23 = vmul.f32 %v2600_v18, %v1926_v8 }
 0xcee   : > { %v1949_v26 = vmul.f32 %v2284_v24, %v1940_v23 }
 0xcef   : > { %v2602_v25 = vpop.eup %2601 }
 0xcf0   : > { %v1941_v27 = vmul.f32 %v2602_v25, %v1927_v14  ;;  %v1958_v31 = vadd.f32 %v2285_v29, %v1949_v26 }
 0xcf2   : > { %v1950_v30 = vmul.f32 %v2284_v24, %v1941_v27 }
 0xcf4   : > { %v1959_v57 = vadd.f32 %v2285_v29, %v1950_v30 }
 0xcf6   : > { %v2301_v59 = vpack.c.bf16 %v1959_v57, %v1958_v31 }
 0xcf8   : > { %2302 = vst [vmem:[%s799_s19] sm:$0xff] %v2301_v59  }
 0xcf9 PF: > { %s29_s29 = sadd.s32 1, %s2625_s29   ;;  %s3148_s27 = sld [smem:[#allocation2_spill]] }
 0xcfa   : > { %p26_p5 = scmp.ge.s32.totalorder %s29_s29, 4   ;;  %s3149_s28 = sld [smem:[#allocation3_spill]] }
 0xcfc   :  { %28 = sbr.rel (!%p26_p5) target bundleno = 4 (0x4), region = 157 }

// kernel: transformer_forward.17
= control target key start
LH: loop header
LB: loop body
LE: loop exit
PB: predicated region body
PF: predicated region fallthrough
CT: control target
= control target key end

     0   :  { %v769_v1 = vmov 0   ;;  %s964_s1 = inlined_call_operand.vmem [shape: bf16[128,256], index: 1, kind: input, shape index: {}]   ;;  %s965_s2 = inlined_call_operand.vmem [shape: bf16[128,256], index: 2, kind: input, shape index: {}]   ;;  %s966_s0 = inlined_call_operand.vmem [shape: bf16[16,128], index: 0, kind: input, shape index: {}]   ;;  %s967_s3 = inlined_call_operand.vmem [shape: bf16[256,128], index: 3, kind: input, shape index: {}]   ;;  %s968_s4 = inlined_call_operand.vmem [shape: f32[1,128], index: 4, kind: input, shape index: {}]   ;;  %s969_s5 = inlined_call_operand.vmem [shape: f32[1,128], index: 5, kind: input, shape index: {}]   ;;  %s970_s6 = inlined_call_operand.vmem [shape: bf16[16,128], index: 6, kind: output, shape index: {}]  }
   0x1   :  { %v684_v0 = vld [vmem:[%s964_s1 + $0x74] ss:$8 sps:$4 sm:$0xff]   ;;  %166 = vmatprep.mubr.bf16.mxu0 %v769_v1  ;;  %305 = vmatprep.mubr.bf16.mxu1 %v769_v1  ;;  %v686_v2 = vld [vmem:[%s964_s1 + $0x70] ss:$8 sps:$4 sm:$0xff]   ;;  %v687_v3 = vld [vmem:[%s964_s1 + $0x64] ss:$8 sps:$4 sm:$0xff]  }
   0x2   :  { %134 = vmatprep.subr.bf16.mxu0 %v684_v0  ;;  %v689_v4 = vld [vmem:[%s964_s1 + $0x60] ss:$8 sps:$4 sm:$0xff]   ;;  %v690_v5 = vld [vmem:[%s964_s1 + $0x54] ss:$8 sps:$4 sm:$0xff]   ;;  %v692_v6 = vld [vmem:[%s964_s1 + $0x50] ss:$8 sps:$4 sm:$0xff]  }
   0x3   :  { %135 = vmatpush1.bf16.msra.mxu0 %v686_v2  ;;  %v693_v7 = vld [vmem:[%s964_s1 + $0x44] ss:$8 sps:$4 sm:$0xff]   ;;  %v695_v8 = vld [vmem:[%s964_s1 + $0x40] ss:$8 sps:$4 sm:$0xff]   ;;  %v707_v9 = vld [vmem:[%s965_s2 + $0x74] ss:$8 sps:$4 sm:$0xff]  }
   0x4   :  { %136 = vmatprep.subr.bf16.mxu0 %v687_v3  ;;  %v710_v10 = vld [vmem:[%s965_s2 + $0x70] ss:$8 sps:$4 sm:$0xff]   ;;  %v696_v11 = vld [vmem:[%s964_s1 + $0x34] ss:$8 sps:$4 sm:$0xff]   ;;  %273 = vmatprep.subr.bf16.mxu1 %v707_v9  ;;  %v712_v12 = vld [vmem:[%s965_s2 + $0x64] ss:$8 sps:$4 sm:$0xff]  }
   0x5   :  { %274 = vmatpush1.bf16.msra.mxu1 %v710_v10  ;;  %v714_v13 = vld [vmem:[%s965_s2 + $0x60] ss:$8 sps:$4 sm:$0xff]   ;;  %v698_v14 = vld [vmem:[%s964_s1 + $0x30] ss:$8 sps:$4 sm:$0xff]   ;;  %v715_v15 = vld [vmem:[%s965_s2 + $0x54] ss:$8 sps:$4 sm:$0xff]  }
   0x6   :  { %275 = vmatprep.subr.bf16.mxu1 %v712_v12  ;;  %v699_v16 = vld [vmem:[%s964_s1 + $0x24] ss:$8 sps:$4 sm:$0xff]   ;;  %v717_v17 = vld [vmem:[%s965_s2 + $0x50] ss:$8 sps:$4 sm:$0xff]   ;;  %v701_v18 = vld [vmem:[%s964_s1 + $0x20] ss:$8 sps:$4 sm:$0xff]  }
   0x7   :  { %137 = vmatpush1.bf16.msra.mxu0 %v689_v4  ;;  %v718_v19 = vld [vmem:[%s965_s2 + $0x44] ss:$8 sps:$4 sm:$0xff]   ;;  %v702_v20 = vld [vmem:[%s964_s1 + $0x14] ss:$8 sps:$4 sm:$0xff]   ;;  %v720_v21 = vld [vmem:[%s965_s2 + $0x40] ss:$8 sps:$4 sm:$0xff]  }
   0x8   :  { %138 = vmatprep.subr.bf16.mxu0 %v690_v5  ;;  %v704_v22 = vld [vmem:[%s964_s1 + $0x10] ss:$8 sps:$4 sm:$0xff]   ;;  %v721_v23 = vld [vmem:[%s965_s2 + $0x34] ss:$8 sps:$4 sm:$0xff]   ;;  %v705_v24 = vld [vmem:[%s964_s1 + $0x4] ss:$8 sps:$4 sm:$0xff]  }
   0x9   :  { %276 = vmatpush1.bf16.msra.mxu1 %v714_v13  ;;  %v723_v25 = vld [vmem:[%s965_s2 + $0x30] ss:$8 sps:$4 sm:$0xff]   ;;  %v709_v26 = vld [vmem:[%s964_s1] ss:$8 sps:$4 sm:$0xff]   ;;  %v724_v27 = vld [vmem:[%s965_s2 + $0x24] ss:$8 sps:$4 sm:$0xff]  }
   0xa   :  { %277 = vmatprep.subr.bf16.mxu1 %v715_v15  ;;  %v711_v28 = vld [vmem:[%s966_s0] sm:$0xff]   ;;  %v727_v30 = vld [vmem:[%s965_s2 + $0x14] ss:$8 sps:$4 sm:$0xff]   ;;  %v729_v31 = vld [vmem:[%s965_s2 + $0x10] ss:$8 sps:$4 sm:$0xff]  }
   0xb   :  { %139 = vmatpush1.bf16.msra.mxu0 %v692_v6  ;;  %v726_v29 = vld [vmem:[%s965_s2 + $0x20] ss:$8 sps:$4 sm:$0xff]   ;;  %v730_v32 = vld [vmem:[%s965_s2 + $0x4] ss:$8 sps:$4 sm:$0xff]   ;;  %v733_v34 = vld [vmem:[%s967_s3 + $0x78] sm:$0xff]  }
   0xc   :  { %140 = vmatprep.subr.bf16.mxu0 %v693_v7  ;;  %v732_v33 = vld [vmem:[%s965_s2] ss:$8 sps:$4 sm:$0xff]   ;;  %v734_v35 = vld [vmem:[%s967_s3 + $0x38] sm:$0xff]   ;;  %v735_v36 = vld [vmem:[%s967_s3 + $0x70] sm:$0xff]  }
   0xd   :  { %278 = vmatpush1.bf16.msra.mxu1 %v717_v17  ;;  %v736_v37 = vld [vmem:[%s967_s3 + $0x30] sm:$0xff]   ;;  %v737_v38 = vld [vmem:[%s967_s3 + $0x68] sm:$0xff]   ;;  %v739_v40 = vld [vmem:[%s967_s3 + $0x60] sm:$0xff]  }
   0xe   :  { %279 = vmatprep.subr.bf16.mxu1 %v718_v19  ;;  %v738_v39 = vld [vmem:[%s967_s3 + $0x28] sm:$0xff]   ;;  %v740_v41 = vld [vmem:[%s967_s3 + $0x20] sm:$0xff]   ;;  %v741_v42 = vld [vmem:[%s967_s3 + $0x58] sm:$0xff]  }
   0xf   :  { %141 = vmatpush1.bf16.msra.mxu0 %v695_v8  ;;  %v742_v43 = vld [vmem:[%s967_s3 + $0x18] sm:$0xff]   ;;  %v743_v44 = vld [vmem:[%s967_s3 + $0x50] sm:$0xff]   ;;  %v745_v46 = vld [vmem:[%s967_s3 + $0x48] sm:$0xff]  }
  0x10   :  { %142 = vmatprep.subr.bf16.mxu0 %v696_v11  ;;  %v744_v45 = vld [vmem:[%s967_s3 + $0x10] sm:$0xff]   ;;  %v746_v47 = vld [vmem:[%s967_s3 + $0x8] sm:$0xff]   ;;  %v747_v48 = vld [vmem:[%s967_s3 + $0x40] sm:$0xff]  }
  0x11   :  { %280 = vmatpush1.bf16.msra.mxu1 %v720_v21  ;;  %v748_v49 = vld [vmem:[%s967_s3] sm:$0xff]  }
  0x12   :  { %281 = vmatprep.subr.bf16.mxu1 %v721_v23  ;;  %v653_v21 = vld [vmem:[%s966_s0] sm:$0xff]  }
  0x13   :  { %143 = vmatpush1.bf16.msra.mxu0 %v698_v14 }
  0x14   :  { %144 = vmatprep.subr.bf16.mxu0 %v699_v16 }
  0x15   :  { %282 = vmatpush1.bf16.msra.mxu1 %v723_v25 }
  0x16   :  { %283 = vmatprep.subr.bf16.mxu1 %v724_v27 }
  0x17   :  { %145 = vmatpush1.bf16.msra.mxu0 %v701_v18 }
  0x18   :  { %146 = vmatprep.subr.bf16.mxu0 %v702_v20 }
  0x19   :  { %284 = vmatpush1.bf16.msra.mxu1 %v726_v29 }
  0x1a   :  { %285 = vmatprep.subr.bf16.mxu1 %v727_v30  ;;  %v655_v30 = vunpack.c.h.bf16 %v653_v21 }
  0x1b   :  { %147 = vmatpush1.bf16.msra.mxu0 %v704_v22 }
  0x1c   :  { %148 = vmatprep.subr.bf16.mxu0 %v705_v24  ;;  %v654_v24 = vunpack.c.l.bf16 %v653_v21 }
  0x1d   :  { %286 = vmatpush1.bf16.msra.mxu1 %v729_v31 }
  0x1e   :  { %287 = vmatprep.subr.bf16.mxu1 %v730_v32 }
  0x1f   :  { %149 = vmatpush1.bf16.msra.mxu0 %v709_v26 }
  0x20   :  { %661 = vmatprep.subr.bf16.mxu0 %v733_v34 }
  0x21   :  { %288 = vmatpush1.bf16.msra.mxu1 %v732_v33 }
  0x22   :  { %167 = vmatmul.mubr.bf16.vlgmr.msra.gmra.mxu0 %v711_v28 }
  0x23   :  { %662 = vmatpush3.bf16.msra.mxu0 %v734_v35 }
  0x24   :  { %306 = vmatmul.mubr.bf16.vlgmr.msra.gmra.mxu1 %v711_v28  ;;  %663 = vmatprep.subr.bf16.mxu0 %v735_v36 }
  0x27   :  { %664 = vmatpush3.bf16.msra.mxu0 %v736_v37 }
  0x28   :  { %665 = vmatprep.subr.bf16.mxu0 %v737_v38 }
  0x2b   :  { %666 = vmatpush3.bf16.msra.mxu0 %v738_v39 }
  0x2c   :  { %667 = vmatprep.subr.bf16.mxu0 %v739_v40 }
  0x2f   :  { %668 = vmatpush3.bf16.msra.mxu0 %v740_v41 }
  0x30   :  { %669 = vmatprep.subr.bf16.mxu0 %v741_v42 }
  0x33   :  { %670 = vmatpush3.bf16.msra.mxu0 %v742_v43 }
  0x34   :  { %671 = vmatprep.subr.bf16.mxu0 %v743_v44 }
  0x37   :  { %672 = vmatpush3.bf16.msra.mxu0 %v744_v45 }
  0x38   :  { %673 = vmatprep.subr.bf16.mxu0 %v745_v46 }
  0x3b   :  { %674 = vmatpush3.bf16.msra.mxu0 %v746_v47 }
  0x3c   :  { %675 = vmatprep.subr.bf16.mxu0 %v747_v48 }
  0x3f   :  { %676 = vmatpush3.bf16.msra.mxu0 %v748_v49  ;;  %v646_v49 = vld [vmem:[%s968_s4] ss:$0 sm:$0xff] }
  0xe2   :  { %v168_v50 = vpop.f32.mrf.mxu0 }
  0xe3   :  { %v626_v51 = vmul.f32 -1.442695, %v168_v50 }
  0xe4   :  { %v170_v52 = vpop.f32.mrf.mxu0  ;;  %v307_v2 = vpop.f32.mrf.mxu1 }
  0xe5   :  { %749 = vpow2.f32 %v626_v51  ;;  %v627_v53 = vmul.f32 -1.442695, %v170_v52 }
  0xe6   :  { %v172_v54 = vpop.f32.mrf.mxu0  ;;  %v309_v3 = vpop.f32.mrf.mxu1 }
  0xe7   :  { %751 = vpow2.f32 %v627_v53  ;;  %v628_v55 = vmul.f32 -1.442695, %v172_v54  ;;  %v647_v53 = vld [vmem:[%s969_s5] ss:$0 sm:$0xff] }
  0xe8   :  { %v174_v56 = vpop.f32.mrf.mxu0  ;;  %v311_v7 = vpop.f32.mrf.mxu1 }
  0xe9   :  { %753 = vpow2.f32 %v628_v55  ;;  %v629_v57 = vmul.f32 -1.442695, %v174_v56 }
  0xea   :  { %v313_v14 = vpop.f32.mrf.mxu1 }
  0xeb   :  { %755 = vpow2.f32 %v629_v57 }
  0xf2   :  { %v750_v58 = vpop.eup %749 }
  0xf3   :  { %v328_v60 = vadd.f32 1.0, %v750_v58 }
  0xf4   :  { %v752_v59 = vpop.eup %751 }
  0xf5   :  { %v329_v61 = vadd.f32 1.0, %v752_v59 }
  0xf6   :  { %v754_v62 = vpop.eup %753 }
  0xf7   :  { %757 = vrcp.f32 %v329_v61  ;;  %v330_v63 = vadd.f32 1.0, %v754_v62 }
  0xf8   :  { %v756_v0 = vpop.eup %755  ;;  %759 = vrcp.f32 %v328_v60 }
  0xf9   :  { %761 = vrcp.f32 %v330_v63  ;;  %v331_v1 = vadd.f32 1.0, %v756_v0 }
  0xfb   :  { %763 = vrcp.f32 %v331_v1 }
 0x104   :  { %v758_v4 = vpop.eup %757 }
 0x105   :  { %v760_v5 = vpop.eup %759  ;;  %v341_v8 = vmul.f32 %v758_v4, %v170_v52 }
 0x106   :  { %v762_v6 = vpop.eup %761  ;;  %v340_v11 = vmul.f32 %v760_v5, %v168_v50 }
 0x107   :  { %v342_v9 = vmul.f32 %v762_v6, %v172_v54  ;;  %v345_v15 = vmul.f32 %v341_v8, %v309_v3 }
 0x108   :  { %v764_v10 = vpop.eup %763  ;;  %v344_v17 = vmul.f32 %v340_v11, %v307_v2 }
 0x109   :  { %v343_v12 = vmul.f32 %v764_v10, %v174_v56  ;;  %v346_v13 = vmul.f32 %v342_v9, %v311_v7 }
 0x10b   :  { %v347_v16 = vmul.f32 %v343_v12, %v313_v14  ;;  %v350_v19 = vpack.c.bf16 %v346_v13, %v344_v17 }
 0x10d   :  { %v351_v18 = vpack.c.bf16 %v347_v16, %v345_v15 }
 0x10f   :  { %512 = vmatprep.mubr.bf16.mxu0 %v351_v18 }
 0x110   :  { %513 = vmatmul.mubr.bf16.vlgmr.msra.gmra.mxu0 %v350_v19 }
 0x1d0   :  { %v677_v20 = vpop.f32.mrf.mxu0 }
 0x1d2   :  { %v678_v22 = vpop.f32.mrf.mxu0 }
 0x1d3   :  { %v679_v23 = vadd.f32 %v678_v22, %v677_v20 }
 0x1d4   :  { %v680_v25 = vpop.f32.mrf.mxu0 }
 0x1d5   :  { %v530_v26 = vmul.f32 1.3949589, %v679_v23 }
 0x1d6   :  { %v681_v27 = vpop.f32.mrf.mxu0 }
 0x1d7   :  { %v682_v28 = vadd.f32 %v681_v27, %v680_v25  ;;  %v536_v29 = vadd.f32 %v654_v24, %v530_v26 }
 0x1d9   :  { %v531_v31 = vmul.f32 1.3949589, %v682_v28  ;;  %538 = vadd.xlane.f32.xlu0 %v536_v29 }
 0x1db   :  { %v537_v32 = vadd.f32 %v655_v30, %v531_v31 }
 0x1dd   :  { %540 = vadd.xlane.f32.xlu0 %v537_v32 }
 0x262   :  { %v539_v33 = vpop.xlane.xlu0 %538 }
 0x263   :  { %v543_v34 = vmul.f32 0.0078125, %v539_v33 }
 0x265   :  { %v545_v35 = vsub.f32 %v536_v29, %v543_v34 }
 0x266   :  { %v541_v36 = vpop.xlane.xlu0 %540 }
 0x267   :  { %v544_v37 = vmul.f32 0.0078125, %v541_v36  ;;  %v547_v38 = vmul.f32 %v545_v35, %v545_v35 }
 0x269   :  { %v546_v39 = vsub.f32 %v537_v32, %v544_v37  ;;  %549 = vadd.xlane.f32.xlu1 %v547_v38 }
 0x26b   :  { %v548_v40 = vmul.f32 %v546_v39, %v546_v39 }
 0x26d   :  { %551 = vadd.xlane.f32.xlu1 %v548_v40 }
 0x2f2   :  { %v550_v41 = vpop.xlane.xlu1 %549 }
 0x2f3   :  { %v553_v42 = vmul.f32 0.0078125, %v550_v41 }
 0x2f5   :  { %v555_v43 = vadd.f32 1e-05, %v553_v42 }
 0x2f6   :  { %v552_v44 = vpop.xlane.xlu1 %551 }
 0x2f7   :  { %765 = vrsqrt.f32 %v555_v43  ;;  %v554_v45 = vmul.f32 0.0078125, %v552_v44 }
 0x2f9   :  { %v556_v46 = vadd.f32 1e-05, %v554_v45 }
 0x2fb   :  { %767 = vrsqrt.f32 %v556_v46 }
 0x304   :  { %v766_v47 = vpop.eup %765 }
 0x305   :  { %v559_v48 = vmul.f32 %v766_v47, %v545_v35 }
 0x307   :  { %v568_v51 = vmul.f32 %v646_v49, %v559_v48 }
 0x308   :  { %v768_v50 = vpop.eup %767 }
 0x309   :  { %v560_v52 = vmul.f32 %v768_v50, %v546_v39  ;;  %v577_v55 = vadd.f32 %v647_v53, %v568_v51 }
 0x30b   :  { %v569_v54 = vmul.f32 %v646_v49, %v560_v52 }
 0x30d   :  { %v578_v56 = vadd.f32 %v647_v53, %v569_v54 }
 0x30f   :  { %v659_v57 = vpack.c.bf16 %v578_v56, %v577_v55 }
 0x311   :  { %660 = vst [vmem:[%s970_s6] sm:$0xff] %v659_v57  }

// kernel: transformer_forward.15
= control target key start
LH: loop header
LB: loop body
LE: loop exit
PB: predicated region body
PF: predicated region fallthrough
CT: control target
= control target key end

     0   :  { %s2442_s27 = smov 0   ;;  %s2444_s28 = smov 0   ;;  %s2780_s0 = inlined_call_operand.vmem [shape: bf16[2,8,128], index: 0, kind: input, shape index: {}, may-alias: {0,1}]   ;;  %s2781_s1 = inlined_call_operand.vmem [shape: bf16[2,8,128], index: 1, kind: input, shape index: {}, may-alias: {0,1}]   ;;  %s2782_s2 = inlined_call_operand.vmem [shape: bf16[128,128], index: 2, kind: input, shape index: {}]   ;;  %s2783_s3 = inlined_call_operand.vmem [shape: bf16[128,128], index: 3, kind: input, shape index: {}]   ;;  %s2784_s4 = inlined_call_operand.vmem [shape: bf16[128,128], index: 4, kind: input, shape index: {}]   ;;  %s2785_s5 = inlined_call_operand.vmem [shape: bf16[128,128], index: 5, kind: input, shape index: {}]   ;;  %s2786_s6 = inlined_call_operand.vmem [shape: f32[8,128], index: 6, kind: input, shape index: {}, may-alias: {6,9}]   ;;  %s2787_s7 = inlined_call_operand.vmem [shape: f32[8,128], index: 7, kind: input, shape index: {}, may-alias: {7,10}]   ;;  %s2788_s8 = inlined_call_operand.vmem [shape: f32[8,128], index: 8, kind: input, shape index: {}, may-alias: {8,11}]   ;;  %s2789_s9 = inlined_call_operand.vmem [shape: f32[8,128], index: 9, kind: input, shape index: {}, may-alias: {6,9}]   ;;  %s2790_s10 = inlined_call_operand.vmem [shape: f32[8,128], index: 10, kind: input, shape index: {}, may-alias: {7,10}]   ;;  %s2791_s11 = inlined_call_operand.vmem [shape: f32[8,128], index: 11, kind: input, shape index: {}, may-alias: {8,11}]   ;;  %s2792_s12 = inlined_call_operand.vmem [shape: f32[2,8,1], index: 12, kind: input, shape index: {}]   ;;  %s2793_s13 = inlined_call_operand.vmem [shape: f32[2,1,8], index: 13, kind: input, shape index: {}]   ;;  %s2794_s14 = inlined_call_operand.vmem [shape: f32[2,4,8,8], index: 14, kind: input, shape index: {}, may-alias: {14,18}]   ;;  %s2795_s15 = inlined_call_operand.vmem [shape: f32[1,128], index: 15, kind: input, shape index: {}]   ;;  %s2796_s16 = inlined_call_operand.vmem [shape: f32[1,128], index: 16, kind: input, shape index: {}]   ;;  %s2797_s17 = inlined_call_operand.vmem [shape: bf16[2,8,128], index: 17, kind: output, shape index: {0}]   ;;  %s2798_s18 = inlined_call_operand.vmem [shape: f32[2,4,8,8], index: 18, kind: output, shape index: {1}, may-alias: {14,18}]  }
   0x1   :  { %2802 = sst [smem:[#allocation5_spill]] %s2780_s0  ;;  %s2446_s29 = smov 0  }
   0x2   :  { %2803 = sst [smem:[#allocation6_spill]] %s2781_s1 }
   0x3   :  { %2804 = sst [smem:[#allocation7_spill]] %s2782_s2 }
   0x4 LB: > { %2805 = sst [smem:[#allocation2_spill]] %s2333_s28  ;;  %s41_s30 = sadd.s32 1, %s2333_s28  ;;  %s2337_s29 = sphi %s2446_s29, %s29_s29   ;;  %s2333_s28 = sphi %s2444_s28, %s2813_s28   ;;  %s2329_s27 = sphi %s2442_s27, %s2812_s27  }
   0x5   : > { %2806 = sst [smem:[#allocation3_spill]] %s2337_s29  ;;  %p1990_p0 = scmp.ge.s32.totalorder %s2337_s29, 1 }
   0x6   : > { %p43_p1 = scmp.ge.s32.totalorder %s41_s30, 2  ;;  %p608_p2 = scmp.lt.s32.totalorder %s2337_s29, 3 }
   0x8   : > { %s2815_s30 = smov (%p43_p1, %s41_s30), 0  ;;  %p609_p3 = pnand %p1990_p0, %p608_p2 }
   0x9   : > { %2807 = sst [smem:[#allocation4_spill]] %s2815_s30  ;;  %p708_p4 = scmp.lt.s32.totalorder (!%p609_p3), %s2329_s27, 1 }
   0xa   : > { %612 = sbr.rel (%p609_p3) target bundleno = 3284 (0xcd4), region = 88  ;;  %s2808_s1 = sld [smem:[#allocation7_spill]] (!%p609_p3) }
   0xb   : > { %s2809_s23 = sld [smem:[#allocation5_spill]] (!%p609_p3)  ;;  %s2345_s2 = smov (!%p609_p3), 64  }
   0xc   : > { %s2810_s28 = sld [smem:[#allocation6_spill]] (!%p609_p3) }
   0xf   : > { %v2339_v1 = vmov 0.0   ;;  %v2266_v2 = vld [vmem:[%s2783_s3 + $0x38] sm:$0xff]   ;;  %vm2340_vm0 = vmmov 0   ;;  %v2268_v4 = vld [vmem:[%s2783_s3 + $0x30] sm:$0xff]   ;;  %v2270_v6 = vld [vmem:[%s2783_s3 + $0x28] sm:$0xff]   ;;  %s2817_s27 = smov (!%p708_p4, %s2329_s27), 1  ;;  %v1117_v60 = vlaneseq }
  0x10   : > { %v2265_v0 = vld [vmem:[%s2808_s1 + $0x38] sm:$0xff]   ;;  %2104 = vmatprep.subr.bf16.mxu0 %v2339_v1  ;;  %2124 = vmatprep.subr.bf16.mxu1 %v2339_v1  ;;  %v2267_v3 = vld [vmem:[%s2808_s1 + $0x30] sm:$0xff]   ;;  %v2269_v5 = vld [vmem:[%s2808_s1 + $0x28] sm:$0xff]   ;;  %s2514_s20 = sshll.u32 %s2817_s27, 2  ;;  %s1993_s30 = sshll.u32 %s2817_s27, 3  ;;  %v2343_v27 = vmov 0  }
  0x11   : > { %2105 = vmatpush3.bf16.msra.mxu0 %v2265_v0  ;;  %2120 = vmatprep.mubr.msk.bf16.mxu0 %vm2340_vm0, %v2339_v1  ;;  %v2271_v7 = vld [vmem:[%s2808_s1 + $0x20] sm:$0xff]   ;;  %v2273_v9 = vld [vmem:[%s2808_s1 + $0x18] sm:$0xff]   ;;  %v2275_v11 = vld [vmem:[%s2808_s1 + $0x10] sm:$0xff]   ;;  %s714_s24 = scalar_lea.vmem %s2809_s23, %s2514_s20  ;;  %s737_s19 = scalar_lea.vmem %s2792_s12, %s1993_s30  ;;  %vm1129_vm1 = vcmask 261120   ;;  %v1118_v62 = vshrl.u32 %v1117_v60, 7  ;;  %v1123_v63 = vand.u32 127, %v1117_v60 }
  0x12   : > { %2125 = vmatpush3.bf16.msra.mxu1 %v2266_v2  ;;  %2106 = vmatprep.subr.bf16.mxu0 %v2339_v1  ;;  %v2272_v8 = vld [vmem:[%s2783_s3 + $0x20] sm:$0xff]   ;;  %v2274_v10 = vld [vmem:[%s2783_s3 + $0x18] sm:$0xff]   ;;  %v2276_v12 = vld [vmem:[%s2783_s3 + $0x10] sm:$0xff]   ;;  %s718_s29 = scalar_lea.vmem %s2810_s28, %s2514_s20  ;;  %s2341_s28 = smov 127   ;;  %vm1180_vm3 = vcmask 64512   ;;  %vm1200_vm4 = vcmask 1043456  }
  0x13   : > { %2126 = vmatprep.subr.bf16.mxu1 %v2339_v1  ;;  %2140 = vmatprep.mubr.msk.bf16.mxu1 %vm2340_vm0, %v2339_v1  ;;  %v2277_v13 = vld [vmem:[%s2808_s1 + $0x8] sm:$0xff]   ;;  %v2279_v15 = vld [vmem:[%s2808_s1] sm:$0xff]   ;;  %v2281_v52 = vld [vmem:[%s2784_s4 + $0x38] sm:$0xff]   ;;  %vm1124_vm2 = vcmp.gt.s32.totalorder %v1123_v63, %v1118_v62  ;;  %s2346_s23 = smov 32   ;;  %vm1620_vm9 = vcmask 523264   ;;  %vm1622_vm10 = vcmask 785408  }
  0x14   : > { %v2278_v14 = vld [vmem:[%s2783_s3 + $0x8] sm:$0xff]   ;;  %v2280_v16 = vld [vmem:[%s2783_s3] sm:$0xff]   ;;  %2264 = vset.pattern.permute.xlu0 %v2343_v27  ;;  %v2282_v53 = vld [vmem:[%s2784_s4 + $0x30] sm:$0xff]  }
  0x15   : > { %2107 = vmatpush3.bf16.msra.mxu0 %v2267_v3  ;;  %v2545_v17 = vld [vmem:[%s714_s24] sm:$0xf]  ;;  %v2283_v54 = vld [vmem:[%s2784_s4 + $0x28] sm:$0xff]   ;;  %v2285_v56 = vld [vmem:[%s2784_s4 + $0x18] sm:$0xff]  }
  0x16   : > { %2127 = vmatpush3.bf16.msra.mxu1 %v2268_v4  ;;  %2108 = vmatprep.subr.bf16.mxu0 %v2339_v1  ;;  %v2547_v18 = vld [vmem:[%s718_s29] sm:$0xf]  ;;  %s2342_s29 = smov 1   ;;  %v2286_v57 = vld [vmem:[%s2784_s4 + $0x10] sm:$0xff]   ;;  %v2287_v58 = vld [vmem:[%s2784_s4 + $0x8] sm:$0xff]  }
  0x17   : > { %2128 = vmatprep.subr.bf16.mxu1 %v2339_v1  ;;  %v1103_v28 = vld [vmem:[%s737_s19] sm:$0xff] }
  0x18   : > { %v988_v29 = vld [vmem:[%s2790_s10] sm:$0xff] }
  0x19   : > { %2109 = vmatpush3.bf16.msra.mxu0 %v2269_v5  ;;  %v987_v30 = vld [vmem:[%s2789_s9] sm:$0xff] }
  0x1a   : > { %2129 = vmatpush3.bf16.msra.mxu1 %v2270_v6  ;;  %2110 = vmatprep.subr.bf16.mxu0 %v2339_v1  ;;  %v989_v34 = vld [vmem:[%s2791_s11] sm:$0xff] }
  0x1b   : > { %2130 = vmatprep.subr.bf16.mxu1 %v2339_v1  ;;  %v872_v36 = vld [vmem:[%s2787_s7] sm:$0xff] }
  0x1c   : > { %v871_v40 = vld [vmem:[%s2786_s6] sm:$0xff] }
  0x1d   : > { %2111 = vmatpush3.bf16.msra.mxu0 %v2271_v7  ;;  %v873_v41 = vld [vmem:[%s2788_s8] sm:$0xff] }
  0x1e   : > { %2131 = vmatpush3.bf16.msra.mxu1 %v2272_v8  ;;  %2112 = vmatprep.subr.bf16.mxu0 %v2339_v1  ;;  %v2284_v55 = vld [vmem:[%s2784_s4 + $0x20] sm:$0xff]  }
  0x1f   : > { %2132 = vmatprep.subr.bf16.mxu1 %v2339_v1  ;;  %v2288_v59 = vld [vmem:[%s2784_s4] sm:$0xff]  }
  0x21   : > { %2113 = vmatpush3.bf16.msra.mxu0 %v2273_v9 }
  0x22   : > { %2133 = vmatpush3.bf16.msra.mxu1 %v2274_v10  ;;  %2114 = vmatprep.subr.bf16.mxu0 %v2339_v1 }
  0x23   : > { %2134 = vmatprep.subr.bf16.mxu1 %v2339_v1 }
  0x25   : > { %2115 = vmatpush3.bf16.msra.mxu0 %v2275_v11 }
  0x26   : > { %2135 = vmatpush3.bf16.msra.mxu1 %v2276_v12  ;;  %2116 = vmatprep.subr.bf16.mxu0 %v2339_v1 }
  0x27   : > { %2136 = vmatprep.subr.bf16.mxu1 %v2339_v1 }
  0x29   : > { %2117 = vmatpush3.bf16.msra.mxu0 %v2277_v13 }
  0x2a   : > { %2137 = vmatpush3.bf16.msra.mxu1 %v2278_v14  ;;  %2118 = vmatprep.subr.bf16.mxu0 %v2339_v1 }
  0x2b   : > { %2138 = vmatprep.subr.bf16.mxu1 %v2339_v1 }
  0x2d   : > { %2119 = vmatpush3.bf16.msra.mxu0 %v2279_v15 }
  0x2e   : > { %2139 = vmatpush3.bf16.msra.mxu1 %v2280_v16  ;;  %2144 = vmatprep.subr.bf16.mxu0 %v2339_v1 }
  0x2f   : > { %2164 = vmatprep.subr.bf16.mxu1 %v2339_v1 }
  0x30   : > { %2121 = vmatmul.mubr.bf16.vlgmr.msra.gmra.mxu0 %v2545_v17 }
  0x31   : > { %2141 = vmatmul.mubr.bf16.vlgmr.msra.gmra.mxu1 %v2547_v18  ;;  %2160 = vmatprep.mubr.msk.bf16.mxu0 %vm2340_vm0, %v2339_v1 }
  0x32   : > { %2166 = vmatprep.mubr.msk.bf16.mxu1 %vm2340_vm0, %v2339_v1  ;;  %2145 = vmatpush3.bf16.msra.mxu0 %v2281_v52 }
  0x33   : > { %2146 = vmatprep.subr.bf16.mxu0 %v2339_v1 }
  0x36   : > { %2147 = vmatpush3.bf16.msra.mxu0 %v2282_v53 }
  0x37   : > { %2148 = vmatprep.subr.bf16.mxu0 %v2339_v1 }
  0x3a   : > { %2149 = vmatpush3.bf16.msra.mxu0 %v2283_v54 }
  0x3b   : > { %2150 = vmatprep.subr.bf16.mxu0 %v2339_v1 }
  0x3e   : > { %2151 = vmatpush3.bf16.msra.mxu0 %v2284_v55 }
  0x3f   : > { %2152 = vmatprep.subr.bf16.mxu0 %v2339_v1 }
  0x42   : > { %2153 = vmatpush3.bf16.msra.mxu0 %v2285_v56 }
  0x43   : > { %2154 = vmatprep.subr.bf16.mxu0 %v2339_v1 }
  0x46   : > { %2155 = vmatpush3.bf16.msra.mxu0 %v2286_v57 }
  0x47   : > { %2156 = vmatprep.subr.bf16.mxu0 %v2339_v1 }
  0x4a   : > { %2157 = vmatpush3.bf16.msra.mxu0 %v2287_v58 }
  0x4b   : > { %2158 = vmatprep.subr.bf16.mxu0 %v2339_v1 }
  0x4e   : > { %2159 = vmatpush3.bf16.msra.mxu0 %v2288_v59 }
  0x4f   : > { %2212 = vmatprep.subr.bf16.mxu0 %v2339_v1 }
  0x51   : > { %2161 = vmatmul.mubr.bf16.vlgmr.msra.gmra.mxu0 %v2547_v18 }
  0x52   : > { %2228 = vmatprep.mubr.msk.bf16.mxu0 %vm2340_vm0, %v2339_v1 }
  0xf0   : > { %v865_v19 = vpop.f32.mrf.mxu0 }
  0xf1   : > { %v981_v20 = vpop.f32.mrf.mxu1  ;;  %874 = vrot.lane.b32.xlu1 %v865_v19, %s2341_s28  ;;  %v878_v45 = vmul.f32 %v871_v40, %v865_v19 }
  0xf2   : > { %990 = vrot.lane.b32.xlu0 %v981_v20, %s2341_s28  ;;  %v2122_v21 = vpop.f32.mrf.mxu0  ;;  %v994_v35 = vmul.f32 %v987_v30, %v981_v20  ;;  %s740_s28 = scalar_lea.vmem %s2793_s13, %s2817_s27 }
  0xf3   : > { %v2142_v22 = vpop.f32.mrf.mxu1  ;;  %v2023_v61 = vld [vmem:[%s740_s28] ss:$0 sm:$0xff] }
  0xf4   : > { %v868_v23 = vpop.f32.mrf.mxu0 }
  0xf5   : > { %v984_v24 = vpop.f32.mrf.mxu1  ;;  %876 = vrot.lane.b32.xlu1 %v865_v19, %s2342_s29 }
  0xf6   : > { %992 = vrot.lane.b32.xlu0 %v981_v20, %s2342_s29  ;;  %v2123_v25 = vpop.f32.mrf.mxu0  ;;  %s2050_s29 = sshll.u32 %s2817_s27, 5  ;;  %s2344_s27 = smov 96  }
  0xf7   : > { %v2143_v26 = vpop.f32.mrf.mxu1  ;;  %s2633_s0 = scalar_lea.vmem %s2794_s14, %s2050_s29  ;;  %s2642_s22 = scalar_lea.vmem %s2798_s18, %s2050_s29 }
  0xf8   : > { %v1178_v6 = vld [vmem:[%s2633_s0] sm:$0xff] }
  0xfa   : > { %1107 = vperm.xlu0 %2264, %v1103_v28  }
 0x111   : > { %v1097_v20 = vpop.f32.mrf.mxu0 }
 0x112   : > { %v2650_v21 = vpack.c.bf16 %v1097_v20, %v1097_v20 }
 0x113   : > { %v2162_v22 = vpop.f32.mrf.mxu0 }
 0x114   : > { %v1202_v23 = vsel %vm1200_vm4, %v2650_v21, 0 }
 0x115   : > { %v1100_v24 = vpop.f32.mrf.mxu0 }
 0x117   : > { %v2163_v25 = vpop.f32.mrf.mxu0 }
 0x163   : > { %v875_v32 = vpop.permute.xlu1 %874 }
 0x164   : > { %v991_v31 = vpop.permute.xlu0 %990  ;;  %v879_v43 = vmul.f32 %v875_v32, %v872_v36 }
 0x165   : > { %v995_v33 = vmul.f32 %v991_v31, %v988_v29 }
 0x166   : > { %v880_v48 = vadd.f32 %v879_v43, %v878_v45 }
 0x167   : > { %v996_v38 = vadd.f32 %v995_v33, %v994_v35  ;;  %v877_v42 = vpop.permute.xlu1 %876 }
 0x168   : > { %v993_v37 = vpop.permute.xlu0 %992  ;;  %v881_v47 = vmul.f32 %v877_v42, %v873_v41 }
 0x169   : > { %v997_v39 = vmul.f32 %v993_v37, %v989_v34 }
 0x16a   : > { %v882_v50 = vadd.f32 %v881_v47, %v880_v48 }
 0x16b   : > { %v998_v44 = vadd.f32 %v997_v39, %v996_v38 }
 0x16c   : > { %v2584_v51 = vpack.c.bf16 %v882_v50, %v882_v50 }
 0x16d   : > { %v2579_v46 = vpack.c.bf16 %v998_v44, %v998_v44 }
 0x16f   : > { %v1134_v49 = vsel %vm1129_vm1, %v2579_v46, 0 }
 0x170   : > { %2165 = vmatpush3.bf16.xpose.msra.mxu1 %v1134_v49 }
 0x171   : > { %2170 = vmatprep.subr.bf16.mxu1 %v2339_v1 }
 0x175   : > { %v1108_v0 = vpop.permute.xlu0 %1107 }
 0x176   : > { %v1116_v2 = vadd.f32 %v2023_v61, %v1108_v0 }
 0x177   : > { %2167 = vmatmul.mubr.msk.bf16.vlgmr.msra.gmra.mxu1 %vm1129_vm1, %v2584_v51 }
 0x178   : > { %2172 = vmatprep.mubr.msk.bf16.mxu1 %vm2340_vm0, %v2339_v1  ;;  %v2635_v3 = vsel %vm1124_vm2, -inf, %v1116_v2  ;;  %2171 = vmatpush3.bf16.msra.mxu1 %v1202_v23 }
 0x179   : > { %2176 = vmatprep.subr.bf16.mxu1 %v2339_v1 }
 0x237   : > { %v1170_v4 = vpop.f32.mrf.mxu1 }
 0x238   : > { %v1176_v5 = vmul.f32 0.17677669, %v1170_v4 }
 0x239   : > { %v2168_v7 = vpop.f32.mrf.mxu1 }
 0x23a   : > { %v1177_v8 = vadd.f32 %v1176_v5, %v2635_v3 }
 0x23b   : > { %v1173_v9 = vpop.f32.mrf.mxu1 }
 0x23c   : > { %v1179_v10 = vadd.f32 %v1178_v6, %v1177_v8 }
 0x23d   : > { %v2169_v11 = vpop.f32.mrf.mxu1 }
 0x23e   : > { %1181 = vst.msk [vmem:[%s2642_s22] sm:$0xff] %vm1180_vm3, %v1179_v10  ;;  %v1182_v12 = vsel %vm1180_vm3, %v1179_v10, -inf }
 0x23f   : > { %1183 = vmax.xlane.f32.xlu1 %v1182_v12 }
 0x245   : > { %v2027_v42 = vld [vmem:[%s2633_s0 + $0x8] sm:$0xff] }
 0x250   : > { %1248 = vrot.lane.b32.xlu1 %v2579_v46, %s2344_s27 }
 0x2c8   : > { %v1184_v13 = vpop.xlane.xlu1 %1183 }
 0x2c9   : > { %v1185_v14 = vmax.f32 %v1184_v13, -3e+38 }
 0x2cb   : > { %v1186_v15 = vsub.f32 %v1179_v10, %v1185_v14 }
 0x2cc   : > { %v1249_v30 = vpop.permute.xlu1 %1248 }
 0x2cd   : > { %v1187_v16 = vmul.f32 1.442695, %v1186_v15  ;;  %v1254_v32 = vsel %vm1129_vm1, %v1249_v30, 0 }
 0x2cf   : > { %2297 = vpow2.f32 %v1187_v16 }
 0x2dc   : > { %v2298_v18 = vpop.eup %2297 }
 0x2dd   : > { %v1189_v19 = vsel %vm1180_vm3, %v2298_v18, 0.0 }
 0x2de   : > { %1190 = vadd.xlane.f32.xlu0 %v1189_v19 }
 0x2f4   : > { %1245 = vrot.lane.b32.xlu0 %v2584_v51, %s2344_s27 }
 0x367   : > { %v1191_v26 = vpop.xlane.xlu0 %1190 }
 0x368   : > { %vm1192_vm5 = vcmp.gt.f32.partialorder %v1191_v26, 0.0 }
 0x369   : > { %v1193_v27 = vsel %vm1192_vm5, %v1191_v26, 1.0 }
 0x36a   : > { %2299 = vrcp.f32 %v1193_v27 }
 0x36b   : > { %v1246_v33 = vpop.permute.xlu0 %1245 }
 0x377   : > { %v2300_v28 = vpop.eup %2299 }
 0x378   : > { %v1195_v29 = vmul.f32 %v2300_v28, %v2298_v18 }
 0x37a   : > { %v1196_v31 = vpack.c.bf16 %v1195_v29, %v1195_v29 }
 0x37c   : > { %2173 = vmatmul.mubr.msk.bf16.vlgmr.msra.gmra.mxu1 %vm1180_vm3, %v1196_v31 }
 0x37d   : > { %2177 = vmatpush3.bf16.xpose.msra.mxu1 %v1254_v32  ;;  %2178 = vmatprep.mubr.msk.bf16.mxu1 %vm2340_vm0, %v2339_v1 }
 0x37e   : > { %2182 = vmatprep.subr.bf16.mxu1 %v2339_v1 }
 0x384   : > { %2179 = vmatmul.mubr.msk.bf16.vlgmr.msra.gmra.mxu1 %vm1129_vm1, %v1246_v33 }
 0x385   : > { %2184 = vmatprep.mubr.msk.bf16.mxu1 %vm2340_vm0, %v2339_v1 }
 0x43c   : > { %v2665_v34 = vpop.f32.mrf.mxu1 }
 0x43e   : > { %v2174_v35 = vpop.f32.mrf.mxu1 }
 0x440   : > { %v1241_v36 = vpop.f32.mrf.mxu1 }
 0x442   : > { %v2175_v37 = vpop.f32.mrf.mxu1 }
 0x444   : > { %v1290_v38 = vpop.f32.mrf.mxu1 }
 0x445   : > { %v1296_v39 = vmul.f32 0.17677669, %v1290_v38 }
 0x446   : > { %v2180_v40 = vpop.f32.mrf.mxu1 }
 0x447   : > { %v1297_v41 = vadd.f32 %v1296_v39, %v2635_v3 }
 0x448   : > { %v1293_v43 = vpop.f32.mrf.mxu1 }
 0x449   : > { %v1300_v44 = vadd.f32 %v2027_v42, %v1297_v41 }
 0x44a   : > { %v2181_v45 = vpop.f32.mrf.mxu1 }
 0x44b   : > { %2028 = vst.msk [vmem:[%s2642_s22 + $0x8] sm:$0xff] %vm1180_vm3, %v1300_v44  ;;  %v1303_v47 = vsel %vm1180_vm3, %v1300_v44, -inf }
 0x44c   : > { %1304 = vmax.xlane.f32.xlu1 %v1303_v47 }
 0x452   : > { %v2031_v11 = vld [vmem:[%s2633_s0 + $0x10] sm:$0xff] }
 0x45d   : > { %1319 = vrot.lane.b32.xlu1 %v2650_v21, %s2344_s27 }
 0x461   : > { %1367 = vrot.lane.b32.xlu1 %v2584_v51, %s2345_s2 }
 0x4d5   : > { %v1305_v48 = vpop.xlane.xlu1 %1304 }
 0x4d6   : > { %v1306_v49 = vmax.f32 %v1305_v48, -3e+38 }
 0x4d8   : > { %v1307_v50 = vsub.f32 %v1300_v44, %v1306_v49 }
 0x4d9   : > { %v1320_v52 = vpop.permute.xlu1 %1319 }
 0x4da   : > { %v1308_v53 = vmul.f32 1.442695, %v1307_v50  ;;  %v1325_v54 = vsel %vm1200_vm4, %v1320_v52, 0 }
 0x4db   : > { %2183 = vmatpush3.bf16.msra.mxu1 %v1325_v54 }
 0x4dc   : > { %2301 = vpow2.f32 %v1308_v53  ;;  %2188 = vmatprep.subr.bf16.mxu1 %v2339_v1 }
 0x4dd   : > { %v1368_v0 = vpop.permute.xlu1 %1367 }
 0x4e9   : > { %v2302_v55 = vpop.eup %2301 }
 0x4ea   : > { %v1310_v56 = vsel %vm1180_vm3, %v2302_v55, 0.0 }
 0x4eb   : > { %1311 = vadd.xlane.f32.xlu0 %v1310_v56 }
 0x501   : > { %1369 = vrot.lane.b32.xlu0 %v2579_v46, %s2345_s2 }
 0x574   : > { %v1312_v57 = vpop.xlane.xlu0 %1311 }
 0x575   : > { %vm1313_vm6 = vcmp.gt.f32.partialorder %v1312_v57, 0.0 }
 0x576   : > { %v1314_v58 = vsel %vm1313_vm6, %v1312_v57, 1.0 }
 0x577   : > { %2303 = vrcp.f32 %v1314_v58 }
 0x578   : > { %v1370_v61 = vpop.permute.xlu0 %1369 }
 0x579   : > { %v1375_v63 = vsel %vm1129_vm1, %v1370_v61, 0  ;;  %v2291_v61 = vld [vmem:[%s2785_s5 + $0x28] sm:$0xff]  }
 0x584   : > { %v2304_v59 = vpop.eup %2303 }
 0x585   : > { %v1316_v60 = vmul.f32 %v2304_v59, %v2302_v55  ;;  %v2289_v59 = vld [vmem:[%s2785_s5 + $0x38] sm:$0xff]  }
 0x586   : > { %2213 = vmatpush3.bf16.msra.mxu0 %v2289_v59 }
 0x587   : > { %v1317_v62 = vpack.c.bf16 %v1316_v60, %v1316_v60  ;;  %v2290_v60 = vld [vmem:[%s2785_s5 + $0x30] sm:$0xff]   ;;  %2214 = vmatprep.subr.bf16.mxu0 %v2339_v1 }
 0x589   : > { %2185 = vmatmul.mubr.msk.bf16.vlgmr.msra.gmra.mxu1 %vm1180_vm3, %v1317_v62  ;;  %v2292_v62 = vld [vmem:[%s2785_s5 + $0x20] sm:$0xff]  }
 0x58a   : > { %2189 = vmatpush3.bf16.xpose.msra.mxu1 %v1375_v63  ;;  %2190 = vmatprep.mubr.msk.bf16.mxu1 %vm2340_vm0, %v2339_v1  ;;  %v2293_v63 = vld [vmem:[%s2785_s5 + $0x18] sm:$0xff]  }
 0x58b   : > { %2194 = vmatprep.subr.bf16.mxu1 %v2339_v1  ;;  %2215 = vmatpush3.bf16.msra.mxu0 %v2290_v60 }
 0x58c   : > { %2216 = vmatprep.subr.bf16.mxu0 %v2339_v1 }
 0x58f   : > { %2217 = vmatpush3.bf16.msra.mxu0 %v2291_v61 }
 0x590   : > { %2218 = vmatprep.subr.bf16.mxu0 %v2339_v1 }
 0x591   : > { %2191 = vmatmul.mubr.msk.bf16.vlgmr.msra.gmra.mxu1 %vm1129_vm1, %v1368_v0  ;;  %v2294_v0 = vld [vmem:[%s2785_s5 + $0x10] sm:$0xff]  }
 0x592   : > { %2196 = vmatprep.mubr.msk.bf16.mxu1 %vm2340_vm0, %v2339_v1 }
 0x593   : > { %2219 = vmatpush3.bf16.msra.mxu0 %v2292_v62 }
 0x594   : > { %2220 = vmatprep.subr.bf16.mxu0 %v2339_v1 }
 0x597   : > { %2221 = vmatpush3.bf16.msra.mxu0 %v2293_v63 }
 0x598   : > { %2222 = vmatprep.subr.bf16.mxu0 %v2339_v1 }
 0x59b   : > { %2223 = vmatpush3.bf16.msra.mxu0 %v2294_v0 }
 0x59c   : > { %2224 = vmatprep.subr.bf16.mxu0 %v2339_v1 }
 0x649   : > { %v2689_v2 = vpop.f32.mrf.mxu1 }
 0x64b   : > { %v2186_v4 = vpop.f32.mrf.mxu1 }
 0x64c   : > { %v2296_v4 = vld [vmem:[%s2785_s5] sm:$0xff]  }
 0x64d   : > { %v1364_v5 = vpop.f32.mrf.mxu1 }
 0x64f   : > { %v2187_v6 = vpop.f32.mrf.mxu1 }
 0x651   : > { %v1411_v7 = vpop.f32.mrf.mxu1 }
 0x652   : > { %v1417_v8 = vmul.f32 0.17677669, %v1411_v7 }
 0x653   : > { %v2192_v9 = vpop.f32.mrf.mxu1 }
 0x654   : > { %v1418_v10 = vadd.f32 %v1417_v8, %v2635_v3 }
 0x655   : > { %v1414_v12 = vpop.f32.mrf.mxu1 }
 0x656   : > { %v1421_v13 = vadd.f32 %v2031_v11, %v1418_v10 }
 0x657   : > { %v2193_v14 = vpop.f32.mrf.mxu1 }
 0x658   : > { %2032 = vst.msk [vmem:[%s2642_s22 + $0x10] sm:$0xff] %vm1180_vm3, %v1421_v13  ;;  %v1424_v15 = vsel %vm1180_vm3, %v1421_v13, -inf }
 0x659   : > { %1425 = vmax.xlane.f32.xlu1 %v1424_v15  ;;  %v1730_v15 = vunpack.c.l.bf16 %v2545_v17  ;;  %v2046_v17 = vld [vmem:[%s2795_s15] ss:$0 sm:$0xff] }
 0x65f   : > { %v2035_v41 = vld [vmem:[%s2633_s0 + $0x18] sm:$0xff] }
 0x66a   : > { %1489 = vrot.lane.b32.xlu1 %v2579_v46, %s2346_s23 }
 0x66e   : > { %1487 = vrot.lane.b32.xlu1 %v2584_v51, %s2346_s23 }
 0x6e2   : > { %v1426_v16 = vpop.xlane.xlu1 %1425 }
 0x6e3   : > { %v1427_v18 = vmax.f32 %v1426_v16, -3e+38 }
 0x6e5   : > { %v1428_v19 = vsub.f32 %v1421_v13, %v1427_v18 }
 0x6e6   : > { %v1490_v28 = vpop.permute.xlu1 %1489 }
 0x6e7   : > { %v1429_v20 = vmul.f32 1.442695, %v1428_v19  ;;  %v1495_v30 = vsel %vm1129_vm1, %v1490_v28, 0 }
 0x6e9   : > { %2305 = vpow2.f32 %v1429_v20 }
 0x6ea   : > { %v1488_v31 = vpop.permute.xlu1 %1487 }
 0x6f6   : > { %v2306_v22 = vpop.eup %2305 }
 0x6f7   : > { %v1431_v23 = vsel %vm1180_vm3, %v2306_v22, 0.0 }
 0x6f8   : > { %1432 = vadd.xlane.f32.xlu0 %v1431_v23 }
 0x70e   : > { %1439 = vrot.lane.b32.xlu0 %v2650_v21, %s2345_s2 }
 0x781   : > { %v1433_v24 = vpop.xlane.xlu0 %1432 }
 0x782   : > { %vm1434_vm7 = vcmp.gt.f32.partialorder %v1433_v24, 0.0 }
 0x783   : > { %v1435_v25 = vsel %vm1434_vm7, %v1433_v24, 1.0 }
 0x784   : > { %2307 = vrcp.f32 %v1435_v25 }
 0x785   : > { %v1440_v46 = vpop.permute.xlu0 %1439 }
 0x786   : > { %v1445_v26 = vsel %vm1200_vm4, %v1440_v46, 0 }
 0x787   : > { %2195 = vmatpush3.bf16.msra.mxu1 %v1445_v26 }
 0x788   : > { %2200 = vmatprep.subr.bf16.mxu1 %v2339_v1 }
 0x791   : > { %v2308_v51 = vpop.eup %2307 }
 0x792   : > { %v1437_v27 = vmul.f32 %v2308_v51, %v2306_v22 }
 0x794   : > { %v1438_v29 = vpack.c.bf16 %v1437_v27, %v1437_v27 }
 0x796   : > { %2197 = vmatmul.mubr.msk.bf16.vlgmr.msra.gmra.mxu1 %vm1180_vm3, %v1438_v29 }
 0x797   : > { %2201 = vmatpush3.bf16.xpose.msra.mxu1 %v1495_v30  ;;  %2202 = vmatprep.mubr.msk.bf16.mxu1 %vm2340_vm0, %v2339_v1  ;;  %v2047_v30 = vld [vmem:[%s2796_s16] ss:$0 sm:$0xff] }
 0x798   : > { %2206 = vmatprep.subr.bf16.mxu1 %v2339_v1 }
 0x79e   : > { %2203 = vmatmul.mubr.msk.bf16.vlgmr.msra.gmra.mxu1 %vm1129_vm1, %v1488_v31 }
 0x79f   : > { %2208 = vmatprep.mubr.msk.bf16.mxu1 %vm2340_vm0, %v2339_v1 }
 0x856   : > { %v1481_v32 = vpop.f32.mrf.mxu1 }
 0x858   : > { %v2198_v33 = vpop.f32.mrf.mxu1 }
 0x85a   : > { %v1484_v35 = vpop.f32.mrf.mxu1 }
 0x85c   : > { %v2199_v36 = vpop.f32.mrf.mxu1 }
 0x85e   : > { %v1531_v37 = vpop.f32.mrf.mxu1 }
 0x85f   : > { %v1537_v38 = vmul.f32 0.17677669, %v1531_v37 }
 0x860   : > { %v2204_v39 = vpop.f32.mrf.mxu1 }
 0x861   : > { %v1538_v40 = vadd.f32 %v1537_v38, %v2635_v3 }
 0x862   : > { %v1534_v42 = vpop.f32.mrf.mxu1 }
 0x863   : > { %v1541_v43 = vadd.f32 %v2035_v41, %v1538_v40 }
 0x864   : > { %v2205_v44 = vpop.f32.mrf.mxu1 }
 0x865   : > { %2036 = vst.msk [vmem:[%s2642_s22 + $0x18] sm:$0xff] %vm1180_vm3, %v1541_v43  ;;  %v1544_v45 = vsel %vm1180_vm3, %v1541_v43, -inf  ;;  %s755_s22 = scalar_lea.vmem %s2797_s17, %s2514_s20 }
 0x866   : > { %1545 = vmax.xlane.f32.xlu0 %v1544_v45 }
 0x87c   : > { %1559 = vrot.lane.b32.xlu0 %v2650_v21, %s2346_s23 }
 0x880   : > { %1612 = vrot.lane.b32.xlu0 %v1481_v32, %s2345_s2 }
 0x8ef   : > { %v1546_v47 = vpop.xlane.xlu0 %1545 }
 0x8f0   : > { %v1547_v48 = vmax.f32 %v1546_v47, -3e+38 }
 0x8f2   : > { %v1548_v49 = vsub.f32 %v1541_v43, %v1547_v48 }
 0x8f3   : > { %v1560_v50 = vpop.permute.xlu0 %1559 }
 0x8f4   : > { %v1549_v52 = vmul.f32 1.442695, %v1548_v49  ;;  %v1565_v3 = vsel %vm1200_vm4, %v1560_v50, 0 }
 0x8f5   : > { %2207 = vmatpush3.bf16.msra.mxu1 %v1565_v3 }
 0x8f6   : > { %2309 = vpow2.f32 %v1549_v52 }
 0x8f7   : > { %v1613_v11 = vpop.permute.xlu0 %1612 }
 0x903   : > { %v2310_v53 = vpop.eup %2309 }
 0x904   : > { %v1551_v54 = vsel %vm1180_vm3, %v2310_v53, 0.0 }
 0x905   : > { %1552 = vadd.xlane.f32.xlu1 %v1551_v54 }
 0x916   : > { %1608 = vrot.lane.b32.xlu1 %v2689_v2, %s2346_s23  ;;  %v2295_v2 = vld [vmem:[%s2785_s5 + $0x8] sm:$0xff]  }
 0x917   : > { %2225 = vmatpush3.bf16.msra.mxu0 %v2295_v2 }
 0x918   : > { %2226 = vmatprep.subr.bf16.mxu0 %v2339_v1 }
 0x91b   : > { %2227 = vmatpush3.bf16.msra.mxu0 %v2296_v4 }
 0x98e   : > { %v1553_v55 = vpop.xlane.xlu1 %1552 }
 0x98f   : > { %vm1554_vm8 = vcmp.gt.f32.partialorder %v1553_v55, 0.0 }
 0x990   : > { %v1555_v21 = vsel %vm1554_vm8, %v1553_v55, 1.0 }
 0x991   : > { %2311 = vrcp.f32 %v1555_v21 }
 0x992   : > { %v1609_v9 = vpop.permute.xlu1 %1608 }
 0x993   : > { %v1619_v10 = vsel %vm1129_vm1, %v2665_v34, %v1609_v9 }
 0x994   : > { %v1621_v12 = vsel %vm1620_vm9, %v1619_v10, %v1613_v11 }
 0x99e   : > { %v2312_v56 = vpop.eup %2311 }
 0x99f   : > { %v1557_v57 = vmul.f32 %v2312_v56, %v2310_v53 }
 0x9a1   : > { %v1558_v58 = vpack.c.bf16 %v1557_v57, %v1557_v57 }
 0x9a3   : > { %2209 = vmatmul.mubr.msk.bf16.vlgmr.msra.gmra.mxu1 %vm1180_vm3, %v1558_v58 }
 0xa63   : > { %v1601_v5 = vpop.f32.mrf.mxu1 }
 0xa64   : > { %1616 = vrot.lane.b32.xlu1 %v1601_v5, %s2344_s27 }
 0xa65   : > { %v2210_v6 = vpop.f32.mrf.mxu1 }
 0xa67   : > { %v1604_v7 = vpop.f32.mrf.mxu1 }
 0xa69   : > { %v2211_v8 = vpop.f32.mrf.mxu1 }
 0xad6   : > { %v1617_v1 = vpop.permute.xlu1 %1616 }
 0xad7   : > { %v1623_v13 = vsel %vm1622_vm10, %v1621_v12, %v1617_v1 }
 0xad8   : > { %v1624_v14 = vpack.c.bf16 %v1623_v13, %v1623_v13 }
 0xada   : > { %2229 = vmatmul.mubr.bf16.vlgmr.msra.gmra.mxu0 %v1624_v14 }
 0xb9a   : > { %v1723_v16 = vpop.f32.mrf.mxu0 }
 0xb9b   : > { %v1729_v18 = vmul.f32 1.3949589, %v1723_v16 }
 0xb9c   : > { %v2230_v19 = vpop.f32.mrf.mxu0 }
 0xb9d   : > { %v1731_v20 = vadd.f32 %v1730_v15, %v1729_v18 }
 0xb9e   : > { %v1726_v22 = vpop.f32.mrf.mxu0 }
 0xb9f   : > { %1732 = vadd.xlane.f32.xlu0 %v1731_v20 }
 0xba0   : > { %v2231_v23 = vpop.f32.mrf.mxu0 }
 0xc28   : > { %v1733_v24 = vpop.xlane.xlu0 %1732 }
 0xc29   : > { %v1735_v34 = vmul.f32 0.0078125, %v1733_v24 }
 0xc2b   : > { %v1736_v25 = vsub.f32 %v1731_v20, %v1735_v34 }
 0xc2d   : > { %v1737_v46 = vmul.f32 %v1736_v25, %v1736_v25 }
 0xc2f   : > { %1738 = vadd.xlane.f32.xlu1 %v1737_v46 }
 0xcb8   : > { %v1739_v26 = vpop.xlane.xlu1 %1738 }
 0xcb9   : > { %v1740_v51 = vmul.f32 0.0078125, %v1739_v26 }
 0xcbb   : > { %v1741_v27 = vadd.f32 1e-05, %v1740_v51 }
 0xcbd   : > { %2313 = vrsqrt.f32 %v1741_v27 }
 0xcca   : > { %v2314_v28 = vpop.eup %2313 }
 0xccb   : > { %v1743_v29 = vmul.f32 %v2314_v28, %v1736_v25 }
 0xccd   : > { %v1751_v31 = vmul.f32 %v2046_v17, %v1743_v29 }
 0xccf   : > { %v1759_v32 = vadd.f32 %v2047_v30, %v1751_v31 }
 0xcd1   : > { %v1760_v33 = vpack.c.bf16 %v1759_v32, %v1759_v32 }
 0xcd3   : > { %1761 = vst [vmem:[%s755_s22] sm:$0xf] %v1760_v33 }
 0xcd4 PF: > { %s2811_s2 = sld [smem:[#allocation3_spill]] }
 0xcd5   : > { %s2812_s27 = sld [smem:[#allocation2_spill]] }
 0xcd6   : > { %s2813_s28 = sld [smem:[#allocation4_spill]] }
 0xcda   : > { %s29_s29 = sadd.s32 1, %s2811_s2  }
 0xcdb   : > { %p26_p5 = scmp.ge.s32.totalorder %s29_s29, 4  }
 0xcdd   :  { %28 = sbr.rel (!%p26_p5) target bundleno = 4 (0x4), region = 157 }

// kernel: transformer_forward.16
= control target key start
LH: loop header
LB: loop body
LE: loop exit
PB: predicated region body
PF: predicated region fallthrough
CT: control target
= control target key end

     0   :  { %s2451_s27 = smov 0   ;;  %s2453_s28 = smov 0   ;;  %s2793_s0 = inlined_call_operand.vmem [shape: bf16[2,8,128], index: 0, kind: input, shape index: {}]   ;;  %s2794_s1 = inlined_call_operand.vmem [shape: bf16[2,16,128], index: 1, kind: input, shape index: {}]   ;;  %s2795_s2 = inlined_call_operand.vmem [shape: bf16[128,128], index: 2, kind: input, shape index: {}]   ;;  %s2796_s3 = inlined_call_operand.vmem [shape: bf16[128,128], index: 3, kind: input, shape index: {}]   ;;  %s2797_s4 = inlined_call_operand.vmem [shape: bf16[128,128], index: 4, kind: input, shape index: {}]   ;;  %s2798_s5 = inlined_call_operand.vmem [shape: bf16[128,128], index: 5, kind: input, shape index: {}]   ;;  %s2799_s6 = inlined_call_operand.vmem [shape: f32[8,128], index: 6, kind: input, shape index: {}]   ;;  %s2800_s7 = inlined_call_operand.vmem [shape: f32[8,128], index: 7, kind: input, shape index: {}]   ;;  %s2801_s8 = inlined_call_operand.vmem [shape: f32[8,128], index: 8, kind: input, shape index: {}]   ;;  %s2802_s9 = inlined_call_operand.vmem [shape: f32[16,128], index: 9, kind: input, shape index: {}]   ;;  %s2803_s10 = inlined_call_operand.vmem [shape: f32[16,128], index: 10, kind: input, shape index: {}]   ;;  %s2804_s11 = inlined_call_operand.vmem [shape: f32[16,128], index: 11, kind: input, shape index: {}]   ;;  %s2805_s12 = inlined_call_operand.vmem [shape: f32[2,8,1], index: 12, kind: input, shape index: {}]   ;;  %s2806_s13 = inlined_call_operand.vmem [shape: f32[2,1,16], index: 13, kind: input, shape index: {}]   ;;  %s2807_s14 = inlined_call_operand.vmem [shape: f32[2,4,8,16], index: 14, kind: input, shape index: {}, may-alias: {14,18}]   ;;  %s2808_s15 = inlined_call_operand.vmem [shape: f32[1,128], index: 15, kind: input, shape index: {}]   ;;  %s2809_s16 = inlined_call_operand.vmem [shape: f32[1,128], index: 16, kind: input, shape index: {}]   ;;  %s2810_s17 = inlined_call_operand.vmem [shape: bf16[2,8,128], index: 17, kind: output, shape index: {0}]   ;;  %s2811_s18 = inlined_call_operand.vmem [shape: f32[2,4,8,16], index: 18, kind: output, shape index: {1}, may-alias: {14,18}]  }
   0x1   :  { %2814 = sst [smem:[#allocation4_spill]] %s2793_s0  ;;  %s2455_s29 = smov 0  }
   0x2   :  { %2815 = sst [smem:[#allocation5_spill]] %s2794_s1 }
   0x3   :  { %2816 = sst [smem:[#allocation6_spill]] %s2795_s2 }
   0x4 LB: > { %2817 = sst [smem:[#allocation2_spill]] %s2342_s28  ;;  %s41_s30 = sadd.s32 1, %s2342_s28  ;;  %s2346_s29 = sphi %s2455_s29, %s29_s29   ;;  %s2342_s28 = sphi %s2453_s28, %s2823_s28   ;;  %s2338_s27 = sphi %s2451_s27, %s2822_s27  }
   0x5   : > { %p1995_p0 = scmp.ge.s32.totalorder %s2346_s29, 1  ;;  %p43_p1 = scmp.ge.s32.totalorder %s41_s30, 2 }
   0x6   : > { %p609_p2 = scmp.lt.s32.totalorder %s2346_s29, 3 }
   0x7   : > { %s2825_s30 = smov (%p43_p1, %s41_s30), 0 }
   0x8   : > { %2818 = sst [smem:[#allocation3_spill]] %s2825_s30  ;;  %p610_p3 = pnand %p1995_p0, %p609_p2 }
   0x9   : > { %s2819_s2 = sld [smem:[#allocation6_spill]] (!%p610_p3)  ;;  %p710_p4 = scmp.lt.s32.totalorder (!%p610_p3), %s2338_s27, 1 }
   0xa   : > { %613 = sbr.rel (%p610_p3) target bundleno = 3285 (0xcd5), region = 88  ;;  %s2820_s19 = sld [smem:[#allocation5_spill]] (!%p610_p3) }
   0xb   : > { %s2821_s0 = sld [smem:[#allocation4_spill]] (!%p610_p3)  ;;  %s2353_s23 = smov (!%p610_p3), 96  }
   0xc   : > { %s2354_s25 = smov (!%p610_p3), 64   ;;  %s2355_s26 = smov (!%p610_p3), 32  }
   0xf   : > { %v2273_v0 = vld [vmem:[%s2796_s3 + $0x38] sm:$0xff]   ;;  %v2348_v1 = vmov 0.0   ;;  %v2274_v2 = vld [vmem:[%s2796_s3 + $0x30] sm:$0xff]   ;;  %vm2349_vm0 = vmmov 0   ;;  %v2276_v5 = vld [vmem:[%s2796_s3 + $0x28] sm:$0xff]   ;;  %s2827_s27 = smov (!%p710_p4, %s2338_s27), 1 }
  0x10   : > { %2132 = vmatprep.subr.bf16.mxu1 %v2348_v1  ;;  %2112 = vmatprep.subr.bf16.mxu0 %v2348_v1  ;;  %v2275_v3 = vld [vmem:[%s2819_s2 + $0x38] sm:$0xff]   ;;  %v2277_v4 = vld [vmem:[%s2819_s2 + $0x30] sm:$0xff]   ;;  %v2279_v6 = vld [vmem:[%s2819_s2 + $0x28] sm:$0xff]   ;;  %s2057_s21 = sshll.u32 %s2827_s27, 3  ;;  %s1996_s24 = sshll.u32 %s2827_s27, 2  ;;  %v2352_v27 = vmov 0  }
  0x11   : > { %2133 = vmatpush3.bf16.msra.mxu1 %v2273_v0  ;;  %2148 = vmatprep.mubr.msk.bf16.mxu1 %vm2349_vm0, %v2348_v1  ;;  %v2278_v7 = vld [vmem:[%s2796_s3 + $0x20] sm:$0xff]   ;;  %v2280_v9 = vld [vmem:[%s2796_s3 + $0x18] sm:$0xff]   ;;  %s721_s1 = scalar_lea.vmem %s2820_s19, %s2057_s21  ;;  %v2282_v11 = vld [vmem:[%s2796_s3 + $0x10] sm:$0xff]   ;;  %s716_s30 = scalar_lea.vmem %s2821_s0, %s1996_s24  ;;  %vm1144_vm1 = vcmask 261120   ;;  %vm1195_vm2 = vcmask 130048   ;;  %vm1625_vm7 = vcmask 523264  }
  0x12   : > { %2134 = vmatprep.subr.bf16.mxu1 %v2348_v1  ;;  %2128 = vmatprep.mubr.msk.bf16.mxu0 %vm2349_vm0, %v2348_v1  ;;  %v2281_v8 = vld [vmem:[%s2819_s2 + $0x20] sm:$0xff]   ;;  %v2283_v10 = vld [vmem:[%s2819_s2 + $0x18] sm:$0xff]   ;;  %v2285_v12 = vld [vmem:[%s2819_s2 + $0x10] sm:$0xff]   ;;  %s2351_s19 = smov 127   ;;  %s740_s22 = scalar_lea.vmem %s2805_s12, %s2057_s21  ;;  %vm1627_vm8 = vcmask 785408  }
  0x13   : > { %2113 = vmatpush3.bf16.msra.mxu0 %v2275_v3  ;;  %v2284_v13 = vld [vmem:[%s2796_s3 + $0x8] sm:$0xff]   ;;  %v2286_v15 = vld [vmem:[%s2796_s3] sm:$0xff]   ;;  %2272 = vset.pattern.permute.xlu0 %v2352_v27  ;;  %v2290_v62 = vld [vmem:[%s2797_s4 + $0x38] sm:$0xff]   ;;  %s743_s0 = scalar_lea.vmem %s2806_s13, %s2827_s27 }
  0x14   : > { %2114 = vmatprep.subr.bf16.mxu0 %v2348_v1  ;;  %v2287_v14 = vld [vmem:[%s2819_s2 + $0x8] sm:$0xff]   ;;  %v2289_v16 = vld [vmem:[%s2819_s2] sm:$0xff]   ;;  %v2291_v63 = vld [vmem:[%s2797_s4 + $0x30] sm:$0xff]  }
  0x15   : > { %2135 = vmatpush3.bf16.msra.mxu1 %v2274_v2  ;;  %v2545_v17 = vld [vmem:[%s721_s1] sm:$0xff]   ;;  %s2350_s1 = smov 1   ;;  %v999_v34 = vld [vmem:[%s2802_s9 + $0x8] sm:$0xff]  ;;  %v2294_v3 = vld [vmem:[%s2797_s4 + $0x18] sm:$0xff]  }
  0x16   : > { %2136 = vmatprep.subr.bf16.mxu1 %v2348_v1  ;;  %v2554_v18 = vld [vmem:[%s716_s30] sm:$0xf]  ;;  %v1001_v35 = vld [vmem:[%s2803_s10 + $0x8] sm:$0xff]  ;;  %s2058_s30 = sshll.u32 %s2827_s27, 5 }
  0x17   : > { %2115 = vmatpush3.bf16.msra.mxu0 %v2277_v4  ;;  %v1127_v28 = vld [vmem:[%s740_s22] sm:$0xff]  ;;  %v1003_v38 = vld [vmem:[%s2804_s11 + $0x8] sm:$0xff]  ;;  %v2295_v4 = vld [vmem:[%s2797_s4 + $0x10] sm:$0xff]   ;;  %s2658_s22 = scalar_lea.vmem %s2811_s18, %s2058_s30 }
  0x18   : > { %2116 = vmatprep.subr.bf16.mxu0 %v2348_v1  ;;  %v1000_v29 = vld [vmem:[%s2803_s10] sm:$0xff]  ;;  %v2292_v0 = vld [vmem:[%s2797_s4 + $0x28] sm:$0xff]  }
  0x19   : > { %2137 = vmatpush3.bf16.msra.mxu1 %v2276_v5  ;;  %v998_v30 = vld [vmem:[%s2802_s9] sm:$0xff]  ;;  %v2296_v5 = vld [vmem:[%s2797_s4 + $0x8] sm:$0xff]  }
  0x1a   : > { %2138 = vmatprep.subr.bf16.mxu1 %v2348_v1  ;;  %v1002_v37 = vld [vmem:[%s2804_s11] sm:$0xff] }
  0x1b   : > { %2117 = vmatpush3.bf16.msra.mxu0 %v2279_v6  ;;  %v875_v44 = vld [vmem:[%s2799_s6] sm:$0xff] }
  0x1c   : > { %2118 = vmatprep.subr.bf16.mxu0 %v2348_v1  ;;  %v876_v45 = vld [vmem:[%s2800_s7] sm:$0xff] }
  0x1d   : > { %2139 = vmatpush3.bf16.msra.mxu1 %v2278_v7  ;;  %v877_v50 = vld [vmem:[%s2801_s8] sm:$0xff] }
  0x1e   : > { %2140 = vmatprep.subr.bf16.mxu1 %v2348_v1  ;;  %v2293_v2 = vld [vmem:[%s2797_s4 + $0x20] sm:$0xff]  }
  0x1f   : > { %2119 = vmatpush3.bf16.msra.mxu0 %v2281_v8  ;;  %v2297_v6 = vld [vmem:[%s2797_s4] sm:$0xff]  }
  0x20   : > { %2120 = vmatprep.subr.bf16.mxu0 %v2348_v1  ;;  %v2030_v7 = vld [vmem:[%s743_s0] ss:$0 sm:$0xff] }
  0x21   : > { %2141 = vmatpush3.bf16.msra.mxu1 %v2280_v9 }
  0x22   : > { %2142 = vmatprep.subr.bf16.mxu1 %v2348_v1 }
  0x23   : > { %2121 = vmatpush3.bf16.msra.mxu0 %v2283_v10 }
  0x24   : > { %2122 = vmatprep.subr.bf16.mxu0 %v2348_v1 }
  0x25   : > { %2143 = vmatpush3.bf16.msra.mxu1 %v2282_v11 }
  0x26   : > { %2144 = vmatprep.subr.bf16.mxu1 %v2348_v1 }
  0x27   : > { %2123 = vmatpush3.bf16.msra.mxu0 %v2285_v12 }
  0x28   : > { %2124 = vmatprep.subr.bf16.mxu0 %v2348_v1 }
  0x29   : > { %2145 = vmatpush3.bf16.msra.mxu1 %v2284_v13 }
  0x2a   : > { %2146 = vmatprep.subr.bf16.mxu1 %v2348_v1 }
  0x2b   : > { %2125 = vmatpush3.bf16.msra.mxu0 %v2287_v14 }
  0x2c   : > { %2126 = vmatprep.subr.bf16.mxu0 %v2348_v1 }
  0x2d   : > { %2147 = vmatpush3.bf16.msra.mxu1 %v2286_v15 }
  0x2e   : > { %2172 = vmatprep.subr.bf16.mxu1 %v2348_v1 }
  0x2f   : > { %2127 = vmatpush3.bf16.msra.mxu0 %v2289_v16 }
  0x30   : > { %2149 = vmatmul.mubr.bf16.vlgmr.msra.gmra.mxu1 %v2545_v17  ;;  %2152 = vmatprep.subr.bf16.mxu0 %v2348_v1 }
  0x31   : > { %2174 = vmatprep.mubr.msk.bf16.mxu1 %vm2349_vm0, %v2348_v1 }
  0x32   : > { %2129 = vmatmul.mubr.bf16.vlgmr.msra.gmra.mxu0 %v2554_v18 }
  0x33   : > { %2168 = vmatprep.mubr.msk.bf16.mxu0 %vm2349_vm0, %v2348_v1  ;;  %2153 = vmatpush3.bf16.msra.mxu0 %v2290_v62 }
  0x34   : > { %2154 = vmatprep.subr.bf16.mxu0 %v2348_v1 }
  0x37   : > { %2155 = vmatpush3.bf16.msra.mxu0 %v2291_v63 }
  0x38   : > { %2156 = vmatprep.subr.bf16.mxu0 %v2348_v1 }
  0x3b   : > { %2157 = vmatpush3.bf16.msra.mxu0 %v2292_v0 }
  0x3c   : > { %2158 = vmatprep.subr.bf16.mxu0 %v2348_v1 }
  0x3f   : > { %2159 = vmatpush3.bf16.msra.mxu0 %v2293_v2 }
  0x40   : > { %2160 = vmatprep.subr.bf16.mxu0 %v2348_v1 }
  0x43   : > { %2161 = vmatpush3.bf16.msra.mxu0 %v2294_v3 }
  0x44   : > { %2162 = vmatprep.subr.bf16.mxu0 %v2348_v1 }
  0x47   : > { %2163 = vmatpush3.bf16.msra.mxu0 %v2295_v4 }
  0x48   : > { %2164 = vmatprep.subr.bf16.mxu0 %v2348_v1 }
  0x4b   : > { %2165 = vmatpush3.bf16.msra.mxu0 %v2296_v5 }
  0x4c   : > { %2166 = vmatprep.subr.bf16.mxu0 %v2348_v1 }
  0x4f   : > { %2167 = vmatpush3.bf16.msra.mxu0 %v2297_v6 }
  0x50   : > { %2220 = vmatprep.subr.bf16.mxu0 %v2348_v1 }
  0x52   : > { %2169 = vmatmul.mubr.bf16.vlgmr.msra.gmra.mxu0 %v2545_v17 }
  0x53   : > { %2236 = vmatprep.mubr.msk.bf16.mxu0 %vm2349_vm0, %v2348_v1 }
  0xf0   : > { %v991_v19 = vpop.f32.mrf.mxu1 }
  0xf1   : > { %1008 = vrot.lane.b32.xlu1 %v991_v19, %s2350_s1  ;;  %1004 = vrot.lane.b32.xlu0 %v991_v19, %s2351_s19  ;;  %v1012_v36 = vmul.f32 %v998_v30, %v991_v19 }
  0xf2   : > { %v2150_v20 = vpop.f32.mrf.mxu1  ;;  %v869_v21 = vpop.f32.mrf.mxu0 }
  0xf3   : > { %v882_v52 = vmul.f32 %v875_v44, %v869_v21 }
  0xf4   : > { %v994_v22 = vpop.f32.mrf.mxu1  ;;  %v2130_v23 = vpop.f32.mrf.mxu0 }
  0xf5   : > { %1010 = vrot.lane.b32.xlu1 %v994_v22, %s2350_s1  ;;  %1006 = vrot.lane.b32.xlu0 %v994_v22, %s2351_s19  ;;  %v1013_v41 = vmul.f32 %v999_v34, %v994_v22 }
  0xf6   : > { %v2151_v24 = vpop.f32.mrf.mxu1  ;;  %v872_v25 = vpop.f32.mrf.mxu0 }
  0xf8   : > { %v2131_v26 = vpop.f32.mrf.mxu0 }
  0xf9   : > { %878 = vrot.lane.b32.xlu0 %v869_v21, %s2351_s19  ;;  %880 = vrot.lane.b32.xlu1 %v869_v21, %s2350_s1  ;;  %s2651_s1 = scalar_lea.vmem %s2807_s14, %s2058_s30  ;;  %s758_s30 = scalar_lea.vmem %s2810_s17, %s1996_s24 }
  0xfa   : > { %v1193_v12 = vld [vmem:[%s2651_s1] sm:$0xff] }
  0xfd   : > { %1131 = vperm.xlu0 %2272, %v1127_v28  }
 0x112   : > { %v1120_v26 = vpop.f32.mrf.mxu0 }
 0x114   : > { %v2170_v27 = vpop.f32.mrf.mxu0 }
 0x116   : > { %v1123_v28 = vpop.f32.mrf.mxu0 }
 0x118   : > { %v2171_v30 = vpop.f32.mrf.mxu0 }
 0x163   : > { %v1009_v31 = vpop.permute.xlu1 %1008  ;;  %v1005_v32 = vpop.permute.xlu0 %1004 }
 0x164   : > { %v1014_v33 = vmul.f32 %v1005_v32, %v1000_v29  ;;  %v1018_v46 = vmul.f32 %v1009_v31, %v1002_v37  ;;  %v2666_v29 = vpack.c.bf16 %v1123_v28, %v1120_v26 }
 0x166   : > { %v1016_v42 = vadd.f32 %v1014_v33, %v1012_v36 }
 0x167   : > { %v1011_v39 = vpop.permute.xlu1 %1010  ;;  %v1007_v40 = vpop.permute.xlu0 %1006 }
 0x168   : > { %v1015_v43 = vmul.f32 %v1007_v40, %v1001_v35  ;;  %v1019_v47 = vmul.f32 %v1011_v39, %v1003_v38  ;;  %v1020_v53 = vadd.f32 %v1018_v46, %v1016_v42 }
 0x16a   : > { %v1017_v48 = vadd.f32 %v1015_v43, %v1013_v41 }
 0x16b   : > { %v879_v49 = vpop.permute.xlu0 %878  ;;  %v881_v51 = vpop.permute.xlu1 %880 }
 0x16c   : > { %v1021_v54 = vadd.f32 %v1019_v47, %v1017_v48  ;;  %v883_v55 = vmul.f32 %v879_v49, %v876_v45  ;;  %v885_v58 = vmul.f32 %v881_v51, %v877_v50 }
 0x16e   : > { %v2595_v56 = vpack.c.bf16 %v1021_v54, %v1020_v53  ;;  %v884_v57 = vadd.f32 %v883_v55, %v882_v52 }
 0x170   : > { %v1149_v59 = vsel %vm1144_vm1, %v2595_v56, 0  ;;  %v886_v60 = vadd.f32 %v885_v58, %v884_v57 }
 0x171   : > { %2173 = vmatpush3.bf16.xpose.msra.mxu1 %v1149_v59 }
 0x172   : > { %2178 = vmatprep.subr.bf16.mxu1 %v2348_v1  ;;  %v2600_v61 = vpack.c.bf16 %v886_v60, %v886_v60 }
 0x178   : > { %2175 = vmatmul.mubr.msk.bf16.vlgmr.msra.gmra.mxu1 %vm1144_vm1, %v2600_v61  ;;  %v1132_v8 = vpop.permute.xlu0 %1131 }
 0x179   : > { %2180 = vmatprep.mubr.msk.bf16.mxu1 %vm2349_vm0, %v2348_v1  ;;  %v2646_v9 = vadd.f32 %v2030_v7, %v1132_v8  ;;  %2179 = vmatpush3.bf16.msra.mxu1 %v2666_v29 }
 0x17a   : > { %2184 = vmatprep.subr.bf16.mxu1 %v2348_v1 }
 0x238   : > { %v1185_v10 = vpop.f32.mrf.mxu1 }
 0x239   : > { %v1191_v11 = vmul.f32 0.17677669, %v1185_v10 }
 0x23a   : > { %v2176_v13 = vpop.f32.mrf.mxu1 }
 0x23b   : > { %v1192_v14 = vadd.f32 %v1191_v11, %v2646_v9 }
 0x23c   : > { %v1188_v15 = vpop.f32.mrf.mxu1 }
 0x23d   : > { %v1194_v16 = vadd.f32 %v1193_v12, %v1192_v14 }
 0x23e   : > { %v2177_v17 = vpop.f32.mrf.mxu1 }
 0x23f   : > { %1196 = vst.msk [vmem:[%s2658_s22] sm:$0xff] %vm1195_vm2, %v1194_v16  ;;  %v1197_v19 = vsel %vm1195_vm2, %v1194_v16, -inf }
 0x240   : > { %1198 = vmax.xlane.f32.xlu1 %v1197_v19 }
 0x246   : > { %v2034_v47 = vld [vmem:[%s2651_s1 + $0x8] sm:$0xff] }
 0x251   : > { %1259 = vrot.lane.b32.xlu1 %v2595_v56, %s2353_s23 }
 0x2c9   : > { %v1199_v20 = vpop.xlane.xlu1 %1198 }
 0x2ca   : > { %v1200_v21 = vmax.f32 %v1199_v20, -3e+38 }
 0x2cc   : > { %v1201_v22 = vsub.f32 %v1194_v16, %v1200_v21 }
 0x2cd   : > { %v1260_v35 = vpop.permute.xlu1 %1259 }
 0x2ce   : > { %v1202_v23 = vmul.f32 1.442695, %v1201_v22  ;;  %v1265_v37 = vsel %vm1144_vm1, %v1260_v35, 0 }
 0x2d0   : > { %2306 = vpow2.f32 %v1202_v23 }
 0x2dd   : > { %v2307_v24 = vpop.eup %2306 }
 0x2de   : > { %v1204_v25 = vsel %vm1195_vm2, %v2307_v24, 0.0 }
 0x2df   : > { %1205 = vadd.xlane.f32.xlu0 %v1204_v25 }
 0x2f5   : > { %1256 = vrot.lane.b32.xlu0 %v2600_v61, %s2353_s23 }
 0x368   : > { %v1206_v31 = vpop.xlane.xlu0 %1205 }
 0x369   : > { %vm1207_vm3 = vcmp.gt.f32.partialorder %v1206_v31, 0.0 }
 0x36a   : > { %v1208_v32 = vsel %vm1207_vm3, %v1206_v31, 1.0 }
 0x36b   : > { %2308 = vrcp.f32 %v1208_v32 }
 0x36c   : > { %v1257_v38 = vpop.permute.xlu0 %1256 }
 0x378   : > { %v2309_v33 = vpop.eup %2308 }
 0x379   : > { %v1210_v34 = vmul.f32 %v2309_v33, %v2307_v24 }
 0x37b   : > { %v1211_v36 = vpack.c.bf16 %v1210_v34, %v1210_v34 }
 0x37d   : > { %2181 = vmatmul.mubr.msk.bf16.vlgmr.msra.gmra.mxu1 %vm1195_vm2, %v1211_v36 }
 0x37e   : > { %2185 = vmatpush3.bf16.xpose.msra.mxu1 %v1265_v37  ;;  %2186 = vmatprep.mubr.msk.bf16.mxu1 %vm2349_vm0, %v2348_v1 }
 0x37f   : > { %2190 = vmatprep.subr.bf16.mxu1 %v2348_v1 }
 0x385   : > { %2187 = vmatmul.mubr.msk.bf16.vlgmr.msra.gmra.mxu1 %vm1144_vm1, %v1257_v38 }
 0x386   : > { %2192 = vmatprep.mubr.msk.bf16.mxu1 %vm2349_vm0, %v2348_v1 }
 0x43d   : > { %v2680_v39 = vpop.f32.mrf.mxu1 }
 0x43f   : > { %v2182_v40 = vpop.f32.mrf.mxu1 }
 0x441   : > { %v1252_v41 = vpop.f32.mrf.mxu1 }
 0x443   : > { %v2183_v42 = vpop.f32.mrf.mxu1 }
 0x445   : > { %v1301_v43 = vpop.f32.mrf.mxu1 }
 0x446   : > { %v1307_v44 = vmul.f32 0.17677669, %v1301_v43 }
 0x447   : > { %v2188_v45 = vpop.f32.mrf.mxu1 }
 0x448   : > { %v1308_v46 = vadd.f32 %v1307_v44, %v2646_v9 }
 0x449   : > { %v1304_v48 = vpop.f32.mrf.mxu1 }
 0x44a   : > { %v1311_v49 = vadd.f32 %v2034_v47, %v1308_v46 }
 0x44b   : > { %v2189_v50 = vpop.f32.mrf.mxu1 }
 0x44c   : > { %2035 = vst.msk [vmem:[%s2658_s22 + $0x8] sm:$0xff] %vm1195_vm2, %v1311_v49  ;;  %v1314_v51 = vsel %vm1195_vm2, %v1311_v49, -inf }
 0x44d   : > { %1315 = vmax.xlane.f32.xlu1 %v1314_v51 }
 0x453   : > { %v2038_v15 = vld [vmem:[%s2651_s1 + $0x10] sm:$0xff] }
 0x45e   : > { %1330 = vrot.lane.b32.xlu1 %v2666_v29, %s2353_s23 }
 0x462   : > { %1376 = vrot.lane.b32.xlu1 %v2600_v61, %s2354_s25 }
 0x4d6   : > { %v1316_v52 = vpop.xlane.xlu1 %1315 }
 0x4d7   : > { %v1317_v53 = vmax.f32 %v1316_v52, -3e+38 }
 0x4d9   : > { %v1318_v54 = vsub.f32 %v1311_v49, %v1317_v53 }
 0x4da   : > { %v1331_v55 = vpop.permute.xlu1 %1330 }
 0x4db   : > { %v1319_v57 = vmul.f32 1.442695, %v1318_v54  ;;  %2191 = vmatpush3.bf16.msra.mxu1 %v1331_v55 }
 0x4dc   : > { %2196 = vmatprep.subr.bf16.mxu1 %v2348_v1 }
 0x4dd   : > { %2310 = vpow2.f32 %v1319_v57 }
 0x4de   : > { %v1377_v5 = vpop.permute.xlu1 %1376 }
 0x4ea   : > { %v2311_v58 = vpop.eup %2310 }
 0x4eb   : > { %v1321_v59 = vsel %vm1195_vm2, %v2311_v58, 0.0 }
 0x4ec   : > { %1322 = vadd.xlane.f32.xlu0 %v1321_v59 }
 0x502   : > { %1378 = vrot.lane.b32.xlu0 %v2595_v56, %s2354_s25 }
 0x575   : > { %v1323_v60 = vpop.xlane.xlu0 %1322 }
 0x576   : > { %vm1324_vm4 = vcmp.gt.f32.partialorder %v1323_v60, 0.0 }
 0x577   : > { %v1325_v62 = vsel %vm1324_vm4, %v1323_v60, 1.0  ;;  %v2298_v60 = vld [vmem:[%s2798_s5 + $0x38] sm:$0xff]  }
 0x578   : > { %2312 = vrcp.f32 %v1325_v62  ;;  %2221 = vmatpush3.bf16.msra.mxu0 %v2298_v60  ;;  %v2299_v62 = vld [vmem:[%s2798_s5 + $0x30] sm:$0xff]  }
 0x579   : > { %v1379_v2 = vpop.permute.xlu0 %1378  ;;  %2222 = vmatprep.subr.bf16.mxu0 %v2348_v1 }
 0x57a   : > { %v1384_v4 = vsel %vm1144_vm1, %v1379_v2, 0  ;;  %v2302_v2 = vld [vmem:[%s2798_s5 + $0x18] sm:$0xff]  }
 0x57c   : > { %2223 = vmatpush3.bf16.msra.mxu0 %v2299_v62 }
 0x57d   : > { %2224 = vmatprep.subr.bf16.mxu0 %v2348_v1 }
 0x585   : > { %v2313_v63 = vpop.eup %2312 }
 0x586   : > { %v1327_v0 = vmul.f32 %v2313_v63, %v2311_v58  ;;  %v2300_v63 = vld [vmem:[%s2798_s5 + $0x28] sm:$0xff]  }
 0x587   : > { %2225 = vmatpush3.bf16.msra.mxu0 %v2300_v63 }
 0x588   : > { %v1328_v3 = vpack.c.bf16 %v1327_v0, %v1327_v0  ;;  %v2301_v0 = vld [vmem:[%s2798_s5 + $0x20] sm:$0xff]   ;;  %2226 = vmatprep.subr.bf16.mxu0 %v2348_v1 }
 0x58a   : > { %2193 = vmatmul.mubr.msk.bf16.vlgmr.msra.gmra.mxu1 %vm1195_vm2, %v1328_v3  ;;  %v2303_v3 = vld [vmem:[%s2798_s5 + $0x10] sm:$0xff]  }
 0x58b   : > { %2197 = vmatpush3.bf16.xpose.msra.mxu1 %v1384_v4  ;;  %2198 = vmatprep.mubr.msk.bf16.mxu1 %vm2349_vm0, %v2348_v1  ;;  %v2304_v4 = vld [vmem:[%s2798_s5 + $0x8] sm:$0xff]  }
 0x58c   : > { %2202 = vmatprep.subr.bf16.mxu1 %v2348_v1  ;;  %2227 = vmatpush3.bf16.msra.mxu0 %v2301_v0 }
 0x58d   : > { %2228 = vmatprep.subr.bf16.mxu0 %v2348_v1 }
 0x590   : > { %2229 = vmatpush3.bf16.msra.mxu0 %v2302_v2 }
 0x591   : > { %2230 = vmatprep.subr.bf16.mxu0 %v2348_v1 }
 0x592   : > { %2199 = vmatmul.mubr.msk.bf16.vlgmr.msra.gmra.mxu1 %vm1144_vm1, %v1377_v5  ;;  %v2305_v5 = vld [vmem:[%s2798_s5] sm:$0xff]  }
 0x593   : > { %2204 = vmatprep.mubr.msk.bf16.mxu1 %vm2349_vm0, %v2348_v1 }
 0x594   : > { %2231 = vmatpush3.bf16.msra.mxu0 %v2303_v3 }
 0x595   : > { %2232 = vmatprep.subr.bf16.mxu0 %v2348_v1 }
 0x598   : > { %2233 = vmatpush3.bf16.msra.mxu0 %v2304_v4 }
 0x599   : > { %2234 = vmatprep.subr.bf16.mxu0 %v2348_v1 }
 0x59c   : > { %2235 = vmatpush3.bf16.msra.mxu0 %v2305_v5 }
 0x64a   : > { %v2703_v6 = vpop.f32.mrf.mxu1 }
 0x64c   : > { %v2194_v7 = vpop.f32.mrf.mxu1 }
 0x64e   : > { %v1373_v8 = vpop.f32.mrf.mxu1 }
 0x650   : > { %v2195_v10 = vpop.f32.mrf.mxu1 }
 0x652   : > { %v1420_v11 = vpop.f32.mrf.mxu1 }
 0x653   : > { %v1426_v12 = vmul.f32 0.17677669, %v1420_v11 }
 0x654   : > { %v2200_v13 = vpop.f32.mrf.mxu1 }
 0x655   : > { %v1427_v14 = vadd.f32 %v1426_v12, %v2646_v9 }
 0x656   : > { %v1423_v16 = vpop.f32.mrf.mxu1 }
 0x657   : > { %v1430_v17 = vadd.f32 %v2038_v15, %v1427_v14 }
 0x658   : > { %v2201_v19 = vpop.f32.mrf.mxu1 }
 0x659   : > { %2039 = vst.msk [vmem:[%s2658_s22 + $0x10] sm:$0xff] %vm1195_vm2, %v1430_v17  ;;  %v1433_v20 = vsel %vm1195_vm2, %v1430_v17, -inf }
 0x65a   : > { %1434 = vmax.xlane.f32.xlu1 %v1433_v20 }
 0x660   : > { %v2042_v44 = vld [vmem:[%s2651_s1 + $0x18] sm:$0xff] }
 0x66b   : > { %1496 = vrot.lane.b32.xlu1 %v2595_v56, %s2355_s26 }
 0x66f   : > { %1494 = vrot.lane.b32.xlu1 %v2600_v61, %s2355_s26 }
 0x6e3   : > { %v1435_v21 = vpop.xlane.xlu1 %1434 }
 0x6e4   : > { %v1436_v22 = vmax.f32 %v1435_v21, -3e+38 }
 0x6e6   : > { %v1437_v23 = vsub.f32 %v1430_v17, %v1436_v22  ;;  %v1735_v17 = vunpack.c.l.bf16 %v2554_v18  ;;  %v2053_v18 = vld [vmem:[%s2808_s15] ss:$0 sm:$0xff] }
 0x6e7   : > { %v1497_v31 = vpop.permute.xlu1 %1496 }
 0x6e8   : > { %v1438_v24 = vmul.f32 1.442695, %v1437_v23  ;;  %v1502_v33 = vsel %vm1144_vm1, %v1497_v31, 0 }
 0x6ea   : > { %2314 = vpow2.f32 %v1438_v24 }
 0x6eb   : > { %v1495_v34 = vpop.permute.xlu1 %1494 }
 0x6f7   : > { %v2315_v25 = vpop.eup %2314 }
 0x6f8   : > { %v1440_v26 = vsel %vm1195_vm2, %v2315_v25, 0.0 }
 0x6f9   : > { %1441 = vadd.xlane.f32.xlu0 %v1440_v26 }
 0x70f   : > { %1448 = vrot.lane.b32.xlu0 %v2666_v29, %s2354_s25 }
 0x782   : > { %v1442_v27 = vpop.xlane.xlu0 %1441 }
 0x783   : > { %vm1443_vm5 = vcmp.gt.f32.partialorder %v1442_v27, 0.0 }
 0x784   : > { %v1444_v28 = vsel %vm1443_vm5, %v1442_v27, 1.0 }
 0x785   : > { %2316 = vrcp.f32 %v1444_v28 }
 0x786   : > { %v1449_v56 = vpop.permute.xlu0 %1448 }
 0x787   : > { %2203 = vmatpush3.bf16.msra.mxu1 %v1449_v56 }
 0x788   : > { %2208 = vmatprep.subr.bf16.mxu1 %v2348_v1 }
 0x792   : > { %v2317_v61 = vpop.eup %2316 }
 0x793   : > { %v1446_v30 = vmul.f32 %v2317_v61, %v2315_v25 }
 0x795   : > { %v1447_v32 = vpack.c.bf16 %v1446_v30, %v1446_v30 }
 0x797   : > { %2205 = vmatmul.mubr.msk.bf16.vlgmr.msra.gmra.mxu1 %vm1195_vm2, %v1447_v32  ;;  %v2054_v32 = vld [vmem:[%s2809_s16] ss:$0 sm:$0xff] }
 0x798   : > { %2209 = vmatpush3.bf16.xpose.msra.mxu1 %v1502_v33  ;;  %2210 = vmatprep.mubr.msk.bf16.mxu1 %vm2349_vm0, %v2348_v1 }
 0x799   : > { %2214 = vmatprep.subr.bf16.mxu1 %v2348_v1 }
 0x79f   : > { %2211 = vmatmul.mubr.msk.bf16.vlgmr.msra.gmra.mxu1 %vm1144_vm1, %v1495_v34 }
 0x7a0   : > { %2216 = vmatprep.mubr.msk.bf16.mxu1 %vm2349_vm0, %v2348_v1 }
 0x857   : > { %v1488_v35 = vpop.f32.mrf.mxu1 }
 0x859   : > { %v2206_v36 = vpop.f32.mrf.mxu1 }
 0x85b   : > { %v1491_v37 = vpop.f32.mrf.mxu1 }
 0x85d   : > { %v2207_v38 = vpop.f32.mrf.mxu1 }
 0x85f   : > { %v1538_v40 = vpop.f32.mrf.mxu1 }
 0x860   : > { %v1544_v41 = vmul.f32 0.17677669, %v1538_v40 }
 0x861   : > { %v2212_v42 = vpop.f32.mrf.mxu1 }
 0x862   : > { %v1545_v43 = vadd.f32 %v1544_v41, %v2646_v9 }
 0x863   : > { %v1541_v45 = vpop.f32.mrf.mxu1 }
 0x864   : > { %v1548_v46 = vadd.f32 %v2042_v44, %v1545_v43 }
 0x865   : > { %v2213_v47 = vpop.f32.mrf.mxu1 }
 0x866   : > { %2043 = vst.msk [vmem:[%s2658_s22 + $0x18] sm:$0xff] %vm1195_vm2, %v1548_v46  ;;  %v1551_v48 = vsel %vm1195_vm2, %v1548_v46, -inf }
 0x867   : > { %1552 = vmax.xlane.f32.xlu0 %v1551_v48 }
 0x87d   : > { %1566 = vrot.lane.b32.xlu0 %v2666_v29, %s2355_s26 }
 0x881   : > { %1617 = vrot.lane.b32.xlu0 %v1488_v35, %s2354_s25 }
 0x8f0   : > { %v1553_v49 = vpop.xlane.xlu0 %1552 }
 0x8f1   : > { %v1554_v50 = vmax.f32 %v1553_v49, -3e+38 }
 0x8f3   : > { %v1555_v51 = vsub.f32 %v1548_v46, %v1554_v50 }
 0x8f4   : > { %v1567_v52 = vpop.permute.xlu0 %1566 }
 0x8f5   : > { %v1556_v53 = vmul.f32 1.442695, %v1555_v51  ;;  %2215 = vmatpush3.bf16.msra.mxu1 %v1567_v52 }
 0x8f7   : > { %2318 = vpow2.f32 %v1556_v53 }
 0x8f8   : > { %v1618_v13 = vpop.permute.xlu0 %1617 }
 0x904   : > { %v2319_v9 = vpop.eup %2318 }
 0x905   : > { %v1558_v54 = vsel %vm1195_vm2, %v2319_v9, 0.0 }
 0x906   : > { %1559 = vadd.xlane.f32.xlu1 %v1558_v54 }
 0x917   : > { %1613 = vrot.lane.b32.xlu1 %v2703_v6, %s2355_s26 }
 0x98f   : > { %v1560_v55 = vpop.xlane.xlu1 %1559 }
 0x990   : > { %vm1561_vm6 = vcmp.gt.f32.partialorder %v1560_v55, 0.0 }
 0x991   : > { %v1562_v57 = vsel %vm1561_vm6, %v1560_v55, 1.0 }
 0x992   : > { %2320 = vrcp.f32 %v1562_v57 }
 0x993   : > { %v1614_v11 = vpop.permute.xlu1 %1613 }
 0x994   : > { %v1624_v12 = vsel %vm1144_vm1, %v2680_v39, %v1614_v11 }
 0x995   : > { %v1626_v14 = vsel %vm1625_vm7, %v1624_v12, %v1618_v13 }
 0x99f   : > { %v2321_v29 = vpop.eup %2320 }
 0x9a0   : > { %v1564_v58 = vmul.f32 %v2321_v29, %v2319_v9 }
 0x9a2   : > { %v1565_v59 = vpack.c.bf16 %v1564_v58, %v1564_v58 }
 0x9a4   : > { %2217 = vmatmul.mubr.msk.bf16.vlgmr.msra.gmra.mxu1 %vm1195_vm2, %v1565_v59 }
 0xa64   : > { %v1606_v6 = vpop.f32.mrf.mxu1 }
 0xa65   : > { %1621 = vrot.lane.b32.xlu1 %v1606_v6, %s2353_s23 }
 0xa66   : > { %v2218_v7 = vpop.f32.mrf.mxu1 }
 0xa68   : > { %v1609_v8 = vpop.f32.mrf.mxu1 }
 0xa6a   : > { %v2219_v10 = vpop.f32.mrf.mxu1 }
 0xad7   : > { %v1622_v1 = vpop.permute.xlu1 %1621 }
 0xad8   : > { %v1628_v15 = vsel %vm1627_vm8, %v1626_v14, %v1622_v1 }
 0xad9   : > { %v1629_v16 = vpack.c.bf16 %v1628_v15, %v1628_v15 }
 0xadb   : > { %2237 = vmatmul.mubr.bf16.vlgmr.msra.gmra.mxu0 %v1629_v16 }
 0xb9b   : > { %v1728_v19 = vpop.f32.mrf.mxu0 }
 0xb9c   : > { %v1734_v20 = vmul.f32 1.3949589, %v1728_v19 }
 0xb9d   : > { %v2238_v21 = vpop.f32.mrf.mxu0 }
 0xb9e   : > { %v1736_v22 = vadd.f32 %v1735_v17, %v1734_v20 }
 0xb9f   : > { %v1731_v23 = vpop.f32.mrf.mxu0 }
 0xba0   : > { %1737 = vadd.xlane.f32.xlu0 %v1736_v22 }
 0xba1   : > { %v2239_v24 = vpop.f32.mrf.mxu0 }
 0xc29   : > { %v1738_v25 = vpop.xlane.xlu0 %1737 }
 0xc2a   : > { %v1740_v39 = vmul.f32 0.0078125, %v1738_v25 }
 0xc2c   : > { %v1741_v26 = vsub.f32 %v1736_v22, %v1740_v39 }
 0xc2e   : > { %v1742_v27 = vmul.f32 %v1741_v26, %v1741_v26 }
 0xc30   : > { %1743 = vadd.xlane.f32.xlu1 %v1742_v27 }
 0xcb9   : > { %v1744_v28 = vpop.xlane.xlu1 %1743 }
 0xcba   : > { %v1745_v56 = vmul.f32 0.0078125, %v1744_v28 }
 0xcbc   : > { %v1746_v61 = vadd.f32 1e-05, %v1745_v56 }
 0xcbe   : > { %2322 = vrsqrt.f32 %v1746_v61 }
 0xccb   : > { %v2323_v30 = vpop.eup %2322 }
 0xccc   : > { %v1748_v31 = vmul.f32 %v2323_v30, %v1741_v26 }
 0xcce   : > { %v1756_v33 = vmul.f32 %v2053_v18, %v1748_v31 }
 0xcd0   : > { %v1764_v34 = vadd.f32 %v2054_v32, %v1756_v33 }
 0xcd2   : > { %v1765_v35 = vpack.c.bf16 %v1764_v34, %v1764_v34 }
 0xcd4   : > { %1766 = vst [vmem:[%s758_s30] sm:$0xf] %v1765_v35 }
 0xcd5 PF: > { %s29_s29 = sadd.s32 1, %s2346_s29   ;;  %s2822_s27 = sld [smem:[#allocation2_spill]] }
 0xcd6   : > { %p26_p5 = scmp.ge.s32.totalorder %s29_s29, 4   ;;  %s2823_s28 = sld [smem:[#allocation3_spill]] }
 0xcd8   :  { %28 = sbr.rel (!%p26_p5) target bundleno = 4 (0x4), region = 157 }

// kernel: transformer_forward.18
= control target key start
LH: loop header
LB: loop body
LE: loop exit
PB: predicated region body
PF: predicated region fallthrough
CT: control target
= control target key end

     0   :  { %s2446_s27 = smov 0   ;;  %s2448_s28 = smov 0   ;;  %s2784_s0 = inlined_call_operand.vmem [shape: bf16[2,8,128], index: 0, kind: input, shape index: {}, may-alias: {0,1}]   ;;  %s2785_s1 = inlined_call_operand.vmem [shape: bf16[2,8,128], index: 1, kind: input, shape index: {}, may-alias: {0,1}]   ;;  %s2786_s2 = inlined_call_operand.vmem [shape: bf16[128,128], index: 2, kind: input, shape index: {}]   ;;  %s2787_s3 = inlined_call_operand.vmem [shape: bf16[128,128], index: 3, kind: input, shape index: {}]   ;;  %s2788_s4 = inlined_call_operand.vmem [shape: bf16[128,128], index: 4, kind: input, shape index: {}]   ;;  %s2789_s5 = inlined_call_operand.vmem [shape: bf16[128,128], index: 5, kind: input, shape index: {}]   ;;  %s2790_s6 = inlined_call_operand.vmem [shape: f32[8,128], index: 6, kind: input, shape index: {}, may-alias: {6,9}]   ;;  %s2791_s7 = inlined_call_operand.vmem [shape: f32[8,128], index: 7, kind: input, shape index: {}, may-alias: {7,10}]   ;;  %s2792_s8 = inlined_call_operand.vmem [shape: f32[8,128], index: 8, kind: input, shape index: {}, may-alias: {8,11}]   ;;  %s2793_s9 = inlined_call_operand.vmem [shape: f32[8,128], index: 9, kind: input, shape index: {}, may-alias: {6,9}]   ;;  %s2794_s10 = inlined_call_operand.vmem [shape: f32[8,128], index: 10, kind: input, shape index: {}, may-alias: {7,10}]   ;;  %s2795_s11 = inlined_call_operand.vmem [shape: f32[8,128], index: 11, kind: input, shape index: {}, may-alias: {8,11}]   ;;  %s2796_s12 = inlined_call_operand.vmem [shape: f32[2,8,1], index: 12, kind: input, shape index: {}]   ;;  %s2797_s13 = inlined_call_operand.vmem [shape: f32[2,1,8], index: 13, kind: input, shape index: {}]   ;;  %s2798_s14 = inlined_call_operand.vmem [shape: f32[2,4,8,8], index: 14, kind: input, shape index: {}, may-alias: {14,18}]   ;;  %s2799_s15 = inlined_call_operand.vmem [shape: f32[1,128], index: 15, kind: input, shape index: {}]   ;;  %s2800_s16 = inlined_call_operand.vmem [shape: f32[1,128], index: 16, kind: input, shape index: {}]   ;;  %s2801_s17 = inlined_call_operand.vmem [shape: bf16[2,8,128], index: 17, kind: output, shape index: {0}]   ;;  %s2802_s18 = inlined_call_operand.vmem [shape: f32[2,4,8,8], index: 18, kind: output, shape index: {1}, may-alias: {14,18}]  }
   0x1   :  { %2806 = sst [smem:[#allocation5_spill]] %s2784_s0  ;;  %s2450_s29 = smov 0  }
   0x2   :  { %2807 = sst [smem:[#allocation6_spill]] %s2785_s1 }
   0x3   :  { %2808 = sst [smem:[#allocation7_spill]] %s2786_s2 }
   0x4 LB: > { %2809 = sst [smem:[#allocation2_spill]] %s2337_s28  ;;  %s41_s30 = sadd.s32 1, %s2337_s28  ;;  %s2341_s29 = sphi %s2450_s29, %s29_s29   ;;  %s2337_s28 = sphi %s2448_s28, %s2817_s28   ;;  %s2333_s27 = sphi %s2446_s27, %s2816_s27  }
   0x5   : > { %2810 = sst [smem:[#allocation3_spill]] %s2341_s29  ;;  %p1994_p0 = scmp.ge.s32.totalorder %s2341_s29, 1 }
   0x6   : > { %p43_p1 = scmp.ge.s32.totalorder %s41_s30, 2  ;;  %p608_p2 = scmp.lt.s32.totalorder %s2341_s29, 3 }
   0x8   : > { %s2819_s30 = smov (%p43_p1, %s41_s30), 0  ;;  %p609_p3 = pnand %p1994_p0, %p608_p2 }
   0x9   : > { %2811 = sst [smem:[#allocation4_spill]] %s2819_s30  ;;  %p708_p4 = scmp.lt.s32.totalorder (!%p609_p3), %s2333_s27, 1 }
   0xa   : > { %612 = sbr.rel (%p609_p3) target bundleno = 3292 (0xcdc), region = 88  ;;  %s2812_s1 = sld [smem:[#allocation7_spill]] (!%p609_p3) }
   0xb   : > { %s2813_s23 = sld [smem:[#allocation5_spill]] (!%p609_p3)  ;;  %s2348_s22 = smov (!%p609_p3), 96  }
   0xc   : > { %s2814_s28 = sld [smem:[#allocation6_spill]] (!%p609_p3)  ;;  %s2349_s2 = smov (!%p609_p3), 64  }
   0xf   : > { %v2343_v1 = vmov 0.0   ;;  %v2270_v2 = vld [vmem:[%s2787_s3 + $0x38] sm:$0xff]   ;;  %vm2344_vm0 = vmmov 0   ;;  %v2272_v4 = vld [vmem:[%s2787_s3 + $0x30] sm:$0xff]   ;;  %v2274_v6 = vld [vmem:[%s2787_s3 + $0x28] sm:$0xff]   ;;  %s2821_s27 = smov (!%p708_p4, %s2333_s27), 1  ;;  %v1117_v60 = vlaneseq }
  0x10   : > { %v2269_v0 = vld [vmem:[%s2812_s1 + $0x38] sm:$0xff]   ;;  %2108 = vmatprep.subr.bf16.mxu0 %v2343_v1  ;;  %2128 = vmatprep.subr.bf16.mxu1 %v2343_v1  ;;  %v2271_v3 = vld [vmem:[%s2812_s1 + $0x30] sm:$0xff]   ;;  %v2273_v5 = vld [vmem:[%s2812_s1 + $0x28] sm:$0xff]   ;;  %s2518_s20 = sshll.u32 %s2821_s27, 2  ;;  %s1997_s30 = sshll.u32 %s2821_s27, 3  ;;  %v2347_v27 = vmov 0  }
  0x11   : > { %2109 = vmatpush3.bf16.msra.mxu0 %v2269_v0  ;;  %2124 = vmatprep.mubr.msk.bf16.mxu0 %vm2344_vm0, %v2343_v1  ;;  %v2275_v7 = vld [vmem:[%s2812_s1 + $0x20] sm:$0xff]   ;;  %v2277_v9 = vld [vmem:[%s2812_s1 + $0x18] sm:$0xff]   ;;  %v2279_v11 = vld [vmem:[%s2812_s1 + $0x10] sm:$0xff]   ;;  %s714_s24 = scalar_lea.vmem %s2813_s23, %s2518_s20  ;;  %s737_s19 = scalar_lea.vmem %s2796_s12, %s1997_s30  ;;  %vm1129_vm1 = vcmask 261120   ;;  %v1118_v62 = vshrl.u32 %v1117_v60, 7  ;;  %v1123_v63 = vand.u32 127, %v1117_v60 }
  0x12   : > { %2129 = vmatpush3.bf16.msra.mxu1 %v2270_v2  ;;  %2110 = vmatprep.subr.bf16.mxu0 %v2343_v1  ;;  %v2276_v8 = vld [vmem:[%s2787_s3 + $0x20] sm:$0xff]   ;;  %v2278_v10 = vld [vmem:[%s2787_s3 + $0x18] sm:$0xff]   ;;  %v2280_v12 = vld [vmem:[%s2787_s3 + $0x10] sm:$0xff]   ;;  %s718_s29 = scalar_lea.vmem %s2814_s28, %s2518_s20  ;;  %s2345_s28 = smov 127   ;;  %vm1180_vm3 = vcmask 64512   ;;  %vm1201_vm4 = vcmask 1043456  }
  0x13   : > { %2130 = vmatprep.subr.bf16.mxu1 %v2343_v1  ;;  %2144 = vmatprep.mubr.msk.bf16.mxu1 %vm2344_vm0, %v2343_v1  ;;  %v2281_v13 = vld [vmem:[%s2812_s1 + $0x8] sm:$0xff]   ;;  %v2283_v15 = vld [vmem:[%s2812_s1] sm:$0xff]   ;;  %v2285_v52 = vld [vmem:[%s2788_s4 + $0x38] sm:$0xff]   ;;  %vm1124_vm2 = vcmp.gt.s32.totalorder %v1123_v63, %v1118_v62  ;;  %s2350_s23 = smov 32   ;;  %vm1624_vm9 = vcmask 523264   ;;  %vm1626_vm10 = vcmask 785408  }
  0x14   : > { %v2282_v14 = vld [vmem:[%s2787_s3 + $0x8] sm:$0xff]   ;;  %v2284_v16 = vld [vmem:[%s2787_s3] sm:$0xff]   ;;  %2268 = vset.pattern.permute.xlu0 %v2347_v27  ;;  %v2286_v53 = vld [vmem:[%s2788_s4 + $0x30] sm:$0xff]  }
  0x15   : > { %2111 = vmatpush3.bf16.msra.mxu0 %v2271_v3  ;;  %v2549_v17 = vld [vmem:[%s714_s24] sm:$0xf]  ;;  %v2287_v54 = vld [vmem:[%s2788_s4 + $0x28] sm:$0xff]   ;;  %v2289_v56 = vld [vmem:[%s2788_s4 + $0x18] sm:$0xff]  }
  0x16   : > { %2131 = vmatpush3.bf16.msra.mxu1 %v2272_v4  ;;  %2112 = vmatprep.subr.bf16.mxu0 %v2343_v1  ;;  %v2551_v18 = vld [vmem:[%s718_s29] sm:$0xf]  ;;  %s2346_s29 = smov 1   ;;  %v2290_v57 = vld [vmem:[%s2788_s4 + $0x10] sm:$0xff]   ;;  %v2291_v58 = vld [vmem:[%s2788_s4 + $0x8] sm:$0xff]  }
  0x17   : > { %2132 = vmatprep.subr.bf16.mxu1 %v2343_v1  ;;  %v1103_v28 = vld [vmem:[%s737_s19] sm:$0xff] }
  0x18   : > { %v988_v29 = vld [vmem:[%s2794_s10] sm:$0xff] }
  0x19   : > { %2113 = vmatpush3.bf16.msra.mxu0 %v2273_v5  ;;  %v987_v30 = vld [vmem:[%s2793_s9] sm:$0xff] }
  0x1a   : > { %2133 = vmatpush3.bf16.msra.mxu1 %v2274_v6  ;;  %2114 = vmatprep.subr.bf16.mxu0 %v2343_v1  ;;  %v989_v34 = vld [vmem:[%s2795_s11] sm:$0xff] }
  0x1b   : > { %2134 = vmatprep.subr.bf16.mxu1 %v2343_v1  ;;  %v872_v36 = vld [vmem:[%s2791_s7] sm:$0xff] }
  0x1c   : > { %v871_v40 = vld [vmem:[%s2790_s6] sm:$0xff] }
  0x1d   : > { %2115 = vmatpush3.bf16.msra.mxu0 %v2275_v7  ;;  %v873_v41 = vld [vmem:[%s2792_s8] sm:$0xff] }
  0x1e   : > { %2135 = vmatpush3.bf16.msra.mxu1 %v2276_v8  ;;  %2116 = vmatprep.subr.bf16.mxu0 %v2343_v1  ;;  %v2288_v55 = vld [vmem:[%s2788_s4 + $0x20] sm:$0xff]  }
  0x1f   : > { %2136 = vmatprep.subr.bf16.mxu1 %v2343_v1  ;;  %v2292_v59 = vld [vmem:[%s2788_s4] sm:$0xff]  }
  0x21   : > { %2117 = vmatpush3.bf16.msra.mxu0 %v2277_v9 }
  0x22   : > { %2137 = vmatpush3.bf16.msra.mxu1 %v2278_v10  ;;  %2118 = vmatprep.subr.bf16.mxu0 %v2343_v1 }
  0x23   : > { %2138 = vmatprep.subr.bf16.mxu1 %v2343_v1 }
  0x25   : > { %2119 = vmatpush3.bf16.msra.mxu0 %v2279_v11 }
  0x26   : > { %2139 = vmatpush3.bf16.msra.mxu1 %v2280_v12  ;;  %2120 = vmatprep.subr.bf16.mxu0 %v2343_v1 }
  0x27   : > { %2140 = vmatprep.subr.bf16.mxu1 %v2343_v1 }
  0x29   : > { %2121 = vmatpush3.bf16.msra.mxu0 %v2281_v13 }
  0x2a   : > { %2141 = vmatpush3.bf16.msra.mxu1 %v2282_v14  ;;  %2122 = vmatprep.subr.bf16.mxu0 %v2343_v1 }
  0x2b   : > { %2142 = vmatprep.subr.bf16.mxu1 %v2343_v1 }
  0x2d   : > { %2123 = vmatpush3.bf16.msra.mxu0 %v2283_v15 }
  0x2e   : > { %2143 = vmatpush3.bf16.msra.mxu1 %v2284_v16  ;;  %2148 = vmatprep.subr.bf16.mxu0 %v2343_v1 }
  0x2f   : > { %2168 = vmatprep.subr.bf16.mxu1 %v2343_v1 }
  0x30   : > { %2125 = vmatmul.mubr.bf16.vlgmr.msra.gmra.mxu0 %v2549_v17 }
  0x31   : > { %2145 = vmatmul.mubr.bf16.vlgmr.msra.gmra.mxu1 %v2551_v18  ;;  %2164 = vmatprep.mubr.msk.bf16.mxu0 %vm2344_vm0, %v2343_v1 }
  0x32   : > { %2170 = vmatprep.mubr.msk.bf16.mxu1 %vm2344_vm0, %v2343_v1  ;;  %2149 = vmatpush3.bf16.msra.mxu0 %v2285_v52 }
  0x33   : > { %2150 = vmatprep.subr.bf16.mxu0 %v2343_v1 }
  0x36   : > { %2151 = vmatpush3.bf16.msra.mxu0 %v2286_v53 }
  0x37   : > { %2152 = vmatprep.subr.bf16.mxu0 %v2343_v1 }
  0x3a   : > { %2153 = vmatpush3.bf16.msra.mxu0 %v2287_v54 }
  0x3b   : > { %2154 = vmatprep.subr.bf16.mxu0 %v2343_v1 }
  0x3e   : > { %2155 = vmatpush3.bf16.msra.mxu0 %v2288_v55 }
  0x3f   : > { %2156 = vmatprep.subr.bf16.mxu0 %v2343_v1 }
  0x42   : > { %2157 = vmatpush3.bf16.msra.mxu0 %v2289_v56 }
  0x43   : > { %2158 = vmatprep.subr.bf16.mxu0 %v2343_v1 }
  0x46   : > { %2159 = vmatpush3.bf16.msra.mxu0 %v2290_v57 }
  0x47   : > { %2160 = vmatprep.subr.bf16.mxu0 %v2343_v1 }
  0x4a   : > { %2161 = vmatpush3.bf16.msra.mxu0 %v2291_v58 }
  0x4b   : > { %2162 = vmatprep.subr.bf16.mxu0 %v2343_v1 }
  0x4e   : > { %2163 = vmatpush3.bf16.msra.mxu0 %v2292_v59 }
  0x4f   : > { %2216 = vmatprep.subr.bf16.mxu0 %v2343_v1 }
  0x51   : > { %2165 = vmatmul.mubr.bf16.vlgmr.msra.gmra.mxu0 %v2551_v18 }
  0x52   : > { %2232 = vmatprep.mubr.msk.bf16.mxu0 %vm2344_vm0, %v2343_v1 }
  0xf0   : > { %v865_v19 = vpop.f32.mrf.mxu0 }
  0xf1   : > { %v981_v20 = vpop.f32.mrf.mxu1  ;;  %874 = vrot.lane.b32.xlu1 %v865_v19, %s2345_s28  ;;  %v878_v45 = vmul.f32 %v871_v40, %v865_v19 }
  0xf2   : > { %990 = vrot.lane.b32.xlu0 %v981_v20, %s2345_s28  ;;  %v2126_v21 = vpop.f32.mrf.mxu0  ;;  %v994_v35 = vmul.f32 %v987_v30, %v981_v20  ;;  %s740_s28 = scalar_lea.vmem %s2797_s13, %s2821_s27 }
  0xf3   : > { %v2146_v22 = vpop.f32.mrf.mxu1  ;;  %v2027_v61 = vld [vmem:[%s740_s28] ss:$0 sm:$0xff] }
  0xf4   : > { %v868_v23 = vpop.f32.mrf.mxu0 }
  0xf5   : > { %v984_v24 = vpop.f32.mrf.mxu1  ;;  %876 = vrot.lane.b32.xlu1 %v865_v19, %s2346_s29 }
  0xf6   : > { %992 = vrot.lane.b32.xlu0 %v981_v20, %s2346_s29  ;;  %v2127_v25 = vpop.f32.mrf.mxu0  ;;  %s2054_s29 = sshll.u32 %s2821_s27, 5 }
  0xf7   : > { %v2147_v26 = vpop.f32.mrf.mxu1  ;;  %s2637_s0 = scalar_lea.vmem %s2798_s14, %s2054_s29  ;;  %s2646_s27 = scalar_lea.vmem %s2802_s18, %s2054_s29 }
  0xf8   : > { %v1178_v7 = vld [vmem:[%s2637_s0] sm:$0xff] }
  0xfa   : > { %1107 = vperm.xlu0 %2268, %v1103_v28  }
 0x111   : > { %v1097_v21 = vpop.f32.mrf.mxu0 }
 0x112   : > { %v2654_v22 = vpack.c.bf16 %v1097_v21, %v1097_v21 }
 0x113   : > { %v2166_v23 = vpop.f32.mrf.mxu0 }
 0x114   : > { %v1203_v24 = vsel %vm1201_vm4, %v2654_v22, 0 }
 0x115   : > { %v1100_v25 = vpop.f32.mrf.mxu0 }
 0x117   : > { %v2167_v26 = vpop.f32.mrf.mxu0 }
 0x163   : > { %v875_v32 = vpop.permute.xlu1 %874 }
 0x164   : > { %v991_v31 = vpop.permute.xlu0 %990  ;;  %v879_v43 = vmul.f32 %v875_v32, %v872_v36 }
 0x165   : > { %v995_v33 = vmul.f32 %v991_v31, %v988_v29 }
 0x166   : > { %v880_v48 = vadd.f32 %v879_v43, %v878_v45 }
 0x167   : > { %v996_v38 = vadd.f32 %v995_v33, %v994_v35  ;;  %v877_v42 = vpop.permute.xlu1 %876 }
 0x168   : > { %v993_v37 = vpop.permute.xlu0 %992  ;;  %v881_v47 = vmul.f32 %v877_v42, %v873_v41 }
 0x169   : > { %v997_v39 = vmul.f32 %v993_v37, %v989_v34 }
 0x16a   : > { %v882_v50 = vadd.f32 %v881_v47, %v880_v48 }
 0x16b   : > { %v998_v44 = vadd.f32 %v997_v39, %v996_v38 }
 0x16c   : > { %v2588_v51 = vpack.c.bf16 %v882_v50, %v882_v50 }
 0x16d   : > { %v2583_v46 = vpack.c.bf16 %v998_v44, %v998_v44 }
 0x16f   : > { %v1134_v49 = vsel %vm1129_vm1, %v2583_v46, 0 }
 0x170   : > { %2169 = vmatpush3.bf16.xpose.msra.mxu1 %v1134_v49 }
 0x171   : > { %2174 = vmatprep.subr.bf16.mxu1 %v2343_v1 }
 0x175   : > { %v1108_v0 = vpop.permute.xlu0 %1107 }
 0x176   : > { %v1116_v2 = vadd.f32 %v2027_v61, %v1108_v0 }
 0x177   : > { %2171 = vmatmul.mubr.msk.bf16.vlgmr.msra.gmra.mxu1 %vm1129_vm1, %v2588_v51 }
 0x178   : > { %2176 = vmatprep.mubr.msk.bf16.mxu1 %vm2344_vm0, %v2343_v1  ;;  %v2639_v3 = vsel %vm1124_vm2, -inf, %v1116_v2  ;;  %2175 = vmatpush3.bf16.msra.mxu1 %v1203_v24 }
 0x179   : > { %2180 = vmatprep.subr.bf16.mxu1 %v2343_v1 }
 0x237   : > { %v1170_v4 = vpop.f32.mrf.mxu1 }
 0x238   : > { %v1176_v5 = vmul.f32 0.17677669, %v1170_v4 }
 0x239   : > { %v2172_v6 = vpop.f32.mrf.mxu1 }
 0x23a   : > { %v1177_v8 = vadd.f32 %v1176_v5, %v2639_v3 }
 0x23b   : > { %v1173_v9 = vpop.f32.mrf.mxu1 }
 0x23c   : > { %v1179_v10 = vadd.f32 %v1178_v7, %v1177_v8 }
 0x23d   : > { %v2173_v11 = vpop.f32.mrf.mxu1 }
 0x23e   : > { %v1182_v12 = vmul.f32 0.5, %v1179_v10  ;;  %1181 = vst.msk [vmem:[%s2646_s27] sm:$0xff] %vm1180_vm3, %v1179_v10 }
 0x240   : > { %v1183_v13 = vsel %vm1180_vm3, %v1182_v12, -inf }
 0x241   : > { %1184 = vmax.xlane.f32.xlu1 %v1183_v13 }
 0x245   : > { %v2031_v44 = vld [vmem:[%s2637_s0 + $0x8] sm:$0xff] }
 0x252   : > { %1249 = vrot.lane.b32.xlu1 %v2583_v46, %s2348_s22 }
 0x2ca   : > { %v1185_v14 = vpop.xlane.xlu1 %1184 }
 0x2cb   : > { %v1186_v15 = vmax.f32 %v1185_v14, -3e+38 }
 0x2cd   : > { %v1187_v16 = vsub.f32 %v1182_v12, %v1186_v15 }
 0x2ce   : > { %v1250_v31 = vpop.permute.xlu1 %1249 }
 0x2cf   : > { %v1188_v18 = vmul.f32 1.442695, %v1187_v16  ;;  %v1255_v33 = vsel %vm1129_vm1, %v1250_v31, 0 }
 0x2d1   : > { %2301 = vpow2.f32 %v1188_v18 }
 0x2de   : > { %v2302_v19 = vpop.eup %2301 }
 0x2df   : > { %v1190_v20 = vsel %vm1180_vm3, %v2302_v19, 0.0 }
 0x2e0   : > { %1191 = vadd.xlane.f32.xlu0 %v1190_v20 }
 0x2f6   : > { %1246 = vrot.lane.b32.xlu0 %v2588_v51, %s2348_s22 }
 0x369   : > { %v1192_v27 = vpop.xlane.xlu0 %1191 }
 0x36a   : > { %vm1193_vm5 = vcmp.gt.f32.partialorder %v1192_v27, 0.0 }
 0x36b   : > { %v1194_v28 = vsel %vm1193_vm5, %v1192_v27, 1.0 }
 0x36c   : > { %2303 = vrcp.f32 %v1194_v28 }
 0x36d   : > { %v1247_v34 = vpop.permute.xlu0 %1246 }
 0x379   : > { %v2304_v29 = vpop.eup %2303 }
 0x37a   : > { %v1196_v30 = vmul.f32 %v2304_v29, %v2302_v19 }
 0x37c   : > { %v1197_v32 = vpack.c.bf16 %v1196_v30, %v1196_v30 }
 0x37e   : > { %2177 = vmatmul.mubr.msk.bf16.vlgmr.msra.gmra.mxu1 %vm1180_vm3, %v1197_v32 }
 0x37f   : > { %2181 = vmatpush3.bf16.xpose.msra.mxu1 %v1255_v33  ;;  %2182 = vmatprep.mubr.msk.bf16.mxu1 %vm2344_vm0, %v2343_v1 }
 0x380   : > { %2186 = vmatprep.subr.bf16.mxu1 %v2343_v1 }
 0x386   : > { %2183 = vmatmul.mubr.msk.bf16.vlgmr.msra.gmra.mxu1 %vm1129_vm1, %v1247_v34 }
 0x387   : > { %2188 = vmatprep.mubr.msk.bf16.mxu1 %vm2344_vm0, %v2343_v1 }
 0x43e   : > { %v2669_v35 = vpop.f32.mrf.mxu1 }
 0x440   : > { %v2178_v36 = vpop.f32.mrf.mxu1 }
 0x442   : > { %v1242_v37 = vpop.f32.mrf.mxu1 }
 0x444   : > { %v2179_v38 = vpop.f32.mrf.mxu1 }
 0x446   : > { %v1291_v39 = vpop.f32.mrf.mxu1 }
 0x447   : > { %v1297_v40 = vmul.f32 0.17677669, %v1291_v39 }
 0x448   : > { %v2184_v41 = vpop.f32.mrf.mxu1 }
 0x449   : > { %v1298_v42 = vadd.f32 %v1297_v40, %v2639_v3 }
 0x44a   : > { %v1294_v43 = vpop.f32.mrf.mxu1 }
 0x44b   : > { %v1301_v45 = vadd.f32 %v2031_v44, %v1298_v42 }
 0x44c   : > { %v2185_v47 = vpop.f32.mrf.mxu1 }
 0x44d   : > { %v1304_v48 = vmul.f32 0.5, %v1301_v45  ;;  %2032 = vst.msk [vmem:[%s2646_s27 + $0x8] sm:$0xff] %vm1180_vm3, %v1301_v45 }
 0x44f   : > { %v1305_v49 = vsel %vm1180_vm3, %v1304_v48, -inf }
 0x450   : > { %1306 = vmax.xlane.f32.xlu1 %v1305_v49 }
 0x454   : > { %v2035_v14 = vld [vmem:[%s2637_s0 + $0x10] sm:$0xff] }
 0x461   : > { %1321 = vrot.lane.b32.xlu1 %v2654_v22, %s2348_s22 }
 0x465   : > { %1369 = vrot.lane.b32.xlu1 %v2588_v51, %s2349_s2 }
 0x4d9   : > { %v1307_v50 = vpop.xlane.xlu1 %1306 }
 0x4da   : > { %v1308_v52 = vmax.f32 %v1307_v50, -3e+38 }
 0x4dc   : > { %v1309_v53 = vsub.f32 %v1304_v48, %v1308_v52 }
 0x4dd   : > { %v1322_v54 = vpop.permute.xlu1 %1321 }
 0x4de   : > { %v1310_v55 = vmul.f32 1.442695, %v1309_v53  ;;  %v1327_v56 = vsel %vm1201_vm4, %v1322_v54, 0 }
 0x4df   : > { %2187 = vmatpush3.bf16.msra.mxu1 %v1327_v56 }
 0x4e0   : > { %2305 = vpow2.f32 %v1310_v55  ;;  %2192 = vmatprep.subr.bf16.mxu1 %v2343_v1 }
 0x4e1   : > { %v1370_v4 = vpop.permute.xlu1 %1369 }
 0x4ed   : > { %v2306_v57 = vpop.eup %2305 }
 0x4ee   : > { %v1312_v58 = vsel %vm1180_vm3, %v2306_v57, 0.0 }
 0x4ef   : > { %1313 = vadd.xlane.f32.xlu0 %v1312_v58 }
 0x505   : > { %1371 = vrot.lane.b32.xlu0 %v2583_v46, %s2349_s2 }
 0x578   : > { %v1314_v59 = vpop.xlane.xlu0 %1313 }
 0x579   : > { %vm1315_vm6 = vcmp.gt.f32.partialorder %v1314_v59, 0.0 }
 0x57a   : > { %v1316_v60 = vsel %vm1315_vm6, %v1314_v59, 1.0 }
 0x57b   : > { %2307 = vrcp.f32 %v1316_v60 }
 0x57c   : > { %v1372_v63 = vpop.permute.xlu0 %1371 }
 0x57d   : > { %v1377_v2 = vsel %vm1129_vm1, %v1372_v63, 0  ;;  %v2293_v63 = vld [vmem:[%s2789_s5 + $0x38] sm:$0xff]  }
 0x57e   : > { %2217 = vmatpush3.bf16.msra.mxu0 %v2293_v63 }
 0x57f   : > { %2218 = vmatprep.subr.bf16.mxu0 %v2343_v1 }
 0x588   : > { %v2308_v61 = vpop.eup %2307 }
 0x589   : > { %v1318_v62 = vmul.f32 %v2308_v61, %v2306_v57 }
 0x58b   : > { %v1319_v0 = vpack.c.bf16 %v1318_v62, %v1318_v62 }
 0x58d   : > { %2189 = vmatmul.mubr.msk.bf16.vlgmr.msra.gmra.mxu1 %vm1180_vm3, %v1319_v0  ;;  %v2294_v0 = vld [vmem:[%s2789_s5 + $0x30] sm:$0xff]  }
 0x58e   : > { %2193 = vmatpush3.bf16.xpose.msra.mxu1 %v1377_v2  ;;  %2194 = vmatprep.mubr.msk.bf16.mxu1 %vm2344_vm0, %v2343_v1  ;;  %v2295_v2 = vld [vmem:[%s2789_s5 + $0x28] sm:$0xff]  }
 0x58f   : > { %2198 = vmatprep.subr.bf16.mxu1 %v2343_v1  ;;  %2219 = vmatpush3.bf16.msra.mxu0 %v2294_v0 }
 0x590   : > { %2220 = vmatprep.subr.bf16.mxu0 %v2343_v1 }
 0x593   : > { %2221 = vmatpush3.bf16.msra.mxu0 %v2295_v2 }
 0x594   : > { %2222 = vmatprep.subr.bf16.mxu0 %v2343_v1 }
 0x595   : > { %2195 = vmatmul.mubr.msk.bf16.vlgmr.msra.gmra.mxu1 %vm1129_vm1, %v1370_v4  ;;  %v2296_v4 = vld [vmem:[%s2789_s5 + $0x20] sm:$0xff]  }
 0x596   : > { %2200 = vmatprep.mubr.msk.bf16.mxu1 %vm2344_vm0, %v2343_v1 }
 0x597   : > { %2223 = vmatpush3.bf16.msra.mxu0 %v2296_v4 }
 0x598   : > { %2224 = vmatprep.subr.bf16.mxu0 %v2343_v1 }
 0x64d   : > { %v2693_v5 = vpop.f32.mrf.mxu1 }
 0x64f   : > { %v2190_v6 = vpop.f32.mrf.mxu1 }
 0x650   : > { %v2298_v6 = vld [vmem:[%s2789_s5 + $0x10] sm:$0xff]  }
 0x651   : > { %v1366_v7 = vpop.f32.mrf.mxu1 }
 0x652   : > { %v2299_v7 = vld [vmem:[%s2789_s5 + $0x8] sm:$0xff]  }
 0x653   : > { %v2191_v8 = vpop.f32.mrf.mxu1 }
 0x654   : > { %v2300_v8 = vld [vmem:[%s2789_s5] sm:$0xff]  }
 0x655   : > { %v1413_v9 = vpop.f32.mrf.mxu1 }
 0x656   : > { %v1419_v10 = vmul.f32 0.17677669, %v1413_v9 }
 0x657   : > { %v2196_v11 = vpop.f32.mrf.mxu1 }
 0x658   : > { %v1420_v12 = vadd.f32 %v1419_v10, %v2639_v3 }
 0x659   : > { %v1416_v13 = vpop.f32.mrf.mxu1 }
 0x65a   : > { %v1423_v15 = vadd.f32 %v2035_v14, %v1420_v12 }
 0x65b   : > { %v2197_v16 = vpop.f32.mrf.mxu1 }
 0x65c   : > { %v1426_v18 = vmul.f32 0.5, %v1423_v15  ;;  %2036 = vst.msk [vmem:[%s2646_s27 + $0x10] sm:$0xff] %vm1180_vm3, %v1423_v15 }
 0x65e   : > { %v1427_v19 = vsel %vm1180_vm3, %v1426_v18, -inf }
 0x65f   : > { %1428 = vmax.xlane.f32.xlu1 %v1427_v19 }
 0x663   : > { %v2039_v45 = vld [vmem:[%s2637_s0 + $0x18] sm:$0xff] }
 0x670   : > { %1492 = vrot.lane.b32.xlu1 %v2583_v46, %s2350_s23 }
 0x674   : > { %1490 = vrot.lane.b32.xlu1 %v2588_v51, %s2350_s23 }
 0x6e8   : > { %v1429_v20 = vpop.xlane.xlu1 %1428 }
 0x6e9   : > { %v1430_v21 = vmax.f32 %v1429_v20, -3e+38  ;;  %v1734_v20 = vunpack.c.l.bf16 %v2549_v17  ;;  %v2050_v17 = vld [vmem:[%s2799_s15] ss:$0 sm:$0xff] }
 0x6eb   : > { %v1431_v23 = vsub.f32 %v1426_v18, %v1430_v21 }
 0x6ec   : > { %v1493_v31 = vpop.permute.xlu1 %1492 }
 0x6ed   : > { %v1432_v24 = vmul.f32 1.442695, %v1431_v23  ;;  %v1498_v33 = vsel %vm1129_vm1, %v1493_v31, 0 }
 0x6ef   : > { %2309 = vpow2.f32 %v1432_v24 }
 0x6f0   : > { %v1491_v34 = vpop.permute.xlu1 %1490 }
 0x6fc   : > { %v2310_v25 = vpop.eup %2309 }
 0x6fd   : > { %v1434_v26 = vsel %vm1180_vm3, %v2310_v25, 0.0 }
 0x6fe   : > { %1435 = vadd.xlane.f32.xlu0 %v1434_v26 }
 0x714   : > { %1442 = vrot.lane.b32.xlu0 %v2654_v22, %s2349_s2 }
 0x787   : > { %v1436_v27 = vpop.xlane.xlu0 %1435 }
 0x788   : > { %vm1437_vm7 = vcmp.gt.f32.partialorder %v1436_v27, 0.0 }
 0x789   : > { %v1438_v28 = vsel %vm1437_vm7, %v1436_v27, 1.0 }
 0x78a   : > { %2311 = vrcp.f32 %v1438_v28 }
 0x78b   : > { %v1443_v46 = vpop.permute.xlu0 %1442 }
 0x78c   : > { %v1448_v29 = vsel %vm1201_vm4, %v1443_v46, 0 }
 0x78d   : > { %2199 = vmatpush3.bf16.msra.mxu1 %v1448_v29 }
 0x78e   : > { %2204 = vmatprep.subr.bf16.mxu1 %v2343_v1 }
 0x797   : > { %v2312_v51 = vpop.eup %2311 }
 0x798   : > { %v1440_v30 = vmul.f32 %v2312_v51, %v2310_v25 }
 0x79a   : > { %v1441_v32 = vpack.c.bf16 %v1440_v30, %v1440_v30 }
 0x79c   : > { %2201 = vmatmul.mubr.msk.bf16.vlgmr.msra.gmra.mxu1 %vm1180_vm3, %v1441_v32 }
 0x79d   : > { %2205 = vmatpush3.bf16.xpose.msra.mxu1 %v1498_v33  ;;  %2206 = vmatprep.mubr.msk.bf16.mxu1 %vm2344_vm0, %v2343_v1 }
 0x79e   : > { %2210 = vmatprep.subr.bf16.mxu1 %v2343_v1 }
 0x7a4   : > { %2207 = vmatmul.mubr.msk.bf16.vlgmr.msra.gmra.mxu1 %vm1129_vm1, %v1491_v34  ;;  %v2051_v34 = vld [vmem:[%s2800_s16] ss:$0 sm:$0xff] }
 0x7a5   : > { %2212 = vmatprep.mubr.msk.bf16.mxu1 %vm2344_vm0, %v2343_v1 }
 0x85c   : > { %v1484_v36 = vpop.f32.mrf.mxu1 }
 0x85e   : > { %v2202_v37 = vpop.f32.mrf.mxu1 }
 0x860   : > { %v1487_v38 = vpop.f32.mrf.mxu1 }
 0x862   : > { %v2203_v39 = vpop.f32.mrf.mxu1 }
 0x864   : > { %v1534_v40 = vpop.f32.mrf.mxu1 }
 0x865   : > { %v1540_v41 = vmul.f32 0.17677669, %v1534_v40 }
 0x866   : > { %v2208_v42 = vpop.f32.mrf.mxu1 }
 0x867   : > { %v1541_v43 = vadd.f32 %v1540_v41, %v2639_v3 }
 0x868   : > { %v1537_v44 = vpop.f32.mrf.mxu1 }
 0x869   : > { %v1544_v47 = vadd.f32 %v2039_v45, %v1541_v43 }
 0x86a   : > { %v2209_v48 = vpop.f32.mrf.mxu1 }
 0x86b   : > { %v1547_v49 = vmul.f32 0.5, %v1544_v47  ;;  %2040 = vst.msk [vmem:[%s2646_s27 + $0x18] sm:$0xff] %vm1180_vm3, %v1544_v47  ;;  %s755_s27 = scalar_lea.vmem %s2801_s17, %s2518_s20 }
 0x86d   : > { %v1548_v50 = vsel %vm1180_vm3, %v1547_v49, -inf }
 0x86e   : > { %1549 = vmax.xlane.f32.xlu0 %v1548_v50 }
 0x884   : > { %1563 = vrot.lane.b32.xlu0 %v2654_v22, %s2350_s23 }
 0x888   : > { %1616 = vrot.lane.b32.xlu0 %v1484_v36, %s2349_s2 }
 0x8f7   : > { %v1550_v52 = vpop.xlane.xlu0 %1549 }
 0x8f8   : > { %v1551_v53 = vmax.f32 %v1550_v52, -3e+38 }
 0x8fa   : > { %v1552_v54 = vsub.f32 %v1547_v49, %v1551_v53 }
 0x8fb   : > { %v1564_v55 = vpop.permute.xlu0 %1563 }
 0x8fc   : > { %v1553_v3 = vmul.f32 1.442695, %v1552_v54  ;;  %v1569_v56 = vsel %vm1201_vm4, %v1564_v55, 0 }
 0x8fd   : > { %2211 = vmatpush3.bf16.msra.mxu1 %v1569_v56 }
 0x8fe   : > { %2313 = vpow2.f32 %v1553_v3 }
 0x8ff   : > { %v1617_v15 = vpop.permute.xlu0 %1616 }
 0x90b   : > { %v2314_v57 = vpop.eup %2313 }
 0x90c   : > { %v1555_v58 = vsel %vm1180_vm3, %v2314_v57, 0.0 }
 0x90d   : > { %1556 = vadd.xlane.f32.xlu1 %v1555_v58 }
 0x91e   : > { %1612 = vrot.lane.b32.xlu1 %v2693_v5, %s2350_s23  ;;  %v2297_v5 = vld [vmem:[%s2789_s5 + $0x18] sm:$0xff]  }
 0x91f   : > { %2225 = vmatpush3.bf16.msra.mxu0 %v2297_v5 }
 0x920   : > { %2226 = vmatprep.subr.bf16.mxu0 %v2343_v1 }
 0x923   : > { %2227 = vmatpush3.bf16.msra.mxu0 %v2298_v6 }
 0x924   : > { %2228 = vmatprep.subr.bf16.mxu0 %v2343_v1 }
 0x927   : > { %2229 = vmatpush3.bf16.msra.mxu0 %v2299_v7 }
 0x928   : > { %2230 = vmatprep.subr.bf16.mxu0 %v2343_v1 }
 0x92b   : > { %2231 = vmatpush3.bf16.msra.mxu0 %v2300_v8 }
 0x996   : > { %v1557_v59 = vpop.xlane.xlu1 %1556 }
 0x997   : > { %vm1558_vm8 = vcmp.gt.f32.partialorder %v1557_v59, 0.0 }
 0x998   : > { %v1559_v22 = vsel %vm1558_vm8, %v1557_v59, 1.0 }
 0x999   : > { %2315 = vrcp.f32 %v1559_v22 }
 0x99a   : > { %v1613_v13 = vpop.permute.xlu1 %1612 }
 0x99b   : > { %v1623_v14 = vsel %vm1129_vm1, %v2669_v35, %v1613_v13 }
 0x99c   : > { %v1625_v16 = vsel %vm1624_vm9, %v1623_v14, %v1617_v15 }
 0x9a6   : > { %v2316_v60 = vpop.eup %2315 }
 0x9a7   : > { %v1561_v61 = vmul.f32 %v2316_v60, %v2314_v57 }
 0x9a9   : > { %v1562_v62 = vpack.c.bf16 %v1561_v61, %v1561_v61 }
 0x9ab   : > { %2213 = vmatmul.mubr.msk.bf16.vlgmr.msra.gmra.mxu1 %vm1180_vm3, %v1562_v62 }
 0xa6b   : > { %v1605_v9 = vpop.f32.mrf.mxu1 }
 0xa6c   : > { %1620 = vrot.lane.b32.xlu1 %v1605_v9, %s2348_s22 }
 0xa6d   : > { %v2214_v10 = vpop.f32.mrf.mxu1 }
 0xa6f   : > { %v1608_v11 = vpop.f32.mrf.mxu1 }
 0xa71   : > { %v2215_v12 = vpop.f32.mrf.mxu1 }
 0xade   : > { %v1621_v1 = vpop.permute.xlu1 %1620 }
 0xadf   : > { %v1627_v18 = vsel %vm1626_vm10, %v1625_v16, %v1621_v1 }
 0xae0   : > { %v1628_v19 = vpack.c.bf16 %v1627_v18, %v1627_v18 }
 0xae2   : > { %2233 = vmatmul.mubr.bf16.vlgmr.msra.gmra.mxu0 %v1628_v19 }
 0xba2   : > { %v1727_v21 = vpop.f32.mrf.mxu0 }
 0xba3   : > { %v1733_v23 = vmul.f32 1.3949589, %v1727_v21 }
 0xba4   : > { %v2234_v24 = vpop.f32.mrf.mxu0 }
 0xba5   : > { %v1735_v25 = vadd.f32 %v1734_v20, %v1733_v23 }
 0xba6   : > { %v1730_v26 = vpop.f32.mrf.mxu0 }
 0xba7   : > { %1736 = vadd.xlane.f32.xlu0 %v1735_v25 }
 0xba8   : > { %v2235_v27 = vpop.f32.mrf.mxu0 }
 0xc30   : > { %v1737_v28 = vpop.xlane.xlu0 %1736 }
 0xc31   : > { %v1739_v35 = vmul.f32 0.0078125, %v1737_v28 }
 0xc33   : > { %v1740_v46 = vsub.f32 %v1735_v25, %v1739_v35 }
 0xc35   : > { %v1741_v29 = vmul.f32 %v1740_v46, %v1740_v46 }
 0xc37   : > { %1742 = vadd.xlane.f32.xlu1 %v1741_v29 }
 0xcc0   : > { %v1743_v51 = vpop.xlane.xlu1 %1742 }
 0xcc1   : > { %v1744_v30 = vmul.f32 0.0078125, %v1743_v51 }
 0xcc3   : > { %v1745_v31 = vadd.f32 1e-05, %v1744_v30 }
 0xcc5   : > { %2317 = vrsqrt.f32 %v1745_v31 }
 0xcd2   : > { %v2318_v32 = vpop.eup %2317 }
 0xcd3   : > { %v1747_v33 = vmul.f32 %v2318_v32, %v1740_v46 }
 0xcd5   : > { %v1755_v36 = vmul.f32 %v2050_v17, %v1747_v33 }
 0xcd7   : > { %v1763_v37 = vadd.f32 %v2051_v34, %v1755_v36 }
 0xcd9   : > { %v1764_v38 = vpack.c.bf16 %v1763_v37, %v1763_v37 }
 0xcdb   : > { %1765 = vst [vmem:[%s755_s27] sm:$0xf] %v1764_v38 }
 0xcdc PF: > { %s2815_s2 = sld [smem:[#allocation3_spill]] }
 0xcdd   : > { %s2816_s27 = sld [smem:[#allocation2_spill]] }
 0xcde   : > { %s2817_s28 = sld [smem:[#allocation4_spill]] }
 0xce2   : > { %s29_s29 = sadd.s32 1, %s2815_s2  }
 0xce3   : > { %p26_p5 = scmp.ge.s32.totalorder %s29_s29, 4  }
 0xce5   :  { %28 = sbr.rel (!%p26_p5) target bundleno = 4 (0x4), region = 157 }

// kernel: transformer_forward.21
= control target key start
LH: loop header
LB: loop body
LE: loop exit
PB: predicated region body
PF: predicated region fallthrough
CT: control target
= control target key end

     0   :  { %v219_v1 = vmov 0.0   ;;  %vm220_vm0 = vmmov 0   ;;  %s269_s0 = inlined_call_operand.vmem [shape: bf16[16,128], index: 0, kind: input, shape index: {}]   ;;  %s270_s1 = inlined_call_operand.vmem [shape: bf16[128,32], index: 1, kind: input, shape index: {}]   ;;  %s271_s2 = inlined_call_operand.hbm [shape: f32[16,32], index: 2, kind: output, shape index: {}]  }
   0x1   :  { %v188_v0 = vld [vmem:[%s270_s1 + $0x38] sm:$0xff]   ;;  %163 = vmatprep.subr.bf16.mxu0 %v219_v1  ;;  %v189_v2 = vld [vmem:[%s270_s1 + $0x30] sm:$0xff]   ;;  %179 = vmatprep.mubr.msk.bf16.mxu0 %vm220_vm0, %v219_v1  ;;  %v190_v3 = vld [vmem:[%s270_s1 + $0x28] sm:$0xff]  }
   0x2   :  { %164 = vmatpush3.bf16.msra.mxu0 %v188_v0 }
   0x3   :  { %165 = vmatprep.subr.bf16.mxu0 %v219_v1 }
   0x6   :  { %166 = vmatpush3.bf16.msra.mxu0 %v189_v2 }
   0x7   :  { %167 = vmatprep.subr.bf16.mxu0 %v219_v1 }
   0x8   :  { %7 = vsyncpa [#allocation3], 0  ;;  %v191_v4 = vld [vmem:[%s270_s1 + $0x20] sm:$0xff]   ;;  %v192_v5 = vld [vmem:[%s270_s1 + $0x18] sm:$0xff]   ;;  %vm126_vm1 = vcmask 261120   ;;  %s221_s27 = smov [#allocation2]  }
   0x9   :  { %v193_v6 = vld [vmem:[%s270_s1 + $0x10] sm:$0xff]   ;;  %v194_v7 = vld [vmem:[%s270_s1 + $0x8] sm:$0xff]   ;;  %v195_v8 = vld [vmem:[%s270_s1] sm:$0xff]   ;;  %s134_s28 = sshll.u32 %s221_s27, 4  ;;  %s135_s28 = int_to_ptr.vmem [resolvable:$true] %s134_s28 }
   0xa   :  { %168 = vmatpush3.bf16.msra.mxu0 %v190_v3  ;;  %v196_v9 = vld [vmem:[%s269_s0] sm:$0xff]   ;;  %s197_s29 = scalar_lea.vmem %s135_s28, 256  ;;  %p202_p1 = scmp.lt.s32.totalorder %s135_s28, %s135_s28 }
   0xb   :  { %169 = vmatprep.subr.bf16.mxu0 %v219_v1  ;;  %p198_p0 = scmp.ne.s32.totalorder %s135_s28, %s197_s29  ;;  %p203_p2 = scmp.lt.s32.totalorder %s197_s29, %s197_s29 }
   0xd   :  { %p204_p3 = por %p203_p2, %p202_p1 }
   0xe   :  { %170 = vmatpush3.bf16.msra.mxu0 %v191_v4 }
   0xf   :  { %171 = vmatprep.subr.bf16.mxu0 %v219_v1  ;;  %p205_p4 = pnand %p204_p3, %p198_p0 }
  0x12   :  { %172 = vmatpush3.bf16.msra.mxu0 %v192_v5 }
  0x13   :  { %173 = vmatprep.subr.bf16.mxu0 %v219_v1 }
  0x16   :  { %174 = vmatpush3.bf16.msra.mxu0 %v193_v6 }
  0x17   :  { %175 = vmatprep.subr.bf16.mxu0 %v219_v1 }
  0x1a   :  { %176 = vmatpush3.bf16.msra.mxu0 %v194_v7 }
  0x1b   :  { %177 = vmatprep.subr.bf16.mxu0 %v219_v1 }
  0x1e   :  { %178 = vmatpush3.bf16.msra.mxu0 %v195_v8 }
  0x21   :  { %180 = vmatmul.mubr.bf16.vlgmr.msra.gmra.mxu0 %v196_v9 }
  0xe1   :  { %v119_v10 = vpop.f32.mrf.mxu0 }
  0xe2   :  { %127 = vst.msk [vmem:[#allocation2] sm:$0xff] %vm126_vm1, %v119_v10 }
  0xe3   :  { %v181_v11 = vpop.f32.mrf.mxu0 }
  0xe5   :  { %v122_v12 = vpop.f32.mrf.mxu0 }
  0xe6   :  { %128 = vst.msk [vmem:[#allocation2 + $0x8] sm:$0xff] %vm126_vm1, %v122_v12 }
  0xe7   :  { %v182_v13 = vpop.f32.mrf.mxu0 }
  0xe8   :  { %208 = shalt.err (!%p205_p4)
}
  0xe9   :  { %s222_s0 = smov 128   ;;  %s223_s1 = smov 8  }
  0xea   :  { %140 = dma.vmem_to_hbm [thread:$0]  %s135_s28, 256, %s271_s2, [#allocation3], %s222_s0, %s222_s0, %s223_s1  }
  0xeb   :  { %217 = dma.done.wait [#allocation3], 256  }
  0xec   :  { %218 = vsyncadd [#allocation3], 4294967040 }
  0xed   :  { %144 = vsyncpa [#allocation3], 1 }

// kernel: transformer_forward.19
= control target key start
LH: loop header
LB: loop body
LE: loop exit
PB: predicated region body
PF: predicated region fallthrough
CT: control target
= control target key end

     0   :  { %s2455_s27 = smov 0   ;;  %s2457_s28 = smov 0   ;;  %s2797_s0 = inlined_call_operand.vmem [shape: bf16[2,8,128], index: 0, kind: input, shape index: {}]   ;;  %s2798_s1 = inlined_call_operand.vmem [shape: bf16[2,16,128], index: 1, kind: input, shape index: {}]   ;;  %s2799_s2 = inlined_call_operand.vmem [shape: bf16[128,128], index: 2, kind: input, shape index: {}]   ;;  %s2800_s3 = inlined_call_operand.vmem [shape: bf16[128,128], index: 3, kind: input, shape index: {}]   ;;  %s2801_s4 = inlined_call_operand.vmem [shape: bf16[128,128], index: 4, kind: input, shape index: {}]   ;;  %s2802_s5 = inlined_call_operand.vmem [shape: bf16[128,128], index: 5, kind: input, shape index: {}]   ;;  %s2803_s6 = inlined_call_operand.vmem [shape: f32[8,128], index: 6, kind: input, shape index: {}]   ;;  %s2804_s7 = inlined_call_operand.vmem [shape: f32[8,128], index: 7, kind: input, shape index: {}]   ;;  %s2805_s8 = inlined_call_operand.vmem [shape: f32[8,128], index: 8, kind: input, shape index: {}]   ;;  %s2806_s9 = inlined_call_operand.vmem [shape: f32[16,128], index: 9, kind: input, shape index: {}]   ;;  %s2807_s10 = inlined_call_operand.vmem [shape: f32[16,128], index: 10, kind: input, shape index: {}]   ;;  %s2808_s11 = inlined_call_operand.vmem [shape: f32[16,128], index: 11, kind: input, shape index: {}]   ;;  %s2809_s12 = inlined_call_operand.vmem [shape: f32[2,8,1], index: 12, kind: input, shape index: {}]   ;;  %s2810_s13 = inlined_call_operand.vmem [shape: f32[2,1,16], index: 13, kind: input, shape index: {}]   ;;  %s2811_s14 = inlined_call_operand.vmem [shape: f32[2,4,8,16], index: 14, kind: input, shape index: {}, may-alias: {14,18}]   ;;  %s2812_s15 = inlined_call_operand.vmem [shape: f32[1,128], index: 15, kind: input, shape index: {}]   ;;  %s2813_s16 = inlined_call_operand.vmem [shape: f32[1,128], index: 16, kind: input, shape index: {}]   ;;  %s2814_s17 = inlined_call_operand.vmem [shape: bf16[2,8,128], index: 17, kind: output, shape index: {0}]   ;;  %s2815_s18 = inlined_call_operand.vmem [shape: f32[2,4,8,16], index: 18, kind: output, shape index: {1}, may-alias: {14,18}]  }
   0x1   :  { %2818 = sst [smem:[#allocation4_spill]] %s2797_s0  ;;  %s2459_s29 = smov 0  }
   0x2   :  { %2819 = sst [smem:[#allocation5_spill]] %s2798_s1 }
   0x3   :  { %2820 = sst [smem:[#allocation6_spill]] %s2799_s2 }
   0x4 LB: > { %2821 = sst [smem:[#allocation2_spill]] %s2346_s28  ;;  %s41_s30 = sadd.s32 1, %s2346_s28  ;;  %s2350_s29 = sphi %s2459_s29, %s29_s29   ;;  %s2346_s28 = sphi %s2457_s28, %s2827_s28   ;;  %s2342_s27 = sphi %s2455_s27, %s2826_s27  }
   0x5   : > { %p1999_p0 = scmp.ge.s32.totalorder %s2350_s29, 1  ;;  %p43_p1 = scmp.ge.s32.totalorder %s41_s30, 2 }
   0x6   : > { %p609_p2 = scmp.lt.s32.totalorder %s2350_s29, 3 }
   0x7   : > { %s2829_s30 = smov (%p43_p1, %s41_s30), 0 }
   0x8   : > { %2822 = sst [smem:[#allocation3_spill]] %s2829_s30  ;;  %p610_p3 = pnand %p1999_p0, %p609_p2 }
   0x9   : > { %s2823_s2 = sld [smem:[#allocation6_spill]] (!%p610_p3)  ;;  %p710_p4 = scmp.lt.s32.totalorder (!%p610_p3), %s2342_s27, 1 }
   0xa   : > { %613 = sbr.rel (%p610_p3) target bundleno = 3293 (0xcdd), region = 88  ;;  %s2824_s19 = sld [smem:[#allocation5_spill]] (!%p610_p3) }
   0xb   : > { %s2825_s0 = sld [smem:[#allocation4_spill]] (!%p610_p3)  ;;  %s2357_s23 = smov (!%p610_p3), 96  }
   0xc   : > { %s2358_s25 = smov (!%p610_p3), 64   ;;  %s2359_s26 = smov (!%p610_p3), 32  }
   0xf   : > { %v2277_v0 = vld [vmem:[%s2800_s3 + $0x38] sm:$0xff]   ;;  %v2352_v1 = vmov 0.0   ;;  %v2278_v2 = vld [vmem:[%s2800_s3 + $0x30] sm:$0xff]   ;;  %vm2353_vm0 = vmmov 0   ;;  %v2280_v5 = vld [vmem:[%s2800_s3 + $0x28] sm:$0xff]   ;;  %s2831_s27 = smov (!%p710_p4, %s2342_s27), 1 }
  0x10   : > { %2136 = vmatprep.subr.bf16.mxu1 %v2352_v1  ;;  %2116 = vmatprep.subr.bf16.mxu0 %v2352_v1  ;;  %v2279_v3 = vld [vmem:[%s2823_s2 + $0x38] sm:$0xff]   ;;  %v2281_v4 = vld [vmem:[%s2823_s2 + $0x30] sm:$0xff]   ;;  %v2283_v6 = vld [vmem:[%s2823_s2 + $0x28] sm:$0xff]   ;;  %s2061_s21 = sshll.u32 %s2831_s27, 3  ;;  %s2000_s24 = sshll.u32 %s2831_s27, 2  ;;  %v2356_v27 = vmov 0  }
  0x11   : > { %2137 = vmatpush3.bf16.msra.mxu1 %v2277_v0  ;;  %2152 = vmatprep.mubr.msk.bf16.mxu1 %vm2353_vm0, %v2352_v1  ;;  %v2282_v7 = vld [vmem:[%s2800_s3 + $0x20] sm:$0xff]   ;;  %v2284_v9 = vld [vmem:[%s2800_s3 + $0x18] sm:$0xff]   ;;  %s721_s1 = scalar_lea.vmem %s2824_s19, %s2061_s21  ;;  %v2286_v11 = vld [vmem:[%s2800_s3 + $0x10] sm:$0xff]   ;;  %s716_s30 = scalar_lea.vmem %s2825_s0, %s2000_s24  ;;  %vm1144_vm1 = vcmask 261120   ;;  %vm1195_vm2 = vcmask 130048   ;;  %vm1629_vm7 = vcmask 523264  }
  0x12   : > { %2138 = vmatprep.subr.bf16.mxu1 %v2352_v1  ;;  %2132 = vmatprep.mubr.msk.bf16.mxu0 %vm2353_vm0, %v2352_v1  ;;  %v2285_v8 = vld [vmem:[%s2823_s2 + $0x20] sm:$0xff]   ;;  %v2287_v10 = vld [vmem:[%s2823_s2 + $0x18] sm:$0xff]   ;;  %v2289_v12 = vld [vmem:[%s2823_s2 + $0x10] sm:$0xff]   ;;  %s2355_s19 = smov 127   ;;  %s740_s22 = scalar_lea.vmem %s2809_s12, %s2061_s21  ;;  %vm1631_vm8 = vcmask 785408  }
  0x13   : > { %2117 = vmatpush3.bf16.msra.mxu0 %v2279_v3  ;;  %v2288_v13 = vld [vmem:[%s2800_s3 + $0x8] sm:$0xff]   ;;  %v2290_v15 = vld [vmem:[%s2800_s3] sm:$0xff]   ;;  %2276 = vset.pattern.permute.xlu0 %v2356_v27  ;;  %v2294_v62 = vld [vmem:[%s2801_s4 + $0x38] sm:$0xff]   ;;  %s743_s0 = scalar_lea.vmem %s2810_s13, %s2831_s27 }
  0x14   : > { %2118 = vmatprep.subr.bf16.mxu0 %v2352_v1  ;;  %v2291_v14 = vld [vmem:[%s2823_s2 + $0x8] sm:$0xff]   ;;  %v2293_v16 = vld [vmem:[%s2823_s2] sm:$0xff]   ;;  %v2295_v63 = vld [vmem:[%s2801_s4 + $0x30] sm:$0xff]  }
  0x15   : > { %2139 = vmatpush3.bf16.msra.mxu1 %v2278_v2  ;;  %v2549_v17 = vld [vmem:[%s721_s1] sm:$0xff]   ;;  %s2354_s1 = smov 1   ;;  %v999_v34 = vld [vmem:[%s2806_s9 + $0x8] sm:$0xff]  ;;  %v2298_v3 = vld [vmem:[%s2801_s4 + $0x18] sm:$0xff]  }
  0x16   : > { %2140 = vmatprep.subr.bf16.mxu1 %v2352_v1  ;;  %v2558_v18 = vld [vmem:[%s716_s30] sm:$0xf]  ;;  %v1001_v35 = vld [vmem:[%s2807_s10 + $0x8] sm:$0xff]  ;;  %s2062_s30 = sshll.u32 %s2831_s27, 5 }
  0x17   : > { %2119 = vmatpush3.bf16.msra.mxu0 %v2281_v4  ;;  %v1127_v28 = vld [vmem:[%s740_s22] sm:$0xff]  ;;  %v1003_v38 = vld [vmem:[%s2808_s11 + $0x8] sm:$0xff]  ;;  %v2299_v4 = vld [vmem:[%s2801_s4 + $0x10] sm:$0xff]   ;;  %s2662_s22 = scalar_lea.vmem %s2815_s18, %s2062_s30 }
  0x18   : > { %2120 = vmatprep.subr.bf16.mxu0 %v2352_v1  ;;  %v1000_v29 = vld [vmem:[%s2807_s10] sm:$0xff]  ;;  %v2296_v0 = vld [vmem:[%s2801_s4 + $0x28] sm:$0xff]  }
  0x19   : > { %2141 = vmatpush3.bf16.msra.mxu1 %v2280_v5  ;;  %v998_v30 = vld [vmem:[%s2806_s9] sm:$0xff]  ;;  %v2300_v5 = vld [vmem:[%s2801_s4 + $0x8] sm:$0xff]  }
  0x1a   : > { %2142 = vmatprep.subr.bf16.mxu1 %v2352_v1  ;;  %v1002_v37 = vld [vmem:[%s2808_s11] sm:$0xff] }
  0x1b   : > { %2121 = vmatpush3.bf16.msra.mxu0 %v2283_v6  ;;  %v875_v44 = vld [vmem:[%s2803_s6] sm:$0xff] }
  0x1c   : > { %2122 = vmatprep.subr.bf16.mxu0 %v2352_v1  ;;  %v876_v45 = vld [vmem:[%s2804_s7] sm:$0xff] }
  0x1d   : > { %2143 = vmatpush3.bf16.msra.mxu1 %v2282_v7  ;;  %v877_v50 = vld [vmem:[%s2805_s8] sm:$0xff] }
  0x1e   : > { %2144 = vmatprep.subr.bf16.mxu1 %v2352_v1  ;;  %v2297_v2 = vld [vmem:[%s2801_s4 + $0x20] sm:$0xff]  }
  0x1f   : > { %2123 = vmatpush3.bf16.msra.mxu0 %v2285_v8  ;;  %v2301_v6 = vld [vmem:[%s2801_s4] sm:$0xff]  }
  0x20   : > { %2124 = vmatprep.subr.bf16.mxu0 %v2352_v1  ;;  %v2034_v7 = vld [vmem:[%s743_s0] ss:$0 sm:$0xff] }
  0x21   : > { %2145 = vmatpush3.bf16.msra.mxu1 %v2284_v9 }
  0x22   : > { %2146 = vmatprep.subr.bf16.mxu1 %v2352_v1 }
  0x23   : > { %2125 = vmatpush3.bf16.msra.mxu0 %v2287_v10 }
  0x24   : > { %2126 = vmatprep.subr.bf16.mxu0 %v2352_v1 }
  0x25   : > { %2147 = vmatpush3.bf16.msra.mxu1 %v2286_v11 }
  0x26   : > { %2148 = vmatprep.subr.bf16.mxu1 %v2352_v1 }
  0x27   : > { %2127 = vmatpush3.bf16.msra.mxu0 %v2289_v12 }
  0x28   : > { %2128 = vmatprep.subr.bf16.mxu0 %v2352_v1 }
  0x29   : > { %2149 = vmatpush3.bf16.msra.mxu1 %v2288_v13 }
  0x2a   : > { %2150 = vmatprep.subr.bf16.mxu1 %v2352_v1 }
  0x2b   : > { %2129 = vmatpush3.bf16.msra.mxu0 %v2291_v14 }
  0x2c   : > { %2130 = vmatprep.subr.bf16.mxu0 %v2352_v1 }
  0x2d   : > { %2151 = vmatpush3.bf16.msra.mxu1 %v2290_v15 }
  0x2e   : > { %2176 = vmatprep.subr.bf16.mxu1 %v2352_v1 }
  0x2f   : > { %2131 = vmatpush3.bf16.msra.mxu0 %v2293_v16 }
  0x30   : > { %2153 = vmatmul.mubr.bf16.vlgmr.msra.gmra.mxu1 %v2549_v17  ;;  %2156 = vmatprep.subr.bf16.mxu0 %v2352_v1 }
  0x31   : > { %2178 = vmatprep.mubr.msk.bf16.mxu1 %vm2353_vm0, %v2352_v1 }
  0x32   : > { %2133 = vmatmul.mubr.bf16.vlgmr.msra.gmra.mxu0 %v2558_v18 }
  0x33   : > { %2172 = vmatprep.mubr.msk.bf16.mxu0 %vm2353_vm0, %v2352_v1  ;;  %2157 = vmatpush3.bf16.msra.mxu0 %v2294_v62 }
  0x34   : > { %2158 = vmatprep.subr.bf16.mxu0 %v2352_v1 }
  0x37   : > { %2159 = vmatpush3.bf16.msra.mxu0 %v2295_v63 }
  0x38   : > { %2160 = vmatprep.subr.bf16.mxu0 %v2352_v1 }
  0x3b   : > { %2161 = vmatpush3.bf16.msra.mxu0 %v2296_v0 }
  0x3c   : > { %2162 = vmatprep.subr.bf16.mxu0 %v2352_v1 }
  0x3f   : > { %2163 = vmatpush3.bf16.msra.mxu0 %v2297_v2 }
  0x40   : > { %2164 = vmatprep.subr.bf16.mxu0 %v2352_v1 }
  0x43   : > { %2165 = vmatpush3.bf16.msra.mxu0 %v2298_v3 }
  0x44   : > { %2166 = vmatprep.subr.bf16.mxu0 %v2352_v1 }
  0x47   : > { %2167 = vmatpush3.bf16.msra.mxu0 %v2299_v4 }
  0x48   : > { %2168 = vmatprep.subr.bf16.mxu0 %v2352_v1 }
  0x4b   : > { %2169 = vmatpush3.bf16.msra.mxu0 %v2300_v5 }
  0x4c   : > { %2170 = vmatprep.subr.bf16.mxu0 %v2352_v1 }
  0x4f   : > { %2171 = vmatpush3.bf16.msra.mxu0 %v2301_v6 }
  0x50   : > { %2224 = vmatprep.subr.bf16.mxu0 %v2352_v1 }
  0x52   : > { %2173 = vmatmul.mubr.bf16.vlgmr.msra.gmra.mxu0 %v2549_v17 }
  0x53   : > { %2240 = vmatprep.mubr.msk.bf16.mxu0 %vm2353_vm0, %v2352_v1 }
  0xf0   : > { %v991_v19 = vpop.f32.mrf.mxu1 }
  0xf1   : > { %1008 = vrot.lane.b32.xlu1 %v991_v19, %s2354_s1  ;;  %1004 = vrot.lane.b32.xlu0 %v991_v19, %s2355_s19  ;;  %v1012_v36 = vmul.f32 %v998_v30, %v991_v19 }
  0xf2   : > { %v2154_v20 = vpop.f32.mrf.mxu1  ;;  %v869_v21 = vpop.f32.mrf.mxu0 }
  0xf3   : > { %v882_v52 = vmul.f32 %v875_v44, %v869_v21 }
  0xf4   : > { %v994_v22 = vpop.f32.mrf.mxu1  ;;  %v2134_v23 = vpop.f32.mrf.mxu0 }
  0xf5   : > { %1010 = vrot.lane.b32.xlu1 %v994_v22, %s2354_s1  ;;  %1006 = vrot.lane.b32.xlu0 %v994_v22, %s2355_s19  ;;  %v1013_v41 = vmul.f32 %v999_v34, %v994_v22 }
  0xf6   : > { %v2155_v24 = vpop.f32.mrf.mxu1  ;;  %v872_v25 = vpop.f32.mrf.mxu0 }
  0xf8   : > { %v2135_v26 = vpop.f32.mrf.mxu0 }
  0xf9   : > { %878 = vrot.lane.b32.xlu0 %v869_v21, %s2355_s19  ;;  %880 = vrot.lane.b32.xlu1 %v869_v21, %s2354_s1  ;;  %s2655_s1 = scalar_lea.vmem %s2811_s14, %s2062_s30  ;;  %s758_s30 = scalar_lea.vmem %s2814_s17, %s2000_s24 }
  0xfa   : > { %v1193_v13 = vld [vmem:[%s2655_s1] sm:$0xff] }
  0xfd   : > { %1131 = vperm.xlu0 %2276, %v1127_v28  }
 0x112   : > { %v1120_v27 = vpop.f32.mrf.mxu0 }
 0x114   : > { %v2174_v28 = vpop.f32.mrf.mxu0 }
 0x163   : > { %v1009_v31 = vpop.permute.xlu1 %1008  ;;  %v1005_v32 = vpop.permute.xlu0 %1004 }
 0x164   : > { %v1014_v33 = vmul.f32 %v1005_v32, %v1000_v29  ;;  %v1018_v46 = vmul.f32 %v1009_v31, %v1002_v37  ;;  %v1123_v29 = vpop.f32.mrf.mxu0 }
 0x165   : > { %v2670_v30 = vpack.c.bf16 %v1123_v29, %v1120_v27 }
 0x166   : > { %v1016_v42 = vadd.f32 %v1014_v33, %v1012_v36  ;;  %v2175_v31 = vpop.f32.mrf.mxu0 }
 0x167   : > { %v1011_v39 = vpop.permute.xlu1 %1010  ;;  %v1007_v40 = vpop.permute.xlu0 %1006 }
 0x168   : > { %v1015_v43 = vmul.f32 %v1007_v40, %v1001_v35  ;;  %v1019_v47 = vmul.f32 %v1011_v39, %v1003_v38  ;;  %v1020_v53 = vadd.f32 %v1018_v46, %v1016_v42 }
 0x16a   : > { %v1017_v48 = vadd.f32 %v1015_v43, %v1013_v41 }
 0x16b   : > { %v879_v49 = vpop.permute.xlu0 %878  ;;  %v881_v51 = vpop.permute.xlu1 %880 }
 0x16c   : > { %v1021_v54 = vadd.f32 %v1019_v47, %v1017_v48  ;;  %v883_v55 = vmul.f32 %v879_v49, %v876_v45  ;;  %v885_v58 = vmul.f32 %v881_v51, %v877_v50 }
 0x16e   : > { %v2599_v56 = vpack.c.bf16 %v1021_v54, %v1020_v53  ;;  %v884_v57 = vadd.f32 %v883_v55, %v882_v52 }
 0x170   : > { %v1149_v59 = vsel %vm1144_vm1, %v2599_v56, 0  ;;  %v886_v60 = vadd.f32 %v885_v58, %v884_v57 }
 0x171   : > { %2177 = vmatpush3.bf16.xpose.msra.mxu1 %v1149_v59 }
 0x172   : > { %2182 = vmatprep.subr.bf16.mxu1 %v2352_v1  ;;  %v2604_v61 = vpack.c.bf16 %v886_v60, %v886_v60 }
 0x178   : > { %2179 = vmatmul.mubr.msk.bf16.vlgmr.msra.gmra.mxu1 %vm1144_vm1, %v2604_v61  ;;  %v1132_v8 = vpop.permute.xlu0 %1131 }
 0x179   : > { %2184 = vmatprep.mubr.msk.bf16.mxu1 %vm2353_vm0, %v2352_v1  ;;  %v2650_v9 = vadd.f32 %v2034_v7, %v1132_v8  ;;  %2183 = vmatpush3.bf16.msra.mxu1 %v2670_v30 }
 0x17a   : > { %2188 = vmatprep.subr.bf16.mxu1 %v2352_v1 }
 0x238   : > { %v1185_v10 = vpop.f32.mrf.mxu1 }
 0x239   : > { %v1191_v11 = vmul.f32 0.17677669, %v1185_v10 }
 0x23a   : > { %v2180_v12 = vpop.f32.mrf.mxu1 }
 0x23b   : > { %v1192_v14 = vadd.f32 %v1191_v11, %v2650_v9 }
 0x23c   : > { %v1188_v15 = vpop.f32.mrf.mxu1 }
 0x23d   : > { %v1194_v16 = vadd.f32 %v1193_v13, %v1192_v14 }
 0x23e   : > { %v2181_v17 = vpop.f32.mrf.mxu1 }
 0x23f   : > { %v1197_v19 = vmul.f32 0.5, %v1194_v16  ;;  %1196 = vst.msk [vmem:[%s2662_s22] sm:$0xff] %vm1195_vm2, %v1194_v16 }
 0x241   : > { %v1198_v20 = vsel %vm1195_vm2, %v1197_v19, -inf }
 0x242   : > { %1199 = vmax.xlane.f32.xlu1 %v1198_v20 }
 0x246   : > { %v2038_v49 = vld [vmem:[%s2655_s1 + $0x8] sm:$0xff] }
 0x253   : > { %1260 = vrot.lane.b32.xlu1 %v2599_v56, %s2357_s23 }
 0x2cb   : > { %v1200_v21 = vpop.xlane.xlu1 %1199 }
 0x2cc   : > { %v1201_v22 = vmax.f32 %v1200_v21, -3e+38 }
 0x2ce   : > { %v1202_v23 = vsub.f32 %v1197_v19, %v1201_v22 }
 0x2cf   : > { %v1261_v36 = vpop.permute.xlu1 %1260 }
 0x2d0   : > { %v1203_v24 = vmul.f32 1.442695, %v1202_v23  ;;  %v1266_v38 = vsel %vm1144_vm1, %v1261_v36, 0 }
 0x2d2   : > { %2310 = vpow2.f32 %v1203_v24 }
 0x2df   : > { %v2311_v25 = vpop.eup %2310 }
 0x2e0   : > { %v1205_v26 = vsel %vm1195_vm2, %v2311_v25, 0.0 }
 0x2e1   : > { %1206 = vadd.xlane.f32.xlu0 %v1205_v26 }
 0x2f7   : > { %1257 = vrot.lane.b32.xlu0 %v2604_v61, %s2357_s23 }
 0x36a   : > { %v1207_v32 = vpop.xlane.xlu0 %1206 }
 0x36b   : > { %vm1208_vm3 = vcmp.gt.f32.partialorder %v1207_v32, 0.0 }
 0x36c   : > { %v1209_v33 = vsel %vm1208_vm3, %v1207_v32, 1.0 }
 0x36d   : > { %2312 = vrcp.f32 %v1209_v33 }
 0x36e   : > { %v1258_v39 = vpop.permute.xlu0 %1257 }
 0x37a   : > { %v2313_v34 = vpop.eup %2312 }
 0x37b   : > { %v1211_v35 = vmul.f32 %v2313_v34, %v2311_v25 }
 0x37d   : > { %v1212_v37 = vpack.c.bf16 %v1211_v35, %v1211_v35 }
 0x37f   : > { %2185 = vmatmul.mubr.msk.bf16.vlgmr.msra.gmra.mxu1 %vm1195_vm2, %v1212_v37 }
 0x380   : > { %2189 = vmatpush3.bf16.xpose.msra.mxu1 %v1266_v38  ;;  %2190 = vmatprep.mubr.msk.bf16.mxu1 %vm2353_vm0, %v2352_v1 }
 0x381   : > { %2194 = vmatprep.subr.bf16.mxu1 %v2352_v1 }
 0x387   : > { %2191 = vmatmul.mubr.msk.bf16.vlgmr.msra.gmra.mxu1 %vm1144_vm1, %v1258_v39 }
 0x388   : > { %2196 = vmatprep.mubr.msk.bf16.mxu1 %vm2353_vm0, %v2352_v1 }
 0x43f   : > { %v2684_v40 = vpop.f32.mrf.mxu1 }
 0x441   : > { %v2186_v41 = vpop.f32.mrf.mxu1 }
 0x443   : > { %v1253_v42 = vpop.f32.mrf.mxu1 }
 0x445   : > { %v2187_v43 = vpop.f32.mrf.mxu1 }
 0x447   : > { %v1302_v44 = vpop.f32.mrf.mxu1 }
 0x448   : > { %v1308_v45 = vmul.f32 0.17677669, %v1302_v44 }
 0x449   : > { %v2192_v46 = vpop.f32.mrf.mxu1 }
 0x44a   : > { %v1309_v47 = vadd.f32 %v1308_v45, %v2650_v9 }
 0x44b   : > { %v1305_v48 = vpop.f32.mrf.mxu1 }
 0x44c   : > { %v1312_v50 = vadd.f32 %v2038_v49, %v1309_v47 }
 0x44d   : > { %v2193_v51 = vpop.f32.mrf.mxu1 }
 0x44e   : > { %v1315_v52 = vmul.f32 0.5, %v1312_v50  ;;  %2039 = vst.msk [vmem:[%s2662_s22 + $0x8] sm:$0xff] %vm1195_vm2, %v1312_v50 }
 0x450   : > { %v1316_v53 = vsel %vm1195_vm2, %v1315_v52, -inf }
 0x451   : > { %1317 = vmax.xlane.f32.xlu1 %v1316_v53 }
 0x455   : > { %v2042_v19 = vld [vmem:[%s2655_s1 + $0x10] sm:$0xff] }
 0x462   : > { %1332 = vrot.lane.b32.xlu1 %v2670_v30, %s2357_s23 }
 0x466   : > { %1378 = vrot.lane.b32.xlu1 %v2604_v61, %s2358_s25 }
 0x4da   : > { %v1318_v54 = vpop.xlane.xlu1 %1317 }
 0x4db   : > { %v1319_v55 = vmax.f32 %v1318_v54, -3e+38 }
 0x4dd   : > { %v1320_v57 = vsub.f32 %v1315_v52, %v1319_v55 }
 0x4de   : > { %v1333_v58 = vpop.permute.xlu1 %1332 }
 0x4df   : > { %v1321_v59 = vmul.f32 1.442695, %v1320_v57  ;;  %2195 = vmatpush3.bf16.msra.mxu1 %v1333_v58 }
 0x4e0   : > { %2200 = vmatprep.subr.bf16.mxu1 %v2352_v1 }
 0x4e1   : > { %2314 = vpow2.f32 %v1321_v59 }
 0x4e2   : > { %v1379_v7 = vpop.permute.xlu1 %1378 }
 0x4ee   : > { %v2315_v60 = vpop.eup %2314 }
 0x4ef   : > { %v1323_v62 = vsel %vm1195_vm2, %v2315_v60, 0.0 }
 0x4f0   : > { %1324 = vadd.xlane.f32.xlu0 %v1323_v62 }
 0x506   : > { %1380 = vrot.lane.b32.xlu0 %v2599_v56, %s2358_s25 }
 0x579   : > { %v1325_v63 = vpop.xlane.xlu0 %1324 }
 0x57a   : > { %vm1326_vm4 = vcmp.gt.f32.partialorder %v1325_v63, 0.0 }
 0x57b   : > { %v1327_v0 = vsel %vm1326_vm4, %v1325_v63, 1.0 }
 0x57c   : > { %2316 = vrcp.f32 %v1327_v0 }
 0x57d   : > { %v1381_v4 = vpop.permute.xlu0 %1380 }
 0x57e   : > { %v1386_v6 = vsel %vm1144_vm1, %v1381_v4, 0  ;;  %v2304_v4 = vld [vmem:[%s2802_s5 + $0x28] sm:$0xff]  }
 0x589   : > { %v2317_v2 = vpop.eup %2316 }
 0x58a   : > { %v1329_v3 = vmul.f32 %v2317_v2, %v2315_v60  ;;  %v2302_v2 = vld [vmem:[%s2802_s5 + $0x38] sm:$0xff]  }
 0x58b   : > { %2225 = vmatpush3.bf16.msra.mxu0 %v2302_v2 }
 0x58c   : > { %v1330_v5 = vpack.c.bf16 %v1329_v3, %v1329_v3  ;;  %v2303_v3 = vld [vmem:[%s2802_s5 + $0x30] sm:$0xff]   ;;  %2226 = vmatprep.subr.bf16.mxu0 %v2352_v1 }
 0x58e   : > { %2197 = vmatmul.mubr.msk.bf16.vlgmr.msra.gmra.mxu1 %vm1195_vm2, %v1330_v5  ;;  %v2305_v5 = vld [vmem:[%s2802_s5 + $0x20] sm:$0xff]  }
 0x58f   : > { %2201 = vmatpush3.bf16.xpose.msra.mxu1 %v1386_v6  ;;  %2202 = vmatprep.mubr.msk.bf16.mxu1 %vm2353_vm0, %v2352_v1  ;;  %v2306_v6 = vld [vmem:[%s2802_s5 + $0x18] sm:$0xff]  }
 0x590   : > { %2206 = vmatprep.subr.bf16.mxu1 %v2352_v1  ;;  %2227 = vmatpush3.bf16.msra.mxu0 %v2303_v3 }
 0x591   : > { %2228 = vmatprep.subr.bf16.mxu0 %v2352_v1 }
 0x594   : > { %2229 = vmatpush3.bf16.msra.mxu0 %v2304_v4 }
 0x595   : > { %2230 = vmatprep.subr.bf16.mxu0 %v2352_v1 }
 0x596   : > { %2203 = vmatmul.mubr.msk.bf16.vlgmr.msra.gmra.mxu1 %vm1144_vm1, %v1379_v7  ;;  %v2307_v7 = vld [vmem:[%s2802_s5 + $0x10] sm:$0xff]  }
 0x597   : > { %2208 = vmatprep.mubr.msk.bf16.mxu1 %vm2353_vm0, %v2352_v1 }
 0x598   : > { %2231 = vmatpush3.bf16.msra.mxu0 %v2305_v5 }
 0x599   : > { %2232 = vmatprep.subr.bf16.mxu0 %v2352_v1 }
 0x59c   : > { %2233 = vmatpush3.bf16.msra.mxu0 %v2306_v6 }
 0x59d   : > { %2234 = vmatprep.subr.bf16.mxu0 %v2352_v1 }
 0x5a0   : > { %2235 = vmatpush3.bf16.msra.mxu0 %v2307_v7 }
 0x5a1   : > { %2236 = vmatprep.subr.bf16.mxu0 %v2352_v1 }
 0x64e   : > { %v2707_v8 = vpop.f32.mrf.mxu1 }
 0x650   : > { %v2198_v10 = vpop.f32.mrf.mxu1 }
 0x651   : > { %v2309_v10 = vld [vmem:[%s2802_s5] sm:$0xff]  }
 0x652   : > { %v1375_v11 = vpop.f32.mrf.mxu1 }
 0x654   : > { %v2199_v12 = vpop.f32.mrf.mxu1 }
 0x656   : > { %v1422_v13 = vpop.f32.mrf.mxu1 }
 0x657   : > { %v1428_v14 = vmul.f32 0.17677669, %v1422_v13 }
 0x658   : > { %v2204_v15 = vpop.f32.mrf.mxu1 }
 0x659   : > { %v1429_v16 = vadd.f32 %v1428_v14, %v2650_v9 }
 0x65a   : > { %v1425_v17 = vpop.f32.mrf.mxu1 }
 0x65b   : > { %v1432_v20 = vadd.f32 %v2042_v19, %v1429_v16 }
 0x65c   : > { %v2205_v21 = vpop.f32.mrf.mxu1 }
 0x65d   : > { %v1435_v22 = vmul.f32 0.5, %v1432_v20  ;;  %2043 = vst.msk [vmem:[%s2662_s22 + $0x10] sm:$0xff] %vm1195_vm2, %v1432_v20 }
 0x65f   : > { %v1436_v23 = vsel %vm1195_vm2, %v1435_v22, -inf }
 0x660   : > { %1437 = vmax.xlane.f32.xlu1 %v1436_v23 }
 0x664   : > { %v2046_v48 = vld [vmem:[%s2655_s1 + $0x18] sm:$0xff] }
 0x671   : > { %1499 = vrot.lane.b32.xlu1 %v2599_v56, %s2359_s26 }
 0x675   : > { %1497 = vrot.lane.b32.xlu1 %v2604_v61, %s2359_s26 }
 0x6e9   : > { %v1438_v24 = vpop.xlane.xlu1 %1437 }
 0x6ea   : > { %v1439_v25 = vmax.f32 %v1438_v24, -3e+38 }
 0x6ec   : > { %v1440_v26 = vsub.f32 %v1435_v22, %v1439_v25  ;;  %v1739_v22 = vunpack.c.l.bf16 %v2558_v18  ;;  %v2057_v18 = vld [vmem:[%s2812_s15] ss:$0 sm:$0xff] }
 0x6ed   : > { %v1500_v34 = vpop.permute.xlu1 %1499 }
 0x6ee   : > { %v1441_v27 = vmul.f32 1.442695, %v1440_v26  ;;  %v1505_v36 = vsel %vm1144_vm1, %v1500_v34, 0 }
 0x6f0   : > { %2318 = vpow2.f32 %v1441_v27 }
 0x6f1   : > { %v1498_v37 = vpop.permute.xlu1 %1497 }
 0x6fd   : > { %v2319_v28 = vpop.eup %2318 }
 0x6fe   : > { %v1443_v29 = vsel %vm1195_vm2, %v2319_v28, 0.0 }
 0x6ff   : > { %1444 = vadd.xlane.f32.xlu0 %v1443_v29 }
 0x715   : > { %1451 = vrot.lane.b32.xlu0 %v2670_v30, %s2358_s25 }
 0x788   : > { %v1445_v31 = vpop.xlane.xlu0 %1444 }
 0x789   : > { %vm1446_vm5 = vcmp.gt.f32.partialorder %v1445_v31, 0.0 }
 0x78a   : > { %v1447_v32 = vsel %vm1446_vm5, %v1445_v31, 1.0 }
 0x78b   : > { %2320 = vrcp.f32 %v1447_v32 }
 0x78c   : > { %v1452_v56 = vpop.permute.xlu0 %1451 }
 0x78d   : > { %2207 = vmatpush3.bf16.msra.mxu1 %v1452_v56 }
 0x78e   : > { %2212 = vmatprep.subr.bf16.mxu1 %v2352_v1 }
 0x798   : > { %v2321_v61 = vpop.eup %2320 }
 0x799   : > { %v1449_v33 = vmul.f32 %v2321_v61, %v2319_v28 }
 0x79b   : > { %v1450_v35 = vpack.c.bf16 %v1449_v33, %v1449_v33 }
 0x79d   : > { %2209 = vmatmul.mubr.msk.bf16.vlgmr.msra.gmra.mxu1 %vm1195_vm2, %v1450_v35 }
 0x79e   : > { %2213 = vmatpush3.bf16.xpose.msra.mxu1 %v1505_v36  ;;  %2214 = vmatprep.mubr.msk.bf16.mxu1 %vm2353_vm0, %v2352_v1  ;;  %v2058_v36 = vld [vmem:[%s2813_s16] ss:$0 sm:$0xff] }
 0x79f   : > { %2218 = vmatprep.subr.bf16.mxu1 %v2352_v1 }
 0x7a5   : > { %2215 = vmatmul.mubr.msk.bf16.vlgmr.msra.gmra.mxu1 %vm1144_vm1, %v1498_v37 }
 0x7a6   : > { %2220 = vmatprep.mubr.msk.bf16.mxu1 %vm2353_vm0, %v2352_v1 }
 0x85d   : > { %v1491_v38 = vpop.f32.mrf.mxu1 }
 0x85f   : > { %v2210_v39 = vpop.f32.mrf.mxu1 }
 0x861   : > { %v1494_v41 = vpop.f32.mrf.mxu1 }
 0x863   : > { %v2211_v42 = vpop.f32.mrf.mxu1 }
 0x865   : > { %v1541_v43 = vpop.f32.mrf.mxu1 }
 0x866   : > { %v1547_v44 = vmul.f32 0.17677669, %v1541_v43 }
 0x867   : > { %v2216_v45 = vpop.f32.mrf.mxu1 }
 0x868   : > { %v1548_v46 = vadd.f32 %v1547_v44, %v2650_v9 }
 0x869   : > { %v1544_v47 = vpop.f32.mrf.mxu1 }
 0x86a   : > { %v1551_v49 = vadd.f32 %v2046_v48, %v1548_v46 }
 0x86b   : > { %v2217_v50 = vpop.f32.mrf.mxu1 }
 0x86c   : > { %v1554_v51 = vmul.f32 0.5, %v1551_v49  ;;  %2047 = vst.msk [vmem:[%s2662_s22 + $0x18] sm:$0xff] %vm1195_vm2, %v1551_v49 }
 0x86e   : > { %v1555_v52 = vsel %vm1195_vm2, %v1554_v51, -inf }
 0x86f   : > { %1556 = vmax.xlane.f32.xlu0 %v1555_v52 }
 0x885   : > { %1570 = vrot.lane.b32.xlu0 %v2670_v30, %s2359_s26 }
 0x889   : > { %1621 = vrot.lane.b32.xlu0 %v1491_v38, %s2358_s25 }
 0x8f8   : > { %v1557_v53 = vpop.xlane.xlu0 %1556 }
 0x8f9   : > { %v1558_v54 = vmax.f32 %v1557_v53, -3e+38 }
 0x8fb   : > { %v1559_v55 = vsub.f32 %v1554_v51, %v1558_v54 }
 0x8fc   : > { %v1571_v57 = vpop.permute.xlu0 %1570 }
 0x8fd   : > { %v1560_v9 = vmul.f32 1.442695, %v1559_v55  ;;  %2219 = vmatpush3.bf16.msra.mxu1 %v1571_v57 }
 0x8ff   : > { %2322 = vpow2.f32 %v1560_v9 }
 0x900   : > { %v1622_v17 = vpop.permute.xlu0 %1621 }
 0x90c   : > { %v2323_v58 = vpop.eup %2322 }
 0x90d   : > { %v1562_v59 = vsel %vm1195_vm2, %v2323_v58, 0.0 }
 0x90e   : > { %1563 = vadd.xlane.f32.xlu1 %v1562_v59 }
 0x91f   : > { %1617 = vrot.lane.b32.xlu1 %v2707_v8, %s2359_s26  ;;  %v2308_v8 = vld [vmem:[%s2802_s5 + $0x8] sm:$0xff]  }
 0x920   : > { %2237 = vmatpush3.bf16.msra.mxu0 %v2308_v8 }
 0x921   : > { %2238 = vmatprep.subr.bf16.mxu0 %v2352_v1 }
 0x924   : > { %2239 = vmatpush3.bf16.msra.mxu0 %v2309_v10 }
 0x997   : > { %v1564_v60 = vpop.xlane.xlu1 %1563 }
 0x998   : > { %vm1565_vm6 = vcmp.gt.f32.partialorder %v1564_v60, 0.0 }
 0x999   : > { %v1566_v62 = vsel %vm1565_vm6, %v1564_v60, 1.0 }
 0x99a   : > { %2324 = vrcp.f32 %v1566_v62 }
 0x99b   : > { %v1618_v15 = vpop.permute.xlu1 %1617 }
 0x99c   : > { %v1628_v16 = vsel %vm1144_vm1, %v2684_v40, %v1618_v15 }
 0x99d   : > { %v1630_v19 = vsel %vm1629_vm7, %v1628_v16, %v1622_v17 }
 0x9a7   : > { %v2325_v30 = vpop.eup %2324 }
 0x9a8   : > { %v1568_v63 = vmul.f32 %v2325_v30, %v2323_v58 }
 0x9aa   : > { %v1569_v0 = vpack.c.bf16 %v1568_v63, %v1568_v63 }
 0x9ac   : > { %2221 = vmatmul.mubr.msk.bf16.vlgmr.msra.gmra.mxu1 %vm1195_vm2, %v1569_v0 }
 0xa6c   : > { %v1610_v11 = vpop.f32.mrf.mxu1 }
 0xa6d   : > { %1625 = vrot.lane.b32.xlu1 %v1610_v11, %s2357_s23 }
 0xa6e   : > { %v2222_v12 = vpop.f32.mrf.mxu1 }
 0xa70   : > { %v1613_v13 = vpop.f32.mrf.mxu1 }
 0xa72   : > { %v2223_v14 = vpop.f32.mrf.mxu1 }
 0xadf   : > { %v1626_v1 = vpop.permute.xlu1 %1625 }
 0xae0   : > { %v1632_v20 = vsel %vm1631_vm8, %v1630_v19, %v1626_v1 }
 0xae1   : > { %v1633_v21 = vpack.c.bf16 %v1632_v20, %v1632_v20 }
 0xae3   : > { %2241 = vmatmul.mubr.bf16.vlgmr.msra.gmra.mxu0 %v1633_v21 }
 0xba3   : > { %v1732_v23 = vpop.f32.mrf.mxu0 }
 0xba4   : > { %v1738_v24 = vmul.f32 1.3949589, %v1732_v23 }
 0xba5   : > { %v2242_v25 = vpop.f32.mrf.mxu0 }
 0xba6   : > { %v1740_v26 = vadd.f32 %v1739_v22, %v1738_v24 }
 0xba7   : > { %v1735_v27 = vpop.f32.mrf.mxu0 }
 0xba8   : > { %1741 = vadd.xlane.f32.xlu0 %v1740_v26 }
 0xba9   : > { %v2243_v28 = vpop.f32.mrf.mxu0 }
 0xc31   : > { %v1742_v29 = vpop.xlane.xlu0 %1741 }
 0xc32   : > { %v1744_v40 = vmul.f32 0.0078125, %v1742_v29 }
 0xc34   : > { %v1745_v31 = vsub.f32 %v1740_v26, %v1744_v40 }
 0xc36   : > { %v1746_v32 = vmul.f32 %v1745_v31, %v1745_v31 }
 0xc38   : > { %1747 = vadd.xlane.f32.xlu1 %v1746_v32 }
 0xcc1   : > { %v1748_v56 = vpop.xlane.xlu1 %1747 }
 0xcc2   : > { %v1749_v61 = vmul.f32 0.0078125, %v1748_v56 }
 0xcc4   : > { %v1750_v33 = vadd.f32 1e-05, %v1749_v61 }
 0xcc6   : > { %2326 = vrsqrt.f32 %v1750_v33 }
 0xcd3   : > { %v2327_v34 = vpop.eup %2326 }
 0xcd4   : > { %v1752_v35 = vmul.f32 %v2327_v34, %v1745_v31 }
 0xcd6   : > { %v1760_v37 = vmul.f32 %v2057_v18, %v1752_v35 }
 0xcd8   : > { %v1768_v38 = vadd.f32 %v2058_v36, %v1760_v37 }
 0xcda   : > { %v1769_v39 = vpack.c.bf16 %v1768_v38, %v1768_v38 }
 0xcdc   : > { %1770 = vst [vmem:[%s758_s30] sm:$0xf] %v1769_v39 }
 0xcdd PF: > { %s29_s29 = sadd.s32 1, %s2350_s29   ;;  %s2826_s27 = sld [smem:[#allocation2_spill]] }
 0xcde   : > { %p26_p5 = scmp.ge.s32.totalorder %s29_s29, 4   ;;  %s2827_s28 = sld [smem:[#allocation3_spill]] }
 0xce0   :  { %28 = sbr.rel (!%p26_p5) target bundleno = 4 (0x4), region = 157 }

</bundles_post_ra>
